<compile_context>
chip_gen: v7x
topology: tpu7x:2x2x1
jax: 0.10.0
libtpu: 0.0.40
codegen_flags: <defaults>
</compile_context>

<pallas_src>
import jax
import jax.numpy as jnp
from jax.experimental import pallas as pl
from jax.experimental.pallas import tpu as pltpu

_LANE = 128
_SUBLANE = 8
_SLAB_COLS = 1024                       # lane-dense slab width (8 x 128)
_BLOCK_BYTES = 8 * 1024 * 1024          # ~8 MiB per pipeline buffer
_VMEM_LIMIT_BYTES = 48 * 1024 * 1024    # 4 x 8 MiB buffers + headroom; < 64 MiB (v7x)
_MIN_PALLAS_ELEMS = 128 * 1024          # below ~0.5 MiB, XLA's fused add wins

# Preferred grid-axis semantics, most aggressive first.  CORE_PARALLEL shards
# the row-block axis across v7x's two TensorCores; if the local toolchain /
# chip rejects it we permanently fall back to the portable spelling.
_DIM_SEM_CHOICES = [
    (pltpu.CORE_PARALLEL, pltpu.ARBITRARY),
    ("parallel", "arbitrary"),
]


def _add_one_kernel(x_ref, o_ref):
    # Elementwise hot path: out = in + 1 (constant cast to the output dtype).
    o_ref[...] = x_ref[...] + jnp.asarray(1, dtype=o_ref.dtype)


def _pick_block(rows, cols, itemsize):
    """Pick a (block_rows, block_cols) tile of ~_BLOCK_BYTES that satisfies the
    TPU block constraints (dims are multiples of the native tile or equal the
    full array dims)."""
    # Sublane alignment grows with sub-32-bit packing (f32: 8, bf16: 16, i8: 32).
    sub = _SUBLANE * max(1, 4 // itemsize)
    # Widest lane-dense block that still leaves >= `sub` rows in the budget.
    max_bc = max(_LANE, (_BLOCK_BYTES // (sub * itemsize)) // _LANE * _LANE)
    bc = cols if cols <= max_bc else max_bc          # == full dim, or %128 == 0
    br = _BLOCK_BYTES // (bc * itemsize)
    if br >= rows:
        br = rows                                    # == full dim
    else:
        br = max(sub, (br // sub) * sub)             # multiple of the sublane tile
    return br, bc


def _launch(x2d, br, bc, dim_sem):
    rows, cols = x2d.shape
    itemsize = x2d.dtype.itemsize
    grid = (pl.cdiv(rows, br), pl.cdiv(cols, bc))    # last blocks may overhang
    return pl.pallas_call(
        _add_one_kernel,
        out_shape=jax.ShapeDtypeStruct(x2d.shape, x2d.dtype),
        grid=grid,
        in_specs=[pl.BlockSpec((br, bc), lambda i, j: (i, j))],
        out_specs=pl.BlockSpec((br, bc), lambda i, j: (i, j)),
        compiler_params=pltpu.CompilerParams(
            dimension_semantics=dim_sem,
            vmem_limit_bytes=_VMEM_LIMIT_BYTES),
        cost_estimate=pl.CostEstimate(
            flops=x2d.size,
            transcendentals=0,
            bytes_accessed=2 * x2d.size * itemsize),
    )(x2d)


def _launch_with_fallback(x2d, br, bc):
    # Compile errors from an unsupported dimension_semantics choice surface
    # synchronously at call time; drop that choice and retry once with the
    # portable spelling.  (Not intended to be wrapped in jax.jit.)
    last_exc = None
    while _DIM_SEM_CHOICES:
        try:
            return _launch(x2d, br, bc, _DIM_SEM_CHOICES[0])
        except Exception as exc:  # chip / toolchain dependent
            last_exc = exc
            _DIM_SEM_CHOICES.pop(0)
    raise last_exc


def tudui_forward(x):
    """Equivalent of Tudui().forward(x): returns x + 1, same shape/dtype."""
    x = jnp.asarray(x)
    n = x.size

    # Fast path: scalar / small inputs.  A pallas launch (plus a single-step
    # pipeline) is pure overhead vs XLA's fused add below ~0.5 MiB.
    if n < _MIN_PALLAS_ELEMS:
        return x + jnp.asarray(1, dtype=x.dtype)

    orig_shape = x.shape
    tail_pad = 0
    if x.ndim >= 2 and orig_shape[-1] >= _LANE:
        # Natural (prod(leading), last) view: no pad, no slice.  Stores are
        # full-width except at most the final <128-lane tail group.
        rows, cols = n // orig_shape[-1], orig_shape[-1]
        x2d = x.reshape(rows, cols)
    elif n % _SLAB_COLS == 0:
        # Narrow last dim / 1-D but evenly divisible: lane-dense slab, no pad.
        rows, cols = n // _SLAB_COLS, _SLAB_COLS
        x2d = x.reshape(rows, cols)
    else:
        # Rare fallback (narrow last dim AND ragged total size): pad the flat
        # vector by < 1024 elements into a slab and slice back afterwards.
        rows, cols = pl.cdiv(n, _SLAB_COLS), _SLAB_COLS
        tail_pad = rows * cols - n
        x2d = jnp.pad(x.reshape(-1), (0, tail_pad)).reshape(rows, cols)

    br, bc = _pick_block(rows, cols, x2d.dtype.itemsize)
    out2d = _launch_with_fallback(x2d, br, bc)

    if tail_pad:
        return out2d.reshape(-1)[:n].reshape(orig_shape)
    return out2d.reshape(orig_shape)


if __name__ == "__main__":
    # Match the reference script: x = torch.tensor(1.0) -> 0-d f32 scalar.
    x_scalar = jnp.asarray(1.0, dtype=jnp.float32)
    out_scalar = jax.block_until_ready(tudui_forward(x_scalar))
    assert out_scalar.shape == ()
    assert jnp.allclose(out_scalar, 2.0)

    key = jax.random.PRNGKey(0)
    k1, k2, k3 = jax.random.split(key, 3)

    # Small NCHW-style tensor -> fast path (below the Pallas threshold).
    x_small = jax.random.normal(k1, (2, 4, 16, 16), dtype=jnp.float32)
    out_small = jax.block_until_ready(tudui_forward(x_small))
    assert out_small.shape == (2, 4, 16, 16)
    assert jnp.allclose(out_small, x_small + 1.0)

    # Aligned 2-D input: multi-block grid with an overhanging last row block
    # (3000 rows, 2048-row blocks) -> exercises masked boundary writes.
    x_aligned = jax.random.normal(k2, (3000, 1024), dtype=jnp.float32)
    out_aligned = jax.block_until_ready(tudui_forward(x_aligned))
    assert out_aligned.shape == (3000, 1024)
    assert jnp.allclose(out_aligned, x_aligned + 1.0)

    # Ragged last dim (1100 % 128 != 0): tiled in place, no pad / no slice.
    x_ragged = jax.random.normal(k3, (1024, 1100), dtype=jnp.float32)
    out_ragged = jax.block_until_ready(tudui_forward(x_ragged))
    assert out_ragged.shape == (1024, 1100)
    assert jnp.allclose(out_ragged, x_ragged + 1.0)

    print("KERNEL_OK")
</pallas_src>

<mosaic_0001>
module attributes {stable_mosaic.version = 11 : i64} {
  func.func @_add_one_kernel(%arg0: i32, %arg1: i32, %arg2: memref<2048x1024xf32, #tpu.memory_space<vmem>>, %arg3: memref<2048x1024xf32, #tpu.memory_space<vmem>>) attributes {dimension_semantics = [#tpu.dimension_semantics<core_parallel>, #tpu.dimension_semantics<arbitrary>], iteration_bounds = array<i64: 2, 1>, scalar_prefetch = 0 : i64, scratch_operands = 0 : i64, tpu.core_type = #tpu.core_type<tc>, window_params = [{transform_indices = @transform_0, window_bounds = array<i64: 2048, 1024>}, {transform_indices = @transform_1, window_bounds = array<i64: 2048, 1024>}]} {
    %c0 = arith.constant 0 : index
    %c0_0 = arith.constant 0 : index
    %0 = vector.load %arg2[%c0, %c0_0] : memref<2048x1024xf32, #tpu.memory_space<vmem>>, vector<2048x1024xf32>
    %cst = arith.constant 1.000000e+00 : f32
    %1 = vector.broadcast %cst : f32 to vector<2048x1024xf32>
    %2 = arith.addf %0, %1 : vector<2048x1024xf32>
    %c0_1 = arith.constant 0 : index
    %c0_2 = arith.constant 0 : index
    %3 = vector.load %arg3[%c0_1, %c0_2] : memref<2048x1024xf32, #tpu.memory_space<vmem>>, vector<2048x1024xf32>
    tpu.vector_store %arg3[%c0_1, %c0_2], %2 {strides = array<i32>} : memref<2048x1024xf32, #tpu.memory_space<vmem>>, vector<2048x1024xf32>,
    return
  }
  func.func @transform_0(%arg0: i32, %arg1: i32) -> (i32, i32) {
    %c0_i32 = arith.constant 0 : i32
    return %arg0, %arg1 : i32, i32
  }
  func.func @transform_1(%arg0: i32, %arg1: i32) -> (i32, i32) {
    %c0_i32 = arith.constant 0 : i32
    return %arg0, %arg1 : i32, i32
  }
}

module attributes {stable_mosaic.version = 11 : i64} {
  func.func @_add_one_kernel(%arg0: i32, %arg1: i32, %arg2: memref<2048x1024xf32, #tpu.memory_space<vmem>>, %arg3: memref<2048x1024xf32, #tpu.memory_space<vmem>>) attributes {dimension_semantics = [#tpu.dimension_semantics<parallel>, #tpu.dimension_semantics<arbitrary>], iteration_bounds = array<i64: 2, 1>, scalar_prefetch = 0 : i64, scratch_operands = 0 : i64, tpu.core_type = #tpu.core_type<tc>, window_params = [{transform_indices = @transform_0, window_bounds = array<i64: 2048, 1024>}, {transform_indices = @transform_1, window_bounds = array<i64: 2048, 1024>}]} {
    %c0 = arith.constant 0 : index
    %c0_0 = arith.constant 0 : index
    %0 = vector.load %arg2[%c0, %c0_0] : memref<2048x1024xf32, #tpu.memory_space<vmem>>, vector<2048x1024xf32>
    %cst = arith.constant 1.000000e+00 : f32
    %1 = vector.broadcast %cst : f32 to vector<2048x1024xf32>
    %2 = arith.addf %0, %1 : vector<2048x1024xf32>
    %c0_1 = arith.constant 0 : index
    %c0_2 = arith.constant 0 : index
    %3 = vector.load %arg3[%c0_1, %c0_2] : memref<2048x1024xf32, #tpu.memory_space<vmem>>, vector<2048x1024xf32>
    tpu.vector_store %arg3[%c0_1, %c0_2], %2 {strides = array<i32>} : memref<2048x1024xf32, #tpu.memory_space<vmem>>, vector<2048x1024xf32>,
    return
  }
  func.func @transform_0(%arg0: i32, %arg1: i32) -> (i32, i32) {
    %c0_i32 = arith.constant 0 : i32
    return %arg0, %arg1 : i32, i32
  }
  func.func @transform_1(%arg0: i32, %arg1: i32) -> (i32, i32) {
    %c0_i32 = arith.constant 0 : i32
    return %arg0, %arg1 : i32, i32
  }
}

</mosaic_0001>

<bundles_post_ra>
// kernel: tpu_custom_call.1
= control target key start
LH: loop header
LB: loop body
LE: loop exit
PB: predicated region body
PF: predicated region fallthrough
CT: control target
= control target key end

     0   :  { %6 = vsyncpa [#allocation3], 0  ;;  %s10932_s0 = inlined_call_operand.hbm [shape: f32[3000,1024], index: 0, kind: input, shape index: {}]   ;;  %s10933_s1 = inlined_call_operand.hbm [shape: f32[3000,1024], index: 1, kind: output, shape index: {}]  }
   0x1   :  { %8 = vsyncpa [#allocation3 + $0x1], 0 }
   0x2   :  { %9 = vsyncpa [#allocation4], 0 }
   0x3   :  { %11 = vsyncpa [#allocation4 + $0x1], 0  ;;  %s6650_s6 = smov 0   ;;  %s6652_s7 = smov 0  }
   0x4   :  { %s6654_s8 = smov 0   ;;  %s6656_s9 = smov 0  }
   0x5   :  { %s6658_s10 = smov 0   ;;  %s6660_s11 = smov 0  }
   0x6 LB: > { %s6430_s12 = sadd.s32 4294967295, %s6632_s11   ;;  %s6431_s13 = sadd.s32 4294967294, %s6632_s11   ;;  %s6632_s11 = sphi %s6660_s11, %s17_s11   ;;  %s6628_s10 = sphi %s6658_s10, %s10944_s10   ;;  %s6624_s9 = sphi %s6656_s9, %s10943_s9   ;;  %s6620_s8 = sphi %s6654_s8, %s10942_s8   ;;  %s6616_s7 = sphi %s6652_s7, %s10941_s7   ;;  %s6612_s6 = sphi %s6650_s6, %s10940_s6  }
   0x7   : > { %s29_s14 = sadd.s32 1, %s6628_s10  ;;  %s38_s15 = sadd.s32 1, %s6620_s8 }
   0x8   : > { %p31_p0 = scmp.ge.s32.totalorder %s29_s14, 2  ;;  %p45_p1 = scmp.ne.s32.totalorder %s6620_s8, %s6616_s7 }
   0x9   : > { %p46_p2 = scmp.eq.s32.totalorder %s6632_s11, 0  ;;  %p51_p3 = scmp.ne.s32.totalorder %s6616_s7, %s6612_s6 }
   0xa   : > { %s10946_s14 = smov (%p31_p0, %s29_s14), 0  ;;  %p52_p5 = scmp.eq.s32.totalorder %s6430_s12, 0 }
   0xb   : > { %p47_p4 = por %p46_p2, %p45_p1  ;;  %s33_s16 = ssub.s32 %s6628_s10, %s10946_s14 }
   0xc   : > { %p77_p6 = scmp.eq.s32.totalorder %s6430_s12, 1  ;;  %p36_p7 = scmp.eq.s32.totalorder %s33_s16, 0 }
   0xd   : > { %p6693_p8 = por %p52_p5, %p51_p3  ;;  %p83_p10 = scmp.eq.s32.totalorder %s6431_s13, 1 }
   0xe   : > { %p6697_p9 = por %p77_p6, %p45_p1  ;;  %p10934_p12 = scmp.ge.s32.totalorder %s6632_s11, 2 }
   0xf   : > { %s6702_s19 = scalar_select %p36_p7, %s6620_s8, %s38_s15  }
  0x10   : > { %p6704_p11 = por %p83_p10, %p51_p3  ;;  %99 = sbr.rel (%p10934_p12) target bundleno = 58 (0x3a), region = 16 }
  0x12   : > { %s10937_s20 = scalar_select %p6704_p11, 1, 0 }
  0x17   : > { %102 = sbr.rel (!%p47_p4) target bundleno = 58 (0x3a), region = 20  ;;  %s103_s21 = sand.u32 (%p47_p4), 1, %s6620_s8  }
  0x18   : > { %s6435_s22 = sshll.u32 (%p47_p4), %s6628_s10, 8  ;;  %s6434_s23 = sshll.u32 (%p47_p4), %s103_s21, 14 }
  0x19   : > { %s110_s24 = ssub.s32 (%p47_p4), 375, %s6435_s22  ;;  %s6716_s27 = scalar_lea.sflag (%p47_p4), [#allocation3], %s103_s21 }
  0x1a   : > { %p111_p13 = scmp.lt.s32.totalorder (%p47_p4), %s110_s24, 256  ;;  %s107_s28 = scalar_lea.vmem (%p47_p4), [#allocation2], %s6434_s23 }
  0x1e   : > { %s10948_s24 = smov (!%p111_p13, %s110_s24), 256 }
  0x1f   : > { %s6713_s25 = sshll.u32 %s10948_s24, 10 }
  0x20   : > { %s116_s26 = ssub.s32 262144, %s6713_s25 }
  0x21   : > { %117 = vsyncadd %s6716_s27, %s116_s26  ;;  %p6438_p0 = scmp.ne.s32.totalorder %s6713_s25, 0  ;;  %s6459_s29 = sshll.u32 %s6628_s10, 18 }
  0x22   : > { %s6724_s3 = scalar_lea.hbm %s10932_s0, %s6459_s29  ;;  %s124_s4 = sshll.u32 %s107_s28, 4  ;;  %s6726_s4 = int_to_ptr.vmem [resolvable:$true] %s124_s4 }
  0x23   : > { %s6522_s5 = scalar_lea.hbm %s6724_s3, %s6713_s25  ;;  %s6526_s15 = scalar_lea.hbm %s10932_s0, 384000 }
  0x24   : > { %p6523_p1 = scmp.ne.s32.totalorder %s6724_s3, %s6522_s5  ;;  %p6527_p4 = scmp.lt.u32.totalorder %s6724_s3, %s10932_s0 }
  0x25   : > { %p6528_p5 = scmp.lt.u32.totalorder %s6526_s15, %s6522_s5  ;;  %p6530_p7 = scmp.lt.u32.totalorder %s6522_s5, %s6724_s3 }
  0x26   : > { %p6524_p2 = pnand %p6523_p1, %p6438_p0 }
  0x27   : > { %p6529_p6 = por %p6528_p5, %p6527_p4 }
  0x28   : > { %p6525_p3 = pneg %p6524_p2 }
  0x29   : > { %p6531_p10 = por %p6530_p7, %p6529_p6 }
  0x2b   : > { %p6532_p13 = pnand %p6531_p10, %p6525_p3 }
  0x2d   : > { %6535 = shalt.err (!%p6532_p13)
}
  0x2e   : > { %s6536_s22 = scalar_lea.vmem %s6726_s4, %s6713_s25  ;;  %s6634_s23 = smov [#allocation2]  }
  0x2f   : > { %p6537_p1 = scmp.ne.s32.totalorder %s6726_s4, %s6536_s22  ;;  %s6540_s24 = sshll.u32 %s6634_s23, 4  ;;  %s6541_s24 = int_to_ptr.vmem [resolvable:$false] %s6540_s24 }
  0x30   : > { %s6542_s26 = scalar_lea.vmem %s6541_s24, 524288  ;;  %p6543_p11 = scmp.lt.s32.totalorder %s6726_s4, %s6541_s24 }
  0x31   : > { %p6538_p2 = pnand %p6537_p1, %p6438_p0  ;;  %p6544_p4 = scmp.lt.s32.totalorder %s6542_s26, %s6536_s22 }
  0x33   : > { %p6539_p12 = pneg %p6538_p2  ;;  %p6545_p5 = por %p6544_p4, %p6543_p11 }
  0x35   : > { %p6546_p6 = pnand %p6545_p5, %p6539_p12 }
  0x37   : > { %6549 = shalt.err (!%p6546_p6)
}
  0x38   : > { %s6635_s28 = smov 1024   ;;  %s6636_s29 = smov 64  }
  0x39   : > { %130 = dma.hbm_to_vmem [thread:$0]  (%p6438_p0), %s6724_s3, %s6713_s25, %s6726_s4, %s6716_s27, %s6635_s28, %s6635_s28, %s6636_s29  }
  0x3a PF: > { %p6443_p3 = scmp.ge.s32.totalorder %s6632_s11, 1  ;;  %p132_p7 = scmp.lt.s32.totalorder %s6632_s11, 3 }
  0x3c   : > { %p133_p10 = pnand %p6443_p3, %p132_p7 }
  0x3d   : > { %s6756_s30 = sand.u32 (!%p133_p10), 1, %s6616_s7  }
  0x3e   : > { %136 = sbr.rel (%p133_p10) target bundleno = 1128 (0x468), region = 24  ;;  %s6444_s2 = sshll.u32 (!%p133_p10), %s6756_s30, 14 }
  0x3f   : > { %s139_s5 = scalar_lea.sflag (!%p133_p10), [#allocation3], %s6756_s30  ;;  %s6760_s12 = scalar_lea.vmem (!%p133_p10), [#allocation2], %s6444_s2 }
  0x45   : > { %6603 = dma.done.wait (%p6693_p8), %s139_s5, 262144  }
  0x46   : > { %6605 = vsyncadd (%p6693_p8), %s139_s5, 4294705152  ;;  %v175_v0 = vld [vmem:[%s6760_s12] sm:$0xff]  ;;  %v176_v1 = vld [vmem:[%s6760_s12 + $0x8] sm:$0xff]  ;;  %s6775_s17 = scalar_lea.vmem [#allocation5], %s6444_s2  ;;  %s6320_s25 = scalar_lea.sflag [#allocation4], %s6756_s30 }
  0x47   : > { %v177_v2 = vld [vmem:[%s6760_s12 + $0x10] sm:$0xff]  ;;  %v2223_v3 = vadd.f32 1.0, %v175_v0  ;;  %v2224_v4 = vadd.f32 1.0, %v176_v1  ;;  %v178_v6 = vld [vmem:[%s6760_s12 + $0x18] sm:$0xff]  ;;  %v179_v7 = vld [vmem:[%s6760_s12 + $0x20] sm:$0xff]  ;;  %s6447_s27 = sshll.u32 (%p6697_p9), %s6624_s9, 8 }
  0x48   : > { %v2225_v5 = vadd.f32 1.0, %v177_v2  ;;  %v180_v8 = vld [vmem:[%s6760_s12 + $0x28] sm:$0xff]  ;;  %v2226_v9 = vadd.f32 1.0, %v178_v6  ;;  %v2227_v10 = vadd.f32 1.0, %v179_v7  ;;  %v181_v12 = vld [vmem:[%s6760_s12 + $0x30] sm:$0xff]  ;;  %v182_v13 = vld [vmem:[%s6760_s12 + $0x38] sm:$0xff] }
  0x49   : > { %v2228_v11 = vadd.f32 1.0, %v180_v8  ;;  %v183_v14 = vld [vmem:[%s6760_s12 + $0x40] sm:$0xff]  ;;  %4271 = vst [vmem:[%s6775_s17] sm:$0xff] %v2223_v3  ;;  %4272 = vst [vmem:[%s6775_s17 + $0x8] sm:$0xff] %v2224_v4  ;;  %v2229_v15 = vadd.f32 1.0, %v181_v12  ;;  %v2230_v16 = vadd.f32 1.0, %v182_v13  ;;  %v184_v18 = vld [vmem:[%s6760_s12 + $0x48] sm:$0xff] }
  0x4a   : > { %4273 = vst [vmem:[%s6775_s17 + $0x10] sm:$0xff] %v2225_v5  ;;  %v2231_v17 = vadd.f32 1.0, %v183_v14  ;;  %v185_v19 = vld [vmem:[%s6760_s12 + $0x50] sm:$0xff]  ;;  %v186_v20 = vld [vmem:[%s6760_s12 + $0x58] sm:$0xff]  ;;  %4274 = vst [vmem:[%s6775_s17 + $0x18] sm:$0xff] %v2226_v9  ;;  %v2232_v21 = vadd.f32 1.0, %v184_v18 }
  0x4b   : > { %4275 = vst [vmem:[%s6775_s17 + $0x20] sm:$0xff] %v2227_v10  ;;  %4276 = vst [vmem:[%s6775_s17 + $0x28] sm:$0xff] %v2228_v11  ;;  %v2233_v22 = vadd.f32 1.0, %v185_v19  ;;  %v2234_v23 = vadd.f32 1.0, %v186_v20  ;;  %v187_v24 = vld [vmem:[%s6760_s12 + $0x60] sm:$0xff]  ;;  %v188_v25 = vld [vmem:[%s6760_s12 + $0x68] sm:$0xff] }
  0x4c   : > { %v189_v26 = vld [vmem:[%s6760_s12 + $0x70] sm:$0xff]  ;;  %4277 = vst [vmem:[%s6775_s17 + $0x30] sm:$0xff] %v2229_v15  ;;  %4278 = vst [vmem:[%s6775_s17 + $0x38] sm:$0xff] %v2230_v16  ;;  %v2235_v27 = vadd.f32 1.0, %v187_v24  ;;  %v2236_v28 = vadd.f32 1.0, %v188_v25  ;;  %v190_v30 = vld [vmem:[%s6760_s12 + $0x78] sm:$0xff] }
  0x4d   : > { %4279 = vst [vmem:[%s6775_s17 + $0x40] sm:$0xff] %v2231_v17  ;;  %v2237_v29 = vadd.f32 1.0, %v189_v26  ;;  %v191_v31 = vld [vmem:[%s6760_s12 + $0x80] sm:$0xff]  ;;  %v192_v32 = vld [vmem:[%s6760_s12 + $0x88] sm:$0xff]  ;;  %4280 = vst [vmem:[%s6775_s17 + $0x48] sm:$0xff] %v2232_v21  ;;  %v2238_v33 = vadd.f32 1.0, %v190_v30 }
  0x4e   : > { %4281 = vst [vmem:[%s6775_s17 + $0x50] sm:$0xff] %v2233_v22  ;;  %4282 = vst [vmem:[%s6775_s17 + $0x58] sm:$0xff] %v2234_v23  ;;  %v2239_v34 = vadd.f32 1.0, %v191_v31  ;;  %v2240_v35 = vadd.f32 1.0, %v192_v32  ;;  %v193_v36 = vld [vmem:[%s6760_s12 + $0x90] sm:$0xff]  ;;  %v194_v37 = vld [vmem:[%s6760_s12 + $0x98] sm:$0xff] }
  0x4f   : > { %v195_v38 = vld [vmem:[%s6760_s12 + $0xa0] sm:$0xff]  ;;  %4283 = vst [vmem:[%s6775_s17 + $0x60] sm:$0xff] %v2235_v27  ;;  %4284 = vst [vmem:[%s6775_s17 + $0x68] sm:$0xff] %v2236_v28  ;;  %v2241_v39 = vadd.f32 1.0, %v193_v36  ;;  %v2242_v40 = vadd.f32 1.0, %v194_v37  ;;  %v196_v42 = vld [vmem:[%s6760_s12 + $0xa8] sm:$0xff] }
  0x50   : > { %4285 = vst [vmem:[%s6775_s17 + $0x70] sm:$0xff] %v2237_v29  ;;  %v2243_v41 = vadd.f32 1.0, %v195_v38  ;;  %v197_v43 = vld [vmem:[%s6760_s12 + $0xb0] sm:$0xff]  ;;  %v198_v44 = vld [vmem:[%s6760_s12 + $0xb8] sm:$0xff]  ;;  %4286 = vst [vmem:[%s6775_s17 + $0x78] sm:$0xff] %v2238_v33  ;;  %v2244_v45 = vadd.f32 1.0, %v196_v42 }
  0x51   : > { %4287 = vst [vmem:[%s6775_s17 + $0x80] sm:$0xff] %v2239_v34  ;;  %4288 = vst [vmem:[%s6775_s17 + $0x88] sm:$0xff] %v2240_v35  ;;  %v2245_v46 = vadd.f32 1.0, %v197_v43  ;;  %v2246_v47 = vadd.f32 1.0, %v198_v44  ;;  %v199_v48 = vld [vmem:[%s6760_s12 + $0xc0] sm:$0xff]  ;;  %v200_v49 = vld [vmem:[%s6760_s12 + $0xc8] sm:$0xff] }
  0x52   : > { %v201_v50 = vld [vmem:[%s6760_s12 + $0xd0] sm:$0xff]  ;;  %4289 = vst [vmem:[%s6775_s17 + $0x90] sm:$0xff] %v2241_v39  ;;  %4290 = vst [vmem:[%s6775_s17 + $0x98] sm:$0xff] %v2242_v40  ;;  %v2247_v51 = vadd.f32 1.0, %v199_v48  ;;  %v2248_v52 = vadd.f32 1.0, %v200_v49  ;;  %v202_v54 = vld [vmem:[%s6760_s12 + $0xd8] sm:$0xff] }
  0x53   : > { %4291 = vst [vmem:[%s6775_s17 + $0xa0] sm:$0xff] %v2243_v41  ;;  %v2249_v53 = vadd.f32 1.0, %v201_v50  ;;  %v203_v55 = vld [vmem:[%s6760_s12 + $0xe0] sm:$0xff]  ;;  %v204_v56 = vld [vmem:[%s6760_s12 + $0xe8] sm:$0xff]  ;;  %4292 = vst [vmem:[%s6775_s17 + $0xa8] sm:$0xff] %v2244_v45  ;;  %v2250_v57 = vadd.f32 1.0, %v202_v54 }
  0x54   : > { %4293 = vst [vmem:[%s6775_s17 + $0xb0] sm:$0xff] %v2245_v46  ;;  %4294 = vst [vmem:[%s6775_s17 + $0xb8] sm:$0xff] %v2246_v47  ;;  %v2251_v58 = vadd.f32 1.0, %v203_v55  ;;  %v2252_v59 = vadd.f32 1.0, %v204_v56  ;;  %v205_v60 = vld [vmem:[%s6760_s12 + $0xf0] sm:$0xff]  ;;  %v206_v61 = vld [vmem:[%s6760_s12 + $0xf8] sm:$0xff] }
  0x55   : > { %v207_v62 = vld [vmem:[%s6760_s12 + $0x100] sm:$0xff]  ;;  %4295 = vst [vmem:[%s6775_s17 + $0xc0] sm:$0xff] %v2247_v51  ;;  %4296 = vst [vmem:[%s6775_s17 + $0xc8] sm:$0xff] %v2248_v52  ;;  %v2253_v63 = vadd.f32 1.0, %v205_v60  ;;  %v2254_v0 = vadd.f32 1.0, %v206_v61  ;;  %v208_v2 = vld [vmem:[%s6760_s12 + $0x108] sm:$0xff] }
  0x56   : > { %4297 = vst [vmem:[%s6775_s17 + $0xd0] sm:$0xff] %v2249_v53  ;;  %v2255_v1 = vadd.f32 1.0, %v207_v62  ;;  %v209_v3 = vld [vmem:[%s6760_s12 + $0x110] sm:$0xff]  ;;  %v210_v4 = vld [vmem:[%s6760_s12 + $0x118] sm:$0xff]  ;;  %4298 = vst [vmem:[%s6775_s17 + $0xd8] sm:$0xff] %v2250_v57  ;;  %v2256_v5 = vadd.f32 1.0, %v208_v2 }
  0x57   : > { %4299 = vst [vmem:[%s6775_s17 + $0xe0] sm:$0xff] %v2251_v58  ;;  %4300 = vst [vmem:[%s6775_s17 + $0xe8] sm:$0xff] %v2252_v59  ;;  %v2257_v6 = vadd.f32 1.0, %v209_v3  ;;  %v2258_v7 = vadd.f32 1.0, %v210_v4  ;;  %v211_v8 = vld [vmem:[%s6760_s12 + $0x120] sm:$0xff]  ;;  %v212_v9 = vld [vmem:[%s6760_s12 + $0x128] sm:$0xff] }
  0x58   : > { %v213_v10 = vld [vmem:[%s6760_s12 + $0x130] sm:$0xff]  ;;  %4301 = vst [vmem:[%s6775_s17 + $0xf0] sm:$0xff] %v2253_v63  ;;  %4302 = vst [vmem:[%s6775_s17 + $0xf8] sm:$0xff] %v2254_v0  ;;  %v2259_v11 = vadd.f32 1.0, %v211_v8  ;;  %v2260_v12 = vadd.f32 1.0, %v212_v9  ;;  %v214_v14 = vld [vmem:[%s6760_s12 + $0x138] sm:$0xff] }
  0x59   : > { %4303 = vst [vmem:[%s6775_s17 + $0x100] sm:$0xff] %v2255_v1  ;;  %v2261_v13 = vadd.f32 1.0, %v213_v10  ;;  %v215_v15 = vld [vmem:[%s6760_s12 + $0x140] sm:$0xff]  ;;  %v216_v16 = vld [vmem:[%s6760_s12 + $0x148] sm:$0xff]  ;;  %4304 = vst [vmem:[%s6775_s17 + $0x108] sm:$0xff] %v2256_v5  ;;  %v2262_v17 = vadd.f32 1.0, %v214_v14 }
  0x5a   : > { %4305 = vst [vmem:[%s6775_s17 + $0x110] sm:$0xff] %v2257_v6  ;;  %4306 = vst [vmem:[%s6775_s17 + $0x118] sm:$0xff] %v2258_v7  ;;  %v2263_v18 = vadd.f32 1.0, %v215_v15  ;;  %v2264_v19 = vadd.f32 1.0, %v216_v16  ;;  %v217_v20 = vld [vmem:[%s6760_s12 + $0x150] sm:$0xff]  ;;  %v218_v21 = vld [vmem:[%s6760_s12 + $0x158] sm:$0xff] }
  0x5b   : > { %v219_v22 = vld [vmem:[%s6760_s12 + $0x160] sm:$0xff]  ;;  %4307 = vst [vmem:[%s6775_s17 + $0x120] sm:$0xff] %v2259_v11  ;;  %4308 = vst [vmem:[%s6775_s17 + $0x128] sm:$0xff] %v2260_v12  ;;  %v2265_v23 = vadd.f32 1.0, %v217_v20  ;;  %v2266_v24 = vadd.f32 1.0, %v218_v21  ;;  %v220_v26 = vld [vmem:[%s6760_s12 + $0x168] sm:$0xff] }
  0x5c   : > { %4309 = vst [vmem:[%s6775_s17 + $0x130] sm:$0xff] %v2261_v13  ;;  %v2267_v25 = vadd.f32 1.0, %v219_v22  ;;  %v221_v27 = vld [vmem:[%s6760_s12 + $0x170] sm:$0xff]  ;;  %v222_v28 = vld [vmem:[%s6760_s12 + $0x178] sm:$0xff]  ;;  %4310 = vst [vmem:[%s6775_s17 + $0x138] sm:$0xff] %v2262_v17  ;;  %v2268_v29 = vadd.f32 1.0, %v220_v26 }
  0x5d   : > { %4311 = vst [vmem:[%s6775_s17 + $0x140] sm:$0xff] %v2263_v18  ;;  %4312 = vst [vmem:[%s6775_s17 + $0x148] sm:$0xff] %v2264_v19  ;;  %v2269_v30 = vadd.f32 1.0, %v221_v27  ;;  %v2270_v31 = vadd.f32 1.0, %v222_v28  ;;  %v223_v32 = vld [vmem:[%s6760_s12 + $0x180] sm:$0xff]  ;;  %v224_v33 = vld [vmem:[%s6760_s12 + $0x188] sm:$0xff] }
  0x5e   : > { %v225_v34 = vld [vmem:[%s6760_s12 + $0x190] sm:$0xff]  ;;  %4313 = vst [vmem:[%s6775_s17 + $0x150] sm:$0xff] %v2265_v23  ;;  %4314 = vst [vmem:[%s6775_s17 + $0x158] sm:$0xff] %v2266_v24  ;;  %v2271_v35 = vadd.f32 1.0, %v223_v32  ;;  %v2272_v36 = vadd.f32 1.0, %v224_v33  ;;  %v226_v38 = vld [vmem:[%s6760_s12 + $0x198] sm:$0xff] }
  0x5f   : > { %4315 = vst [vmem:[%s6775_s17 + $0x160] sm:$0xff] %v2267_v25  ;;  %v2273_v37 = vadd.f32 1.0, %v225_v34  ;;  %v227_v39 = vld [vmem:[%s6760_s12 + $0x1a0] sm:$0xff]  ;;  %v228_v40 = vld [vmem:[%s6760_s12 + $0x1a8] sm:$0xff]  ;;  %4316 = vst [vmem:[%s6775_s17 + $0x168] sm:$0xff] %v2268_v29  ;;  %v2274_v41 = vadd.f32 1.0, %v226_v38 }
  0x60   : > { %4317 = vst [vmem:[%s6775_s17 + $0x170] sm:$0xff] %v2269_v30  ;;  %4318 = vst [vmem:[%s6775_s17 + $0x178] sm:$0xff] %v2270_v31  ;;  %v2275_v42 = vadd.f32 1.0, %v227_v39  ;;  %v2276_v43 = vadd.f32 1.0, %v228_v40  ;;  %v229_v44 = vld [vmem:[%s6760_s12 + $0x1b0] sm:$0xff]  ;;  %v230_v45 = vld [vmem:[%s6760_s12 + $0x1b8] sm:$0xff] }
  0x61   : > { %v231_v46 = vld [vmem:[%s6760_s12 + $0x1c0] sm:$0xff]  ;;  %4319 = vst [vmem:[%s6775_s17 + $0x180] sm:$0xff] %v2271_v35  ;;  %4320 = vst [vmem:[%s6775_s17 + $0x188] sm:$0xff] %v2272_v36  ;;  %v2277_v47 = vadd.f32 1.0, %v229_v44  ;;  %v2278_v48 = vadd.f32 1.0, %v230_v45  ;;  %v232_v50 = vld [vmem:[%s6760_s12 + $0x1c8] sm:$0xff] }
  0x62   : > { %4321 = vst [vmem:[%s6775_s17 + $0x190] sm:$0xff] %v2273_v37  ;;  %v2279_v49 = vadd.f32 1.0, %v231_v46  ;;  %v233_v51 = vld [vmem:[%s6760_s12 + $0x1d0] sm:$0xff]  ;;  %v234_v52 = vld [vmem:[%s6760_s12 + $0x1d8] sm:$0xff]  ;;  %4322 = vst [vmem:[%s6775_s17 + $0x198] sm:$0xff] %v2274_v41  ;;  %v2280_v53 = vadd.f32 1.0, %v232_v50 }
  0x63   : > { %4323 = vst [vmem:[%s6775_s17 + $0x1a0] sm:$0xff] %v2275_v42  ;;  %4324 = vst [vmem:[%s6775_s17 + $0x1a8] sm:$0xff] %v2276_v43  ;;  %v2281_v54 = vadd.f32 1.0, %v233_v51  ;;  %v2282_v55 = vadd.f32 1.0, %v234_v52  ;;  %v235_v56 = vld [vmem:[%s6760_s12 + $0x1e0] sm:$0xff]  ;;  %v236_v57 = vld [vmem:[%s6760_s12 + $0x1e8] sm:$0xff] }
  0x64   : > { %v237_v58 = vld [vmem:[%s6760_s12 + $0x1f0] sm:$0xff]  ;;  %4325 = vst [vmem:[%s6775_s17 + $0x1b0] sm:$0xff] %v2277_v47  ;;  %4326 = vst [vmem:[%s6775_s17 + $0x1b8] sm:$0xff] %v2278_v48  ;;  %v2283_v59 = vadd.f32 1.0, %v235_v56  ;;  %v2284_v60 = vadd.f32 1.0, %v236_v57  ;;  %v238_v62 = vld [vmem:[%s6760_s12 + $0x1f8] sm:$0xff] }
  0x65   : > { %4327 = vst [vmem:[%s6775_s17 + $0x1c0] sm:$0xff] %v2279_v49  ;;  %v2285_v61 = vadd.f32 1.0, %v237_v58  ;;  %v239_v63 = vld [vmem:[%s6760_s12 + $0x200] sm:$0xff]  ;;  %v240_v0 = vld [vmem:[%s6760_s12 + $0x208] sm:$0xff]  ;;  %4328 = vst [vmem:[%s6775_s17 + $0x1c8] sm:$0xff] %v2280_v53  ;;  %v2286_v1 = vadd.f32 1.0, %v238_v62 }
  0x66   : > { %4329 = vst [vmem:[%s6775_s17 + $0x1d0] sm:$0xff] %v2281_v54  ;;  %4330 = vst [vmem:[%s6775_s17 + $0x1d8] sm:$0xff] %v2282_v55  ;;  %v2287_v2 = vadd.f32 1.0, %v239_v63  ;;  %v2288_v3 = vadd.f32 1.0, %v240_v0  ;;  %v241_v4 = vld [vmem:[%s6760_s12 + $0x210] sm:$0xff]  ;;  %v242_v5 = vld [vmem:[%s6760_s12 + $0x218] sm:$0xff] }
  0x67   : > { %v243_v6 = vld [vmem:[%s6760_s12 + $0x220] sm:$0xff]  ;;  %4331 = vst [vmem:[%s6775_s17 + $0x1e0] sm:$0xff] %v2283_v59  ;;  %4332 = vst [vmem:[%s6775_s17 + $0x1e8] sm:$0xff] %v2284_v60  ;;  %v2289_v7 = vadd.f32 1.0, %v241_v4  ;;  %v2290_v8 = vadd.f32 1.0, %v242_v5  ;;  %v244_v10 = vld [vmem:[%s6760_s12 + $0x228] sm:$0xff] }
  0x68   : > { %4333 = vst [vmem:[%s6775_s17 + $0x1f0] sm:$0xff] %v2285_v61  ;;  %v2291_v9 = vadd.f32 1.0, %v243_v6  ;;  %v245_v11 = vld [vmem:[%s6760_s12 + $0x230] sm:$0xff]  ;;  %v246_v12 = vld [vmem:[%s6760_s12 + $0x238] sm:$0xff]  ;;  %4334 = vst [vmem:[%s6775_s17 + $0x1f8] sm:$0xff] %v2286_v1  ;;  %v2292_v13 = vadd.f32 1.0, %v244_v10 }
  0x69   : > { %4335 = vst [vmem:[%s6775_s17 + $0x200] sm:$0xff] %v2287_v2  ;;  %4336 = vst [vmem:[%s6775_s17 + $0x208] sm:$0xff] %v2288_v3  ;;  %v2293_v14 = vadd.f32 1.0, %v245_v11  ;;  %v2294_v15 = vadd.f32 1.0, %v246_v12  ;;  %v247_v16 = vld [vmem:[%s6760_s12 + $0x240] sm:$0xff]  ;;  %v248_v17 = vld [vmem:[%s6760_s12 + $0x248] sm:$0xff] }
  0x6a   : > { %v249_v18 = vld [vmem:[%s6760_s12 + $0x250] sm:$0xff]  ;;  %4337 = vst [vmem:[%s6775_s17 + $0x210] sm:$0xff] %v2289_v7  ;;  %4338 = vst [vmem:[%s6775_s17 + $0x218] sm:$0xff] %v2290_v8  ;;  %v2295_v19 = vadd.f32 1.0, %v247_v16  ;;  %v2296_v20 = vadd.f32 1.0, %v248_v17  ;;  %v250_v22 = vld [vmem:[%s6760_s12 + $0x258] sm:$0xff] }
  0x6b   : > { %4339 = vst [vmem:[%s6775_s17 + $0x220] sm:$0xff] %v2291_v9  ;;  %v2297_v21 = vadd.f32 1.0, %v249_v18  ;;  %v251_v23 = vld [vmem:[%s6760_s12 + $0x260] sm:$0xff]  ;;  %v252_v24 = vld [vmem:[%s6760_s12 + $0x268] sm:$0xff]  ;;  %4340 = vst [vmem:[%s6775_s17 + $0x228] sm:$0xff] %v2292_v13  ;;  %v2298_v25 = vadd.f32 1.0, %v250_v22 }
  0x6c   : > { %4341 = vst [vmem:[%s6775_s17 + $0x230] sm:$0xff] %v2293_v14  ;;  %4342 = vst [vmem:[%s6775_s17 + $0x238] sm:$0xff] %v2294_v15  ;;  %v2299_v26 = vadd.f32 1.0, %v251_v23  ;;  %v2300_v27 = vadd.f32 1.0, %v252_v24  ;;  %v253_v28 = vld [vmem:[%s6760_s12 + $0x270] sm:$0xff]  ;;  %v254_v29 = vld [vmem:[%s6760_s12 + $0x278] sm:$0xff] }
  0x6d   : > { %v255_v30 = vld [vmem:[%s6760_s12 + $0x280] sm:$0xff]  ;;  %4343 = vst [vmem:[%s6775_s17 + $0x240] sm:$0xff] %v2295_v19  ;;  %4344 = vst [vmem:[%s6775_s17 + $0x248] sm:$0xff] %v2296_v20  ;;  %v2301_v31 = vadd.f32 1.0, %v253_v28  ;;  %v2302_v32 = vadd.f32 1.0, %v254_v29  ;;  %v256_v34 = vld [vmem:[%s6760_s12 + $0x288] sm:$0xff] }
  0x6e   : > { %4345 = vst [vmem:[%s6775_s17 + $0x250] sm:$0xff] %v2297_v21  ;;  %v2303_v33 = vadd.f32 1.0, %v255_v30  ;;  %v257_v35 = vld [vmem:[%s6760_s12 + $0x290] sm:$0xff]  ;;  %v258_v36 = vld [vmem:[%s6760_s12 + $0x298] sm:$0xff]  ;;  %4346 = vst [vmem:[%s6775_s17 + $0x258] sm:$0xff] %v2298_v25  ;;  %v2304_v37 = vadd.f32 1.0, %v256_v34 }
  0x6f   : > { %4347 = vst [vmem:[%s6775_s17 + $0x260] sm:$0xff] %v2299_v26  ;;  %4348 = vst [vmem:[%s6775_s17 + $0x268] sm:$0xff] %v2300_v27  ;;  %v2305_v38 = vadd.f32 1.0, %v257_v35  ;;  %v2306_v39 = vadd.f32 1.0, %v258_v36  ;;  %v259_v40 = vld [vmem:[%s6760_s12 + $0x2a0] sm:$0xff]  ;;  %v260_v41 = vld [vmem:[%s6760_s12 + $0x2a8] sm:$0xff] }
  0x70   : > { %v261_v42 = vld [vmem:[%s6760_s12 + $0x2b0] sm:$0xff]  ;;  %4349 = vst [vmem:[%s6775_s17 + $0x270] sm:$0xff] %v2301_v31  ;;  %4350 = vst [vmem:[%s6775_s17 + $0x278] sm:$0xff] %v2302_v32  ;;  %v2307_v43 = vadd.f32 1.0, %v259_v40  ;;  %v2308_v44 = vadd.f32 1.0, %v260_v41  ;;  %v262_v46 = vld [vmem:[%s6760_s12 + $0x2b8] sm:$0xff] }
  0x71   : > { %4351 = vst [vmem:[%s6775_s17 + $0x280] sm:$0xff] %v2303_v33  ;;  %v2309_v45 = vadd.f32 1.0, %v261_v42  ;;  %v263_v47 = vld [vmem:[%s6760_s12 + $0x2c0] sm:$0xff]  ;;  %v264_v48 = vld [vmem:[%s6760_s12 + $0x2c8] sm:$0xff]  ;;  %4352 = vst [vmem:[%s6775_s17 + $0x288] sm:$0xff] %v2304_v37  ;;  %v2310_v49 = vadd.f32 1.0, %v262_v46 }
  0x72   : > { %4353 = vst [vmem:[%s6775_s17 + $0x290] sm:$0xff] %v2305_v38  ;;  %4354 = vst [vmem:[%s6775_s17 + $0x298] sm:$0xff] %v2306_v39  ;;  %v2311_v50 = vadd.f32 1.0, %v263_v47  ;;  %v2312_v51 = vadd.f32 1.0, %v264_v48  ;;  %v265_v52 = vld [vmem:[%s6760_s12 + $0x2d0] sm:$0xff]  ;;  %v266_v53 = vld [vmem:[%s6760_s12 + $0x2d8] sm:$0xff] }
  0x73   : > { %v267_v54 = vld [vmem:[%s6760_s12 + $0x2e0] sm:$0xff]  ;;  %4355 = vst [vmem:[%s6775_s17 + $0x2a0] sm:$0xff] %v2307_v43  ;;  %4356 = vst [vmem:[%s6775_s17 + $0x2a8] sm:$0xff] %v2308_v44  ;;  %v2313_v55 = vadd.f32 1.0, %v265_v52  ;;  %v2314_v56 = vadd.f32 1.0, %v266_v53  ;;  %v268_v58 = vld [vmem:[%s6760_s12 + $0x2e8] sm:$0xff] }
  0x74   : > { %4357 = vst [vmem:[%s6775_s17 + $0x2b0] sm:$0xff] %v2309_v45  ;;  %v2315_v57 = vadd.f32 1.0, %v267_v54  ;;  %v269_v59 = vld [vmem:[%s6760_s12 + $0x2f0] sm:$0xff]  ;;  %v270_v60 = vld [vmem:[%s6760_s12 + $0x2f8] sm:$0xff]  ;;  %4358 = vst [vmem:[%s6775_s17 + $0x2b8] sm:$0xff] %v2310_v49  ;;  %v2316_v61 = vadd.f32 1.0, %v268_v58 }
  0x75   : > { %4359 = vst [vmem:[%s6775_s17 + $0x2c0] sm:$0xff] %v2311_v50  ;;  %4360 = vst [vmem:[%s6775_s17 + $0x2c8] sm:$0xff] %v2312_v51  ;;  %v2317_v62 = vadd.f32 1.0, %v269_v59  ;;  %v2318_v63 = vadd.f32 1.0, %v270_v60  ;;  %v271_v0 = vld [vmem:[%s6760_s12 + $0x300] sm:$0xff]  ;;  %v272_v1 = vld [vmem:[%s6760_s12 + $0x308] sm:$0xff] }
  0x76   : > { %v273_v2 = vld [vmem:[%s6760_s12 + $0x310] sm:$0xff]  ;;  %4361 = vst [vmem:[%s6775_s17 + $0x2d0] sm:$0xff] %v2313_v55  ;;  %4362 = vst [vmem:[%s6775_s17 + $0x2d8] sm:$0xff] %v2314_v56  ;;  %v2319_v3 = vadd.f32 1.0, %v271_v0  ;;  %v2320_v4 = vadd.f32 1.0, %v272_v1  ;;  %v274_v6 = vld [vmem:[%s6760_s12 + $0x318] sm:$0xff] }
  0x77   : > { %4363 = vst [vmem:[%s6775_s17 + $0x2e0] sm:$0xff] %v2315_v57  ;;  %v2321_v5 = vadd.f32 1.0, %v273_v2  ;;  %v275_v7 = vld [vmem:[%s6760_s12 + $0x320] sm:$0xff]  ;;  %v276_v8 = vld [vmem:[%s6760_s12 + $0x328] sm:$0xff]  ;;  %4364 = vst [vmem:[%s6775_s17 + $0x2e8] sm:$0xff] %v2316_v61  ;;  %v2322_v9 = vadd.f32 1.0, %v274_v6 }
  0x78   : > { %4365 = vst [vmem:[%s6775_s17 + $0x2f0] sm:$0xff] %v2317_v62  ;;  %4366 = vst [vmem:[%s6775_s17 + $0x2f8] sm:$0xff] %v2318_v63  ;;  %v2323_v10 = vadd.f32 1.0, %v275_v7  ;;  %v2324_v11 = vadd.f32 1.0, %v276_v8  ;;  %v277_v12 = vld [vmem:[%s6760_s12 + $0x330] sm:$0xff]  ;;  %v278_v13 = vld [vmem:[%s6760_s12 + $0x338] sm:$0xff] }
  0x79   : > { %v279_v14 = vld [vmem:[%s6760_s12 + $0x340] sm:$0xff]  ;;  %4367 = vst [vmem:[%s6775_s17 + $0x300] sm:$0xff] %v2319_v3  ;;  %4368 = vst [vmem:[%s6775_s17 + $0x308] sm:$0xff] %v2320_v4  ;;  %v2325_v15 = vadd.f32 1.0, %v277_v12  ;;  %v2326_v16 = vadd.f32 1.0, %v278_v13  ;;  %v280_v18 = vld [vmem:[%s6760_s12 + $0x348] sm:$0xff] }
  0x7a   : > { %4369 = vst [vmem:[%s6775_s17 + $0x310] sm:$0xff] %v2321_v5  ;;  %v2327_v17 = vadd.f32 1.0, %v279_v14  ;;  %v281_v19 = vld [vmem:[%s6760_s12 + $0x350] sm:$0xff]  ;;  %v282_v20 = vld [vmem:[%s6760_s12 + $0x358] sm:$0xff]  ;;  %4370 = vst [vmem:[%s6775_s17 + $0x318] sm:$0xff] %v2322_v9  ;;  %v2328_v21 = vadd.f32 1.0, %v280_v18 }
  0x7b   : > { %4371 = vst [vmem:[%s6775_s17 + $0x320] sm:$0xff] %v2323_v10  ;;  %4372 = vst [vmem:[%s6775_s17 + $0x328] sm:$0xff] %v2324_v11  ;;  %v2329_v22 = vadd.f32 1.0, %v281_v19  ;;  %v2330_v23 = vadd.f32 1.0, %v282_v20  ;;  %v283_v24 = vld [vmem:[%s6760_s12 + $0x360] sm:$0xff]  ;;  %v284_v25 = vld [vmem:[%s6760_s12 + $0x368] sm:$0xff] }
  0x7c   : > { %v285_v26 = vld [vmem:[%s6760_s12 + $0x370] sm:$0xff]  ;;  %4373 = vst [vmem:[%s6775_s17 + $0x330] sm:$0xff] %v2325_v15  ;;  %4374 = vst [vmem:[%s6775_s17 + $0x338] sm:$0xff] %v2326_v16  ;;  %v2331_v27 = vadd.f32 1.0, %v283_v24  ;;  %v2332_v28 = vadd.f32 1.0, %v284_v25  ;;  %v286_v30 = vld [vmem:[%s6760_s12 + $0x378] sm:$0xff] }
  0x7d   : > { %4375 = vst [vmem:[%s6775_s17 + $0x340] sm:$0xff] %v2327_v17  ;;  %v2333_v29 = vadd.f32 1.0, %v285_v26  ;;  %v287_v31 = vld [vmem:[%s6760_s12 + $0x380] sm:$0xff]  ;;  %v288_v32 = vld [vmem:[%s6760_s12 + $0x388] sm:$0xff]  ;;  %4376 = vst [vmem:[%s6775_s17 + $0x348] sm:$0xff] %v2328_v21  ;;  %v2334_v33 = vadd.f32 1.0, %v286_v30 }
  0x7e   : > { %4377 = vst [vmem:[%s6775_s17 + $0x350] sm:$0xff] %v2329_v22  ;;  %4378 = vst [vmem:[%s6775_s17 + $0x358] sm:$0xff] %v2330_v23  ;;  %v2335_v34 = vadd.f32 1.0, %v287_v31  ;;  %v2336_v35 = vadd.f32 1.0, %v288_v32  ;;  %v289_v36 = vld [vmem:[%s6760_s12 + $0x390] sm:$0xff]  ;;  %v290_v37 = vld [vmem:[%s6760_s12 + $0x398] sm:$0xff] }
  0x7f   : > { %v291_v38 = vld [vmem:[%s6760_s12 + $0x3a0] sm:$0xff]  ;;  %4379 = vst [vmem:[%s6775_s17 + $0x360] sm:$0xff] %v2331_v27  ;;  %4380 = vst [vmem:[%s6775_s17 + $0x368] sm:$0xff] %v2332_v28  ;;  %v2337_v39 = vadd.f32 1.0, %v289_v36  ;;  %v2338_v40 = vadd.f32 1.0, %v290_v37  ;;  %v292_v42 = vld [vmem:[%s6760_s12 + $0x3a8] sm:$0xff] }
  0x80   : > { %4381 = vst [vmem:[%s6775_s17 + $0x370] sm:$0xff] %v2333_v29  ;;  %v2339_v41 = vadd.f32 1.0, %v291_v38  ;;  %v293_v43 = vld [vmem:[%s6760_s12 + $0x3b0] sm:$0xff]  ;;  %v294_v44 = vld [vmem:[%s6760_s12 + $0x3b8] sm:$0xff]  ;;  %4382 = vst [vmem:[%s6775_s17 + $0x378] sm:$0xff] %v2334_v33  ;;  %v2340_v45 = vadd.f32 1.0, %v292_v42 }
  0x81   : > { %4383 = vst [vmem:[%s6775_s17 + $0x380] sm:$0xff] %v2335_v34  ;;  %4384 = vst [vmem:[%s6775_s17 + $0x388] sm:$0xff] %v2336_v35  ;;  %v2341_v46 = vadd.f32 1.0, %v293_v43  ;;  %v2342_v47 = vadd.f32 1.0, %v294_v44  ;;  %v295_v48 = vld [vmem:[%s6760_s12 + $0x3c0] sm:$0xff]  ;;  %v296_v49 = vld [vmem:[%s6760_s12 + $0x3c8] sm:$0xff] }
  0x82   : > { %v297_v50 = vld [vmem:[%s6760_s12 + $0x3d0] sm:$0xff]  ;;  %4385 = vst [vmem:[%s6775_s17 + $0x390] sm:$0xff] %v2337_v39  ;;  %4386 = vst [vmem:[%s6775_s17 + $0x398] sm:$0xff] %v2338_v40  ;;  %v2343_v51 = vadd.f32 1.0, %v295_v48  ;;  %v2344_v52 = vadd.f32 1.0, %v296_v49  ;;  %v298_v54 = vld [vmem:[%s6760_s12 + $0x3d8] sm:$0xff] }
  0x83   : > { %4387 = vst [vmem:[%s6775_s17 + $0x3a0] sm:$0xff] %v2339_v41  ;;  %v2345_v53 = vadd.f32 1.0, %v297_v50  ;;  %v299_v55 = vld [vmem:[%s6760_s12 + $0x3e0] sm:$0xff]  ;;  %v300_v56 = vld [vmem:[%s6760_s12 + $0x3e8] sm:$0xff]  ;;  %4388 = vst [vmem:[%s6775_s17 + $0x3a8] sm:$0xff] %v2340_v45  ;;  %v2346_v57 = vadd.f32 1.0, %v298_v54 }
  0x84   : > { %4389 = vst [vmem:[%s6775_s17 + $0x3b0] sm:$0xff] %v2341_v46  ;;  %4390 = vst [vmem:[%s6775_s17 + $0x3b8] sm:$0xff] %v2342_v47  ;;  %v2347_v58 = vadd.f32 1.0, %v299_v55  ;;  %v2348_v59 = vadd.f32 1.0, %v300_v56  ;;  %v301_v60 = vld [vmem:[%s6760_s12 + $0x3f0] sm:$0xff]  ;;  %v302_v61 = vld [vmem:[%s6760_s12 + $0x3f8] sm:$0xff] }
  0x85   : > { %v303_v62 = vld [vmem:[%s6760_s12 + $0x400] sm:$0xff]  ;;  %4391 = vst [vmem:[%s6775_s17 + $0x3c0] sm:$0xff] %v2343_v51  ;;  %4392 = vst [vmem:[%s6775_s17 + $0x3c8] sm:$0xff] %v2344_v52  ;;  %v2349_v63 = vadd.f32 1.0, %v301_v60  ;;  %v2350_v0 = vadd.f32 1.0, %v302_v61  ;;  %v304_v2 = vld [vmem:[%s6760_s12 + $0x408] sm:$0xff] }
  0x86   : > { %4393 = vst [vmem:[%s6775_s17 + $0x3d0] sm:$0xff] %v2345_v53  ;;  %v2351_v1 = vadd.f32 1.0, %v303_v62  ;;  %v305_v3 = vld [vmem:[%s6760_s12 + $0x410] sm:$0xff]  ;;  %v306_v4 = vld [vmem:[%s6760_s12 + $0x418] sm:$0xff]  ;;  %4394 = vst [vmem:[%s6775_s17 + $0x3d8] sm:$0xff] %v2346_v57  ;;  %v2352_v5 = vadd.f32 1.0, %v304_v2 }
  0x87   : > { %4395 = vst [vmem:[%s6775_s17 + $0x3e0] sm:$0xff] %v2347_v58  ;;  %4396 = vst [vmem:[%s6775_s17 + $0x3e8] sm:$0xff] %v2348_v59  ;;  %v2353_v6 = vadd.f32 1.0, %v305_v3  ;;  %v2354_v7 = vadd.f32 1.0, %v306_v4  ;;  %v307_v8 = vld [vmem:[%s6760_s12 + $0x420] sm:$0xff]  ;;  %v308_v9 = vld [vmem:[%s6760_s12 + $0x428] sm:$0xff] }
  0x88   : > { %v309_v10 = vld [vmem:[%s6760_s12 + $0x430] sm:$0xff]  ;;  %4397 = vst [vmem:[%s6775_s17 + $0x3f0] sm:$0xff] %v2349_v63  ;;  %4398 = vst [vmem:[%s6775_s17 + $0x3f8] sm:$0xff] %v2350_v0  ;;  %v2355_v11 = vadd.f32 1.0, %v307_v8  ;;  %v2356_v12 = vadd.f32 1.0, %v308_v9  ;;  %v310_v14 = vld [vmem:[%s6760_s12 + $0x438] sm:$0xff] }
  0x89   : > { %4399 = vst [vmem:[%s6775_s17 + $0x400] sm:$0xff] %v2351_v1  ;;  %v2357_v13 = vadd.f32 1.0, %v309_v10  ;;  %v311_v15 = vld [vmem:[%s6760_s12 + $0x440] sm:$0xff]  ;;  %v312_v16 = vld [vmem:[%s6760_s12 + $0x448] sm:$0xff]  ;;  %4400 = vst [vmem:[%s6775_s17 + $0x408] sm:$0xff] %v2352_v5  ;;  %v2358_v17 = vadd.f32 1.0, %v310_v14 }
  0x8a   : > { %4401 = vst [vmem:[%s6775_s17 + $0x410] sm:$0xff] %v2353_v6  ;;  %4402 = vst [vmem:[%s6775_s17 + $0x418] sm:$0xff] %v2354_v7  ;;  %v2359_v18 = vadd.f32 1.0, %v311_v15  ;;  %v2360_v19 = vadd.f32 1.0, %v312_v16  ;;  %v313_v20 = vld [vmem:[%s6760_s12 + $0x450] sm:$0xff]  ;;  %v314_v21 = vld [vmem:[%s6760_s12 + $0x458] sm:$0xff] }
  0x8b   : > { %v315_v22 = vld [vmem:[%s6760_s12 + $0x460] sm:$0xff]  ;;  %4403 = vst [vmem:[%s6775_s17 + $0x420] sm:$0xff] %v2355_v11  ;;  %4404 = vst [vmem:[%s6775_s17 + $0x428] sm:$0xff] %v2356_v12  ;;  %v2361_v23 = vadd.f32 1.0, %v313_v20  ;;  %v2362_v24 = vadd.f32 1.0, %v314_v21  ;;  %v316_v26 = vld [vmem:[%s6760_s12 + $0x468] sm:$0xff] }
  0x8c   : > { %4405 = vst [vmem:[%s6775_s17 + $0x430] sm:$0xff] %v2357_v13  ;;  %v2363_v25 = vadd.f32 1.0, %v315_v22  ;;  %v317_v27 = vld [vmem:[%s6760_s12 + $0x470] sm:$0xff]  ;;  %v318_v28 = vld [vmem:[%s6760_s12 + $0x478] sm:$0xff]  ;;  %4406 = vst [vmem:[%s6775_s17 + $0x438] sm:$0xff] %v2358_v17  ;;  %v2364_v29 = vadd.f32 1.0, %v316_v26 }
  0x8d   : > { %4407 = vst [vmem:[%s6775_s17 + $0x440] sm:$0xff] %v2359_v18  ;;  %4408 = vst [vmem:[%s6775_s17 + $0x448] sm:$0xff] %v2360_v19  ;;  %v2365_v30 = vadd.f32 1.0, %v317_v27  ;;  %v2366_v31 = vadd.f32 1.0, %v318_v28  ;;  %v319_v32 = vld [vmem:[%s6760_s12 + $0x480] sm:$0xff]  ;;  %v320_v33 = vld [vmem:[%s6760_s12 + $0x488] sm:$0xff] }
  0x8e   : > { %v321_v34 = vld [vmem:[%s6760_s12 + $0x490] sm:$0xff]  ;;  %4409 = vst [vmem:[%s6775_s17 + $0x450] sm:$0xff] %v2361_v23  ;;  %4410 = vst [vmem:[%s6775_s17 + $0x458] sm:$0xff] %v2362_v24  ;;  %v2367_v35 = vadd.f32 1.0, %v319_v32  ;;  %v2368_v36 = vadd.f32 1.0, %v320_v33  ;;  %v322_v38 = vld [vmem:[%s6760_s12 + $0x498] sm:$0xff] }
  0x8f   : > { %4411 = vst [vmem:[%s6775_s17 + $0x460] sm:$0xff] %v2363_v25  ;;  %v2369_v37 = vadd.f32 1.0, %v321_v34  ;;  %v323_v39 = vld [vmem:[%s6760_s12 + $0x4a0] sm:$0xff]  ;;  %v324_v40 = vld [vmem:[%s6760_s12 + $0x4a8] sm:$0xff]  ;;  %4412 = vst [vmem:[%s6775_s17 + $0x468] sm:$0xff] %v2364_v29  ;;  %v2370_v41 = vadd.f32 1.0, %v322_v38 }
  0x90   : > { %4413 = vst [vmem:[%s6775_s17 + $0x470] sm:$0xff] %v2365_v30  ;;  %4414 = vst [vmem:[%s6775_s17 + $0x478] sm:$0xff] %v2366_v31  ;;  %v2371_v42 = vadd.f32 1.0, %v323_v39  ;;  %v2372_v43 = vadd.f32 1.0, %v324_v40  ;;  %v325_v44 = vld [vmem:[%s6760_s12 + $0x4b0] sm:$0xff]  ;;  %v326_v45 = vld [vmem:[%s6760_s12 + $0x4b8] sm:$0xff] }
  0x91   : > { %v327_v46 = vld [vmem:[%s6760_s12 + $0x4c0] sm:$0xff]  ;;  %4415 = vst [vmem:[%s6775_s17 + $0x480] sm:$0xff] %v2367_v35  ;;  %4416 = vst [vmem:[%s6775_s17 + $0x488] sm:$0xff] %v2368_v36  ;;  %v2373_v47 = vadd.f32 1.0, %v325_v44  ;;  %v2374_v48 = vadd.f32 1.0, %v326_v45  ;;  %v328_v50 = vld [vmem:[%s6760_s12 + $0x4c8] sm:$0xff] }
  0x92   : > { %4417 = vst [vmem:[%s6775_s17 + $0x490] sm:$0xff] %v2369_v37  ;;  %v2375_v49 = vadd.f32 1.0, %v327_v46  ;;  %v329_v51 = vld [vmem:[%s6760_s12 + $0x4d0] sm:$0xff]  ;;  %v330_v52 = vld [vmem:[%s6760_s12 + $0x4d8] sm:$0xff]  ;;  %4418 = vst [vmem:[%s6775_s17 + $0x498] sm:$0xff] %v2370_v41  ;;  %v2376_v53 = vadd.f32 1.0, %v328_v50 }
  0x93   : > { %4419 = vst [vmem:[%s6775_s17 + $0x4a0] sm:$0xff] %v2371_v42  ;;  %4420 = vst [vmem:[%s6775_s17 + $0x4a8] sm:$0xff] %v2372_v43  ;;  %v2377_v54 = vadd.f32 1.0, %v329_v51  ;;  %v2378_v55 = vadd.f32 1.0, %v330_v52  ;;  %v331_v56 = vld [vmem:[%s6760_s12 + $0x4e0] sm:$0xff]  ;;  %v332_v57 = vld [vmem:[%s6760_s12 + $0x4e8] sm:$0xff] }
  0x94   : > { %v333_v58 = vld [vmem:[%s6760_s12 + $0x4f0] sm:$0xff]  ;;  %4421 = vst [vmem:[%s6775_s17 + $0x4b0] sm:$0xff] %v2373_v47  ;;  %4422 = vst [vmem:[%s6775_s17 + $0x4b8] sm:$0xff] %v2374_v48  ;;  %v2379_v59 = vadd.f32 1.0, %v331_v56  ;;  %v2380_v60 = vadd.f32 1.0, %v332_v57  ;;  %v334_v62 = vld [vmem:[%s6760_s12 + $0x4f8] sm:$0xff] }
  0x95   : > { %4423 = vst [vmem:[%s6775_s17 + $0x4c0] sm:$0xff] %v2375_v49  ;;  %v2381_v61 = vadd.f32 1.0, %v333_v58  ;;  %v335_v63 = vld [vmem:[%s6760_s12 + $0x500] sm:$0xff]  ;;  %v336_v0 = vld [vmem:[%s6760_s12 + $0x508] sm:$0xff]  ;;  %4424 = vst [vmem:[%s6775_s17 + $0x4c8] sm:$0xff] %v2376_v53  ;;  %v2382_v1 = vadd.f32 1.0, %v334_v62 }
  0x96   : > { %4425 = vst [vmem:[%s6775_s17 + $0x4d0] sm:$0xff] %v2377_v54  ;;  %4426 = vst [vmem:[%s6775_s17 + $0x4d8] sm:$0xff] %v2378_v55  ;;  %v2383_v2 = vadd.f32 1.0, %v335_v63  ;;  %v2384_v3 = vadd.f32 1.0, %v336_v0  ;;  %v337_v4 = vld [vmem:[%s6760_s12 + $0x510] sm:$0xff]  ;;  %v338_v5 = vld [vmem:[%s6760_s12 + $0x518] sm:$0xff] }
  0x97   : > { %v339_v6 = vld [vmem:[%s6760_s12 + $0x520] sm:$0xff]  ;;  %4427 = vst [vmem:[%s6775_s17 + $0x4e0] sm:$0xff] %v2379_v59  ;;  %4428 = vst [vmem:[%s6775_s17 + $0x4e8] sm:$0xff] %v2380_v60  ;;  %v2385_v7 = vadd.f32 1.0, %v337_v4  ;;  %v2386_v8 = vadd.f32 1.0, %v338_v5  ;;  %v340_v10 = vld [vmem:[%s6760_s12 + $0x528] sm:$0xff] }
  0x98   : > { %4429 = vst [vmem:[%s6775_s17 + $0x4f0] sm:$0xff] %v2381_v61  ;;  %v2387_v9 = vadd.f32 1.0, %v339_v6  ;;  %v341_v11 = vld [vmem:[%s6760_s12 + $0x530] sm:$0xff]  ;;  %v342_v12 = vld [vmem:[%s6760_s12 + $0x538] sm:$0xff]  ;;  %4430 = vst [vmem:[%s6775_s17 + $0x4f8] sm:$0xff] %v2382_v1  ;;  %v2388_v13 = vadd.f32 1.0, %v340_v10 }
  0x99   : > { %4431 = vst [vmem:[%s6775_s17 + $0x500] sm:$0xff] %v2383_v2  ;;  %4432 = vst [vmem:[%s6775_s17 + $0x508] sm:$0xff] %v2384_v3  ;;  %v2389_v14 = vadd.f32 1.0, %v341_v11  ;;  %v2390_v15 = vadd.f32 1.0, %v342_v12  ;;  %v343_v16 = vld [vmem:[%s6760_s12 + $0x540] sm:$0xff]  ;;  %v344_v17 = vld [vmem:[%s6760_s12 + $0x548] sm:$0xff] }
  0x9a   : > { %v345_v18 = vld [vmem:[%s6760_s12 + $0x550] sm:$0xff]  ;;  %4433 = vst [vmem:[%s6775_s17 + $0x510] sm:$0xff] %v2385_v7  ;;  %4434 = vst [vmem:[%s6775_s17 + $0x518] sm:$0xff] %v2386_v8  ;;  %v2391_v19 = vadd.f32 1.0, %v343_v16  ;;  %v2392_v20 = vadd.f32 1.0, %v344_v17  ;;  %v346_v22 = vld [vmem:[%s6760_s12 + $0x558] sm:$0xff] }
  0x9b   : > { %4435 = vst [vmem:[%s6775_s17 + $0x520] sm:$0xff] %v2387_v9  ;;  %v2393_v21 = vadd.f32 1.0, %v345_v18  ;;  %v347_v23 = vld [vmem:[%s6760_s12 + $0x560] sm:$0xff]  ;;  %v348_v24 = vld [vmem:[%s6760_s12 + $0x568] sm:$0xff]  ;;  %4436 = vst [vmem:[%s6775_s17 + $0x528] sm:$0xff] %v2388_v13  ;;  %v2394_v25 = vadd.f32 1.0, %v346_v22 }
  0x9c   : > { %4437 = vst [vmem:[%s6775_s17 + $0x530] sm:$0xff] %v2389_v14  ;;  %4438 = vst [vmem:[%s6775_s17 + $0x538] sm:$0xff] %v2390_v15  ;;  %v2395_v26 = vadd.f32 1.0, %v347_v23  ;;  %v2396_v27 = vadd.f32 1.0, %v348_v24  ;;  %v349_v28 = vld [vmem:[%s6760_s12 + $0x570] sm:$0xff]  ;;  %v350_v29 = vld [vmem:[%s6760_s12 + $0x578] sm:$0xff] }
  0x9d   : > { %v351_v30 = vld [vmem:[%s6760_s12 + $0x580] sm:$0xff]  ;;  %4439 = vst [vmem:[%s6775_s17 + $0x540] sm:$0xff] %v2391_v19  ;;  %4440 = vst [vmem:[%s6775_s17 + $0x548] sm:$0xff] %v2392_v20  ;;  %v2397_v31 = vadd.f32 1.0, %v349_v28  ;;  %v2398_v32 = vadd.f32 1.0, %v350_v29  ;;  %v352_v34 = vld [vmem:[%s6760_s12 + $0x588] sm:$0xff] }
  0x9e   : > { %4441 = vst [vmem:[%s6775_s17 + $0x550] sm:$0xff] %v2393_v21  ;;  %v2399_v33 = vadd.f32 1.0, %v351_v30  ;;  %v353_v35 = vld [vmem:[%s6760_s12 + $0x590] sm:$0xff]  ;;  %v354_v36 = vld [vmem:[%s6760_s12 + $0x598] sm:$0xff]  ;;  %4442 = vst [vmem:[%s6775_s17 + $0x558] sm:$0xff] %v2394_v25  ;;  %v2400_v37 = vadd.f32 1.0, %v352_v34 }
  0x9f   : > { %4443 = vst [vmem:[%s6775_s17 + $0x560] sm:$0xff] %v2395_v26  ;;  %4444 = vst [vmem:[%s6775_s17 + $0x568] sm:$0xff] %v2396_v27  ;;  %v2401_v38 = vadd.f32 1.0, %v353_v35  ;;  %v2402_v39 = vadd.f32 1.0, %v354_v36  ;;  %v355_v40 = vld [vmem:[%s6760_s12 + $0x5a0] sm:$0xff]  ;;  %v356_v41 = vld [vmem:[%s6760_s12 + $0x5a8] sm:$0xff] }
  0xa0   : > { %v357_v42 = vld [vmem:[%s6760_s12 + $0x5b0] sm:$0xff]  ;;  %4445 = vst [vmem:[%s6775_s17 + $0x570] sm:$0xff] %v2397_v31  ;;  %4446 = vst [vmem:[%s6775_s17 + $0x578] sm:$0xff] %v2398_v32  ;;  %v2403_v43 = vadd.f32 1.0, %v355_v40  ;;  %v2404_v44 = vadd.f32 1.0, %v356_v41  ;;  %v358_v46 = vld [vmem:[%s6760_s12 + $0x5b8] sm:$0xff] }
  0xa1   : > { %4447 = vst [vmem:[%s6775_s17 + $0x580] sm:$0xff] %v2399_v33  ;;  %v2405_v45 = vadd.f32 1.0, %v357_v42  ;;  %v359_v47 = vld [vmem:[%s6760_s12 + $0x5c0] sm:$0xff]  ;;  %v360_v48 = vld [vmem:[%s6760_s12 + $0x5c8] sm:$0xff]  ;;  %4448 = vst [vmem:[%s6775_s17 + $0x588] sm:$0xff] %v2400_v37  ;;  %v2406_v49 = vadd.f32 1.0, %v358_v46 }
  0xa2   : > { %4449 = vst [vmem:[%s6775_s17 + $0x590] sm:$0xff] %v2401_v38  ;;  %4450 = vst [vmem:[%s6775_s17 + $0x598] sm:$0xff] %v2402_v39  ;;  %v2407_v50 = vadd.f32 1.0, %v359_v47  ;;  %v2408_v51 = vadd.f32 1.0, %v360_v48  ;;  %v361_v52 = vld [vmem:[%s6760_s12 + $0x5d0] sm:$0xff]  ;;  %v362_v53 = vld [vmem:[%s6760_s12 + $0x5d8] sm:$0xff] }
  0xa3   : > { %v363_v54 = vld [vmem:[%s6760_s12 + $0x5e0] sm:$0xff]  ;;  %4451 = vst [vmem:[%s6775_s17 + $0x5a0] sm:$0xff] %v2403_v43  ;;  %4452 = vst [vmem:[%s6775_s17 + $0x5a8] sm:$0xff] %v2404_v44  ;;  %v2409_v55 = vadd.f32 1.0, %v361_v52  ;;  %v2410_v56 = vadd.f32 1.0, %v362_v53  ;;  %v364_v58 = vld [vmem:[%s6760_s12 + $0x5e8] sm:$0xff] }
  0xa4   : > { %4453 = vst [vmem:[%s6775_s17 + $0x5b0] sm:$0xff] %v2405_v45  ;;  %v2411_v57 = vadd.f32 1.0, %v363_v54  ;;  %v365_v59 = vld [vmem:[%s6760_s12 + $0x5f0] sm:$0xff]  ;;  %v366_v60 = vld [vmem:[%s6760_s12 + $0x5f8] sm:$0xff]  ;;  %4454 = vst [vmem:[%s6775_s17 + $0x5b8] sm:$0xff] %v2406_v49  ;;  %v2412_v61 = vadd.f32 1.0, %v364_v58 }
  0xa5   : > { %4455 = vst [vmem:[%s6775_s17 + $0x5c0] sm:$0xff] %v2407_v50  ;;  %4456 = vst [vmem:[%s6775_s17 + $0x5c8] sm:$0xff] %v2408_v51  ;;  %v2413_v62 = vadd.f32 1.0, %v365_v59  ;;  %v2414_v63 = vadd.f32 1.0, %v366_v60  ;;  %v367_v0 = vld [vmem:[%s6760_s12 + $0x600] sm:$0xff]  ;;  %v368_v1 = vld [vmem:[%s6760_s12 + $0x608] sm:$0xff] }
  0xa6   : > { %v369_v2 = vld [vmem:[%s6760_s12 + $0x610] sm:$0xff]  ;;  %4457 = vst [vmem:[%s6775_s17 + $0x5d0] sm:$0xff] %v2409_v55  ;;  %4458 = vst [vmem:[%s6775_s17 + $0x5d8] sm:$0xff] %v2410_v56  ;;  %v2415_v3 = vadd.f32 1.0, %v367_v0  ;;  %v2416_v4 = vadd.f32 1.0, %v368_v1  ;;  %v370_v6 = vld [vmem:[%s6760_s12 + $0x618] sm:$0xff] }
  0xa7   : > { %4459 = vst [vmem:[%s6775_s17 + $0x5e0] sm:$0xff] %v2411_v57  ;;  %v2417_v5 = vadd.f32 1.0, %v369_v2  ;;  %v371_v7 = vld [vmem:[%s6760_s12 + $0x620] sm:$0xff]  ;;  %v372_v8 = vld [vmem:[%s6760_s12 + $0x628] sm:$0xff]  ;;  %4460 = vst [vmem:[%s6775_s17 + $0x5e8] sm:$0xff] %v2412_v61  ;;  %v2418_v9 = vadd.f32 1.0, %v370_v6 }
  0xa8   : > { %4461 = vst [vmem:[%s6775_s17 + $0x5f0] sm:$0xff] %v2413_v62  ;;  %4462 = vst [vmem:[%s6775_s17 + $0x5f8] sm:$0xff] %v2414_v63  ;;  %v2419_v10 = vadd.f32 1.0, %v371_v7  ;;  %v2420_v11 = vadd.f32 1.0, %v372_v8  ;;  %v373_v12 = vld [vmem:[%s6760_s12 + $0x630] sm:$0xff]  ;;  %v374_v13 = vld [vmem:[%s6760_s12 + $0x638] sm:$0xff] }
  0xa9   : > { %v375_v14 = vld [vmem:[%s6760_s12 + $0x640] sm:$0xff]  ;;  %4463 = vst [vmem:[%s6775_s17 + $0x600] sm:$0xff] %v2415_v3  ;;  %4464 = vst [vmem:[%s6775_s17 + $0x608] sm:$0xff] %v2416_v4  ;;  %v2421_v15 = vadd.f32 1.0, %v373_v12  ;;  %v2422_v16 = vadd.f32 1.0, %v374_v13  ;;  %v376_v18 = vld [vmem:[%s6760_s12 + $0x648] sm:$0xff] }
  0xaa   : > { %4465 = vst [vmem:[%s6775_s17 + $0x610] sm:$0xff] %v2417_v5  ;;  %v2423_v17 = vadd.f32 1.0, %v375_v14  ;;  %v377_v19 = vld [vmem:[%s6760_s12 + $0x650] sm:$0xff]  ;;  %v378_v20 = vld [vmem:[%s6760_s12 + $0x658] sm:$0xff]  ;;  %4466 = vst [vmem:[%s6775_s17 + $0x618] sm:$0xff] %v2418_v9  ;;  %v2424_v21 = vadd.f32 1.0, %v376_v18 }
  0xab   : > { %4467 = vst [vmem:[%s6775_s17 + $0x620] sm:$0xff] %v2419_v10  ;;  %4468 = vst [vmem:[%s6775_s17 + $0x628] sm:$0xff] %v2420_v11  ;;  %v2425_v22 = vadd.f32 1.0, %v377_v19  ;;  %v2426_v23 = vadd.f32 1.0, %v378_v20  ;;  %v379_v24 = vld [vmem:[%s6760_s12 + $0x660] sm:$0xff]  ;;  %v380_v25 = vld [vmem:[%s6760_s12 + $0x668] sm:$0xff] }
  0xac   : > { %v381_v26 = vld [vmem:[%s6760_s12 + $0x670] sm:$0xff]  ;;  %4469 = vst [vmem:[%s6775_s17 + $0x630] sm:$0xff] %v2421_v15  ;;  %4470 = vst [vmem:[%s6775_s17 + $0x638] sm:$0xff] %v2422_v16  ;;  %v2427_v27 = vadd.f32 1.0, %v379_v24  ;;  %v2428_v28 = vadd.f32 1.0, %v380_v25  ;;  %v382_v30 = vld [vmem:[%s6760_s12 + $0x678] sm:$0xff] }
  0xad   : > { %4471 = vst [vmem:[%s6775_s17 + $0x640] sm:$0xff] %v2423_v17  ;;  %v2429_v29 = vadd.f32 1.0, %v381_v26  ;;  %v383_v31 = vld [vmem:[%s6760_s12 + $0x680] sm:$0xff]  ;;  %v384_v32 = vld [vmem:[%s6760_s12 + $0x688] sm:$0xff]  ;;  %4472 = vst [vmem:[%s6775_s17 + $0x648] sm:$0xff] %v2424_v21  ;;  %v2430_v33 = vadd.f32 1.0, %v382_v30 }
  0xae   : > { %4473 = vst [vmem:[%s6775_s17 + $0x650] sm:$0xff] %v2425_v22  ;;  %4474 = vst [vmem:[%s6775_s17 + $0x658] sm:$0xff] %v2426_v23  ;;  %v2431_v34 = vadd.f32 1.0, %v383_v31  ;;  %v2432_v35 = vadd.f32 1.0, %v384_v32  ;;  %v385_v36 = vld [vmem:[%s6760_s12 + $0x690] sm:$0xff]  ;;  %v386_v37 = vld [vmem:[%s6760_s12 + $0x698] sm:$0xff] }
  0xaf   : > { %v387_v38 = vld [vmem:[%s6760_s12 + $0x6a0] sm:$0xff]  ;;  %4475 = vst [vmem:[%s6775_s17 + $0x660] sm:$0xff] %v2427_v27  ;;  %4476 = vst [vmem:[%s6775_s17 + $0x668] sm:$0xff] %v2428_v28  ;;  %v2433_v39 = vadd.f32 1.0, %v385_v36  ;;  %v2434_v40 = vadd.f32 1.0, %v386_v37  ;;  %v388_v42 = vld [vmem:[%s6760_s12 + $0x6a8] sm:$0xff] }
  0xb0   : > { %4477 = vst [vmem:[%s6775_s17 + $0x670] sm:$0xff] %v2429_v29  ;;  %v2435_v41 = vadd.f32 1.0, %v387_v38  ;;  %v389_v43 = vld [vmem:[%s6760_s12 + $0x6b0] sm:$0xff]  ;;  %v390_v44 = vld [vmem:[%s6760_s12 + $0x6b8] sm:$0xff]  ;;  %4478 = vst [vmem:[%s6775_s17 + $0x678] sm:$0xff] %v2430_v33  ;;  %v2436_v45 = vadd.f32 1.0, %v388_v42 }
  0xb1   : > { %4479 = vst [vmem:[%s6775_s17 + $0x680] sm:$0xff] %v2431_v34  ;;  %4480 = vst [vmem:[%s6775_s17 + $0x688] sm:$0xff] %v2432_v35  ;;  %v2437_v46 = vadd.f32 1.0, %v389_v43  ;;  %v2438_v47 = vadd.f32 1.0, %v390_v44  ;;  %v391_v48 = vld [vmem:[%s6760_s12 + $0x6c0] sm:$0xff]  ;;  %v392_v49 = vld [vmem:[%s6760_s12 + $0x6c8] sm:$0xff] }
  0xb2   : > { %v393_v50 = vld [vmem:[%s6760_s12 + $0x6d0] sm:$0xff]  ;;  %4481 = vst [vmem:[%s6775_s17 + $0x690] sm:$0xff] %v2433_v39  ;;  %4482 = vst [vmem:[%s6775_s17 + $0x698] sm:$0xff] %v2434_v40  ;;  %v2439_v51 = vadd.f32 1.0, %v391_v48  ;;  %v2440_v52 = vadd.f32 1.0, %v392_v49  ;;  %v394_v54 = vld [vmem:[%s6760_s12 + $0x6d8] sm:$0xff] }
  0xb3   : > { %4483 = vst [vmem:[%s6775_s17 + $0x6a0] sm:$0xff] %v2435_v41  ;;  %v2441_v53 = vadd.f32 1.0, %v393_v50  ;;  %v395_v55 = vld [vmem:[%s6760_s12 + $0x6e0] sm:$0xff]  ;;  %v396_v56 = vld [vmem:[%s6760_s12 + $0x6e8] sm:$0xff]  ;;  %4484 = vst [vmem:[%s6775_s17 + $0x6a8] sm:$0xff] %v2436_v45  ;;  %v2442_v57 = vadd.f32 1.0, %v394_v54 }
  0xb4   : > { %4485 = vst [vmem:[%s6775_s17 + $0x6b0] sm:$0xff] %v2437_v46  ;;  %4486 = vst [vmem:[%s6775_s17 + $0x6b8] sm:$0xff] %v2438_v47  ;;  %v2443_v58 = vadd.f32 1.0, %v395_v55  ;;  %v2444_v59 = vadd.f32 1.0, %v396_v56  ;;  %v397_v60 = vld [vmem:[%s6760_s12 + $0x6f0] sm:$0xff]  ;;  %v398_v61 = vld [vmem:[%s6760_s12 + $0x6f8] sm:$0xff] }
  0xb5   : > { %v399_v62 = vld [vmem:[%s6760_s12 + $0x700] sm:$0xff]  ;;  %4487 = vst [vmem:[%s6775_s17 + $0x6c0] sm:$0xff] %v2439_v51  ;;  %4488 = vst [vmem:[%s6775_s17 + $0x6c8] sm:$0xff] %v2440_v52  ;;  %v2445_v63 = vadd.f32 1.0, %v397_v60  ;;  %v2446_v0 = vadd.f32 1.0, %v398_v61  ;;  %v400_v2 = vld [vmem:[%s6760_s12 + $0x708] sm:$0xff] }
  0xb6   : > { %4489 = vst [vmem:[%s6775_s17 + $0x6d0] sm:$0xff] %v2441_v53  ;;  %v2447_v1 = vadd.f32 1.0, %v399_v62  ;;  %v401_v3 = vld [vmem:[%s6760_s12 + $0x710] sm:$0xff]  ;;  %v402_v4 = vld [vmem:[%s6760_s12 + $0x718] sm:$0xff]  ;;  %4490 = vst [vmem:[%s6775_s17 + $0x6d8] sm:$0xff] %v2442_v57  ;;  %v2448_v5 = vadd.f32 1.0, %v400_v2 }
  0xb7   : > { %4491 = vst [vmem:[%s6775_s17 + $0x6e0] sm:$0xff] %v2443_v58  ;;  %4492 = vst [vmem:[%s6775_s17 + $0x6e8] sm:$0xff] %v2444_v59  ;;  %v2449_v6 = vadd.f32 1.0, %v401_v3  ;;  %v2450_v7 = vadd.f32 1.0, %v402_v4  ;;  %v403_v8 = vld [vmem:[%s6760_s12 + $0x720] sm:$0xff]  ;;  %v404_v9 = vld [vmem:[%s6760_s12 + $0x728] sm:$0xff] }
  0xb8   : > { %v405_v10 = vld [vmem:[%s6760_s12 + $0x730] sm:$0xff]  ;;  %4493 = vst [vmem:[%s6775_s17 + $0x6f0] sm:$0xff] %v2445_v63  ;;  %4494 = vst [vmem:[%s6775_s17 + $0x6f8] sm:$0xff] %v2446_v0  ;;  %v2451_v11 = vadd.f32 1.0, %v403_v8  ;;  %v2452_v12 = vadd.f32 1.0, %v404_v9  ;;  %v406_v14 = vld [vmem:[%s6760_s12 + $0x738] sm:$0xff] }
  0xb9   : > { %4495 = vst [vmem:[%s6775_s17 + $0x700] sm:$0xff] %v2447_v1  ;;  %v2453_v13 = vadd.f32 1.0, %v405_v10  ;;  %v407_v15 = vld [vmem:[%s6760_s12 + $0x740] sm:$0xff]  ;;  %v408_v16 = vld [vmem:[%s6760_s12 + $0x748] sm:$0xff]  ;;  %4496 = vst [vmem:[%s6775_s17 + $0x708] sm:$0xff] %v2448_v5  ;;  %v2454_v17 = vadd.f32 1.0, %v406_v14 }
  0xba   : > { %4497 = vst [vmem:[%s6775_s17 + $0x710] sm:$0xff] %v2449_v6  ;;  %4498 = vst [vmem:[%s6775_s17 + $0x718] sm:$0xff] %v2450_v7  ;;  %v2455_v18 = vadd.f32 1.0, %v407_v15  ;;  %v2456_v19 = vadd.f32 1.0, %v408_v16  ;;  %v409_v20 = vld [vmem:[%s6760_s12 + $0x750] sm:$0xff]  ;;  %v410_v21 = vld [vmem:[%s6760_s12 + $0x758] sm:$0xff] }
  0xbb   : > { %v411_v22 = vld [vmem:[%s6760_s12 + $0x760] sm:$0xff]  ;;  %4499 = vst [vmem:[%s6775_s17 + $0x720] sm:$0xff] %v2451_v11  ;;  %4500 = vst [vmem:[%s6775_s17 + $0x728] sm:$0xff] %v2452_v12  ;;  %v2457_v23 = vadd.f32 1.0, %v409_v20  ;;  %v2458_v24 = vadd.f32 1.0, %v410_v21  ;;  %v412_v26 = vld [vmem:[%s6760_s12 + $0x768] sm:$0xff] }
  0xbc   : > { %4501 = vst [vmem:[%s6775_s17 + $0x730] sm:$0xff] %v2453_v13  ;;  %v2459_v25 = vadd.f32 1.0, %v411_v22  ;;  %v413_v27 = vld [vmem:[%s6760_s12 + $0x770] sm:$0xff]  ;;  %v414_v28 = vld [vmem:[%s6760_s12 + $0x778] sm:$0xff]  ;;  %4502 = vst [vmem:[%s6775_s17 + $0x738] sm:$0xff] %v2454_v17  ;;  %v2460_v29 = vadd.f32 1.0, %v412_v26 }
  0xbd   : > { %4503 = vst [vmem:[%s6775_s17 + $0x740] sm:$0xff] %v2455_v18  ;;  %4504 = vst [vmem:[%s6775_s17 + $0x748] sm:$0xff] %v2456_v19  ;;  %v2461_v30 = vadd.f32 1.0, %v413_v27  ;;  %v2462_v31 = vadd.f32 1.0, %v414_v28  ;;  %v415_v32 = vld [vmem:[%s6760_s12 + $0x780] sm:$0xff]  ;;  %v416_v33 = vld [vmem:[%s6760_s12 + $0x788] sm:$0xff] }
  0xbe   : > { %v417_v34 = vld [vmem:[%s6760_s12 + $0x790] sm:$0xff]  ;;  %4505 = vst [vmem:[%s6775_s17 + $0x750] sm:$0xff] %v2457_v23  ;;  %4506 = vst [vmem:[%s6775_s17 + $0x758] sm:$0xff] %v2458_v24  ;;  %v2463_v35 = vadd.f32 1.0, %v415_v32  ;;  %v2464_v36 = vadd.f32 1.0, %v416_v33  ;;  %v418_v38 = vld [vmem:[%s6760_s12 + $0x798] sm:$0xff] }
  0xbf   : > { %4507 = vst [vmem:[%s6775_s17 + $0x760] sm:$0xff] %v2459_v25  ;;  %v2465_v37 = vadd.f32 1.0, %v417_v34  ;;  %v419_v39 = vld [vmem:[%s6760_s12 + $0x7a0] sm:$0xff]  ;;  %v420_v40 = vld [vmem:[%s6760_s12 + $0x7a8] sm:$0xff]  ;;  %4508 = vst [vmem:[%s6775_s17 + $0x768] sm:$0xff] %v2460_v29  ;;  %v2466_v41 = vadd.f32 1.0, %v418_v38 }
  0xc0   : > { %4509 = vst [vmem:[%s6775_s17 + $0x770] sm:$0xff] %v2461_v30  ;;  %4510 = vst [vmem:[%s6775_s17 + $0x778] sm:$0xff] %v2462_v31  ;;  %v2467_v42 = vadd.f32 1.0, %v419_v39  ;;  %v2468_v43 = vadd.f32 1.0, %v420_v40  ;;  %v421_v44 = vld [vmem:[%s6760_s12 + $0x7b0] sm:$0xff]  ;;  %v422_v45 = vld [vmem:[%s6760_s12 + $0x7b8] sm:$0xff] }
  0xc1   : > { %v423_v46 = vld [vmem:[%s6760_s12 + $0x7c0] sm:$0xff]  ;;  %4511 = vst [vmem:[%s6775_s17 + $0x780] sm:$0xff] %v2463_v35  ;;  %4512 = vst [vmem:[%s6775_s17 + $0x788] sm:$0xff] %v2464_v36  ;;  %v2469_v47 = vadd.f32 1.0, %v421_v44  ;;  %v2470_v48 = vadd.f32 1.0, %v422_v45  ;;  %v424_v50 = vld [vmem:[%s6760_s12 + $0x7c8] sm:$0xff] }
  0xc2   : > { %4513 = vst [vmem:[%s6775_s17 + $0x790] sm:$0xff] %v2465_v37  ;;  %v2471_v49 = vadd.f32 1.0, %v423_v46  ;;  %v425_v51 = vld [vmem:[%s6760_s12 + $0x7d0] sm:$0xff]  ;;  %v426_v52 = vld [vmem:[%s6760_s12 + $0x7d8] sm:$0xff]  ;;  %4514 = vst [vmem:[%s6775_s17 + $0x798] sm:$0xff] %v2466_v41  ;;  %v2472_v53 = vadd.f32 1.0, %v424_v50 }
  0xc3   : > { %4515 = vst [vmem:[%s6775_s17 + $0x7a0] sm:$0xff] %v2467_v42  ;;  %4516 = vst [vmem:[%s6775_s17 + $0x7a8] sm:$0xff] %v2468_v43  ;;  %v2473_v54 = vadd.f32 1.0, %v425_v51  ;;  %v2474_v55 = vadd.f32 1.0, %v426_v52  ;;  %v427_v56 = vld [vmem:[%s6760_s12 + $0x7e0] sm:$0xff]  ;;  %v428_v57 = vld [vmem:[%s6760_s12 + $0x7e8] sm:$0xff] }
  0xc4   : > { %v429_v58 = vld [vmem:[%s6760_s12 + $0x7f0] sm:$0xff]  ;;  %4517 = vst [vmem:[%s6775_s17 + $0x7b0] sm:$0xff] %v2469_v47  ;;  %4518 = vst [vmem:[%s6775_s17 + $0x7b8] sm:$0xff] %v2470_v48  ;;  %v2475_v59 = vadd.f32 1.0, %v427_v56  ;;  %v2476_v60 = vadd.f32 1.0, %v428_v57  ;;  %v430_v62 = vld [vmem:[%s6760_s12 + $0x7f8] sm:$0xff] }
  0xc5   : > { %4519 = vst [vmem:[%s6775_s17 + $0x7c0] sm:$0xff] %v2471_v49  ;;  %v2477_v61 = vadd.f32 1.0, %v429_v58  ;;  %v431_v63 = vld [vmem:[%s6760_s12 + $0x800] sm:$0xff]  ;;  %v432_v0 = vld [vmem:[%s6760_s12 + $0x808] sm:$0xff]  ;;  %4520 = vst [vmem:[%s6775_s17 + $0x7c8] sm:$0xff] %v2472_v53  ;;  %v2478_v1 = vadd.f32 1.0, %v430_v62 }
  0xc6   : > { %4521 = vst [vmem:[%s6775_s17 + $0x7d0] sm:$0xff] %v2473_v54  ;;  %4522 = vst [vmem:[%s6775_s17 + $0x7d8] sm:$0xff] %v2474_v55  ;;  %v2479_v2 = vadd.f32 1.0, %v431_v63  ;;  %v2480_v3 = vadd.f32 1.0, %v432_v0  ;;  %v433_v4 = vld [vmem:[%s6760_s12 + $0x810] sm:$0xff]  ;;  %v434_v5 = vld [vmem:[%s6760_s12 + $0x818] sm:$0xff] }
  0xc7   : > { %v435_v6 = vld [vmem:[%s6760_s12 + $0x820] sm:$0xff]  ;;  %4523 = vst [vmem:[%s6775_s17 + $0x7e0] sm:$0xff] %v2475_v59  ;;  %4524 = vst [vmem:[%s6775_s17 + $0x7e8] sm:$0xff] %v2476_v60  ;;  %v2481_v7 = vadd.f32 1.0, %v433_v4  ;;  %v2482_v8 = vadd.f32 1.0, %v434_v5  ;;  %v436_v10 = vld [vmem:[%s6760_s12 + $0x828] sm:$0xff] }
  0xc8   : > { %4525 = vst [vmem:[%s6775_s17 + $0x7f0] sm:$0xff] %v2477_v61  ;;  %v2483_v9 = vadd.f32 1.0, %v435_v6  ;;  %v437_v11 = vld [vmem:[%s6760_s12 + $0x830] sm:$0xff]  ;;  %v438_v12 = vld [vmem:[%s6760_s12 + $0x838] sm:$0xff]  ;;  %4526 = vst [vmem:[%s6775_s17 + $0x7f8] sm:$0xff] %v2478_v1  ;;  %v2484_v13 = vadd.f32 1.0, %v436_v10 }
  0xc9   : > { %4527 = vst [vmem:[%s6775_s17 + $0x800] sm:$0xff] %v2479_v2  ;;  %4528 = vst [vmem:[%s6775_s17 + $0x808] sm:$0xff] %v2480_v3  ;;  %v2485_v14 = vadd.f32 1.0, %v437_v11  ;;  %v2486_v15 = vadd.f32 1.0, %v438_v12  ;;  %v439_v16 = vld [vmem:[%s6760_s12 + $0x840] sm:$0xff]  ;;  %v440_v17 = vld [vmem:[%s6760_s12 + $0x848] sm:$0xff] }
  0xca   : > { %v441_v18 = vld [vmem:[%s6760_s12 + $0x850] sm:$0xff]  ;;  %4529 = vst [vmem:[%s6775_s17 + $0x810] sm:$0xff] %v2481_v7  ;;  %4530 = vst [vmem:[%s6775_s17 + $0x818] sm:$0xff] %v2482_v8  ;;  %v2487_v19 = vadd.f32 1.0, %v439_v16  ;;  %v2488_v20 = vadd.f32 1.0, %v440_v17  ;;  %v442_v22 = vld [vmem:[%s6760_s12 + $0x858] sm:$0xff] }
  0xcb   : > { %4531 = vst [vmem:[%s6775_s17 + $0x820] sm:$0xff] %v2483_v9  ;;  %v2489_v21 = vadd.f32 1.0, %v441_v18  ;;  %v443_v23 = vld [vmem:[%s6760_s12 + $0x860] sm:$0xff]  ;;  %v444_v24 = vld [vmem:[%s6760_s12 + $0x868] sm:$0xff]  ;;  %4532 = vst [vmem:[%s6775_s17 + $0x828] sm:$0xff] %v2484_v13  ;;  %v2490_v25 = vadd.f32 1.0, %v442_v22 }
  0xcc   : > { %4533 = vst [vmem:[%s6775_s17 + $0x830] sm:$0xff] %v2485_v14  ;;  %4534 = vst [vmem:[%s6775_s17 + $0x838] sm:$0xff] %v2486_v15  ;;  %v2491_v26 = vadd.f32 1.0, %v443_v23  ;;  %v2492_v27 = vadd.f32 1.0, %v444_v24  ;;  %v445_v28 = vld [vmem:[%s6760_s12 + $0x870] sm:$0xff]  ;;  %v446_v29 = vld [vmem:[%s6760_s12 + $0x878] sm:$0xff] }
  0xcd   : > { %v447_v30 = vld [vmem:[%s6760_s12 + $0x880] sm:$0xff]  ;;  %4535 = vst [vmem:[%s6775_s17 + $0x840] sm:$0xff] %v2487_v19  ;;  %4536 = vst [vmem:[%s6775_s17 + $0x848] sm:$0xff] %v2488_v20  ;;  %v2493_v31 = vadd.f32 1.0, %v445_v28  ;;  %v2494_v32 = vadd.f32 1.0, %v446_v29  ;;  %v448_v34 = vld [vmem:[%s6760_s12 + $0x888] sm:$0xff] }
  0xce   : > { %4537 = vst [vmem:[%s6775_s17 + $0x850] sm:$0xff] %v2489_v21  ;;  %v2495_v33 = vadd.f32 1.0, %v447_v30  ;;  %v449_v35 = vld [vmem:[%s6760_s12 + $0x890] sm:$0xff]  ;;  %v450_v36 = vld [vmem:[%s6760_s12 + $0x898] sm:$0xff]  ;;  %4538 = vst [vmem:[%s6775_s17 + $0x858] sm:$0xff] %v2490_v25  ;;  %v2496_v37 = vadd.f32 1.0, %v448_v34 }
  0xcf   : > { %4539 = vst [vmem:[%s6775_s17 + $0x860] sm:$0xff] %v2491_v26  ;;  %4540 = vst [vmem:[%s6775_s17 + $0x868] sm:$0xff] %v2492_v27  ;;  %v2497_v38 = vadd.f32 1.0, %v449_v35  ;;  %v2498_v39 = vadd.f32 1.0, %v450_v36  ;;  %v451_v40 = vld [vmem:[%s6760_s12 + $0x8a0] sm:$0xff]  ;;  %v452_v41 = vld [vmem:[%s6760_s12 + $0x8a8] sm:$0xff] }
  0xd0   : > { %v453_v42 = vld [vmem:[%s6760_s12 + $0x8b0] sm:$0xff]  ;;  %4541 = vst [vmem:[%s6775_s17 + $0x870] sm:$0xff] %v2493_v31  ;;  %4542 = vst [vmem:[%s6775_s17 + $0x878] sm:$0xff] %v2494_v32  ;;  %v2499_v43 = vadd.f32 1.0, %v451_v40  ;;  %v2500_v44 = vadd.f32 1.0, %v452_v41  ;;  %v454_v46 = vld [vmem:[%s6760_s12 + $0x8b8] sm:$0xff] }
  0xd1   : > { %4543 = vst [vmem:[%s6775_s17 + $0x880] sm:$0xff] %v2495_v33  ;;  %v2501_v45 = vadd.f32 1.0, %v453_v42  ;;  %v455_v47 = vld [vmem:[%s6760_s12 + $0x8c0] sm:$0xff]  ;;  %v456_v48 = vld [vmem:[%s6760_s12 + $0x8c8] sm:$0xff]  ;;  %4544 = vst [vmem:[%s6775_s17 + $0x888] sm:$0xff] %v2496_v37  ;;  %v2502_v49 = vadd.f32 1.0, %v454_v46 }
  0xd2   : > { %4545 = vst [vmem:[%s6775_s17 + $0x890] sm:$0xff] %v2497_v38  ;;  %4546 = vst [vmem:[%s6775_s17 + $0x898] sm:$0xff] %v2498_v39  ;;  %v2503_v50 = vadd.f32 1.0, %v455_v47  ;;  %v2504_v51 = vadd.f32 1.0, %v456_v48  ;;  %v457_v52 = vld [vmem:[%s6760_s12 + $0x8d0] sm:$0xff]  ;;  %v458_v53 = vld [vmem:[%s6760_s12 + $0x8d8] sm:$0xff] }
  0xd3   : > { %v459_v54 = vld [vmem:[%s6760_s12 + $0x8e0] sm:$0xff]  ;;  %4547 = vst [vmem:[%s6775_s17 + $0x8a0] sm:$0xff] %v2499_v43  ;;  %4548 = vst [vmem:[%s6775_s17 + $0x8a8] sm:$0xff] %v2500_v44  ;;  %v2505_v55 = vadd.f32 1.0, %v457_v52  ;;  %v2506_v56 = vadd.f32 1.0, %v458_v53  ;;  %v460_v58 = vld [vmem:[%s6760_s12 + $0x8e8] sm:$0xff] }
  0xd4   : > { %4549 = vst [vmem:[%s6775_s17 + $0x8b0] sm:$0xff] %v2501_v45  ;;  %v2507_v57 = vadd.f32 1.0, %v459_v54  ;;  %v461_v59 = vld [vmem:[%s6760_s12 + $0x8f0] sm:$0xff]  ;;  %v462_v60 = vld [vmem:[%s6760_s12 + $0x8f8] sm:$0xff]  ;;  %4550 = vst [vmem:[%s6775_s17 + $0x8b8] sm:$0xff] %v2502_v49  ;;  %v2508_v61 = vadd.f32 1.0, %v460_v58 }
  0xd5   : > { %4551 = vst [vmem:[%s6775_s17 + $0x8c0] sm:$0xff] %v2503_v50  ;;  %4552 = vst [vmem:[%s6775_s17 + $0x8c8] sm:$0xff] %v2504_v51  ;;  %v2509_v62 = vadd.f32 1.0, %v461_v59  ;;  %v2510_v63 = vadd.f32 1.0, %v462_v60  ;;  %v463_v0 = vld [vmem:[%s6760_s12 + $0x900] sm:$0xff]  ;;  %v464_v1 = vld [vmem:[%s6760_s12 + $0x908] sm:$0xff] }
  0xd6   : > { %v465_v2 = vld [vmem:[%s6760_s12 + $0x910] sm:$0xff]  ;;  %4553 = vst [vmem:[%s6775_s17 + $0x8d0] sm:$0xff] %v2505_v55  ;;  %4554 = vst [vmem:[%s6775_s17 + $0x8d8] sm:$0xff] %v2506_v56  ;;  %v2511_v3 = vadd.f32 1.0, %v463_v0  ;;  %v2512_v4 = vadd.f32 1.0, %v464_v1  ;;  %v466_v6 = vld [vmem:[%s6760_s12 + $0x918] sm:$0xff] }
  0xd7   : > { %4555 = vst [vmem:[%s6775_s17 + $0x8e0] sm:$0xff] %v2507_v57  ;;  %v2513_v5 = vadd.f32 1.0, %v465_v2  ;;  %v467_v7 = vld [vmem:[%s6760_s12 + $0x920] sm:$0xff]  ;;  %v468_v8 = vld [vmem:[%s6760_s12 + $0x928] sm:$0xff]  ;;  %4556 = vst [vmem:[%s6775_s17 + $0x8e8] sm:$0xff] %v2508_v61  ;;  %v2514_v9 = vadd.f32 1.0, %v466_v6 }
  0xd8   : > { %4557 = vst [vmem:[%s6775_s17 + $0x8f0] sm:$0xff] %v2509_v62  ;;  %4558 = vst [vmem:[%s6775_s17 + $0x8f8] sm:$0xff] %v2510_v63  ;;  %v2515_v10 = vadd.f32 1.0, %v467_v7  ;;  %v2516_v11 = vadd.f32 1.0, %v468_v8  ;;  %v469_v12 = vld [vmem:[%s6760_s12 + $0x930] sm:$0xff]  ;;  %v470_v13 = vld [vmem:[%s6760_s12 + $0x938] sm:$0xff] }
  0xd9   : > { %v471_v14 = vld [vmem:[%s6760_s12 + $0x940] sm:$0xff]  ;;  %4559 = vst [vmem:[%s6775_s17 + $0x900] sm:$0xff] %v2511_v3  ;;  %4560 = vst [vmem:[%s6775_s17 + $0x908] sm:$0xff] %v2512_v4  ;;  %v2517_v15 = vadd.f32 1.0, %v469_v12  ;;  %v2518_v16 = vadd.f32 1.0, %v470_v13  ;;  %v472_v18 = vld [vmem:[%s6760_s12 + $0x948] sm:$0xff] }
  0xda   : > { %4561 = vst [vmem:[%s6775_s17 + $0x910] sm:$0xff] %v2513_v5  ;;  %v2519_v17 = vadd.f32 1.0, %v471_v14  ;;  %v473_v19 = vld [vmem:[%s6760_s12 + $0x950] sm:$0xff]  ;;  %v474_v20 = vld [vmem:[%s6760_s12 + $0x958] sm:$0xff]  ;;  %4562 = vst [vmem:[%s6775_s17 + $0x918] sm:$0xff] %v2514_v9  ;;  %v2520_v21 = vadd.f32 1.0, %v472_v18 }
  0xdb   : > { %4563 = vst [vmem:[%s6775_s17 + $0x920] sm:$0xff] %v2515_v10  ;;  %4564 = vst [vmem:[%s6775_s17 + $0x928] sm:$0xff] %v2516_v11  ;;  %v2521_v22 = vadd.f32 1.0, %v473_v19  ;;  %v2522_v23 = vadd.f32 1.0, %v474_v20  ;;  %v475_v24 = vld [vmem:[%s6760_s12 + $0x960] sm:$0xff]  ;;  %v476_v25 = vld [vmem:[%s6760_s12 + $0x968] sm:$0xff] }
  0xdc   : > { %v477_v26 = vld [vmem:[%s6760_s12 + $0x970] sm:$0xff]  ;;  %4565 = vst [vmem:[%s6775_s17 + $0x930] sm:$0xff] %v2517_v15  ;;  %4566 = vst [vmem:[%s6775_s17 + $0x938] sm:$0xff] %v2518_v16  ;;  %v2523_v27 = vadd.f32 1.0, %v475_v24  ;;  %v2524_v28 = vadd.f32 1.0, %v476_v25  ;;  %v478_v30 = vld [vmem:[%s6760_s12 + $0x978] sm:$0xff] }
  0xdd   : > { %4567 = vst [vmem:[%s6775_s17 + $0x940] sm:$0xff] %v2519_v17  ;;  %v2525_v29 = vadd.f32 1.0, %v477_v26  ;;  %v479_v31 = vld [vmem:[%s6760_s12 + $0x980] sm:$0xff]  ;;  %v480_v32 = vld [vmem:[%s6760_s12 + $0x988] sm:$0xff]  ;;  %4568 = vst [vmem:[%s6775_s17 + $0x948] sm:$0xff] %v2520_v21  ;;  %v2526_v33 = vadd.f32 1.0, %v478_v30 }
  0xde   : > { %4569 = vst [vmem:[%s6775_s17 + $0x950] sm:$0xff] %v2521_v22  ;;  %4570 = vst [vmem:[%s6775_s17 + $0x958] sm:$0xff] %v2522_v23  ;;  %v2527_v34 = vadd.f32 1.0, %v479_v31  ;;  %v2528_v35 = vadd.f32 1.0, %v480_v32  ;;  %v481_v36 = vld [vmem:[%s6760_s12 + $0x990] sm:$0xff]  ;;  %v482_v37 = vld [vmem:[%s6760_s12 + $0x998] sm:$0xff] }
  0xdf   : > { %v483_v38 = vld [vmem:[%s6760_s12 + $0x9a0] sm:$0xff]  ;;  %4571 = vst [vmem:[%s6775_s17 + $0x960] sm:$0xff] %v2523_v27  ;;  %4572 = vst [vmem:[%s6775_s17 + $0x968] sm:$0xff] %v2524_v28  ;;  %v2529_v39 = vadd.f32 1.0, %v481_v36  ;;  %v2530_v40 = vadd.f32 1.0, %v482_v37  ;;  %v484_v42 = vld [vmem:[%s6760_s12 + $0x9a8] sm:$0xff] }
  0xe0   : > { %4573 = vst [vmem:[%s6775_s17 + $0x970] sm:$0xff] %v2525_v29  ;;  %v2531_v41 = vadd.f32 1.0, %v483_v38  ;;  %v485_v43 = vld [vmem:[%s6760_s12 + $0x9b0] sm:$0xff]  ;;  %v486_v44 = vld [vmem:[%s6760_s12 + $0x9b8] sm:$0xff]  ;;  %4574 = vst [vmem:[%s6775_s17 + $0x978] sm:$0xff] %v2526_v33  ;;  %v2532_v45 = vadd.f32 1.0, %v484_v42 }
  0xe1   : > { %4575 = vst [vmem:[%s6775_s17 + $0x980] sm:$0xff] %v2527_v34  ;;  %4576 = vst [vmem:[%s6775_s17 + $0x988] sm:$0xff] %v2528_v35  ;;  %v2533_v46 = vadd.f32 1.0, %v485_v43  ;;  %v2534_v47 = vadd.f32 1.0, %v486_v44  ;;  %v487_v48 = vld [vmem:[%s6760_s12 + $0x9c0] sm:$0xff]  ;;  %v488_v49 = vld [vmem:[%s6760_s12 + $0x9c8] sm:$0xff] }
  0xe2   : > { %v489_v50 = vld [vmem:[%s6760_s12 + $0x9d0] sm:$0xff]  ;;  %4577 = vst [vmem:[%s6775_s17 + $0x990] sm:$0xff] %v2529_v39  ;;  %4578 = vst [vmem:[%s6775_s17 + $0x998] sm:$0xff] %v2530_v40  ;;  %v2535_v51 = vadd.f32 1.0, %v487_v48  ;;  %v2536_v52 = vadd.f32 1.0, %v488_v49  ;;  %v490_v54 = vld [vmem:[%s6760_s12 + $0x9d8] sm:$0xff] }
  0xe3   : > { %4579 = vst [vmem:[%s6775_s17 + $0x9a0] sm:$0xff] %v2531_v41  ;;  %v2537_v53 = vadd.f32 1.0, %v489_v50  ;;  %v491_v55 = vld [vmem:[%s6760_s12 + $0x9e0] sm:$0xff]  ;;  %v492_v56 = vld [vmem:[%s6760_s12 + $0x9e8] sm:$0xff]  ;;  %4580 = vst [vmem:[%s6775_s17 + $0x9a8] sm:$0xff] %v2532_v45  ;;  %v2538_v57 = vadd.f32 1.0, %v490_v54 }
  0xe4   : > { %4581 = vst [vmem:[%s6775_s17 + $0x9b0] sm:$0xff] %v2533_v46  ;;  %4582 = vst [vmem:[%s6775_s17 + $0x9b8] sm:$0xff] %v2534_v47  ;;  %v2539_v58 = vadd.f32 1.0, %v491_v55  ;;  %v2540_v59 = vadd.f32 1.0, %v492_v56  ;;  %v493_v60 = vld [vmem:[%s6760_s12 + $0x9f0] sm:$0xff]  ;;  %v494_v61 = vld [vmem:[%s6760_s12 + $0x9f8] sm:$0xff] }
  0xe5   : > { %v495_v62 = vld [vmem:[%s6760_s12 + $0xa00] sm:$0xff]  ;;  %4583 = vst [vmem:[%s6775_s17 + $0x9c0] sm:$0xff] %v2535_v51  ;;  %4584 = vst [vmem:[%s6775_s17 + $0x9c8] sm:$0xff] %v2536_v52  ;;  %v2541_v63 = vadd.f32 1.0, %v493_v60  ;;  %v2542_v0 = vadd.f32 1.0, %v494_v61  ;;  %v496_v2 = vld [vmem:[%s6760_s12 + $0xa08] sm:$0xff] }
  0xe6   : > { %4585 = vst [vmem:[%s6775_s17 + $0x9d0] sm:$0xff] %v2537_v53  ;;  %v2543_v1 = vadd.f32 1.0, %v495_v62  ;;  %v497_v3 = vld [vmem:[%s6760_s12 + $0xa10] sm:$0xff]  ;;  %v498_v4 = vld [vmem:[%s6760_s12 + $0xa18] sm:$0xff]  ;;  %4586 = vst [vmem:[%s6775_s17 + $0x9d8] sm:$0xff] %v2538_v57  ;;  %v2544_v5 = vadd.f32 1.0, %v496_v2 }
  0xe7   : > { %4587 = vst [vmem:[%s6775_s17 + $0x9e0] sm:$0xff] %v2539_v58  ;;  %4588 = vst [vmem:[%s6775_s17 + $0x9e8] sm:$0xff] %v2540_v59  ;;  %v2545_v6 = vadd.f32 1.0, %v497_v3  ;;  %v2546_v7 = vadd.f32 1.0, %v498_v4  ;;  %v499_v8 = vld [vmem:[%s6760_s12 + $0xa20] sm:$0xff]  ;;  %v500_v9 = vld [vmem:[%s6760_s12 + $0xa28] sm:$0xff] }
  0xe8   : > { %v501_v10 = vld [vmem:[%s6760_s12 + $0xa30] sm:$0xff]  ;;  %4589 = vst [vmem:[%s6775_s17 + $0x9f0] sm:$0xff] %v2541_v63  ;;  %4590 = vst [vmem:[%s6775_s17 + $0x9f8] sm:$0xff] %v2542_v0  ;;  %v2547_v11 = vadd.f32 1.0, %v499_v8  ;;  %v2548_v12 = vadd.f32 1.0, %v500_v9  ;;  %v502_v14 = vld [vmem:[%s6760_s12 + $0xa38] sm:$0xff] }
  0xe9   : > { %4591 = vst [vmem:[%s6775_s17 + $0xa00] sm:$0xff] %v2543_v1  ;;  %v2549_v13 = vadd.f32 1.0, %v501_v10  ;;  %v503_v15 = vld [vmem:[%s6760_s12 + $0xa40] sm:$0xff]  ;;  %v504_v16 = vld [vmem:[%s6760_s12 + $0xa48] sm:$0xff]  ;;  %4592 = vst [vmem:[%s6775_s17 + $0xa08] sm:$0xff] %v2544_v5  ;;  %v2550_v17 = vadd.f32 1.0, %v502_v14 }
  0xea   : > { %4593 = vst [vmem:[%s6775_s17 + $0xa10] sm:$0xff] %v2545_v6  ;;  %4594 = vst [vmem:[%s6775_s17 + $0xa18] sm:$0xff] %v2546_v7  ;;  %v2551_v18 = vadd.f32 1.0, %v503_v15  ;;  %v2552_v19 = vadd.f32 1.0, %v504_v16  ;;  %v505_v20 = vld [vmem:[%s6760_s12 + $0xa50] sm:$0xff]  ;;  %v506_v21 = vld [vmem:[%s6760_s12 + $0xa58] sm:$0xff] }
  0xeb   : > { %v507_v22 = vld [vmem:[%s6760_s12 + $0xa60] sm:$0xff]  ;;  %4595 = vst [vmem:[%s6775_s17 + $0xa20] sm:$0xff] %v2547_v11  ;;  %4596 = vst [vmem:[%s6775_s17 + $0xa28] sm:$0xff] %v2548_v12  ;;  %v2553_v23 = vadd.f32 1.0, %v505_v20  ;;  %v2554_v24 = vadd.f32 1.0, %v506_v21  ;;  %v508_v26 = vld [vmem:[%s6760_s12 + $0xa68] sm:$0xff] }
  0xec   : > { %4597 = vst [vmem:[%s6775_s17 + $0xa30] sm:$0xff] %v2549_v13  ;;  %v2555_v25 = vadd.f32 1.0, %v507_v22  ;;  %v509_v27 = vld [vmem:[%s6760_s12 + $0xa70] sm:$0xff]  ;;  %v510_v28 = vld [vmem:[%s6760_s12 + $0xa78] sm:$0xff]  ;;  %4598 = vst [vmem:[%s6775_s17 + $0xa38] sm:$0xff] %v2550_v17  ;;  %v2556_v29 = vadd.f32 1.0, %v508_v26 }
  0xed   : > { %4599 = vst [vmem:[%s6775_s17 + $0xa40] sm:$0xff] %v2551_v18  ;;  %4600 = vst [vmem:[%s6775_s17 + $0xa48] sm:$0xff] %v2552_v19  ;;  %v2557_v30 = vadd.f32 1.0, %v509_v27  ;;  %v2558_v31 = vadd.f32 1.0, %v510_v28  ;;  %v511_v32 = vld [vmem:[%s6760_s12 + $0xa80] sm:$0xff]  ;;  %v512_v33 = vld [vmem:[%s6760_s12 + $0xa88] sm:$0xff] }
  0xee   : > { %v513_v34 = vld [vmem:[%s6760_s12 + $0xa90] sm:$0xff]  ;;  %4601 = vst [vmem:[%s6775_s17 + $0xa50] sm:$0xff] %v2553_v23  ;;  %4602 = vst [vmem:[%s6775_s17 + $0xa58] sm:$0xff] %v2554_v24  ;;  %v2559_v35 = vadd.f32 1.0, %v511_v32  ;;  %v2560_v36 = vadd.f32 1.0, %v512_v33  ;;  %v514_v38 = vld [vmem:[%s6760_s12 + $0xa98] sm:$0xff] }
  0xef   : > { %4603 = vst [vmem:[%s6775_s17 + $0xa60] sm:$0xff] %v2555_v25  ;;  %v2561_v37 = vadd.f32 1.0, %v513_v34  ;;  %v515_v39 = vld [vmem:[%s6760_s12 + $0xaa0] sm:$0xff]  ;;  %v516_v40 = vld [vmem:[%s6760_s12 + $0xaa8] sm:$0xff]  ;;  %4604 = vst [vmem:[%s6775_s17 + $0xa68] sm:$0xff] %v2556_v29  ;;  %v2562_v41 = vadd.f32 1.0, %v514_v38 }
  0xf0   : > { %4605 = vst [vmem:[%s6775_s17 + $0xa70] sm:$0xff] %v2557_v30  ;;  %4606 = vst [vmem:[%s6775_s17 + $0xa78] sm:$0xff] %v2558_v31  ;;  %v2563_v42 = vadd.f32 1.0, %v515_v39  ;;  %v2564_v43 = vadd.f32 1.0, %v516_v40  ;;  %v517_v44 = vld [vmem:[%s6760_s12 + $0xab0] sm:$0xff]  ;;  %v518_v45 = vld [vmem:[%s6760_s12 + $0xab8] sm:$0xff] }
  0xf1   : > { %v519_v46 = vld [vmem:[%s6760_s12 + $0xac0] sm:$0xff]  ;;  %4607 = vst [vmem:[%s6775_s17 + $0xa80] sm:$0xff] %v2559_v35  ;;  %4608 = vst [vmem:[%s6775_s17 + $0xa88] sm:$0xff] %v2560_v36  ;;  %v2565_v47 = vadd.f32 1.0, %v517_v44  ;;  %v2566_v48 = vadd.f32 1.0, %v518_v45  ;;  %v520_v50 = vld [vmem:[%s6760_s12 + $0xac8] sm:$0xff] }
  0xf2   : > { %4609 = vst [vmem:[%s6775_s17 + $0xa90] sm:$0xff] %v2561_v37  ;;  %v2567_v49 = vadd.f32 1.0, %v519_v46  ;;  %v521_v51 = vld [vmem:[%s6760_s12 + $0xad0] sm:$0xff]  ;;  %v522_v52 = vld [vmem:[%s6760_s12 + $0xad8] sm:$0xff]  ;;  %4610 = vst [vmem:[%s6775_s17 + $0xa98] sm:$0xff] %v2562_v41  ;;  %v2568_v53 = vadd.f32 1.0, %v520_v50 }
  0xf3   : > { %4611 = vst [vmem:[%s6775_s17 + $0xaa0] sm:$0xff] %v2563_v42  ;;  %4612 = vst [vmem:[%s6775_s17 + $0xaa8] sm:$0xff] %v2564_v43  ;;  %v2569_v54 = vadd.f32 1.0, %v521_v51  ;;  %v2570_v55 = vadd.f32 1.0, %v522_v52  ;;  %v523_v56 = vld [vmem:[%s6760_s12 + $0xae0] sm:$0xff]  ;;  %v524_v57 = vld [vmem:[%s6760_s12 + $0xae8] sm:$0xff] }
  0xf4   : > { %v525_v58 = vld [vmem:[%s6760_s12 + $0xaf0] sm:$0xff]  ;;  %4613 = vst [vmem:[%s6775_s17 + $0xab0] sm:$0xff] %v2565_v47  ;;  %4614 = vst [vmem:[%s6775_s17 + $0xab8] sm:$0xff] %v2566_v48  ;;  %v2571_v59 = vadd.f32 1.0, %v523_v56  ;;  %v2572_v60 = vadd.f32 1.0, %v524_v57  ;;  %v526_v62 = vld [vmem:[%s6760_s12 + $0xaf8] sm:$0xff] }
  0xf5   : > { %4615 = vst [vmem:[%s6775_s17 + $0xac0] sm:$0xff] %v2567_v49  ;;  %v2573_v61 = vadd.f32 1.0, %v525_v58  ;;  %v527_v63 = vld [vmem:[%s6760_s12 + $0xb00] sm:$0xff]  ;;  %v528_v0 = vld [vmem:[%s6760_s12 + $0xb08] sm:$0xff]  ;;  %4616 = vst [vmem:[%s6775_s17 + $0xac8] sm:$0xff] %v2568_v53  ;;  %v2574_v1 = vadd.f32 1.0, %v526_v62 }
  0xf6   : > { %4617 = vst [vmem:[%s6775_s17 + $0xad0] sm:$0xff] %v2569_v54  ;;  %4618 = vst [vmem:[%s6775_s17 + $0xad8] sm:$0xff] %v2570_v55  ;;  %v2575_v2 = vadd.f32 1.0, %v527_v63  ;;  %v2576_v3 = vadd.f32 1.0, %v528_v0  ;;  %v529_v4 = vld [vmem:[%s6760_s12 + $0xb10] sm:$0xff]  ;;  %v530_v5 = vld [vmem:[%s6760_s12 + $0xb18] sm:$0xff] }
  0xf7   : > { %v531_v6 = vld [vmem:[%s6760_s12 + $0xb20] sm:$0xff]  ;;  %4619 = vst [vmem:[%s6775_s17 + $0xae0] sm:$0xff] %v2571_v59  ;;  %4620 = vst [vmem:[%s6775_s17 + $0xae8] sm:$0xff] %v2572_v60  ;;  %v2577_v7 = vadd.f32 1.0, %v529_v4  ;;  %v2578_v8 = vadd.f32 1.0, %v530_v5  ;;  %v532_v10 = vld [vmem:[%s6760_s12 + $0xb28] sm:$0xff] }
  0xf8   : > { %4621 = vst [vmem:[%s6775_s17 + $0xaf0] sm:$0xff] %v2573_v61  ;;  %v2579_v9 = vadd.f32 1.0, %v531_v6  ;;  %v533_v11 = vld [vmem:[%s6760_s12 + $0xb30] sm:$0xff]  ;;  %v534_v12 = vld [vmem:[%s6760_s12 + $0xb38] sm:$0xff]  ;;  %4622 = vst [vmem:[%s6775_s17 + $0xaf8] sm:$0xff] %v2574_v1  ;;  %v2580_v13 = vadd.f32 1.0, %v532_v10 }
  0xf9   : > { %4623 = vst [vmem:[%s6775_s17 + $0xb00] sm:$0xff] %v2575_v2  ;;  %4624 = vst [vmem:[%s6775_s17 + $0xb08] sm:$0xff] %v2576_v3  ;;  %v2581_v14 = vadd.f32 1.0, %v533_v11  ;;  %v2582_v15 = vadd.f32 1.0, %v534_v12  ;;  %v535_v16 = vld [vmem:[%s6760_s12 + $0xb40] sm:$0xff]  ;;  %v536_v17 = vld [vmem:[%s6760_s12 + $0xb48] sm:$0xff] }
  0xfa   : > { %v537_v18 = vld [vmem:[%s6760_s12 + $0xb50] sm:$0xff]  ;;  %4625 = vst [vmem:[%s6775_s17 + $0xb10] sm:$0xff] %v2577_v7  ;;  %4626 = vst [vmem:[%s6775_s17 + $0xb18] sm:$0xff] %v2578_v8  ;;  %v2583_v19 = vadd.f32 1.0, %v535_v16  ;;  %v2584_v20 = vadd.f32 1.0, %v536_v17  ;;  %v538_v22 = vld [vmem:[%s6760_s12 + $0xb58] sm:$0xff] }
  0xfb   : > { %4627 = vst [vmem:[%s6775_s17 + $0xb20] sm:$0xff] %v2579_v9  ;;  %v2585_v21 = vadd.f32 1.0, %v537_v18  ;;  %v539_v23 = vld [vmem:[%s6760_s12 + $0xb60] sm:$0xff]  ;;  %v540_v24 = vld [vmem:[%s6760_s12 + $0xb68] sm:$0xff]  ;;  %4628 = vst [vmem:[%s6775_s17 + $0xb28] sm:$0xff] %v2580_v13  ;;  %v2586_v25 = vadd.f32 1.0, %v538_v22 }
  0xfc   : > { %4629 = vst [vmem:[%s6775_s17 + $0xb30] sm:$0xff] %v2581_v14  ;;  %4630 = vst [vmem:[%s6775_s17 + $0xb38] sm:$0xff] %v2582_v15  ;;  %v2587_v26 = vadd.f32 1.0, %v539_v23  ;;  %v2588_v27 = vadd.f32 1.0, %v540_v24  ;;  %v541_v28 = vld [vmem:[%s6760_s12 + $0xb70] sm:$0xff]  ;;  %v542_v29 = vld [vmem:[%s6760_s12 + $0xb78] sm:$0xff] }
  0xfd   : > { %v543_v30 = vld [vmem:[%s6760_s12 + $0xb80] sm:$0xff]  ;;  %4631 = vst [vmem:[%s6775_s17 + $0xb40] sm:$0xff] %v2583_v19  ;;  %4632 = vst [vmem:[%s6775_s17 + $0xb48] sm:$0xff] %v2584_v20  ;;  %v2589_v31 = vadd.f32 1.0, %v541_v28  ;;  %v2590_v32 = vadd.f32 1.0, %v542_v29  ;;  %v544_v34 = vld [vmem:[%s6760_s12 + $0xb88] sm:$0xff] }
  0xfe   : > { %4633 = vst [vmem:[%s6775_s17 + $0xb50] sm:$0xff] %v2585_v21  ;;  %v2591_v33 = vadd.f32 1.0, %v543_v30  ;;  %v545_v35 = vld [vmem:[%s6760_s12 + $0xb90] sm:$0xff]  ;;  %v546_v36 = vld [vmem:[%s6760_s12 + $0xb98] sm:$0xff]  ;;  %4634 = vst [vmem:[%s6775_s17 + $0xb58] sm:$0xff] %v2586_v25  ;;  %v2592_v37 = vadd.f32 1.0, %v544_v34 }
  0xff   : > { %4635 = vst [vmem:[%s6775_s17 + $0xb60] sm:$0xff] %v2587_v26  ;;  %4636 = vst [vmem:[%s6775_s17 + $0xb68] sm:$0xff] %v2588_v27  ;;  %v2593_v38 = vadd.f32 1.0, %v545_v35  ;;  %v2594_v39 = vadd.f32 1.0, %v546_v36  ;;  %v547_v40 = vld [vmem:[%s6760_s12 + $0xba0] sm:$0xff]  ;;  %v548_v41 = vld [vmem:[%s6760_s12 + $0xba8] sm:$0xff] }
 0x100   : > { %v549_v42 = vld [vmem:[%s6760_s12 + $0xbb0] sm:$0xff]  ;;  %4637 = vst [vmem:[%s6775_s17 + $0xb70] sm:$0xff] %v2589_v31  ;;  %4638 = vst [vmem:[%s6775_s17 + $0xb78] sm:$0xff] %v2590_v32  ;;  %v2595_v43 = vadd.f32 1.0, %v547_v40  ;;  %v2596_v44 = vadd.f32 1.0, %v548_v41  ;;  %v550_v46 = vld [vmem:[%s6760_s12 + $0xbb8] sm:$0xff] }
 0x101   : > { %4639 = vst [vmem:[%s6775_s17 + $0xb80] sm:$0xff] %v2591_v33  ;;  %v2597_v45 = vadd.f32 1.0, %v549_v42  ;;  %v551_v47 = vld [vmem:[%s6760_s12 + $0xbc0] sm:$0xff]  ;;  %v552_v48 = vld [vmem:[%s6760_s12 + $0xbc8] sm:$0xff]  ;;  %4640 = vst [vmem:[%s6775_s17 + $0xb88] sm:$0xff] %v2592_v37  ;;  %v2598_v49 = vadd.f32 1.0, %v550_v46 }
 0x102   : > { %4641 = vst [vmem:[%s6775_s17 + $0xb90] sm:$0xff] %v2593_v38  ;;  %4642 = vst [vmem:[%s6775_s17 + $0xb98] sm:$0xff] %v2594_v39  ;;  %v2599_v50 = vadd.f32 1.0, %v551_v47  ;;  %v2600_v51 = vadd.f32 1.0, %v552_v48  ;;  %v553_v52 = vld [vmem:[%s6760_s12 + $0xbd0] sm:$0xff]  ;;  %v554_v53 = vld [vmem:[%s6760_s12 + $0xbd8] sm:$0xff] }
 0x103   : > { %v555_v54 = vld [vmem:[%s6760_s12 + $0xbe0] sm:$0xff]  ;;  %4643 = vst [vmem:[%s6775_s17 + $0xba0] sm:$0xff] %v2595_v43  ;;  %4644 = vst [vmem:[%s6775_s17 + $0xba8] sm:$0xff] %v2596_v44  ;;  %v2601_v55 = vadd.f32 1.0, %v553_v52  ;;  %v2602_v56 = vadd.f32 1.0, %v554_v53  ;;  %v556_v58 = vld [vmem:[%s6760_s12 + $0xbe8] sm:$0xff] }
 0x104   : > { %4645 = vst [vmem:[%s6775_s17 + $0xbb0] sm:$0xff] %v2597_v45  ;;  %v2603_v57 = vadd.f32 1.0, %v555_v54  ;;  %v557_v59 = vld [vmem:[%s6760_s12 + $0xbf0] sm:$0xff]  ;;  %v558_v60 = vld [vmem:[%s6760_s12 + $0xbf8] sm:$0xff]  ;;  %4646 = vst [vmem:[%s6775_s17 + $0xbb8] sm:$0xff] %v2598_v49  ;;  %v2604_v61 = vadd.f32 1.0, %v556_v58 }
 0x105   : > { %4647 = vst [vmem:[%s6775_s17 + $0xbc0] sm:$0xff] %v2599_v50  ;;  %4648 = vst [vmem:[%s6775_s17 + $0xbc8] sm:$0xff] %v2600_v51  ;;  %v2605_v62 = vadd.f32 1.0, %v557_v59  ;;  %v2606_v63 = vadd.f32 1.0, %v558_v60  ;;  %v559_v0 = vld [vmem:[%s6760_s12 + $0xc00] sm:$0xff]  ;;  %v560_v1 = vld [vmem:[%s6760_s12 + $0xc08] sm:$0xff] }
 0x106   : > { %v561_v2 = vld [vmem:[%s6760_s12 + $0xc10] sm:$0xff]  ;;  %4649 = vst [vmem:[%s6775_s17 + $0xbd0] sm:$0xff] %v2601_v55  ;;  %4650 = vst [vmem:[%s6775_s17 + $0xbd8] sm:$0xff] %v2602_v56  ;;  %v2607_v3 = vadd.f32 1.0, %v559_v0  ;;  %v2608_v4 = vadd.f32 1.0, %v560_v1  ;;  %v562_v6 = vld [vmem:[%s6760_s12 + $0xc18] sm:$0xff] }
 0x107   : > { %4651 = vst [vmem:[%s6775_s17 + $0xbe0] sm:$0xff] %v2603_v57  ;;  %v2609_v5 = vadd.f32 1.0, %v561_v2  ;;  %v563_v7 = vld [vmem:[%s6760_s12 + $0xc20] sm:$0xff]  ;;  %v564_v8 = vld [vmem:[%s6760_s12 + $0xc28] sm:$0xff]  ;;  %4652 = vst [vmem:[%s6775_s17 + $0xbe8] sm:$0xff] %v2604_v61  ;;  %v2610_v9 = vadd.f32 1.0, %v562_v6 }
 0x108   : > { %4653 = vst [vmem:[%s6775_s17 + $0xbf0] sm:$0xff] %v2605_v62  ;;  %4654 = vst [vmem:[%s6775_s17 + $0xbf8] sm:$0xff] %v2606_v63  ;;  %v2611_v10 = vadd.f32 1.0, %v563_v7  ;;  %v2612_v11 = vadd.f32 1.0, %v564_v8  ;;  %v565_v12 = vld [vmem:[%s6760_s12 + $0xc30] sm:$0xff]  ;;  %v566_v13 = vld [vmem:[%s6760_s12 + $0xc38] sm:$0xff] }
 0x109   : > { %v567_v14 = vld [vmem:[%s6760_s12 + $0xc40] sm:$0xff]  ;;  %4655 = vst [vmem:[%s6775_s17 + $0xc00] sm:$0xff] %v2607_v3  ;;  %4656 = vst [vmem:[%s6775_s17 + $0xc08] sm:$0xff] %v2608_v4  ;;  %v2613_v15 = vadd.f32 1.0, %v565_v12  ;;  %v2614_v16 = vadd.f32 1.0, %v566_v13  ;;  %v568_v18 = vld [vmem:[%s6760_s12 + $0xc48] sm:$0xff] }
 0x10a   : > { %4657 = vst [vmem:[%s6775_s17 + $0xc10] sm:$0xff] %v2609_v5  ;;  %v2615_v17 = vadd.f32 1.0, %v567_v14  ;;  %v569_v19 = vld [vmem:[%s6760_s12 + $0xc50] sm:$0xff]  ;;  %v570_v20 = vld [vmem:[%s6760_s12 + $0xc58] sm:$0xff]  ;;  %4658 = vst [vmem:[%s6775_s17 + $0xc18] sm:$0xff] %v2610_v9  ;;  %v2616_v21 = vadd.f32 1.0, %v568_v18 }
 0x10b   : > { %4659 = vst [vmem:[%s6775_s17 + $0xc20] sm:$0xff] %v2611_v10  ;;  %4660 = vst [vmem:[%s6775_s17 + $0xc28] sm:$0xff] %v2612_v11  ;;  %v2617_v22 = vadd.f32 1.0, %v569_v19  ;;  %v2618_v23 = vadd.f32 1.0, %v570_v20  ;;  %v571_v24 = vld [vmem:[%s6760_s12 + $0xc60] sm:$0xff]  ;;  %v572_v25 = vld [vmem:[%s6760_s12 + $0xc68] sm:$0xff] }
 0x10c   : > { %v573_v26 = vld [vmem:[%s6760_s12 + $0xc70] sm:$0xff]  ;;  %4661 = vst [vmem:[%s6775_s17 + $0xc30] sm:$0xff] %v2613_v15  ;;  %4662 = vst [vmem:[%s6775_s17 + $0xc38] sm:$0xff] %v2614_v16  ;;  %v2619_v27 = vadd.f32 1.0, %v571_v24  ;;  %v2620_v28 = vadd.f32 1.0, %v572_v25  ;;  %v574_v30 = vld [vmem:[%s6760_s12 + $0xc78] sm:$0xff] }
 0x10d   : > { %4663 = vst [vmem:[%s6775_s17 + $0xc40] sm:$0xff] %v2615_v17  ;;  %v2621_v29 = vadd.f32 1.0, %v573_v26  ;;  %v575_v31 = vld [vmem:[%s6760_s12 + $0xc80] sm:$0xff]  ;;  %v576_v32 = vld [vmem:[%s6760_s12 + $0xc88] sm:$0xff]  ;;  %4664 = vst [vmem:[%s6775_s17 + $0xc48] sm:$0xff] %v2616_v21  ;;  %v2622_v33 = vadd.f32 1.0, %v574_v30 }
 0x10e   : > { %4665 = vst [vmem:[%s6775_s17 + $0xc50] sm:$0xff] %v2617_v22  ;;  %4666 = vst [vmem:[%s6775_s17 + $0xc58] sm:$0xff] %v2618_v23  ;;  %v2623_v34 = vadd.f32 1.0, %v575_v31  ;;  %v2624_v35 = vadd.f32 1.0, %v576_v32  ;;  %v577_v36 = vld [vmem:[%s6760_s12 + $0xc90] sm:$0xff]  ;;  %v578_v37 = vld [vmem:[%s6760_s12 + $0xc98] sm:$0xff] }
 0x10f   : > { %v579_v38 = vld [vmem:[%s6760_s12 + $0xca0] sm:$0xff]  ;;  %4667 = vst [vmem:[%s6775_s17 + $0xc60] sm:$0xff] %v2619_v27  ;;  %4668 = vst [vmem:[%s6775_s17 + $0xc68] sm:$0xff] %v2620_v28  ;;  %v2625_v39 = vadd.f32 1.0, %v577_v36  ;;  %v2626_v40 = vadd.f32 1.0, %v578_v37  ;;  %v580_v42 = vld [vmem:[%s6760_s12 + $0xca8] sm:$0xff] }
 0x110   : > { %4669 = vst [vmem:[%s6775_s17 + $0xc70] sm:$0xff] %v2621_v29  ;;  %v2627_v41 = vadd.f32 1.0, %v579_v38  ;;  %v581_v43 = vld [vmem:[%s6760_s12 + $0xcb0] sm:$0xff]  ;;  %v582_v44 = vld [vmem:[%s6760_s12 + $0xcb8] sm:$0xff]  ;;  %4670 = vst [vmem:[%s6775_s17 + $0xc78] sm:$0xff] %v2622_v33  ;;  %v2628_v45 = vadd.f32 1.0, %v580_v42 }
 0x111   : > { %4671 = vst [vmem:[%s6775_s17 + $0xc80] sm:$0xff] %v2623_v34  ;;  %4672 = vst [vmem:[%s6775_s17 + $0xc88] sm:$0xff] %v2624_v35  ;;  %v2629_v46 = vadd.f32 1.0, %v581_v43  ;;  %v2630_v47 = vadd.f32 1.0, %v582_v44  ;;  %v583_v48 = vld [vmem:[%s6760_s12 + $0xcc0] sm:$0xff]  ;;  %v584_v49 = vld [vmem:[%s6760_s12 + $0xcc8] sm:$0xff] }
 0x112   : > { %v585_v50 = vld [vmem:[%s6760_s12 + $0xcd0] sm:$0xff]  ;;  %4673 = vst [vmem:[%s6775_s17 + $0xc90] sm:$0xff] %v2625_v39  ;;  %4674 = vst [vmem:[%s6775_s17 + $0xc98] sm:$0xff] %v2626_v40  ;;  %v2631_v51 = vadd.f32 1.0, %v583_v48  ;;  %v2632_v52 = vadd.f32 1.0, %v584_v49  ;;  %v586_v54 = vld [vmem:[%s6760_s12 + $0xcd8] sm:$0xff] }
 0x113   : > { %4675 = vst [vmem:[%s6775_s17 + $0xca0] sm:$0xff] %v2627_v41  ;;  %v2633_v53 = vadd.f32 1.0, %v585_v50  ;;  %v587_v55 = vld [vmem:[%s6760_s12 + $0xce0] sm:$0xff]  ;;  %v588_v56 = vld [vmem:[%s6760_s12 + $0xce8] sm:$0xff]  ;;  %4676 = vst [vmem:[%s6775_s17 + $0xca8] sm:$0xff] %v2628_v45  ;;  %v2634_v57 = vadd.f32 1.0, %v586_v54 }
 0x114   : > { %4677 = vst [vmem:[%s6775_s17 + $0xcb0] sm:$0xff] %v2629_v46  ;;  %4678 = vst [vmem:[%s6775_s17 + $0xcb8] sm:$0xff] %v2630_v47  ;;  %v2635_v58 = vadd.f32 1.0, %v587_v55  ;;  %v2636_v59 = vadd.f32 1.0, %v588_v56  ;;  %v589_v60 = vld [vmem:[%s6760_s12 + $0xcf0] sm:$0xff]  ;;  %v590_v61 = vld [vmem:[%s6760_s12 + $0xcf8] sm:$0xff] }
 0x115   : > { %v591_v62 = vld [vmem:[%s6760_s12 + $0xd00] sm:$0xff]  ;;  %4679 = vst [vmem:[%s6775_s17 + $0xcc0] sm:$0xff] %v2631_v51  ;;  %4680 = vst [vmem:[%s6775_s17 + $0xcc8] sm:$0xff] %v2632_v52  ;;  %v2637_v63 = vadd.f32 1.0, %v589_v60  ;;  %v2638_v0 = vadd.f32 1.0, %v590_v61  ;;  %v592_v2 = vld [vmem:[%s6760_s12 + $0xd08] sm:$0xff] }
 0x116   : > { %4681 = vst [vmem:[%s6775_s17 + $0xcd0] sm:$0xff] %v2633_v53  ;;  %v2639_v1 = vadd.f32 1.0, %v591_v62  ;;  %v593_v3 = vld [vmem:[%s6760_s12 + $0xd10] sm:$0xff]  ;;  %v594_v4 = vld [vmem:[%s6760_s12 + $0xd18] sm:$0xff]  ;;  %4682 = vst [vmem:[%s6775_s17 + $0xcd8] sm:$0xff] %v2634_v57  ;;  %v2640_v5 = vadd.f32 1.0, %v592_v2 }
 0x117   : > { %4683 = vst [vmem:[%s6775_s17 + $0xce0] sm:$0xff] %v2635_v58  ;;  %4684 = vst [vmem:[%s6775_s17 + $0xce8] sm:$0xff] %v2636_v59  ;;  %v2641_v6 = vadd.f32 1.0, %v593_v3  ;;  %v2642_v7 = vadd.f32 1.0, %v594_v4  ;;  %v595_v8 = vld [vmem:[%s6760_s12 + $0xd20] sm:$0xff]  ;;  %v596_v9 = vld [vmem:[%s6760_s12 + $0xd28] sm:$0xff] }
 0x118   : > { %v597_v10 = vld [vmem:[%s6760_s12 + $0xd30] sm:$0xff]  ;;  %4685 = vst [vmem:[%s6775_s17 + $0xcf0] sm:$0xff] %v2637_v63  ;;  %4686 = vst [vmem:[%s6775_s17 + $0xcf8] sm:$0xff] %v2638_v0  ;;  %v2643_v11 = vadd.f32 1.0, %v595_v8  ;;  %v2644_v12 = vadd.f32 1.0, %v596_v9  ;;  %v598_v14 = vld [vmem:[%s6760_s12 + $0xd38] sm:$0xff] }
 0x119   : > { %4687 = vst [vmem:[%s6775_s17 + $0xd00] sm:$0xff] %v2639_v1  ;;  %v2645_v13 = vadd.f32 1.0, %v597_v10  ;;  %v599_v15 = vld [vmem:[%s6760_s12 + $0xd40] sm:$0xff]  ;;  %v600_v16 = vld [vmem:[%s6760_s12 + $0xd48] sm:$0xff]  ;;  %4688 = vst [vmem:[%s6775_s17 + $0xd08] sm:$0xff] %v2640_v5  ;;  %v2646_v17 = vadd.f32 1.0, %v598_v14 }
 0x11a   : > { %4689 = vst [vmem:[%s6775_s17 + $0xd10] sm:$0xff] %v2641_v6  ;;  %4690 = vst [vmem:[%s6775_s17 + $0xd18] sm:$0xff] %v2642_v7  ;;  %v2647_v18 = vadd.f32 1.0, %v599_v15  ;;  %v2648_v19 = vadd.f32 1.0, %v600_v16  ;;  %v601_v20 = vld [vmem:[%s6760_s12 + $0xd50] sm:$0xff]  ;;  %v602_v21 = vld [vmem:[%s6760_s12 + $0xd58] sm:$0xff] }
 0x11b   : > { %v603_v22 = vld [vmem:[%s6760_s12 + $0xd60] sm:$0xff]  ;;  %4691 = vst [vmem:[%s6775_s17 + $0xd20] sm:$0xff] %v2643_v11  ;;  %4692 = vst [vmem:[%s6775_s17 + $0xd28] sm:$0xff] %v2644_v12  ;;  %v2649_v23 = vadd.f32 1.0, %v601_v20  ;;  %v2650_v24 = vadd.f32 1.0, %v602_v21  ;;  %v604_v26 = vld [vmem:[%s6760_s12 + $0xd68] sm:$0xff] }
 0x11c   : > { %4693 = vst [vmem:[%s6775_s17 + $0xd30] sm:$0xff] %v2645_v13  ;;  %v2651_v25 = vadd.f32 1.0, %v603_v22  ;;  %v605_v27 = vld [vmem:[%s6760_s12 + $0xd70] sm:$0xff]  ;;  %v606_v28 = vld [vmem:[%s6760_s12 + $0xd78] sm:$0xff]  ;;  %4694 = vst [vmem:[%s6775_s17 + $0xd38] sm:$0xff] %v2646_v17  ;;  %v2652_v29 = vadd.f32 1.0, %v604_v26 }
 0x11d   : > { %4695 = vst [vmem:[%s6775_s17 + $0xd40] sm:$0xff] %v2647_v18  ;;  %4696 = vst [vmem:[%s6775_s17 + $0xd48] sm:$0xff] %v2648_v19  ;;  %v2653_v30 = vadd.f32 1.0, %v605_v27  ;;  %v2654_v31 = vadd.f32 1.0, %v606_v28  ;;  %v607_v32 = vld [vmem:[%s6760_s12 + $0xd80] sm:$0xff]  ;;  %v608_v33 = vld [vmem:[%s6760_s12 + $0xd88] sm:$0xff] }
 0x11e   : > { %v609_v34 = vld [vmem:[%s6760_s12 + $0xd90] sm:$0xff]  ;;  %4697 = vst [vmem:[%s6775_s17 + $0xd50] sm:$0xff] %v2649_v23  ;;  %4698 = vst [vmem:[%s6775_s17 + $0xd58] sm:$0xff] %v2650_v24  ;;  %v2655_v35 = vadd.f32 1.0, %v607_v32  ;;  %v2656_v36 = vadd.f32 1.0, %v608_v33  ;;  %v610_v38 = vld [vmem:[%s6760_s12 + $0xd98] sm:$0xff] }
 0x11f   : > { %4699 = vst [vmem:[%s6775_s17 + $0xd60] sm:$0xff] %v2651_v25  ;;  %v2657_v37 = vadd.f32 1.0, %v609_v34  ;;  %v611_v39 = vld [vmem:[%s6760_s12 + $0xda0] sm:$0xff]  ;;  %v612_v40 = vld [vmem:[%s6760_s12 + $0xda8] sm:$0xff]  ;;  %4700 = vst [vmem:[%s6775_s17 + $0xd68] sm:$0xff] %v2652_v29  ;;  %v2658_v41 = vadd.f32 1.0, %v610_v38 }
 0x120   : > { %4701 = vst [vmem:[%s6775_s17 + $0xd70] sm:$0xff] %v2653_v30  ;;  %4702 = vst [vmem:[%s6775_s17 + $0xd78] sm:$0xff] %v2654_v31  ;;  %v2659_v42 = vadd.f32 1.0, %v611_v39  ;;  %v2660_v43 = vadd.f32 1.0, %v612_v40  ;;  %v613_v44 = vld [vmem:[%s6760_s12 + $0xdb0] sm:$0xff]  ;;  %v614_v45 = vld [vmem:[%s6760_s12 + $0xdb8] sm:$0xff] }
 0x121   : > { %v615_v46 = vld [vmem:[%s6760_s12 + $0xdc0] sm:$0xff]  ;;  %4703 = vst [vmem:[%s6775_s17 + $0xd80] sm:$0xff] %v2655_v35  ;;  %4704 = vst [vmem:[%s6775_s17 + $0xd88] sm:$0xff] %v2656_v36  ;;  %v2661_v47 = vadd.f32 1.0, %v613_v44  ;;  %v2662_v48 = vadd.f32 1.0, %v614_v45  ;;  %v616_v50 = vld [vmem:[%s6760_s12 + $0xdc8] sm:$0xff] }
 0x122   : > { %4705 = vst [vmem:[%s6775_s17 + $0xd90] sm:$0xff] %v2657_v37  ;;  %v2663_v49 = vadd.f32 1.0, %v615_v46  ;;  %v617_v51 = vld [vmem:[%s6760_s12 + $0xdd0] sm:$0xff]  ;;  %v618_v52 = vld [vmem:[%s6760_s12 + $0xdd8] sm:$0xff]  ;;  %4706 = vst [vmem:[%s6775_s17 + $0xd98] sm:$0xff] %v2658_v41  ;;  %v2664_v53 = vadd.f32 1.0, %v616_v50 }
 0x123   : > { %4707 = vst [vmem:[%s6775_s17 + $0xda0] sm:$0xff] %v2659_v42  ;;  %4708 = vst [vmem:[%s6775_s17 + $0xda8] sm:$0xff] %v2660_v43  ;;  %v2665_v54 = vadd.f32 1.0, %v617_v51  ;;  %v2666_v55 = vadd.f32 1.0, %v618_v52  ;;  %v619_v56 = vld [vmem:[%s6760_s12 + $0xde0] sm:$0xff]  ;;  %v620_v57 = vld [vmem:[%s6760_s12 + $0xde8] sm:$0xff] }
 0x124   : > { %v621_v58 = vld [vmem:[%s6760_s12 + $0xdf0] sm:$0xff]  ;;  %4709 = vst [vmem:[%s6775_s17 + $0xdb0] sm:$0xff] %v2661_v47  ;;  %4710 = vst [vmem:[%s6775_s17 + $0xdb8] sm:$0xff] %v2662_v48  ;;  %v2667_v59 = vadd.f32 1.0, %v619_v56  ;;  %v2668_v60 = vadd.f32 1.0, %v620_v57  ;;  %v622_v62 = vld [vmem:[%s6760_s12 + $0xdf8] sm:$0xff] }
 0x125   : > { %4711 = vst [vmem:[%s6775_s17 + $0xdc0] sm:$0xff] %v2663_v49  ;;  %v2669_v61 = vadd.f32 1.0, %v621_v58  ;;  %v623_v63 = vld [vmem:[%s6760_s12 + $0xe00] sm:$0xff]  ;;  %v624_v0 = vld [vmem:[%s6760_s12 + $0xe08] sm:$0xff]  ;;  %4712 = vst [vmem:[%s6775_s17 + $0xdc8] sm:$0xff] %v2664_v53  ;;  %v2670_v1 = vadd.f32 1.0, %v622_v62 }
 0x126   : > { %4713 = vst [vmem:[%s6775_s17 + $0xdd0] sm:$0xff] %v2665_v54  ;;  %4714 = vst [vmem:[%s6775_s17 + $0xdd8] sm:$0xff] %v2666_v55  ;;  %v2671_v2 = vadd.f32 1.0, %v623_v63  ;;  %v2672_v3 = vadd.f32 1.0, %v624_v0  ;;  %v625_v4 = vld [vmem:[%s6760_s12 + $0xe10] sm:$0xff]  ;;  %v626_v5 = vld [vmem:[%s6760_s12 + $0xe18] sm:$0xff] }
 0x127   : > { %v627_v6 = vld [vmem:[%s6760_s12 + $0xe20] sm:$0xff]  ;;  %4715 = vst [vmem:[%s6775_s17 + $0xde0] sm:$0xff] %v2667_v59  ;;  %4716 = vst [vmem:[%s6775_s17 + $0xde8] sm:$0xff] %v2668_v60  ;;  %v2673_v7 = vadd.f32 1.0, %v625_v4  ;;  %v2674_v8 = vadd.f32 1.0, %v626_v5  ;;  %v628_v10 = vld [vmem:[%s6760_s12 + $0xe28] sm:$0xff] }
 0x128   : > { %4717 = vst [vmem:[%s6775_s17 + $0xdf0] sm:$0xff] %v2669_v61  ;;  %v2675_v9 = vadd.f32 1.0, %v627_v6  ;;  %v629_v11 = vld [vmem:[%s6760_s12 + $0xe30] sm:$0xff]  ;;  %v630_v12 = vld [vmem:[%s6760_s12 + $0xe38] sm:$0xff]  ;;  %4718 = vst [vmem:[%s6775_s17 + $0xdf8] sm:$0xff] %v2670_v1  ;;  %v2676_v13 = vadd.f32 1.0, %v628_v10 }
 0x129   : > { %4719 = vst [vmem:[%s6775_s17 + $0xe00] sm:$0xff] %v2671_v2  ;;  %4720 = vst [vmem:[%s6775_s17 + $0xe08] sm:$0xff] %v2672_v3  ;;  %v2677_v14 = vadd.f32 1.0, %v629_v11  ;;  %v2678_v15 = vadd.f32 1.0, %v630_v12  ;;  %v631_v16 = vld [vmem:[%s6760_s12 + $0xe40] sm:$0xff]  ;;  %v632_v17 = vld [vmem:[%s6760_s12 + $0xe48] sm:$0xff] }
 0x12a   : > { %v633_v18 = vld [vmem:[%s6760_s12 + $0xe50] sm:$0xff]  ;;  %4721 = vst [vmem:[%s6775_s17 + $0xe10] sm:$0xff] %v2673_v7  ;;  %4722 = vst [vmem:[%s6775_s17 + $0xe18] sm:$0xff] %v2674_v8  ;;  %v2679_v19 = vadd.f32 1.0, %v631_v16  ;;  %v2680_v20 = vadd.f32 1.0, %v632_v17  ;;  %v634_v22 = vld [vmem:[%s6760_s12 + $0xe58] sm:$0xff] }
 0x12b   : > { %4723 = vst [vmem:[%s6775_s17 + $0xe20] sm:$0xff] %v2675_v9  ;;  %v2681_v21 = vadd.f32 1.0, %v633_v18  ;;  %v635_v23 = vld [vmem:[%s6760_s12 + $0xe60] sm:$0xff]  ;;  %v636_v24 = vld [vmem:[%s6760_s12 + $0xe68] sm:$0xff]  ;;  %4724 = vst [vmem:[%s6775_s17 + $0xe28] sm:$0xff] %v2676_v13  ;;  %v2682_v25 = vadd.f32 1.0, %v634_v22 }
 0x12c   : > { %4725 = vst [vmem:[%s6775_s17 + $0xe30] sm:$0xff] %v2677_v14  ;;  %4726 = vst [vmem:[%s6775_s17 + $0xe38] sm:$0xff] %v2678_v15  ;;  %v2683_v26 = vadd.f32 1.0, %v635_v23  ;;  %v2684_v27 = vadd.f32 1.0, %v636_v24  ;;  %v637_v28 = vld [vmem:[%s6760_s12 + $0xe70] sm:$0xff]  ;;  %v638_v29 = vld [vmem:[%s6760_s12 + $0xe78] sm:$0xff] }
 0x12d   : > { %v639_v30 = vld [vmem:[%s6760_s12 + $0xe80] sm:$0xff]  ;;  %4727 = vst [vmem:[%s6775_s17 + $0xe40] sm:$0xff] %v2679_v19  ;;  %4728 = vst [vmem:[%s6775_s17 + $0xe48] sm:$0xff] %v2680_v20  ;;  %v2685_v31 = vadd.f32 1.0, %v637_v28  ;;  %v2686_v32 = vadd.f32 1.0, %v638_v29  ;;  %v640_v34 = vld [vmem:[%s6760_s12 + $0xe88] sm:$0xff] }
 0x12e   : > { %4729 = vst [vmem:[%s6775_s17 + $0xe50] sm:$0xff] %v2681_v21  ;;  %v2687_v33 = vadd.f32 1.0, %v639_v30  ;;  %v641_v35 = vld [vmem:[%s6760_s12 + $0xe90] sm:$0xff]  ;;  %v642_v36 = vld [vmem:[%s6760_s12 + $0xe98] sm:$0xff]  ;;  %4730 = vst [vmem:[%s6775_s17 + $0xe58] sm:$0xff] %v2682_v25  ;;  %v2688_v37 = vadd.f32 1.0, %v640_v34 }
 0x12f   : > { %4731 = vst [vmem:[%s6775_s17 + $0xe60] sm:$0xff] %v2683_v26  ;;  %4732 = vst [vmem:[%s6775_s17 + $0xe68] sm:$0xff] %v2684_v27  ;;  %v2689_v38 = vadd.f32 1.0, %v641_v35  ;;  %v2690_v39 = vadd.f32 1.0, %v642_v36  ;;  %v643_v40 = vld [vmem:[%s6760_s12 + $0xea0] sm:$0xff]  ;;  %v644_v41 = vld [vmem:[%s6760_s12 + $0xea8] sm:$0xff] }
 0x130   : > { %v645_v42 = vld [vmem:[%s6760_s12 + $0xeb0] sm:$0xff]  ;;  %4733 = vst [vmem:[%s6775_s17 + $0xe70] sm:$0xff] %v2685_v31  ;;  %4734 = vst [vmem:[%s6775_s17 + $0xe78] sm:$0xff] %v2686_v32  ;;  %v2691_v43 = vadd.f32 1.0, %v643_v40  ;;  %v2692_v44 = vadd.f32 1.0, %v644_v41  ;;  %v646_v46 = vld [vmem:[%s6760_s12 + $0xeb8] sm:$0xff] }
 0x131   : > { %4735 = vst [vmem:[%s6775_s17 + $0xe80] sm:$0xff] %v2687_v33  ;;  %v2693_v45 = vadd.f32 1.0, %v645_v42  ;;  %v647_v47 = vld [vmem:[%s6760_s12 + $0xec0] sm:$0xff]  ;;  %v648_v48 = vld [vmem:[%s6760_s12 + $0xec8] sm:$0xff]  ;;  %4736 = vst [vmem:[%s6775_s17 + $0xe88] sm:$0xff] %v2688_v37  ;;  %v2694_v49 = vadd.f32 1.0, %v646_v46 }
 0x132   : > { %4737 = vst [vmem:[%s6775_s17 + $0xe90] sm:$0xff] %v2689_v38  ;;  %4738 = vst [vmem:[%s6775_s17 + $0xe98] sm:$0xff] %v2690_v39  ;;  %v2695_v50 = vadd.f32 1.0, %v647_v47  ;;  %v2696_v51 = vadd.f32 1.0, %v648_v48  ;;  %v649_v52 = vld [vmem:[%s6760_s12 + $0xed0] sm:$0xff]  ;;  %v650_v53 = vld [vmem:[%s6760_s12 + $0xed8] sm:$0xff] }
 0x133   : > { %v651_v54 = vld [vmem:[%s6760_s12 + $0xee0] sm:$0xff]  ;;  %4739 = vst [vmem:[%s6775_s17 + $0xea0] sm:$0xff] %v2691_v43  ;;  %4740 = vst [vmem:[%s6775_s17 + $0xea8] sm:$0xff] %v2692_v44  ;;  %v2697_v55 = vadd.f32 1.0, %v649_v52  ;;  %v2698_v56 = vadd.f32 1.0, %v650_v53  ;;  %v652_v58 = vld [vmem:[%s6760_s12 + $0xee8] sm:$0xff] }
 0x134   : > { %4741 = vst [vmem:[%s6775_s17 + $0xeb0] sm:$0xff] %v2693_v45  ;;  %v2699_v57 = vadd.f32 1.0, %v651_v54  ;;  %v653_v59 = vld [vmem:[%s6760_s12 + $0xef0] sm:$0xff]  ;;  %v654_v60 = vld [vmem:[%s6760_s12 + $0xef8] sm:$0xff]  ;;  %4742 = vst [vmem:[%s6775_s17 + $0xeb8] sm:$0xff] %v2694_v49  ;;  %v2700_v61 = vadd.f32 1.0, %v652_v58 }
 0x135   : > { %4743 = vst [vmem:[%s6775_s17 + $0xec0] sm:$0xff] %v2695_v50  ;;  %4744 = vst [vmem:[%s6775_s17 + $0xec8] sm:$0xff] %v2696_v51  ;;  %v2701_v62 = vadd.f32 1.0, %v653_v59  ;;  %v2702_v63 = vadd.f32 1.0, %v654_v60  ;;  %v655_v0 = vld [vmem:[%s6760_s12 + $0xf00] sm:$0xff]  ;;  %v656_v1 = vld [vmem:[%s6760_s12 + $0xf08] sm:$0xff] }
 0x136   : > { %v657_v2 = vld [vmem:[%s6760_s12 + $0xf10] sm:$0xff]  ;;  %4745 = vst [vmem:[%s6775_s17 + $0xed0] sm:$0xff] %v2697_v55  ;;  %4746 = vst [vmem:[%s6775_s17 + $0xed8] sm:$0xff] %v2698_v56  ;;  %v2703_v3 = vadd.f32 1.0, %v655_v0  ;;  %v2704_v4 = vadd.f32 1.0, %v656_v1  ;;  %v658_v6 = vld [vmem:[%s6760_s12 + $0xf18] sm:$0xff] }
 0x137   : > { %4747 = vst [vmem:[%s6775_s17 + $0xee0] sm:$0xff] %v2699_v57  ;;  %v2705_v5 = vadd.f32 1.0, %v657_v2  ;;  %v659_v7 = vld [vmem:[%s6760_s12 + $0xf20] sm:$0xff]  ;;  %v660_v8 = vld [vmem:[%s6760_s12 + $0xf28] sm:$0xff]  ;;  %4748 = vst [vmem:[%s6775_s17 + $0xee8] sm:$0xff] %v2700_v61  ;;  %v2706_v9 = vadd.f32 1.0, %v658_v6 }
 0x138   : > { %4749 = vst [vmem:[%s6775_s17 + $0xef0] sm:$0xff] %v2701_v62  ;;  %4750 = vst [vmem:[%s6775_s17 + $0xef8] sm:$0xff] %v2702_v63  ;;  %v2707_v10 = vadd.f32 1.0, %v659_v7  ;;  %v2708_v11 = vadd.f32 1.0, %v660_v8  ;;  %v661_v12 = vld [vmem:[%s6760_s12 + $0xf30] sm:$0xff]  ;;  %v662_v13 = vld [vmem:[%s6760_s12 + $0xf38] sm:$0xff] }
 0x139   : > { %v663_v14 = vld [vmem:[%s6760_s12 + $0xf40] sm:$0xff]  ;;  %4751 = vst [vmem:[%s6775_s17 + $0xf00] sm:$0xff] %v2703_v3  ;;  %4752 = vst [vmem:[%s6775_s17 + $0xf08] sm:$0xff] %v2704_v4  ;;  %v2709_v15 = vadd.f32 1.0, %v661_v12  ;;  %v2710_v16 = vadd.f32 1.0, %v662_v13  ;;  %v664_v18 = vld [vmem:[%s6760_s12 + $0xf48] sm:$0xff] }
 0x13a   : > { %4753 = vst [vmem:[%s6775_s17 + $0xf10] sm:$0xff] %v2705_v5  ;;  %v2711_v17 = vadd.f32 1.0, %v663_v14  ;;  %v665_v19 = vld [vmem:[%s6760_s12 + $0xf50] sm:$0xff]  ;;  %v666_v20 = vld [vmem:[%s6760_s12 + $0xf58] sm:$0xff]  ;;  %4754 = vst [vmem:[%s6775_s17 + $0xf18] sm:$0xff] %v2706_v9  ;;  %v2712_v21 = vadd.f32 1.0, %v664_v18 }
 0x13b   : > { %4755 = vst [vmem:[%s6775_s17 + $0xf20] sm:$0xff] %v2707_v10  ;;  %4756 = vst [vmem:[%s6775_s17 + $0xf28] sm:$0xff] %v2708_v11  ;;  %v2713_v22 = vadd.f32 1.0, %v665_v19  ;;  %v2714_v23 = vadd.f32 1.0, %v666_v20  ;;  %v667_v24 = vld [vmem:[%s6760_s12 + $0xf60] sm:$0xff]  ;;  %v668_v25 = vld [vmem:[%s6760_s12 + $0xf68] sm:$0xff] }
 0x13c   : > { %v669_v26 = vld [vmem:[%s6760_s12 + $0xf70] sm:$0xff]  ;;  %4757 = vst [vmem:[%s6775_s17 + $0xf30] sm:$0xff] %v2709_v15  ;;  %4758 = vst [vmem:[%s6775_s17 + $0xf38] sm:$0xff] %v2710_v16  ;;  %v2715_v27 = vadd.f32 1.0, %v667_v24  ;;  %v2716_v28 = vadd.f32 1.0, %v668_v25  ;;  %v670_v30 = vld [vmem:[%s6760_s12 + $0xf78] sm:$0xff] }
 0x13d   : > { %4759 = vst [vmem:[%s6775_s17 + $0xf40] sm:$0xff] %v2711_v17  ;;  %v2717_v29 = vadd.f32 1.0, %v669_v26  ;;  %v671_v31 = vld [vmem:[%s6760_s12 + $0xf80] sm:$0xff]  ;;  %v672_v32 = vld [vmem:[%s6760_s12 + $0xf88] sm:$0xff]  ;;  %4760 = vst [vmem:[%s6775_s17 + $0xf48] sm:$0xff] %v2712_v21  ;;  %v2718_v33 = vadd.f32 1.0, %v670_v30 }
 0x13e   : > { %4761 = vst [vmem:[%s6775_s17 + $0xf50] sm:$0xff] %v2713_v22  ;;  %4762 = vst [vmem:[%s6775_s17 + $0xf58] sm:$0xff] %v2714_v23  ;;  %v2719_v34 = vadd.f32 1.0, %v671_v31  ;;  %v2720_v35 = vadd.f32 1.0, %v672_v32  ;;  %v673_v36 = vld [vmem:[%s6760_s12 + $0xf90] sm:$0xff]  ;;  %v674_v37 = vld [vmem:[%s6760_s12 + $0xf98] sm:$0xff] }
 0x13f   : > { %v675_v38 = vld [vmem:[%s6760_s12 + $0xfa0] sm:$0xff]  ;;  %4763 = vst [vmem:[%s6775_s17 + $0xf60] sm:$0xff] %v2715_v27  ;;  %4764 = vst [vmem:[%s6775_s17 + $0xf68] sm:$0xff] %v2716_v28  ;;  %v2721_v39 = vadd.f32 1.0, %v673_v36  ;;  %v2722_v40 = vadd.f32 1.0, %v674_v37  ;;  %v676_v42 = vld [vmem:[%s6760_s12 + $0xfa8] sm:$0xff] }
 0x140   : > { %4765 = vst [vmem:[%s6775_s17 + $0xf70] sm:$0xff] %v2717_v29  ;;  %v2723_v41 = vadd.f32 1.0, %v675_v38  ;;  %v677_v43 = vld [vmem:[%s6760_s12 + $0xfb0] sm:$0xff]  ;;  %v678_v44 = vld [vmem:[%s6760_s12 + $0xfb8] sm:$0xff]  ;;  %4766 = vst [vmem:[%s6775_s17 + $0xf78] sm:$0xff] %v2718_v33  ;;  %v2724_v45 = vadd.f32 1.0, %v676_v42 }
 0x141   : > { %4767 = vst [vmem:[%s6775_s17 + $0xf80] sm:$0xff] %v2719_v34  ;;  %4768 = vst [vmem:[%s6775_s17 + $0xf88] sm:$0xff] %v2720_v35  ;;  %v2725_v46 = vadd.f32 1.0, %v677_v43  ;;  %v2726_v47 = vadd.f32 1.0, %v678_v44  ;;  %v679_v48 = vld [vmem:[%s6760_s12 + $0xfc0] sm:$0xff]  ;;  %v680_v49 = vld [vmem:[%s6760_s12 + $0xfc8] sm:$0xff] }
 0x142   : > { %v681_v50 = vld [vmem:[%s6760_s12 + $0xfd0] sm:$0xff]  ;;  %4769 = vst [vmem:[%s6775_s17 + $0xf90] sm:$0xff] %v2721_v39  ;;  %4770 = vst [vmem:[%s6775_s17 + $0xf98] sm:$0xff] %v2722_v40  ;;  %v2727_v51 = vadd.f32 1.0, %v679_v48  ;;  %v2728_v52 = vadd.f32 1.0, %v680_v49  ;;  %v682_v54 = vld [vmem:[%s6760_s12 + $0xfd8] sm:$0xff] }
 0x143   : > { %4771 = vst [vmem:[%s6775_s17 + $0xfa0] sm:$0xff] %v2723_v41  ;;  %v2729_v53 = vadd.f32 1.0, %v681_v50  ;;  %v683_v55 = vld [vmem:[%s6760_s12 + $0xfe0] sm:$0xff]  ;;  %v684_v56 = vld [vmem:[%s6760_s12 + $0xfe8] sm:$0xff]  ;;  %4772 = vst [vmem:[%s6775_s17 + $0xfa8] sm:$0xff] %v2724_v45  ;;  %v2730_v57 = vadd.f32 1.0, %v682_v54 }
 0x144   : > { %4773 = vst [vmem:[%s6775_s17 + $0xfb0] sm:$0xff] %v2725_v46  ;;  %4774 = vst [vmem:[%s6775_s17 + $0xfb8] sm:$0xff] %v2726_v47  ;;  %v2731_v58 = vadd.f32 1.0, %v683_v55  ;;  %v2732_v59 = vadd.f32 1.0, %v684_v56  ;;  %v685_v60 = vld [vmem:[%s6760_s12 + $0xff0] sm:$0xff]  ;;  %v686_v61 = vld [vmem:[%s6760_s12 + $0xff8] sm:$0xff] }
 0x145   : > { %v687_v62 = vld [vmem:[%s6760_s12 + $0x1000] sm:$0xff]  ;;  %4775 = vst [vmem:[%s6775_s17 + $0xfc0] sm:$0xff] %v2727_v51  ;;  %4776 = vst [vmem:[%s6775_s17 + $0xfc8] sm:$0xff] %v2728_v52  ;;  %v2733_v63 = vadd.f32 1.0, %v685_v60  ;;  %v2734_v0 = vadd.f32 1.0, %v686_v61  ;;  %v688_v2 = vld [vmem:[%s6760_s12 + $0x1008] sm:$0xff] }
 0x146   : > { %4777 = vst [vmem:[%s6775_s17 + $0xfd0] sm:$0xff] %v2729_v53  ;;  %v2735_v1 = vadd.f32 1.0, %v687_v62  ;;  %v689_v3 = vld [vmem:[%s6760_s12 + $0x1010] sm:$0xff]  ;;  %v690_v4 = vld [vmem:[%s6760_s12 + $0x1018] sm:$0xff]  ;;  %4778 = vst [vmem:[%s6775_s17 + $0xfd8] sm:$0xff] %v2730_v57  ;;  %v2736_v5 = vadd.f32 1.0, %v688_v2 }
 0x147   : > { %4779 = vst [vmem:[%s6775_s17 + $0xfe0] sm:$0xff] %v2731_v58  ;;  %4780 = vst [vmem:[%s6775_s17 + $0xfe8] sm:$0xff] %v2732_v59  ;;  %v2737_v6 = vadd.f32 1.0, %v689_v3  ;;  %v2738_v7 = vadd.f32 1.0, %v690_v4  ;;  %v691_v8 = vld [vmem:[%s6760_s12 + $0x1020] sm:$0xff]  ;;  %v692_v9 = vld [vmem:[%s6760_s12 + $0x1028] sm:$0xff] }
 0x148   : > { %v693_v10 = vld [vmem:[%s6760_s12 + $0x1030] sm:$0xff]  ;;  %4781 = vst [vmem:[%s6775_s17 + $0xff0] sm:$0xff] %v2733_v63  ;;  %4782 = vst [vmem:[%s6775_s17 + $0xff8] sm:$0xff] %v2734_v0  ;;  %v2739_v11 = vadd.f32 1.0, %v691_v8  ;;  %v2740_v12 = vadd.f32 1.0, %v692_v9  ;;  %v694_v14 = vld [vmem:[%s6760_s12 + $0x1038] sm:$0xff] }
 0x149   : > { %4783 = vst [vmem:[%s6775_s17 + $0x1000] sm:$0xff] %v2735_v1  ;;  %v2741_v13 = vadd.f32 1.0, %v693_v10  ;;  %v695_v15 = vld [vmem:[%s6760_s12 + $0x1040] sm:$0xff]  ;;  %v696_v16 = vld [vmem:[%s6760_s12 + $0x1048] sm:$0xff]  ;;  %4784 = vst [vmem:[%s6775_s17 + $0x1008] sm:$0xff] %v2736_v5  ;;  %v2742_v17 = vadd.f32 1.0, %v694_v14 }
 0x14a   : > { %4785 = vst [vmem:[%s6775_s17 + $0x1010] sm:$0xff] %v2737_v6  ;;  %4786 = vst [vmem:[%s6775_s17 + $0x1018] sm:$0xff] %v2738_v7  ;;  %v2743_v18 = vadd.f32 1.0, %v695_v15  ;;  %v2744_v19 = vadd.f32 1.0, %v696_v16  ;;  %v697_v20 = vld [vmem:[%s6760_s12 + $0x1050] sm:$0xff]  ;;  %v698_v21 = vld [vmem:[%s6760_s12 + $0x1058] sm:$0xff] }
 0x14b   : > { %v699_v22 = vld [vmem:[%s6760_s12 + $0x1060] sm:$0xff]  ;;  %4787 = vst [vmem:[%s6775_s17 + $0x1020] sm:$0xff] %v2739_v11  ;;  %4788 = vst [vmem:[%s6775_s17 + $0x1028] sm:$0xff] %v2740_v12  ;;  %v2745_v23 = vadd.f32 1.0, %v697_v20  ;;  %v2746_v24 = vadd.f32 1.0, %v698_v21  ;;  %v700_v26 = vld [vmem:[%s6760_s12 + $0x1068] sm:$0xff] }
 0x14c   : > { %4789 = vst [vmem:[%s6775_s17 + $0x1030] sm:$0xff] %v2741_v13  ;;  %v2747_v25 = vadd.f32 1.0, %v699_v22  ;;  %v701_v27 = vld [vmem:[%s6760_s12 + $0x1070] sm:$0xff]  ;;  %v702_v28 = vld [vmem:[%s6760_s12 + $0x1078] sm:$0xff]  ;;  %4790 = vst [vmem:[%s6775_s17 + $0x1038] sm:$0xff] %v2742_v17  ;;  %v2748_v29 = vadd.f32 1.0, %v700_v26 }
 0x14d   : > { %4791 = vst [vmem:[%s6775_s17 + $0x1040] sm:$0xff] %v2743_v18  ;;  %4792 = vst [vmem:[%s6775_s17 + $0x1048] sm:$0xff] %v2744_v19  ;;  %v2749_v30 = vadd.f32 1.0, %v701_v27  ;;  %v2750_v31 = vadd.f32 1.0, %v702_v28  ;;  %v703_v32 = vld [vmem:[%s6760_s12 + $0x1080] sm:$0xff]  ;;  %v704_v33 = vld [vmem:[%s6760_s12 + $0x1088] sm:$0xff] }
 0x14e   : > { %v705_v34 = vld [vmem:[%s6760_s12 + $0x1090] sm:$0xff]  ;;  %4793 = vst [vmem:[%s6775_s17 + $0x1050] sm:$0xff] %v2745_v23  ;;  %4794 = vst [vmem:[%s6775_s17 + $0x1058] sm:$0xff] %v2746_v24  ;;  %v2751_v35 = vadd.f32 1.0, %v703_v32  ;;  %v2752_v36 = vadd.f32 1.0, %v704_v33  ;;  %v706_v38 = vld [vmem:[%s6760_s12 + $0x1098] sm:$0xff] }
 0x14f   : > { %4795 = vst [vmem:[%s6775_s17 + $0x1060] sm:$0xff] %v2747_v25  ;;  %v2753_v37 = vadd.f32 1.0, %v705_v34  ;;  %v707_v39 = vld [vmem:[%s6760_s12 + $0x10a0] sm:$0xff]  ;;  %v708_v40 = vld [vmem:[%s6760_s12 + $0x10a8] sm:$0xff]  ;;  %4796 = vst [vmem:[%s6775_s17 + $0x1068] sm:$0xff] %v2748_v29  ;;  %v2754_v41 = vadd.f32 1.0, %v706_v38 }
 0x150   : > { %4797 = vst [vmem:[%s6775_s17 + $0x1070] sm:$0xff] %v2749_v30  ;;  %4798 = vst [vmem:[%s6775_s17 + $0x1078] sm:$0xff] %v2750_v31  ;;  %v2755_v42 = vadd.f32 1.0, %v707_v39  ;;  %v2756_v43 = vadd.f32 1.0, %v708_v40  ;;  %v709_v44 = vld [vmem:[%s6760_s12 + $0x10b0] sm:$0xff]  ;;  %v710_v45 = vld [vmem:[%s6760_s12 + $0x10b8] sm:$0xff] }
 0x151   : > { %v711_v46 = vld [vmem:[%s6760_s12 + $0x10c0] sm:$0xff]  ;;  %4799 = vst [vmem:[%s6775_s17 + $0x1080] sm:$0xff] %v2751_v35  ;;  %4800 = vst [vmem:[%s6775_s17 + $0x1088] sm:$0xff] %v2752_v36  ;;  %v2757_v47 = vadd.f32 1.0, %v709_v44  ;;  %v2758_v48 = vadd.f32 1.0, %v710_v45  ;;  %v712_v50 = vld [vmem:[%s6760_s12 + $0x10c8] sm:$0xff] }
 0x152   : > { %4801 = vst [vmem:[%s6775_s17 + $0x1090] sm:$0xff] %v2753_v37  ;;  %v2759_v49 = vadd.f32 1.0, %v711_v46  ;;  %v713_v51 = vld [vmem:[%s6760_s12 + $0x10d0] sm:$0xff]  ;;  %v714_v52 = vld [vmem:[%s6760_s12 + $0x10d8] sm:$0xff]  ;;  %4802 = vst [vmem:[%s6775_s17 + $0x1098] sm:$0xff] %v2754_v41  ;;  %v2760_v53 = vadd.f32 1.0, %v712_v50 }
 0x153   : > { %4803 = vst [vmem:[%s6775_s17 + $0x10a0] sm:$0xff] %v2755_v42  ;;  %4804 = vst [vmem:[%s6775_s17 + $0x10a8] sm:$0xff] %v2756_v43  ;;  %v2761_v54 = vadd.f32 1.0, %v713_v51  ;;  %v2762_v55 = vadd.f32 1.0, %v714_v52  ;;  %v715_v56 = vld [vmem:[%s6760_s12 + $0x10e0] sm:$0xff]  ;;  %v716_v57 = vld [vmem:[%s6760_s12 + $0x10e8] sm:$0xff] }
 0x154   : > { %v717_v58 = vld [vmem:[%s6760_s12 + $0x10f0] sm:$0xff]  ;;  %4805 = vst [vmem:[%s6775_s17 + $0x10b0] sm:$0xff] %v2757_v47  ;;  %4806 = vst [vmem:[%s6775_s17 + $0x10b8] sm:$0xff] %v2758_v48  ;;  %v2763_v59 = vadd.f32 1.0, %v715_v56  ;;  %v2764_v60 = vadd.f32 1.0, %v716_v57  ;;  %v718_v62 = vld [vmem:[%s6760_s12 + $0x10f8] sm:$0xff] }
 0x155   : > { %4807 = vst [vmem:[%s6775_s17 + $0x10c0] sm:$0xff] %v2759_v49  ;;  %v2765_v61 = vadd.f32 1.0, %v717_v58  ;;  %v719_v63 = vld [vmem:[%s6760_s12 + $0x1100] sm:$0xff]  ;;  %v720_v0 = vld [vmem:[%s6760_s12 + $0x1108] sm:$0xff]  ;;  %4808 = vst [vmem:[%s6775_s17 + $0x10c8] sm:$0xff] %v2760_v53  ;;  %v2766_v1 = vadd.f32 1.0, %v718_v62 }
 0x156   : > { %4809 = vst [vmem:[%s6775_s17 + $0x10d0] sm:$0xff] %v2761_v54  ;;  %4810 = vst [vmem:[%s6775_s17 + $0x10d8] sm:$0xff] %v2762_v55  ;;  %v2767_v2 = vadd.f32 1.0, %v719_v63  ;;  %v2768_v3 = vadd.f32 1.0, %v720_v0  ;;  %v721_v4 = vld [vmem:[%s6760_s12 + $0x1110] sm:$0xff]  ;;  %v722_v5 = vld [vmem:[%s6760_s12 + $0x1118] sm:$0xff] }
 0x157   : > { %v723_v6 = vld [vmem:[%s6760_s12 + $0x1120] sm:$0xff]  ;;  %4811 = vst [vmem:[%s6775_s17 + $0x10e0] sm:$0xff] %v2763_v59  ;;  %4812 = vst [vmem:[%s6775_s17 + $0x10e8] sm:$0xff] %v2764_v60  ;;  %v2769_v7 = vadd.f32 1.0, %v721_v4  ;;  %v2770_v8 = vadd.f32 1.0, %v722_v5  ;;  %v724_v10 = vld [vmem:[%s6760_s12 + $0x1128] sm:$0xff] }
 0x158   : > { %4813 = vst [vmem:[%s6775_s17 + $0x10f0] sm:$0xff] %v2765_v61  ;;  %v2771_v9 = vadd.f32 1.0, %v723_v6  ;;  %v725_v11 = vld [vmem:[%s6760_s12 + $0x1130] sm:$0xff]  ;;  %v726_v12 = vld [vmem:[%s6760_s12 + $0x1138] sm:$0xff]  ;;  %4814 = vst [vmem:[%s6775_s17 + $0x10f8] sm:$0xff] %v2766_v1  ;;  %v2772_v13 = vadd.f32 1.0, %v724_v10 }
 0x159   : > { %4815 = vst [vmem:[%s6775_s17 + $0x1100] sm:$0xff] %v2767_v2  ;;  %4816 = vst [vmem:[%s6775_s17 + $0x1108] sm:$0xff] %v2768_v3  ;;  %v2773_v14 = vadd.f32 1.0, %v725_v11  ;;  %v2774_v15 = vadd.f32 1.0, %v726_v12  ;;  %v727_v16 = vld [vmem:[%s6760_s12 + $0x1140] sm:$0xff]  ;;  %v728_v17 = vld [vmem:[%s6760_s12 + $0x1148] sm:$0xff] }
 0x15a   : > { %v729_v18 = vld [vmem:[%s6760_s12 + $0x1150] sm:$0xff]  ;;  %4817 = vst [vmem:[%s6775_s17 + $0x1110] sm:$0xff] %v2769_v7  ;;  %4818 = vst [vmem:[%s6775_s17 + $0x1118] sm:$0xff] %v2770_v8  ;;  %v2775_v19 = vadd.f32 1.0, %v727_v16  ;;  %v2776_v20 = vadd.f32 1.0, %v728_v17  ;;  %v730_v22 = vld [vmem:[%s6760_s12 + $0x1158] sm:$0xff] }
 0x15b   : > { %4819 = vst [vmem:[%s6775_s17 + $0x1120] sm:$0xff] %v2771_v9  ;;  %v2777_v21 = vadd.f32 1.0, %v729_v18  ;;  %v731_v23 = vld [vmem:[%s6760_s12 + $0x1160] sm:$0xff]  ;;  %v732_v24 = vld [vmem:[%s6760_s12 + $0x1168] sm:$0xff]  ;;  %4820 = vst [vmem:[%s6775_s17 + $0x1128] sm:$0xff] %v2772_v13  ;;  %v2778_v25 = vadd.f32 1.0, %v730_v22 }
 0x15c   : > { %4821 = vst [vmem:[%s6775_s17 + $0x1130] sm:$0xff] %v2773_v14  ;;  %4822 = vst [vmem:[%s6775_s17 + $0x1138] sm:$0xff] %v2774_v15  ;;  %v2779_v26 = vadd.f32 1.0, %v731_v23  ;;  %v2780_v27 = vadd.f32 1.0, %v732_v24  ;;  %v733_v28 = vld [vmem:[%s6760_s12 + $0x1170] sm:$0xff]  ;;  %v734_v29 = vld [vmem:[%s6760_s12 + $0x1178] sm:$0xff] }
 0x15d   : > { %v735_v30 = vld [vmem:[%s6760_s12 + $0x1180] sm:$0xff]  ;;  %4823 = vst [vmem:[%s6775_s17 + $0x1140] sm:$0xff] %v2775_v19  ;;  %4824 = vst [vmem:[%s6775_s17 + $0x1148] sm:$0xff] %v2776_v20  ;;  %v2781_v31 = vadd.f32 1.0, %v733_v28  ;;  %v2782_v32 = vadd.f32 1.0, %v734_v29  ;;  %v736_v34 = vld [vmem:[%s6760_s12 + $0x1188] sm:$0xff] }
 0x15e   : > { %4825 = vst [vmem:[%s6775_s17 + $0x1150] sm:$0xff] %v2777_v21  ;;  %v2783_v33 = vadd.f32 1.0, %v735_v30  ;;  %v737_v35 = vld [vmem:[%s6760_s12 + $0x1190] sm:$0xff]  ;;  %v738_v36 = vld [vmem:[%s6760_s12 + $0x1198] sm:$0xff]  ;;  %4826 = vst [vmem:[%s6775_s17 + $0x1158] sm:$0xff] %v2778_v25  ;;  %v2784_v37 = vadd.f32 1.0, %v736_v34 }
 0x15f   : > { %4827 = vst [vmem:[%s6775_s17 + $0x1160] sm:$0xff] %v2779_v26  ;;  %4828 = vst [vmem:[%s6775_s17 + $0x1168] sm:$0xff] %v2780_v27  ;;  %v2785_v38 = vadd.f32 1.0, %v737_v35  ;;  %v2786_v39 = vadd.f32 1.0, %v738_v36  ;;  %v739_v40 = vld [vmem:[%s6760_s12 + $0x11a0] sm:$0xff]  ;;  %v740_v41 = vld [vmem:[%s6760_s12 + $0x11a8] sm:$0xff] }
 0x160   : > { %v741_v42 = vld [vmem:[%s6760_s12 + $0x11b0] sm:$0xff]  ;;  %4829 = vst [vmem:[%s6775_s17 + $0x1170] sm:$0xff] %v2781_v31  ;;  %4830 = vst [vmem:[%s6775_s17 + $0x1178] sm:$0xff] %v2782_v32  ;;  %v2787_v43 = vadd.f32 1.0, %v739_v40  ;;  %v2788_v44 = vadd.f32 1.0, %v740_v41  ;;  %v742_v46 = vld [vmem:[%s6760_s12 + $0x11b8] sm:$0xff] }
 0x161   : > { %4831 = vst [vmem:[%s6775_s17 + $0x1180] sm:$0xff] %v2783_v33  ;;  %v2789_v45 = vadd.f32 1.0, %v741_v42  ;;  %v743_v47 = vld [vmem:[%s6760_s12 + $0x11c0] sm:$0xff]  ;;  %v744_v48 = vld [vmem:[%s6760_s12 + $0x11c8] sm:$0xff]  ;;  %4832 = vst [vmem:[%s6775_s17 + $0x1188] sm:$0xff] %v2784_v37  ;;  %v2790_v49 = vadd.f32 1.0, %v742_v46 }
 0x162   : > { %4833 = vst [vmem:[%s6775_s17 + $0x1190] sm:$0xff] %v2785_v38  ;;  %4834 = vst [vmem:[%s6775_s17 + $0x1198] sm:$0xff] %v2786_v39  ;;  %v2791_v50 = vadd.f32 1.0, %v743_v47  ;;  %v2792_v51 = vadd.f32 1.0, %v744_v48  ;;  %v745_v52 = vld [vmem:[%s6760_s12 + $0x11d0] sm:$0xff]  ;;  %v746_v53 = vld [vmem:[%s6760_s12 + $0x11d8] sm:$0xff] }
 0x163   : > { %v747_v54 = vld [vmem:[%s6760_s12 + $0x11e0] sm:$0xff]  ;;  %4835 = vst [vmem:[%s6775_s17 + $0x11a0] sm:$0xff] %v2787_v43  ;;  %4836 = vst [vmem:[%s6775_s17 + $0x11a8] sm:$0xff] %v2788_v44  ;;  %v2793_v55 = vadd.f32 1.0, %v745_v52  ;;  %v2794_v56 = vadd.f32 1.0, %v746_v53  ;;  %v748_v58 = vld [vmem:[%s6760_s12 + $0x11e8] sm:$0xff] }
 0x164   : > { %4837 = vst [vmem:[%s6775_s17 + $0x11b0] sm:$0xff] %v2789_v45  ;;  %v2795_v57 = vadd.f32 1.0, %v747_v54  ;;  %v749_v59 = vld [vmem:[%s6760_s12 + $0x11f0] sm:$0xff]  ;;  %v750_v60 = vld [vmem:[%s6760_s12 + $0x11f8] sm:$0xff]  ;;  %4838 = vst [vmem:[%s6775_s17 + $0x11b8] sm:$0xff] %v2790_v49  ;;  %v2796_v61 = vadd.f32 1.0, %v748_v58 }
 0x165   : > { %4839 = vst [vmem:[%s6775_s17 + $0x11c0] sm:$0xff] %v2791_v50  ;;  %4840 = vst [vmem:[%s6775_s17 + $0x11c8] sm:$0xff] %v2792_v51  ;;  %v2797_v62 = vadd.f32 1.0, %v749_v59  ;;  %v2798_v63 = vadd.f32 1.0, %v750_v60  ;;  %v751_v0 = vld [vmem:[%s6760_s12 + $0x1200] sm:$0xff]  ;;  %v752_v1 = vld [vmem:[%s6760_s12 + $0x1208] sm:$0xff] }
 0x166   : > { %v753_v2 = vld [vmem:[%s6760_s12 + $0x1210] sm:$0xff]  ;;  %4841 = vst [vmem:[%s6775_s17 + $0x11d0] sm:$0xff] %v2793_v55  ;;  %4842 = vst [vmem:[%s6775_s17 + $0x11d8] sm:$0xff] %v2794_v56  ;;  %v2799_v3 = vadd.f32 1.0, %v751_v0  ;;  %v2800_v4 = vadd.f32 1.0, %v752_v1  ;;  %v754_v6 = vld [vmem:[%s6760_s12 + $0x1218] sm:$0xff] }
 0x167   : > { %4843 = vst [vmem:[%s6775_s17 + $0x11e0] sm:$0xff] %v2795_v57  ;;  %v2801_v5 = vadd.f32 1.0, %v753_v2  ;;  %v755_v7 = vld [vmem:[%s6760_s12 + $0x1220] sm:$0xff]  ;;  %v756_v8 = vld [vmem:[%s6760_s12 + $0x1228] sm:$0xff]  ;;  %4844 = vst [vmem:[%s6775_s17 + $0x11e8] sm:$0xff] %v2796_v61  ;;  %v2802_v9 = vadd.f32 1.0, %v754_v6 }
 0x168   : > { %4845 = vst [vmem:[%s6775_s17 + $0x11f0] sm:$0xff] %v2797_v62  ;;  %4846 = vst [vmem:[%s6775_s17 + $0x11f8] sm:$0xff] %v2798_v63  ;;  %v2803_v10 = vadd.f32 1.0, %v755_v7  ;;  %v2804_v11 = vadd.f32 1.0, %v756_v8  ;;  %v757_v12 = vld [vmem:[%s6760_s12 + $0x1230] sm:$0xff]  ;;  %v758_v13 = vld [vmem:[%s6760_s12 + $0x1238] sm:$0xff] }
 0x169   : > { %v759_v14 = vld [vmem:[%s6760_s12 + $0x1240] sm:$0xff]  ;;  %4847 = vst [vmem:[%s6775_s17 + $0x1200] sm:$0xff] %v2799_v3  ;;  %4848 = vst [vmem:[%s6775_s17 + $0x1208] sm:$0xff] %v2800_v4  ;;  %v2805_v15 = vadd.f32 1.0, %v757_v12  ;;  %v2806_v16 = vadd.f32 1.0, %v758_v13  ;;  %v760_v18 = vld [vmem:[%s6760_s12 + $0x1248] sm:$0xff] }
 0x16a   : > { %4849 = vst [vmem:[%s6775_s17 + $0x1210] sm:$0xff] %v2801_v5  ;;  %v2807_v17 = vadd.f32 1.0, %v759_v14  ;;  %v761_v19 = vld [vmem:[%s6760_s12 + $0x1250] sm:$0xff]  ;;  %v762_v20 = vld [vmem:[%s6760_s12 + $0x1258] sm:$0xff]  ;;  %4850 = vst [vmem:[%s6775_s17 + $0x1218] sm:$0xff] %v2802_v9  ;;  %v2808_v21 = vadd.f32 1.0, %v760_v18 }
 0x16b   : > { %4851 = vst [vmem:[%s6775_s17 + $0x1220] sm:$0xff] %v2803_v10  ;;  %4852 = vst [vmem:[%s6775_s17 + $0x1228] sm:$0xff] %v2804_v11  ;;  %v2809_v22 = vadd.f32 1.0, %v761_v19  ;;  %v2810_v23 = vadd.f32 1.0, %v762_v20  ;;  %v763_v24 = vld [vmem:[%s6760_s12 + $0x1260] sm:$0xff]  ;;  %v764_v25 = vld [vmem:[%s6760_s12 + $0x1268] sm:$0xff] }
 0x16c   : > { %v765_v26 = vld [vmem:[%s6760_s12 + $0x1270] sm:$0xff]  ;;  %4853 = vst [vmem:[%s6775_s17 + $0x1230] sm:$0xff] %v2805_v15  ;;  %4854 = vst [vmem:[%s6775_s17 + $0x1238] sm:$0xff] %v2806_v16  ;;  %v2811_v27 = vadd.f32 1.0, %v763_v24  ;;  %v2812_v28 = vadd.f32 1.0, %v764_v25  ;;  %v766_v30 = vld [vmem:[%s6760_s12 + $0x1278] sm:$0xff] }
 0x16d   : > { %4855 = vst [vmem:[%s6775_s17 + $0x1240] sm:$0xff] %v2807_v17  ;;  %v2813_v29 = vadd.f32 1.0, %v765_v26  ;;  %v767_v31 = vld [vmem:[%s6760_s12 + $0x1280] sm:$0xff]  ;;  %v768_v32 = vld [vmem:[%s6760_s12 + $0x1288] sm:$0xff]  ;;  %4856 = vst [vmem:[%s6775_s17 + $0x1248] sm:$0xff] %v2808_v21  ;;  %v2814_v33 = vadd.f32 1.0, %v766_v30 }
 0x16e   : > { %4857 = vst [vmem:[%s6775_s17 + $0x1250] sm:$0xff] %v2809_v22  ;;  %4858 = vst [vmem:[%s6775_s17 + $0x1258] sm:$0xff] %v2810_v23  ;;  %v2815_v34 = vadd.f32 1.0, %v767_v31  ;;  %v2816_v35 = vadd.f32 1.0, %v768_v32  ;;  %v769_v36 = vld [vmem:[%s6760_s12 + $0x1290] sm:$0xff]  ;;  %v770_v37 = vld [vmem:[%s6760_s12 + $0x1298] sm:$0xff] }
 0x16f   : > { %v771_v38 = vld [vmem:[%s6760_s12 + $0x12a0] sm:$0xff]  ;;  %4859 = vst [vmem:[%s6775_s17 + $0x1260] sm:$0xff] %v2811_v27  ;;  %4860 = vst [vmem:[%s6775_s17 + $0x1268] sm:$0xff] %v2812_v28  ;;  %v2817_v39 = vadd.f32 1.0, %v769_v36  ;;  %v2818_v40 = vadd.f32 1.0, %v770_v37  ;;  %v772_v42 = vld [vmem:[%s6760_s12 + $0x12a8] sm:$0xff] }
 0x170   : > { %4861 = vst [vmem:[%s6775_s17 + $0x1270] sm:$0xff] %v2813_v29  ;;  %v2819_v41 = vadd.f32 1.0, %v771_v38  ;;  %v773_v43 = vld [vmem:[%s6760_s12 + $0x12b0] sm:$0xff]  ;;  %v774_v44 = vld [vmem:[%s6760_s12 + $0x12b8] sm:$0xff]  ;;  %4862 = vst [vmem:[%s6775_s17 + $0x1278] sm:$0xff] %v2814_v33  ;;  %v2820_v45 = vadd.f32 1.0, %v772_v42 }
 0x171   : > { %4863 = vst [vmem:[%s6775_s17 + $0x1280] sm:$0xff] %v2815_v34  ;;  %4864 = vst [vmem:[%s6775_s17 + $0x1288] sm:$0xff] %v2816_v35  ;;  %v2821_v46 = vadd.f32 1.0, %v773_v43  ;;  %v2822_v47 = vadd.f32 1.0, %v774_v44  ;;  %v775_v48 = vld [vmem:[%s6760_s12 + $0x12c0] sm:$0xff]  ;;  %v776_v49 = vld [vmem:[%s6760_s12 + $0x12c8] sm:$0xff] }
 0x172   : > { %v777_v50 = vld [vmem:[%s6760_s12 + $0x12d0] sm:$0xff]  ;;  %4865 = vst [vmem:[%s6775_s17 + $0x1290] sm:$0xff] %v2817_v39  ;;  %4866 = vst [vmem:[%s6775_s17 + $0x1298] sm:$0xff] %v2818_v40  ;;  %v2823_v51 = vadd.f32 1.0, %v775_v48  ;;  %v2824_v52 = vadd.f32 1.0, %v776_v49  ;;  %v778_v54 = vld [vmem:[%s6760_s12 + $0x12d8] sm:$0xff] }
 0x173   : > { %4867 = vst [vmem:[%s6775_s17 + $0x12a0] sm:$0xff] %v2819_v41  ;;  %v2825_v53 = vadd.f32 1.0, %v777_v50  ;;  %v779_v55 = vld [vmem:[%s6760_s12 + $0x12e0] sm:$0xff]  ;;  %v780_v56 = vld [vmem:[%s6760_s12 + $0x12e8] sm:$0xff]  ;;  %4868 = vst [vmem:[%s6775_s17 + $0x12a8] sm:$0xff] %v2820_v45  ;;  %v2826_v57 = vadd.f32 1.0, %v778_v54 }
 0x174   : > { %4869 = vst [vmem:[%s6775_s17 + $0x12b0] sm:$0xff] %v2821_v46  ;;  %4870 = vst [vmem:[%s6775_s17 + $0x12b8] sm:$0xff] %v2822_v47  ;;  %v2827_v58 = vadd.f32 1.0, %v779_v55  ;;  %v2828_v59 = vadd.f32 1.0, %v780_v56  ;;  %v781_v60 = vld [vmem:[%s6760_s12 + $0x12f0] sm:$0xff]  ;;  %v782_v61 = vld [vmem:[%s6760_s12 + $0x12f8] sm:$0xff] }
 0x175   : > { %v783_v62 = vld [vmem:[%s6760_s12 + $0x1300] sm:$0xff]  ;;  %4871 = vst [vmem:[%s6775_s17 + $0x12c0] sm:$0xff] %v2823_v51  ;;  %4872 = vst [vmem:[%s6775_s17 + $0x12c8] sm:$0xff] %v2824_v52  ;;  %v2829_v63 = vadd.f32 1.0, %v781_v60  ;;  %v2830_v0 = vadd.f32 1.0, %v782_v61  ;;  %v784_v2 = vld [vmem:[%s6760_s12 + $0x1308] sm:$0xff] }
 0x176   : > { %4873 = vst [vmem:[%s6775_s17 + $0x12d0] sm:$0xff] %v2825_v53  ;;  %v2831_v1 = vadd.f32 1.0, %v783_v62  ;;  %v785_v3 = vld [vmem:[%s6760_s12 + $0x1310] sm:$0xff]  ;;  %v786_v4 = vld [vmem:[%s6760_s12 + $0x1318] sm:$0xff]  ;;  %4874 = vst [vmem:[%s6775_s17 + $0x12d8] sm:$0xff] %v2826_v57  ;;  %v2832_v5 = vadd.f32 1.0, %v784_v2 }
 0x177   : > { %4875 = vst [vmem:[%s6775_s17 + $0x12e0] sm:$0xff] %v2827_v58  ;;  %4876 = vst [vmem:[%s6775_s17 + $0x12e8] sm:$0xff] %v2828_v59  ;;  %v2833_v6 = vadd.f32 1.0, %v785_v3  ;;  %v2834_v7 = vadd.f32 1.0, %v786_v4  ;;  %v787_v8 = vld [vmem:[%s6760_s12 + $0x1320] sm:$0xff]  ;;  %v788_v9 = vld [vmem:[%s6760_s12 + $0x1328] sm:$0xff] }
 0x178   : > { %v789_v10 = vld [vmem:[%s6760_s12 + $0x1330] sm:$0xff]  ;;  %4877 = vst [vmem:[%s6775_s17 + $0x12f0] sm:$0xff] %v2829_v63  ;;  %4878 = vst [vmem:[%s6775_s17 + $0x12f8] sm:$0xff] %v2830_v0  ;;  %v2835_v11 = vadd.f32 1.0, %v787_v8  ;;  %v2836_v12 = vadd.f32 1.0, %v788_v9  ;;  %v790_v14 = vld [vmem:[%s6760_s12 + $0x1338] sm:$0xff] }
 0x179   : > { %4879 = vst [vmem:[%s6775_s17 + $0x1300] sm:$0xff] %v2831_v1  ;;  %v2837_v13 = vadd.f32 1.0, %v789_v10  ;;  %v791_v15 = vld [vmem:[%s6760_s12 + $0x1340] sm:$0xff]  ;;  %v792_v16 = vld [vmem:[%s6760_s12 + $0x1348] sm:$0xff]  ;;  %4880 = vst [vmem:[%s6775_s17 + $0x1308] sm:$0xff] %v2832_v5  ;;  %v2838_v17 = vadd.f32 1.0, %v790_v14 }
 0x17a   : > { %4881 = vst [vmem:[%s6775_s17 + $0x1310] sm:$0xff] %v2833_v6  ;;  %4882 = vst [vmem:[%s6775_s17 + $0x1318] sm:$0xff] %v2834_v7  ;;  %v2839_v18 = vadd.f32 1.0, %v791_v15  ;;  %v2840_v19 = vadd.f32 1.0, %v792_v16  ;;  %v793_v20 = vld [vmem:[%s6760_s12 + $0x1350] sm:$0xff]  ;;  %v794_v21 = vld [vmem:[%s6760_s12 + $0x1358] sm:$0xff] }
 0x17b   : > { %v795_v22 = vld [vmem:[%s6760_s12 + $0x1360] sm:$0xff]  ;;  %4883 = vst [vmem:[%s6775_s17 + $0x1320] sm:$0xff] %v2835_v11  ;;  %4884 = vst [vmem:[%s6775_s17 + $0x1328] sm:$0xff] %v2836_v12  ;;  %v2841_v23 = vadd.f32 1.0, %v793_v20  ;;  %v2842_v24 = vadd.f32 1.0, %v794_v21  ;;  %v796_v26 = vld [vmem:[%s6760_s12 + $0x1368] sm:$0xff] }
 0x17c   : > { %4885 = vst [vmem:[%s6775_s17 + $0x1330] sm:$0xff] %v2837_v13  ;;  %v2843_v25 = vadd.f32 1.0, %v795_v22  ;;  %v797_v27 = vld [vmem:[%s6760_s12 + $0x1370] sm:$0xff]  ;;  %v798_v28 = vld [vmem:[%s6760_s12 + $0x1378] sm:$0xff]  ;;  %4886 = vst [vmem:[%s6775_s17 + $0x1338] sm:$0xff] %v2838_v17  ;;  %v2844_v29 = vadd.f32 1.0, %v796_v26 }
 0x17d   : > { %4887 = vst [vmem:[%s6775_s17 + $0x1340] sm:$0xff] %v2839_v18  ;;  %4888 = vst [vmem:[%s6775_s17 + $0x1348] sm:$0xff] %v2840_v19  ;;  %v2845_v30 = vadd.f32 1.0, %v797_v27  ;;  %v2846_v31 = vadd.f32 1.0, %v798_v28  ;;  %v799_v32 = vld [vmem:[%s6760_s12 + $0x1380] sm:$0xff]  ;;  %v800_v33 = vld [vmem:[%s6760_s12 + $0x1388] sm:$0xff] }
 0x17e   : > { %v801_v34 = vld [vmem:[%s6760_s12 + $0x1390] sm:$0xff]  ;;  %4889 = vst [vmem:[%s6775_s17 + $0x1350] sm:$0xff] %v2841_v23  ;;  %4890 = vst [vmem:[%s6775_s17 + $0x1358] sm:$0xff] %v2842_v24  ;;  %v2847_v35 = vadd.f32 1.0, %v799_v32  ;;  %v2848_v36 = vadd.f32 1.0, %v800_v33  ;;  %v802_v38 = vld [vmem:[%s6760_s12 + $0x1398] sm:$0xff] }
 0x17f   : > { %4891 = vst [vmem:[%s6775_s17 + $0x1360] sm:$0xff] %v2843_v25  ;;  %v2849_v37 = vadd.f32 1.0, %v801_v34  ;;  %v803_v39 = vld [vmem:[%s6760_s12 + $0x13a0] sm:$0xff]  ;;  %v804_v40 = vld [vmem:[%s6760_s12 + $0x13a8] sm:$0xff]  ;;  %4892 = vst [vmem:[%s6775_s17 + $0x1368] sm:$0xff] %v2844_v29  ;;  %v2850_v41 = vadd.f32 1.0, %v802_v38 }
 0x180   : > { %4893 = vst [vmem:[%s6775_s17 + $0x1370] sm:$0xff] %v2845_v30  ;;  %4894 = vst [vmem:[%s6775_s17 + $0x1378] sm:$0xff] %v2846_v31  ;;  %v2851_v42 = vadd.f32 1.0, %v803_v39  ;;  %v2852_v43 = vadd.f32 1.0, %v804_v40  ;;  %v805_v44 = vld [vmem:[%s6760_s12 + $0x13b0] sm:$0xff]  ;;  %v806_v45 = vld [vmem:[%s6760_s12 + $0x13b8] sm:$0xff] }
 0x181   : > { %v807_v46 = vld [vmem:[%s6760_s12 + $0x13c0] sm:$0xff]  ;;  %4895 = vst [vmem:[%s6775_s17 + $0x1380] sm:$0xff] %v2847_v35  ;;  %4896 = vst [vmem:[%s6775_s17 + $0x1388] sm:$0xff] %v2848_v36  ;;  %v2853_v47 = vadd.f32 1.0, %v805_v44  ;;  %v2854_v48 = vadd.f32 1.0, %v806_v45  ;;  %v808_v50 = vld [vmem:[%s6760_s12 + $0x13c8] sm:$0xff] }
 0x182   : > { %4897 = vst [vmem:[%s6775_s17 + $0x1390] sm:$0xff] %v2849_v37  ;;  %v2855_v49 = vadd.f32 1.0, %v807_v46  ;;  %v809_v51 = vld [vmem:[%s6760_s12 + $0x13d0] sm:$0xff]  ;;  %v810_v52 = vld [vmem:[%s6760_s12 + $0x13d8] sm:$0xff]  ;;  %4898 = vst [vmem:[%s6775_s17 + $0x1398] sm:$0xff] %v2850_v41  ;;  %v2856_v53 = vadd.f32 1.0, %v808_v50 }
 0x183   : > { %4899 = vst [vmem:[%s6775_s17 + $0x13a0] sm:$0xff] %v2851_v42  ;;  %4900 = vst [vmem:[%s6775_s17 + $0x13a8] sm:$0xff] %v2852_v43  ;;  %v2857_v54 = vadd.f32 1.0, %v809_v51  ;;  %v2858_v55 = vadd.f32 1.0, %v810_v52  ;;  %v811_v56 = vld [vmem:[%s6760_s12 + $0x13e0] sm:$0xff]  ;;  %v812_v57 = vld [vmem:[%s6760_s12 + $0x13e8] sm:$0xff] }
 0x184   : > { %v813_v58 = vld [vmem:[%s6760_s12 + $0x13f0] sm:$0xff]  ;;  %4901 = vst [vmem:[%s6775_s17 + $0x13b0] sm:$0xff] %v2853_v47  ;;  %4902 = vst [vmem:[%s6775_s17 + $0x13b8] sm:$0xff] %v2854_v48  ;;  %v2859_v59 = vadd.f32 1.0, %v811_v56  ;;  %v2860_v60 = vadd.f32 1.0, %v812_v57  ;;  %v814_v62 = vld [vmem:[%s6760_s12 + $0x13f8] sm:$0xff] }
 0x185   : > { %4903 = vst [vmem:[%s6775_s17 + $0x13c0] sm:$0xff] %v2855_v49  ;;  %v2861_v61 = vadd.f32 1.0, %v813_v58  ;;  %v815_v63 = vld [vmem:[%s6760_s12 + $0x1400] sm:$0xff]  ;;  %v816_v0 = vld [vmem:[%s6760_s12 + $0x1408] sm:$0xff]  ;;  %4904 = vst [vmem:[%s6775_s17 + $0x13c8] sm:$0xff] %v2856_v53  ;;  %v2862_v1 = vadd.f32 1.0, %v814_v62 }
 0x186   : > { %4905 = vst [vmem:[%s6775_s17 + $0x13d0] sm:$0xff] %v2857_v54  ;;  %4906 = vst [vmem:[%s6775_s17 + $0x13d8] sm:$0xff] %v2858_v55  ;;  %v2863_v2 = vadd.f32 1.0, %v815_v63  ;;  %v2864_v3 = vadd.f32 1.0, %v816_v0  ;;  %v817_v4 = vld [vmem:[%s6760_s12 + $0x1410] sm:$0xff]  ;;  %v818_v5 = vld [vmem:[%s6760_s12 + $0x1418] sm:$0xff] }
 0x187   : > { %v819_v6 = vld [vmem:[%s6760_s12 + $0x1420] sm:$0xff]  ;;  %4907 = vst [vmem:[%s6775_s17 + $0x13e0] sm:$0xff] %v2859_v59  ;;  %4908 = vst [vmem:[%s6775_s17 + $0x13e8] sm:$0xff] %v2860_v60  ;;  %v2865_v7 = vadd.f32 1.0, %v817_v4  ;;  %v2866_v8 = vadd.f32 1.0, %v818_v5  ;;  %v820_v10 = vld [vmem:[%s6760_s12 + $0x1428] sm:$0xff] }
 0x188   : > { %4909 = vst [vmem:[%s6775_s17 + $0x13f0] sm:$0xff] %v2861_v61  ;;  %v2867_v9 = vadd.f32 1.0, %v819_v6  ;;  %v821_v11 = vld [vmem:[%s6760_s12 + $0x1430] sm:$0xff]  ;;  %v822_v12 = vld [vmem:[%s6760_s12 + $0x1438] sm:$0xff]  ;;  %4910 = vst [vmem:[%s6775_s17 + $0x13f8] sm:$0xff] %v2862_v1  ;;  %v2868_v13 = vadd.f32 1.0, %v820_v10 }
 0x189   : > { %4911 = vst [vmem:[%s6775_s17 + $0x1400] sm:$0xff] %v2863_v2  ;;  %4912 = vst [vmem:[%s6775_s17 + $0x1408] sm:$0xff] %v2864_v3  ;;  %v2869_v14 = vadd.f32 1.0, %v821_v11  ;;  %v2870_v15 = vadd.f32 1.0, %v822_v12  ;;  %v823_v16 = vld [vmem:[%s6760_s12 + $0x1440] sm:$0xff]  ;;  %v824_v17 = vld [vmem:[%s6760_s12 + $0x1448] sm:$0xff] }
 0x18a   : > { %v825_v18 = vld [vmem:[%s6760_s12 + $0x1450] sm:$0xff]  ;;  %4913 = vst [vmem:[%s6775_s17 + $0x1410] sm:$0xff] %v2865_v7  ;;  %4914 = vst [vmem:[%s6775_s17 + $0x1418] sm:$0xff] %v2866_v8  ;;  %v2871_v19 = vadd.f32 1.0, %v823_v16  ;;  %v2872_v20 = vadd.f32 1.0, %v824_v17  ;;  %v826_v22 = vld [vmem:[%s6760_s12 + $0x1458] sm:$0xff] }
 0x18b   : > { %4915 = vst [vmem:[%s6775_s17 + $0x1420] sm:$0xff] %v2867_v9  ;;  %v2873_v21 = vadd.f32 1.0, %v825_v18  ;;  %v827_v23 = vld [vmem:[%s6760_s12 + $0x1460] sm:$0xff]  ;;  %v828_v24 = vld [vmem:[%s6760_s12 + $0x1468] sm:$0xff]  ;;  %4916 = vst [vmem:[%s6775_s17 + $0x1428] sm:$0xff] %v2868_v13  ;;  %v2874_v25 = vadd.f32 1.0, %v826_v22 }
 0x18c   : > { %4917 = vst [vmem:[%s6775_s17 + $0x1430] sm:$0xff] %v2869_v14  ;;  %4918 = vst [vmem:[%s6775_s17 + $0x1438] sm:$0xff] %v2870_v15  ;;  %v2875_v26 = vadd.f32 1.0, %v827_v23  ;;  %v2876_v27 = vadd.f32 1.0, %v828_v24  ;;  %v829_v28 = vld [vmem:[%s6760_s12 + $0x1470] sm:$0xff]  ;;  %v830_v29 = vld [vmem:[%s6760_s12 + $0x1478] sm:$0xff] }
 0x18d   : > { %v831_v30 = vld [vmem:[%s6760_s12 + $0x1480] sm:$0xff]  ;;  %4919 = vst [vmem:[%s6775_s17 + $0x1440] sm:$0xff] %v2871_v19  ;;  %4920 = vst [vmem:[%s6775_s17 + $0x1448] sm:$0xff] %v2872_v20  ;;  %v2877_v31 = vadd.f32 1.0, %v829_v28  ;;  %v2878_v32 = vadd.f32 1.0, %v830_v29  ;;  %v832_v34 = vld [vmem:[%s6760_s12 + $0x1488] sm:$0xff] }
 0x18e   : > { %4921 = vst [vmem:[%s6775_s17 + $0x1450] sm:$0xff] %v2873_v21  ;;  %v2879_v33 = vadd.f32 1.0, %v831_v30  ;;  %v833_v35 = vld [vmem:[%s6760_s12 + $0x1490] sm:$0xff]  ;;  %v834_v36 = vld [vmem:[%s6760_s12 + $0x1498] sm:$0xff]  ;;  %4922 = vst [vmem:[%s6775_s17 + $0x1458] sm:$0xff] %v2874_v25  ;;  %v2880_v37 = vadd.f32 1.0, %v832_v34 }
 0x18f   : > { %4923 = vst [vmem:[%s6775_s17 + $0x1460] sm:$0xff] %v2875_v26  ;;  %4924 = vst [vmem:[%s6775_s17 + $0x1468] sm:$0xff] %v2876_v27  ;;  %v2881_v38 = vadd.f32 1.0, %v833_v35  ;;  %v2882_v39 = vadd.f32 1.0, %v834_v36  ;;  %v835_v40 = vld [vmem:[%s6760_s12 + $0x14a0] sm:$0xff]  ;;  %v836_v41 = vld [vmem:[%s6760_s12 + $0x14a8] sm:$0xff] }
 0x190   : > { %v837_v42 = vld [vmem:[%s6760_s12 + $0x14b0] sm:$0xff]  ;;  %4925 = vst [vmem:[%s6775_s17 + $0x1470] sm:$0xff] %v2877_v31  ;;  %4926 = vst [vmem:[%s6775_s17 + $0x1478] sm:$0xff] %v2878_v32  ;;  %v2883_v43 = vadd.f32 1.0, %v835_v40  ;;  %v2884_v44 = vadd.f32 1.0, %v836_v41  ;;  %v838_v46 = vld [vmem:[%s6760_s12 + $0x14b8] sm:$0xff] }
 0x191   : > { %4927 = vst [vmem:[%s6775_s17 + $0x1480] sm:$0xff] %v2879_v33  ;;  %v2885_v45 = vadd.f32 1.0, %v837_v42  ;;  %v839_v47 = vld [vmem:[%s6760_s12 + $0x14c0] sm:$0xff]  ;;  %v840_v48 = vld [vmem:[%s6760_s12 + $0x14c8] sm:$0xff]  ;;  %4928 = vst [vmem:[%s6775_s17 + $0x1488] sm:$0xff] %v2880_v37  ;;  %v2886_v49 = vadd.f32 1.0, %v838_v46 }
 0x192   : > { %4929 = vst [vmem:[%s6775_s17 + $0x1490] sm:$0xff] %v2881_v38  ;;  %4930 = vst [vmem:[%s6775_s17 + $0x1498] sm:$0xff] %v2882_v39  ;;  %v2887_v50 = vadd.f32 1.0, %v839_v47  ;;  %v2888_v51 = vadd.f32 1.0, %v840_v48  ;;  %v841_v52 = vld [vmem:[%s6760_s12 + $0x14d0] sm:$0xff]  ;;  %v842_v53 = vld [vmem:[%s6760_s12 + $0x14d8] sm:$0xff] }
 0x193   : > { %v843_v54 = vld [vmem:[%s6760_s12 + $0x14e0] sm:$0xff]  ;;  %4931 = vst [vmem:[%s6775_s17 + $0x14a0] sm:$0xff] %v2883_v43  ;;  %4932 = vst [vmem:[%s6775_s17 + $0x14a8] sm:$0xff] %v2884_v44  ;;  %v2889_v55 = vadd.f32 1.0, %v841_v52  ;;  %v2890_v56 = vadd.f32 1.0, %v842_v53  ;;  %v844_v58 = vld [vmem:[%s6760_s12 + $0x14e8] sm:$0xff] }
 0x194   : > { %4933 = vst [vmem:[%s6775_s17 + $0x14b0] sm:$0xff] %v2885_v45  ;;  %v2891_v57 = vadd.f32 1.0, %v843_v54  ;;  %v845_v59 = vld [vmem:[%s6760_s12 + $0x14f0] sm:$0xff]  ;;  %v846_v60 = vld [vmem:[%s6760_s12 + $0x14f8] sm:$0xff]  ;;  %4934 = vst [vmem:[%s6775_s17 + $0x14b8] sm:$0xff] %v2886_v49  ;;  %v2892_v61 = vadd.f32 1.0, %v844_v58 }
 0x195   : > { %4935 = vst [vmem:[%s6775_s17 + $0x14c0] sm:$0xff] %v2887_v50  ;;  %4936 = vst [vmem:[%s6775_s17 + $0x14c8] sm:$0xff] %v2888_v51  ;;  %v2893_v62 = vadd.f32 1.0, %v845_v59  ;;  %v2894_v63 = vadd.f32 1.0, %v846_v60  ;;  %v847_v0 = vld [vmem:[%s6760_s12 + $0x1500] sm:$0xff]  ;;  %v848_v1 = vld [vmem:[%s6760_s12 + $0x1508] sm:$0xff] }
 0x196   : > { %v849_v2 = vld [vmem:[%s6760_s12 + $0x1510] sm:$0xff]  ;;  %4937 = vst [vmem:[%s6775_s17 + $0x14d0] sm:$0xff] %v2889_v55  ;;  %4938 = vst [vmem:[%s6775_s17 + $0x14d8] sm:$0xff] %v2890_v56  ;;  %v2895_v3 = vadd.f32 1.0, %v847_v0  ;;  %v2896_v4 = vadd.f32 1.0, %v848_v1  ;;  %v850_v6 = vld [vmem:[%s6760_s12 + $0x1518] sm:$0xff] }
 0x197   : > { %4939 = vst [vmem:[%s6775_s17 + $0x14e0] sm:$0xff] %v2891_v57  ;;  %v2897_v5 = vadd.f32 1.0, %v849_v2  ;;  %v851_v7 = vld [vmem:[%s6760_s12 + $0x1520] sm:$0xff]  ;;  %v852_v8 = vld [vmem:[%s6760_s12 + $0x1528] sm:$0xff]  ;;  %4940 = vst [vmem:[%s6775_s17 + $0x14e8] sm:$0xff] %v2892_v61  ;;  %v2898_v9 = vadd.f32 1.0, %v850_v6 }
 0x198   : > { %4941 = vst [vmem:[%s6775_s17 + $0x14f0] sm:$0xff] %v2893_v62  ;;  %4942 = vst [vmem:[%s6775_s17 + $0x14f8] sm:$0xff] %v2894_v63  ;;  %v2899_v10 = vadd.f32 1.0, %v851_v7  ;;  %v2900_v11 = vadd.f32 1.0, %v852_v8  ;;  %v853_v12 = vld [vmem:[%s6760_s12 + $0x1530] sm:$0xff]  ;;  %v854_v13 = vld [vmem:[%s6760_s12 + $0x1538] sm:$0xff] }
 0x199   : > { %v855_v14 = vld [vmem:[%s6760_s12 + $0x1540] sm:$0xff]  ;;  %4943 = vst [vmem:[%s6775_s17 + $0x1500] sm:$0xff] %v2895_v3  ;;  %4944 = vst [vmem:[%s6775_s17 + $0x1508] sm:$0xff] %v2896_v4  ;;  %v2901_v15 = vadd.f32 1.0, %v853_v12  ;;  %v2902_v16 = vadd.f32 1.0, %v854_v13  ;;  %v856_v18 = vld [vmem:[%s6760_s12 + $0x1548] sm:$0xff] }
 0x19a   : > { %4945 = vst [vmem:[%s6775_s17 + $0x1510] sm:$0xff] %v2897_v5  ;;  %v2903_v17 = vadd.f32 1.0, %v855_v14  ;;  %v857_v19 = vld [vmem:[%s6760_s12 + $0x1550] sm:$0xff]  ;;  %v858_v20 = vld [vmem:[%s6760_s12 + $0x1558] sm:$0xff]  ;;  %4946 = vst [vmem:[%s6775_s17 + $0x1518] sm:$0xff] %v2898_v9  ;;  %v2904_v21 = vadd.f32 1.0, %v856_v18 }
 0x19b   : > { %4947 = vst [vmem:[%s6775_s17 + $0x1520] sm:$0xff] %v2899_v10  ;;  %4948 = vst [vmem:[%s6775_s17 + $0x1528] sm:$0xff] %v2900_v11  ;;  %v2905_v22 = vadd.f32 1.0, %v857_v19  ;;  %v2906_v23 = vadd.f32 1.0, %v858_v20  ;;  %v859_v24 = vld [vmem:[%s6760_s12 + $0x1560] sm:$0xff]  ;;  %v860_v25 = vld [vmem:[%s6760_s12 + $0x1568] sm:$0xff] }
 0x19c   : > { %v861_v26 = vld [vmem:[%s6760_s12 + $0x1570] sm:$0xff]  ;;  %4949 = vst [vmem:[%s6775_s17 + $0x1530] sm:$0xff] %v2901_v15  ;;  %4950 = vst [vmem:[%s6775_s17 + $0x1538] sm:$0xff] %v2902_v16  ;;  %v2907_v27 = vadd.f32 1.0, %v859_v24  ;;  %v2908_v28 = vadd.f32 1.0, %v860_v25  ;;  %v862_v30 = vld [vmem:[%s6760_s12 + $0x1578] sm:$0xff] }
 0x19d   : > { %4951 = vst [vmem:[%s6775_s17 + $0x1540] sm:$0xff] %v2903_v17  ;;  %v2909_v29 = vadd.f32 1.0, %v861_v26  ;;  %v863_v31 = vld [vmem:[%s6760_s12 + $0x1580] sm:$0xff]  ;;  %v864_v32 = vld [vmem:[%s6760_s12 + $0x1588] sm:$0xff]  ;;  %4952 = vst [vmem:[%s6775_s17 + $0x1548] sm:$0xff] %v2904_v21  ;;  %v2910_v33 = vadd.f32 1.0, %v862_v30 }
 0x19e   : > { %4953 = vst [vmem:[%s6775_s17 + $0x1550] sm:$0xff] %v2905_v22  ;;  %4954 = vst [vmem:[%s6775_s17 + $0x1558] sm:$0xff] %v2906_v23  ;;  %v2911_v34 = vadd.f32 1.0, %v863_v31  ;;  %v2912_v35 = vadd.f32 1.0, %v864_v32  ;;  %v865_v36 = vld [vmem:[%s6760_s12 + $0x1590] sm:$0xff]  ;;  %v866_v37 = vld [vmem:[%s6760_s12 + $0x1598] sm:$0xff] }
 0x19f   : > { %v867_v38 = vld [vmem:[%s6760_s12 + $0x15a0] sm:$0xff]  ;;  %4955 = vst [vmem:[%s6775_s17 + $0x1560] sm:$0xff] %v2907_v27  ;;  %4956 = vst [vmem:[%s6775_s17 + $0x1568] sm:$0xff] %v2908_v28  ;;  %v2913_v39 = vadd.f32 1.0, %v865_v36  ;;  %v2914_v40 = vadd.f32 1.0, %v866_v37  ;;  %v868_v42 = vld [vmem:[%s6760_s12 + $0x15a8] sm:$0xff] }
 0x1a0   : > { %4957 = vst [vmem:[%s6775_s17 + $0x1570] sm:$0xff] %v2909_v29  ;;  %v2915_v41 = vadd.f32 1.0, %v867_v38  ;;  %v869_v43 = vld [vmem:[%s6760_s12 + $0x15b0] sm:$0xff]  ;;  %v870_v44 = vld [vmem:[%s6760_s12 + $0x15b8] sm:$0xff]  ;;  %4958 = vst [vmem:[%s6775_s17 + $0x1578] sm:$0xff] %v2910_v33  ;;  %v2916_v45 = vadd.f32 1.0, %v868_v42 }
 0x1a1   : > { %4959 = vst [vmem:[%s6775_s17 + $0x1580] sm:$0xff] %v2911_v34  ;;  %4960 = vst [vmem:[%s6775_s17 + $0x1588] sm:$0xff] %v2912_v35  ;;  %v2917_v46 = vadd.f32 1.0, %v869_v43  ;;  %v2918_v47 = vadd.f32 1.0, %v870_v44  ;;  %v871_v48 = vld [vmem:[%s6760_s12 + $0x15c0] sm:$0xff]  ;;  %v872_v49 = vld [vmem:[%s6760_s12 + $0x15c8] sm:$0xff] }
 0x1a2   : > { %v873_v50 = vld [vmem:[%s6760_s12 + $0x15d0] sm:$0xff]  ;;  %4961 = vst [vmem:[%s6775_s17 + $0x1590] sm:$0xff] %v2913_v39  ;;  %4962 = vst [vmem:[%s6775_s17 + $0x1598] sm:$0xff] %v2914_v40  ;;  %v2919_v51 = vadd.f32 1.0, %v871_v48  ;;  %v2920_v52 = vadd.f32 1.0, %v872_v49  ;;  %v874_v54 = vld [vmem:[%s6760_s12 + $0x15d8] sm:$0xff] }
 0x1a3   : > { %4963 = vst [vmem:[%s6775_s17 + $0x15a0] sm:$0xff] %v2915_v41  ;;  %v2921_v53 = vadd.f32 1.0, %v873_v50  ;;  %v875_v55 = vld [vmem:[%s6760_s12 + $0x15e0] sm:$0xff]  ;;  %v876_v56 = vld [vmem:[%s6760_s12 + $0x15e8] sm:$0xff]  ;;  %4964 = vst [vmem:[%s6775_s17 + $0x15a8] sm:$0xff] %v2916_v45  ;;  %v2922_v57 = vadd.f32 1.0, %v874_v54 }
 0x1a4   : > { %4965 = vst [vmem:[%s6775_s17 + $0x15b0] sm:$0xff] %v2917_v46  ;;  %4966 = vst [vmem:[%s6775_s17 + $0x15b8] sm:$0xff] %v2918_v47  ;;  %v2923_v58 = vadd.f32 1.0, %v875_v55  ;;  %v2924_v59 = vadd.f32 1.0, %v876_v56  ;;  %v877_v60 = vld [vmem:[%s6760_s12 + $0x15f0] sm:$0xff]  ;;  %v878_v61 = vld [vmem:[%s6760_s12 + $0x15f8] sm:$0xff] }
 0x1a5   : > { %v879_v62 = vld [vmem:[%s6760_s12 + $0x1600] sm:$0xff]  ;;  %4967 = vst [vmem:[%s6775_s17 + $0x15c0] sm:$0xff] %v2919_v51  ;;  %4968 = vst [vmem:[%s6775_s17 + $0x15c8] sm:$0xff] %v2920_v52  ;;  %v2925_v63 = vadd.f32 1.0, %v877_v60  ;;  %v2926_v0 = vadd.f32 1.0, %v878_v61  ;;  %v880_v2 = vld [vmem:[%s6760_s12 + $0x1608] sm:$0xff] }
 0x1a6   : > { %4969 = vst [vmem:[%s6775_s17 + $0x15d0] sm:$0xff] %v2921_v53  ;;  %v2927_v1 = vadd.f32 1.0, %v879_v62  ;;  %v881_v3 = vld [vmem:[%s6760_s12 + $0x1610] sm:$0xff]  ;;  %v882_v4 = vld [vmem:[%s6760_s12 + $0x1618] sm:$0xff]  ;;  %4970 = vst [vmem:[%s6775_s17 + $0x15d8] sm:$0xff] %v2922_v57  ;;  %v2928_v5 = vadd.f32 1.0, %v880_v2 }
 0x1a7   : > { %4971 = vst [vmem:[%s6775_s17 + $0x15e0] sm:$0xff] %v2923_v58  ;;  %4972 = vst [vmem:[%s6775_s17 + $0x15e8] sm:$0xff] %v2924_v59  ;;  %v2929_v6 = vadd.f32 1.0, %v881_v3  ;;  %v2930_v7 = vadd.f32 1.0, %v882_v4  ;;  %v883_v8 = vld [vmem:[%s6760_s12 + $0x1620] sm:$0xff]  ;;  %v884_v9 = vld [vmem:[%s6760_s12 + $0x1628] sm:$0xff] }
 0x1a8   : > { %v885_v10 = vld [vmem:[%s6760_s12 + $0x1630] sm:$0xff]  ;;  %4973 = vst [vmem:[%s6775_s17 + $0x15f0] sm:$0xff] %v2925_v63  ;;  %4974 = vst [vmem:[%s6775_s17 + $0x15f8] sm:$0xff] %v2926_v0  ;;  %v2931_v11 = vadd.f32 1.0, %v883_v8  ;;  %v2932_v12 = vadd.f32 1.0, %v884_v9  ;;  %v886_v14 = vld [vmem:[%s6760_s12 + $0x1638] sm:$0xff] }
 0x1a9   : > { %4975 = vst [vmem:[%s6775_s17 + $0x1600] sm:$0xff] %v2927_v1  ;;  %v2933_v13 = vadd.f32 1.0, %v885_v10  ;;  %v887_v15 = vld [vmem:[%s6760_s12 + $0x1640] sm:$0xff]  ;;  %v888_v16 = vld [vmem:[%s6760_s12 + $0x1648] sm:$0xff]  ;;  %4976 = vst [vmem:[%s6775_s17 + $0x1608] sm:$0xff] %v2928_v5  ;;  %v2934_v17 = vadd.f32 1.0, %v886_v14 }
 0x1aa   : > { %4977 = vst [vmem:[%s6775_s17 + $0x1610] sm:$0xff] %v2929_v6  ;;  %4978 = vst [vmem:[%s6775_s17 + $0x1618] sm:$0xff] %v2930_v7  ;;  %v2935_v18 = vadd.f32 1.0, %v887_v15  ;;  %v2936_v19 = vadd.f32 1.0, %v888_v16  ;;  %v889_v20 = vld [vmem:[%s6760_s12 + $0x1650] sm:$0xff]  ;;  %v890_v21 = vld [vmem:[%s6760_s12 + $0x1658] sm:$0xff] }
 0x1ab   : > { %v891_v22 = vld [vmem:[%s6760_s12 + $0x1660] sm:$0xff]  ;;  %4979 = vst [vmem:[%s6775_s17 + $0x1620] sm:$0xff] %v2931_v11  ;;  %4980 = vst [vmem:[%s6775_s17 + $0x1628] sm:$0xff] %v2932_v12  ;;  %v2937_v23 = vadd.f32 1.0, %v889_v20  ;;  %v2938_v24 = vadd.f32 1.0, %v890_v21  ;;  %v892_v26 = vld [vmem:[%s6760_s12 + $0x1668] sm:$0xff] }
 0x1ac   : > { %4981 = vst [vmem:[%s6775_s17 + $0x1630] sm:$0xff] %v2933_v13  ;;  %v2939_v25 = vadd.f32 1.0, %v891_v22  ;;  %v893_v27 = vld [vmem:[%s6760_s12 + $0x1670] sm:$0xff]  ;;  %v894_v28 = vld [vmem:[%s6760_s12 + $0x1678] sm:$0xff]  ;;  %4982 = vst [vmem:[%s6775_s17 + $0x1638] sm:$0xff] %v2934_v17  ;;  %v2940_v29 = vadd.f32 1.0, %v892_v26 }
 0x1ad   : > { %4983 = vst [vmem:[%s6775_s17 + $0x1640] sm:$0xff] %v2935_v18  ;;  %4984 = vst [vmem:[%s6775_s17 + $0x1648] sm:$0xff] %v2936_v19  ;;  %v2941_v30 = vadd.f32 1.0, %v893_v27  ;;  %v2942_v31 = vadd.f32 1.0, %v894_v28  ;;  %v895_v32 = vld [vmem:[%s6760_s12 + $0x1680] sm:$0xff]  ;;  %v896_v33 = vld [vmem:[%s6760_s12 + $0x1688] sm:$0xff] }
 0x1ae   : > { %v897_v34 = vld [vmem:[%s6760_s12 + $0x1690] sm:$0xff]  ;;  %4985 = vst [vmem:[%s6775_s17 + $0x1650] sm:$0xff] %v2937_v23  ;;  %4986 = vst [vmem:[%s6775_s17 + $0x1658] sm:$0xff] %v2938_v24  ;;  %v2943_v35 = vadd.f32 1.0, %v895_v32  ;;  %v2944_v36 = vadd.f32 1.0, %v896_v33  ;;  %v898_v38 = vld [vmem:[%s6760_s12 + $0x1698] sm:$0xff] }
 0x1af   : > { %4987 = vst [vmem:[%s6775_s17 + $0x1660] sm:$0xff] %v2939_v25  ;;  %v2945_v37 = vadd.f32 1.0, %v897_v34  ;;  %v899_v39 = vld [vmem:[%s6760_s12 + $0x16a0] sm:$0xff]  ;;  %v900_v40 = vld [vmem:[%s6760_s12 + $0x16a8] sm:$0xff]  ;;  %4988 = vst [vmem:[%s6775_s17 + $0x1668] sm:$0xff] %v2940_v29  ;;  %v2946_v41 = vadd.f32 1.0, %v898_v38 }
 0x1b0   : > { %4989 = vst [vmem:[%s6775_s17 + $0x1670] sm:$0xff] %v2941_v30  ;;  %4990 = vst [vmem:[%s6775_s17 + $0x1678] sm:$0xff] %v2942_v31  ;;  %v2947_v42 = vadd.f32 1.0, %v899_v39  ;;  %v2948_v43 = vadd.f32 1.0, %v900_v40  ;;  %v901_v44 = vld [vmem:[%s6760_s12 + $0x16b0] sm:$0xff]  ;;  %v902_v45 = vld [vmem:[%s6760_s12 + $0x16b8] sm:$0xff] }
 0x1b1   : > { %v903_v46 = vld [vmem:[%s6760_s12 + $0x16c0] sm:$0xff]  ;;  %4991 = vst [vmem:[%s6775_s17 + $0x1680] sm:$0xff] %v2943_v35  ;;  %4992 = vst [vmem:[%s6775_s17 + $0x1688] sm:$0xff] %v2944_v36  ;;  %v2949_v47 = vadd.f32 1.0, %v901_v44  ;;  %v2950_v48 = vadd.f32 1.0, %v902_v45  ;;  %v904_v50 = vld [vmem:[%s6760_s12 + $0x16c8] sm:$0xff] }
 0x1b2   : > { %4993 = vst [vmem:[%s6775_s17 + $0x1690] sm:$0xff] %v2945_v37  ;;  %v2951_v49 = vadd.f32 1.0, %v903_v46  ;;  %v905_v51 = vld [vmem:[%s6760_s12 + $0x16d0] sm:$0xff]  ;;  %v906_v52 = vld [vmem:[%s6760_s12 + $0x16d8] sm:$0xff]  ;;  %4994 = vst [vmem:[%s6775_s17 + $0x1698] sm:$0xff] %v2946_v41  ;;  %v2952_v53 = vadd.f32 1.0, %v904_v50 }
 0x1b3   : > { %4995 = vst [vmem:[%s6775_s17 + $0x16a0] sm:$0xff] %v2947_v42  ;;  %4996 = vst [vmem:[%s6775_s17 + $0x16a8] sm:$0xff] %v2948_v43  ;;  %v2953_v54 = vadd.f32 1.0, %v905_v51  ;;  %v2954_v55 = vadd.f32 1.0, %v906_v52  ;;  %v907_v56 = vld [vmem:[%s6760_s12 + $0x16e0] sm:$0xff]  ;;  %v908_v57 = vld [vmem:[%s6760_s12 + $0x16e8] sm:$0xff] }
 0x1b4   : > { %v909_v58 = vld [vmem:[%s6760_s12 + $0x16f0] sm:$0xff]  ;;  %4997 = vst [vmem:[%s6775_s17 + $0x16b0] sm:$0xff] %v2949_v47  ;;  %4998 = vst [vmem:[%s6775_s17 + $0x16b8] sm:$0xff] %v2950_v48  ;;  %v2955_v59 = vadd.f32 1.0, %v907_v56  ;;  %v2956_v60 = vadd.f32 1.0, %v908_v57  ;;  %v910_v62 = vld [vmem:[%s6760_s12 + $0x16f8] sm:$0xff] }
 0x1b5   : > { %4999 = vst [vmem:[%s6775_s17 + $0x16c0] sm:$0xff] %v2951_v49  ;;  %v2957_v61 = vadd.f32 1.0, %v909_v58  ;;  %v911_v63 = vld [vmem:[%s6760_s12 + $0x1700] sm:$0xff]  ;;  %v912_v0 = vld [vmem:[%s6760_s12 + $0x1708] sm:$0xff]  ;;  %5000 = vst [vmem:[%s6775_s17 + $0x16c8] sm:$0xff] %v2952_v53  ;;  %v2958_v1 = vadd.f32 1.0, %v910_v62 }
 0x1b6   : > { %5001 = vst [vmem:[%s6775_s17 + $0x16d0] sm:$0xff] %v2953_v54  ;;  %5002 = vst [vmem:[%s6775_s17 + $0x16d8] sm:$0xff] %v2954_v55  ;;  %v2959_v2 = vadd.f32 1.0, %v911_v63  ;;  %v2960_v3 = vadd.f32 1.0, %v912_v0  ;;  %v913_v4 = vld [vmem:[%s6760_s12 + $0x1710] sm:$0xff]  ;;  %v914_v5 = vld [vmem:[%s6760_s12 + $0x1718] sm:$0xff] }
 0x1b7   : > { %v915_v6 = vld [vmem:[%s6760_s12 + $0x1720] sm:$0xff]  ;;  %5003 = vst [vmem:[%s6775_s17 + $0x16e0] sm:$0xff] %v2955_v59  ;;  %5004 = vst [vmem:[%s6775_s17 + $0x16e8] sm:$0xff] %v2956_v60  ;;  %v2961_v7 = vadd.f32 1.0, %v913_v4  ;;  %v2962_v8 = vadd.f32 1.0, %v914_v5  ;;  %v916_v10 = vld [vmem:[%s6760_s12 + $0x1728] sm:$0xff] }
 0x1b8   : > { %5005 = vst [vmem:[%s6775_s17 + $0x16f0] sm:$0xff] %v2957_v61  ;;  %v2963_v9 = vadd.f32 1.0, %v915_v6  ;;  %v917_v11 = vld [vmem:[%s6760_s12 + $0x1730] sm:$0xff]  ;;  %v918_v12 = vld [vmem:[%s6760_s12 + $0x1738] sm:$0xff]  ;;  %5006 = vst [vmem:[%s6775_s17 + $0x16f8] sm:$0xff] %v2958_v1  ;;  %v2964_v13 = vadd.f32 1.0, %v916_v10 }
 0x1b9   : > { %5007 = vst [vmem:[%s6775_s17 + $0x1700] sm:$0xff] %v2959_v2  ;;  %5008 = vst [vmem:[%s6775_s17 + $0x1708] sm:$0xff] %v2960_v3  ;;  %v2965_v14 = vadd.f32 1.0, %v917_v11  ;;  %v2966_v15 = vadd.f32 1.0, %v918_v12  ;;  %v919_v16 = vld [vmem:[%s6760_s12 + $0x1740] sm:$0xff]  ;;  %v920_v17 = vld [vmem:[%s6760_s12 + $0x1748] sm:$0xff] }
 0x1ba   : > { %v921_v18 = vld [vmem:[%s6760_s12 + $0x1750] sm:$0xff]  ;;  %5009 = vst [vmem:[%s6775_s17 + $0x1710] sm:$0xff] %v2961_v7  ;;  %5010 = vst [vmem:[%s6775_s17 + $0x1718] sm:$0xff] %v2962_v8  ;;  %v2967_v19 = vadd.f32 1.0, %v919_v16  ;;  %v2968_v20 = vadd.f32 1.0, %v920_v17  ;;  %v922_v22 = vld [vmem:[%s6760_s12 + $0x1758] sm:$0xff] }
 0x1bb   : > { %5011 = vst [vmem:[%s6775_s17 + $0x1720] sm:$0xff] %v2963_v9  ;;  %v2969_v21 = vadd.f32 1.0, %v921_v18  ;;  %v923_v23 = vld [vmem:[%s6760_s12 + $0x1760] sm:$0xff]  ;;  %v924_v24 = vld [vmem:[%s6760_s12 + $0x1768] sm:$0xff]  ;;  %5012 = vst [vmem:[%s6775_s17 + $0x1728] sm:$0xff] %v2964_v13  ;;  %v2970_v25 = vadd.f32 1.0, %v922_v22 }
 0x1bc   : > { %5013 = vst [vmem:[%s6775_s17 + $0x1730] sm:$0xff] %v2965_v14  ;;  %5014 = vst [vmem:[%s6775_s17 + $0x1738] sm:$0xff] %v2966_v15  ;;  %v2971_v26 = vadd.f32 1.0, %v923_v23  ;;  %v2972_v27 = vadd.f32 1.0, %v924_v24  ;;  %v925_v28 = vld [vmem:[%s6760_s12 + $0x1770] sm:$0xff]  ;;  %v926_v29 = vld [vmem:[%s6760_s12 + $0x1778] sm:$0xff] }
 0x1bd   : > { %v927_v30 = vld [vmem:[%s6760_s12 + $0x1780] sm:$0xff]  ;;  %5015 = vst [vmem:[%s6775_s17 + $0x1740] sm:$0xff] %v2967_v19  ;;  %5016 = vst [vmem:[%s6775_s17 + $0x1748] sm:$0xff] %v2968_v20  ;;  %v2973_v31 = vadd.f32 1.0, %v925_v28  ;;  %v2974_v32 = vadd.f32 1.0, %v926_v29  ;;  %v928_v34 = vld [vmem:[%s6760_s12 + $0x1788] sm:$0xff] }
 0x1be   : > { %5017 = vst [vmem:[%s6775_s17 + $0x1750] sm:$0xff] %v2969_v21  ;;  %v2975_v33 = vadd.f32 1.0, %v927_v30  ;;  %v929_v35 = vld [vmem:[%s6760_s12 + $0x1790] sm:$0xff]  ;;  %v930_v36 = vld [vmem:[%s6760_s12 + $0x1798] sm:$0xff]  ;;  %5018 = vst [vmem:[%s6775_s17 + $0x1758] sm:$0xff] %v2970_v25  ;;  %v2976_v37 = vadd.f32 1.0, %v928_v34 }
 0x1bf   : > { %5019 = vst [vmem:[%s6775_s17 + $0x1760] sm:$0xff] %v2971_v26  ;;  %5020 = vst [vmem:[%s6775_s17 + $0x1768] sm:$0xff] %v2972_v27  ;;  %v2977_v38 = vadd.f32 1.0, %v929_v35  ;;  %v2978_v39 = vadd.f32 1.0, %v930_v36  ;;  %v931_v40 = vld [vmem:[%s6760_s12 + $0x17a0] sm:$0xff]  ;;  %v932_v41 = vld [vmem:[%s6760_s12 + $0x17a8] sm:$0xff] }
 0x1c0   : > { %v933_v42 = vld [vmem:[%s6760_s12 + $0x17b0] sm:$0xff]  ;;  %5021 = vst [vmem:[%s6775_s17 + $0x1770] sm:$0xff] %v2973_v31  ;;  %5022 = vst [vmem:[%s6775_s17 + $0x1778] sm:$0xff] %v2974_v32  ;;  %v2979_v43 = vadd.f32 1.0, %v931_v40  ;;  %v2980_v44 = vadd.f32 1.0, %v932_v41  ;;  %v934_v46 = vld [vmem:[%s6760_s12 + $0x17b8] sm:$0xff] }
 0x1c1   : > { %5023 = vst [vmem:[%s6775_s17 + $0x1780] sm:$0xff] %v2975_v33  ;;  %v2981_v45 = vadd.f32 1.0, %v933_v42  ;;  %v935_v47 = vld [vmem:[%s6760_s12 + $0x17c0] sm:$0xff]  ;;  %v936_v48 = vld [vmem:[%s6760_s12 + $0x17c8] sm:$0xff]  ;;  %5024 = vst [vmem:[%s6775_s17 + $0x1788] sm:$0xff] %v2976_v37  ;;  %v2982_v49 = vadd.f32 1.0, %v934_v46 }
 0x1c2   : > { %5025 = vst [vmem:[%s6775_s17 + $0x1790] sm:$0xff] %v2977_v38  ;;  %5026 = vst [vmem:[%s6775_s17 + $0x1798] sm:$0xff] %v2978_v39  ;;  %v2983_v50 = vadd.f32 1.0, %v935_v47  ;;  %v2984_v51 = vadd.f32 1.0, %v936_v48  ;;  %v937_v52 = vld [vmem:[%s6760_s12 + $0x17d0] sm:$0xff]  ;;  %v938_v53 = vld [vmem:[%s6760_s12 + $0x17d8] sm:$0xff] }
 0x1c3   : > { %v939_v54 = vld [vmem:[%s6760_s12 + $0x17e0] sm:$0xff]  ;;  %5027 = vst [vmem:[%s6775_s17 + $0x17a0] sm:$0xff] %v2979_v43  ;;  %5028 = vst [vmem:[%s6775_s17 + $0x17a8] sm:$0xff] %v2980_v44  ;;  %v2985_v55 = vadd.f32 1.0, %v937_v52  ;;  %v2986_v56 = vadd.f32 1.0, %v938_v53  ;;  %v940_v58 = vld [vmem:[%s6760_s12 + $0x17e8] sm:$0xff] }
 0x1c4   : > { %5029 = vst [vmem:[%s6775_s17 + $0x17b0] sm:$0xff] %v2981_v45  ;;  %v2987_v57 = vadd.f32 1.0, %v939_v54  ;;  %v941_v59 = vld [vmem:[%s6760_s12 + $0x17f0] sm:$0xff]  ;;  %v942_v60 = vld [vmem:[%s6760_s12 + $0x17f8] sm:$0xff]  ;;  %5030 = vst [vmem:[%s6775_s17 + $0x17b8] sm:$0xff] %v2982_v49  ;;  %v2988_v61 = vadd.f32 1.0, %v940_v58 }
 0x1c5   : > { %5031 = vst [vmem:[%s6775_s17 + $0x17c0] sm:$0xff] %v2983_v50  ;;  %5032 = vst [vmem:[%s6775_s17 + $0x17c8] sm:$0xff] %v2984_v51  ;;  %v2989_v62 = vadd.f32 1.0, %v941_v59  ;;  %v2990_v63 = vadd.f32 1.0, %v942_v60  ;;  %v943_v0 = vld [vmem:[%s6760_s12 + $0x1800] sm:$0xff]  ;;  %v944_v1 = vld [vmem:[%s6760_s12 + $0x1808] sm:$0xff] }
 0x1c6   : > { %v945_v2 = vld [vmem:[%s6760_s12 + $0x1810] sm:$0xff]  ;;  %5033 = vst [vmem:[%s6775_s17 + $0x17d0] sm:$0xff] %v2985_v55  ;;  %5034 = vst [vmem:[%s6775_s17 + $0x17d8] sm:$0xff] %v2986_v56  ;;  %v2991_v3 = vadd.f32 1.0, %v943_v0  ;;  %v2992_v4 = vadd.f32 1.0, %v944_v1  ;;  %v946_v6 = vld [vmem:[%s6760_s12 + $0x1818] sm:$0xff] }
 0x1c7   : > { %5035 = vst [vmem:[%s6775_s17 + $0x17e0] sm:$0xff] %v2987_v57  ;;  %v2993_v5 = vadd.f32 1.0, %v945_v2  ;;  %v947_v7 = vld [vmem:[%s6760_s12 + $0x1820] sm:$0xff]  ;;  %v948_v8 = vld [vmem:[%s6760_s12 + $0x1828] sm:$0xff]  ;;  %5036 = vst [vmem:[%s6775_s17 + $0x17e8] sm:$0xff] %v2988_v61  ;;  %v2994_v9 = vadd.f32 1.0, %v946_v6 }
 0x1c8   : > { %5037 = vst [vmem:[%s6775_s17 + $0x17f0] sm:$0xff] %v2989_v62  ;;  %5038 = vst [vmem:[%s6775_s17 + $0x17f8] sm:$0xff] %v2990_v63  ;;  %v2995_v10 = vadd.f32 1.0, %v947_v7  ;;  %v2996_v11 = vadd.f32 1.0, %v948_v8  ;;  %v949_v12 = vld [vmem:[%s6760_s12 + $0x1830] sm:$0xff]  ;;  %v950_v13 = vld [vmem:[%s6760_s12 + $0x1838] sm:$0xff] }
 0x1c9   : > { %v951_v14 = vld [vmem:[%s6760_s12 + $0x1840] sm:$0xff]  ;;  %5039 = vst [vmem:[%s6775_s17 + $0x1800] sm:$0xff] %v2991_v3  ;;  %5040 = vst [vmem:[%s6775_s17 + $0x1808] sm:$0xff] %v2992_v4  ;;  %v2997_v15 = vadd.f32 1.0, %v949_v12  ;;  %v2998_v16 = vadd.f32 1.0, %v950_v13  ;;  %v952_v18 = vld [vmem:[%s6760_s12 + $0x1848] sm:$0xff] }
 0x1ca   : > { %5041 = vst [vmem:[%s6775_s17 + $0x1810] sm:$0xff] %v2993_v5  ;;  %v2999_v17 = vadd.f32 1.0, %v951_v14  ;;  %v953_v19 = vld [vmem:[%s6760_s12 + $0x1850] sm:$0xff]  ;;  %v954_v20 = vld [vmem:[%s6760_s12 + $0x1858] sm:$0xff]  ;;  %5042 = vst [vmem:[%s6775_s17 + $0x1818] sm:$0xff] %v2994_v9  ;;  %v3000_v21 = vadd.f32 1.0, %v952_v18 }
 0x1cb   : > { %5043 = vst [vmem:[%s6775_s17 + $0x1820] sm:$0xff] %v2995_v10  ;;  %5044 = vst [vmem:[%s6775_s17 + $0x1828] sm:$0xff] %v2996_v11  ;;  %v3001_v22 = vadd.f32 1.0, %v953_v19  ;;  %v3002_v23 = vadd.f32 1.0, %v954_v20  ;;  %v955_v24 = vld [vmem:[%s6760_s12 + $0x1860] sm:$0xff]  ;;  %v956_v25 = vld [vmem:[%s6760_s12 + $0x1868] sm:$0xff] }
 0x1cc   : > { %v957_v26 = vld [vmem:[%s6760_s12 + $0x1870] sm:$0xff]  ;;  %5045 = vst [vmem:[%s6775_s17 + $0x1830] sm:$0xff] %v2997_v15  ;;  %5046 = vst [vmem:[%s6775_s17 + $0x1838] sm:$0xff] %v2998_v16  ;;  %v3003_v27 = vadd.f32 1.0, %v955_v24  ;;  %v3004_v28 = vadd.f32 1.0, %v956_v25  ;;  %v958_v30 = vld [vmem:[%s6760_s12 + $0x1878] sm:$0xff] }
 0x1cd   : > { %5047 = vst [vmem:[%s6775_s17 + $0x1840] sm:$0xff] %v2999_v17  ;;  %v3005_v29 = vadd.f32 1.0, %v957_v26  ;;  %v959_v31 = vld [vmem:[%s6760_s12 + $0x1880] sm:$0xff]  ;;  %v960_v32 = vld [vmem:[%s6760_s12 + $0x1888] sm:$0xff]  ;;  %5048 = vst [vmem:[%s6775_s17 + $0x1848] sm:$0xff] %v3000_v21  ;;  %v3006_v33 = vadd.f32 1.0, %v958_v30 }
 0x1ce   : > { %5049 = vst [vmem:[%s6775_s17 + $0x1850] sm:$0xff] %v3001_v22  ;;  %5050 = vst [vmem:[%s6775_s17 + $0x1858] sm:$0xff] %v3002_v23  ;;  %v3007_v34 = vadd.f32 1.0, %v959_v31  ;;  %v3008_v35 = vadd.f32 1.0, %v960_v32  ;;  %v961_v36 = vld [vmem:[%s6760_s12 + $0x1890] sm:$0xff]  ;;  %v962_v37 = vld [vmem:[%s6760_s12 + $0x1898] sm:$0xff] }
 0x1cf   : > { %v963_v38 = vld [vmem:[%s6760_s12 + $0x18a0] sm:$0xff]  ;;  %5051 = vst [vmem:[%s6775_s17 + $0x1860] sm:$0xff] %v3003_v27  ;;  %5052 = vst [vmem:[%s6775_s17 + $0x1868] sm:$0xff] %v3004_v28  ;;  %v3009_v39 = vadd.f32 1.0, %v961_v36  ;;  %v3010_v40 = vadd.f32 1.0, %v962_v37  ;;  %v964_v42 = vld [vmem:[%s6760_s12 + $0x18a8] sm:$0xff] }
 0x1d0   : > { %5053 = vst [vmem:[%s6775_s17 + $0x1870] sm:$0xff] %v3005_v29  ;;  %v3011_v41 = vadd.f32 1.0, %v963_v38  ;;  %v965_v43 = vld [vmem:[%s6760_s12 + $0x18b0] sm:$0xff]  ;;  %v966_v44 = vld [vmem:[%s6760_s12 + $0x18b8] sm:$0xff]  ;;  %5054 = vst [vmem:[%s6775_s17 + $0x1878] sm:$0xff] %v3006_v33  ;;  %v3012_v45 = vadd.f32 1.0, %v964_v42 }
 0x1d1   : > { %5055 = vst [vmem:[%s6775_s17 + $0x1880] sm:$0xff] %v3007_v34  ;;  %5056 = vst [vmem:[%s6775_s17 + $0x1888] sm:$0xff] %v3008_v35  ;;  %v3013_v46 = vadd.f32 1.0, %v965_v43  ;;  %v3014_v47 = vadd.f32 1.0, %v966_v44  ;;  %v967_v48 = vld [vmem:[%s6760_s12 + $0x18c0] sm:$0xff]  ;;  %v968_v49 = vld [vmem:[%s6760_s12 + $0x18c8] sm:$0xff] }
 0x1d2   : > { %v969_v50 = vld [vmem:[%s6760_s12 + $0x18d0] sm:$0xff]  ;;  %5057 = vst [vmem:[%s6775_s17 + $0x1890] sm:$0xff] %v3009_v39  ;;  %5058 = vst [vmem:[%s6775_s17 + $0x1898] sm:$0xff] %v3010_v40  ;;  %v3015_v51 = vadd.f32 1.0, %v967_v48  ;;  %v3016_v52 = vadd.f32 1.0, %v968_v49  ;;  %v970_v54 = vld [vmem:[%s6760_s12 + $0x18d8] sm:$0xff] }
 0x1d3   : > { %5059 = vst [vmem:[%s6775_s17 + $0x18a0] sm:$0xff] %v3011_v41  ;;  %v3017_v53 = vadd.f32 1.0, %v969_v50  ;;  %v971_v55 = vld [vmem:[%s6760_s12 + $0x18e0] sm:$0xff]  ;;  %v972_v56 = vld [vmem:[%s6760_s12 + $0x18e8] sm:$0xff]  ;;  %5060 = vst [vmem:[%s6775_s17 + $0x18a8] sm:$0xff] %v3012_v45  ;;  %v3018_v57 = vadd.f32 1.0, %v970_v54 }
 0x1d4   : > { %5061 = vst [vmem:[%s6775_s17 + $0x18b0] sm:$0xff] %v3013_v46  ;;  %5062 = vst [vmem:[%s6775_s17 + $0x18b8] sm:$0xff] %v3014_v47  ;;  %v3019_v58 = vadd.f32 1.0, %v971_v55  ;;  %v3020_v59 = vadd.f32 1.0, %v972_v56  ;;  %v973_v60 = vld [vmem:[%s6760_s12 + $0x18f0] sm:$0xff]  ;;  %v974_v61 = vld [vmem:[%s6760_s12 + $0x18f8] sm:$0xff] }
 0x1d5   : > { %v975_v62 = vld [vmem:[%s6760_s12 + $0x1900] sm:$0xff]  ;;  %5063 = vst [vmem:[%s6775_s17 + $0x18c0] sm:$0xff] %v3015_v51  ;;  %5064 = vst [vmem:[%s6775_s17 + $0x18c8] sm:$0xff] %v3016_v52  ;;  %v3021_v63 = vadd.f32 1.0, %v973_v60  ;;  %v3022_v0 = vadd.f32 1.0, %v974_v61  ;;  %v976_v2 = vld [vmem:[%s6760_s12 + $0x1908] sm:$0xff] }
 0x1d6   : > { %5065 = vst [vmem:[%s6775_s17 + $0x18d0] sm:$0xff] %v3017_v53  ;;  %v3023_v1 = vadd.f32 1.0, %v975_v62  ;;  %v977_v3 = vld [vmem:[%s6760_s12 + $0x1910] sm:$0xff]  ;;  %v978_v4 = vld [vmem:[%s6760_s12 + $0x1918] sm:$0xff]  ;;  %5066 = vst [vmem:[%s6775_s17 + $0x18d8] sm:$0xff] %v3018_v57  ;;  %v3024_v5 = vadd.f32 1.0, %v976_v2 }
 0x1d7   : > { %5067 = vst [vmem:[%s6775_s17 + $0x18e0] sm:$0xff] %v3019_v58  ;;  %5068 = vst [vmem:[%s6775_s17 + $0x18e8] sm:$0xff] %v3020_v59  ;;  %v3025_v6 = vadd.f32 1.0, %v977_v3  ;;  %v3026_v7 = vadd.f32 1.0, %v978_v4  ;;  %v979_v8 = vld [vmem:[%s6760_s12 + $0x1920] sm:$0xff]  ;;  %v980_v9 = vld [vmem:[%s6760_s12 + $0x1928] sm:$0xff] }
 0x1d8   : > { %v981_v10 = vld [vmem:[%s6760_s12 + $0x1930] sm:$0xff]  ;;  %5069 = vst [vmem:[%s6775_s17 + $0x18f0] sm:$0xff] %v3021_v63  ;;  %5070 = vst [vmem:[%s6775_s17 + $0x18f8] sm:$0xff] %v3022_v0  ;;  %v3027_v11 = vadd.f32 1.0, %v979_v8  ;;  %v3028_v12 = vadd.f32 1.0, %v980_v9  ;;  %v982_v14 = vld [vmem:[%s6760_s12 + $0x1938] sm:$0xff] }
 0x1d9   : > { %5071 = vst [vmem:[%s6775_s17 + $0x1900] sm:$0xff] %v3023_v1  ;;  %v3029_v13 = vadd.f32 1.0, %v981_v10  ;;  %v983_v15 = vld [vmem:[%s6760_s12 + $0x1940] sm:$0xff]  ;;  %v984_v16 = vld [vmem:[%s6760_s12 + $0x1948] sm:$0xff]  ;;  %5072 = vst [vmem:[%s6775_s17 + $0x1908] sm:$0xff] %v3024_v5  ;;  %v3030_v17 = vadd.f32 1.0, %v982_v14 }
 0x1da   : > { %5073 = vst [vmem:[%s6775_s17 + $0x1910] sm:$0xff] %v3025_v6  ;;  %5074 = vst [vmem:[%s6775_s17 + $0x1918] sm:$0xff] %v3026_v7  ;;  %v3031_v18 = vadd.f32 1.0, %v983_v15  ;;  %v3032_v19 = vadd.f32 1.0, %v984_v16  ;;  %v985_v20 = vld [vmem:[%s6760_s12 + $0x1950] sm:$0xff]  ;;  %v986_v21 = vld [vmem:[%s6760_s12 + $0x1958] sm:$0xff] }
 0x1db   : > { %v987_v22 = vld [vmem:[%s6760_s12 + $0x1960] sm:$0xff]  ;;  %5075 = vst [vmem:[%s6775_s17 + $0x1920] sm:$0xff] %v3027_v11  ;;  %5076 = vst [vmem:[%s6775_s17 + $0x1928] sm:$0xff] %v3028_v12  ;;  %v3033_v23 = vadd.f32 1.0, %v985_v20  ;;  %v3034_v24 = vadd.f32 1.0, %v986_v21  ;;  %v988_v26 = vld [vmem:[%s6760_s12 + $0x1968] sm:$0xff] }
 0x1dc   : > { %5077 = vst [vmem:[%s6775_s17 + $0x1930] sm:$0xff] %v3029_v13  ;;  %v3035_v25 = vadd.f32 1.0, %v987_v22  ;;  %v989_v27 = vld [vmem:[%s6760_s12 + $0x1970] sm:$0xff]  ;;  %v990_v28 = vld [vmem:[%s6760_s12 + $0x1978] sm:$0xff]  ;;  %5078 = vst [vmem:[%s6775_s17 + $0x1938] sm:$0xff] %v3030_v17  ;;  %v3036_v29 = vadd.f32 1.0, %v988_v26 }
 0x1dd   : > { %5079 = vst [vmem:[%s6775_s17 + $0x1940] sm:$0xff] %v3031_v18  ;;  %5080 = vst [vmem:[%s6775_s17 + $0x1948] sm:$0xff] %v3032_v19  ;;  %v3037_v30 = vadd.f32 1.0, %v989_v27  ;;  %v3038_v31 = vadd.f32 1.0, %v990_v28  ;;  %v991_v32 = vld [vmem:[%s6760_s12 + $0x1980] sm:$0xff]  ;;  %v992_v33 = vld [vmem:[%s6760_s12 + $0x1988] sm:$0xff] }
 0x1de   : > { %v993_v34 = vld [vmem:[%s6760_s12 + $0x1990] sm:$0xff]  ;;  %5081 = vst [vmem:[%s6775_s17 + $0x1950] sm:$0xff] %v3033_v23  ;;  %5082 = vst [vmem:[%s6775_s17 + $0x1958] sm:$0xff] %v3034_v24  ;;  %v3039_v35 = vadd.f32 1.0, %v991_v32  ;;  %v3040_v36 = vadd.f32 1.0, %v992_v33  ;;  %v994_v38 = vld [vmem:[%s6760_s12 + $0x1998] sm:$0xff] }
 0x1df   : > { %5083 = vst [vmem:[%s6775_s17 + $0x1960] sm:$0xff] %v3035_v25  ;;  %v3041_v37 = vadd.f32 1.0, %v993_v34  ;;  %v995_v39 = vld [vmem:[%s6760_s12 + $0x19a0] sm:$0xff]  ;;  %v996_v40 = vld [vmem:[%s6760_s12 + $0x19a8] sm:$0xff]  ;;  %5084 = vst [vmem:[%s6775_s17 + $0x1968] sm:$0xff] %v3036_v29  ;;  %v3042_v41 = vadd.f32 1.0, %v994_v38 }
 0x1e0   : > { %5085 = vst [vmem:[%s6775_s17 + $0x1970] sm:$0xff] %v3037_v30  ;;  %5086 = vst [vmem:[%s6775_s17 + $0x1978] sm:$0xff] %v3038_v31  ;;  %v3043_v42 = vadd.f32 1.0, %v995_v39  ;;  %v3044_v43 = vadd.f32 1.0, %v996_v40  ;;  %v997_v44 = vld [vmem:[%s6760_s12 + $0x19b0] sm:$0xff]  ;;  %v998_v45 = vld [vmem:[%s6760_s12 + $0x19b8] sm:$0xff] }
 0x1e1   : > { %v999_v46 = vld [vmem:[%s6760_s12 + $0x19c0] sm:$0xff]  ;;  %5087 = vst [vmem:[%s6775_s17 + $0x1980] sm:$0xff] %v3039_v35  ;;  %5088 = vst [vmem:[%s6775_s17 + $0x1988] sm:$0xff] %v3040_v36  ;;  %v3045_v47 = vadd.f32 1.0, %v997_v44  ;;  %v3046_v48 = vadd.f32 1.0, %v998_v45  ;;  %v1000_v50 = vld [vmem:[%s6760_s12 + $0x19c8] sm:$0xff] }
 0x1e2   : > { %5089 = vst [vmem:[%s6775_s17 + $0x1990] sm:$0xff] %v3041_v37  ;;  %v3047_v49 = vadd.f32 1.0, %v999_v46  ;;  %v1001_v51 = vld [vmem:[%s6760_s12 + $0x19d0] sm:$0xff]  ;;  %v1002_v52 = vld [vmem:[%s6760_s12 + $0x19d8] sm:$0xff]  ;;  %5090 = vst [vmem:[%s6775_s17 + $0x1998] sm:$0xff] %v3042_v41  ;;  %v3048_v53 = vadd.f32 1.0, %v1000_v50 }
 0x1e3   : > { %5091 = vst [vmem:[%s6775_s17 + $0x19a0] sm:$0xff] %v3043_v42  ;;  %5092 = vst [vmem:[%s6775_s17 + $0x19a8] sm:$0xff] %v3044_v43  ;;  %v3049_v54 = vadd.f32 1.0, %v1001_v51  ;;  %v3050_v55 = vadd.f32 1.0, %v1002_v52  ;;  %v1003_v56 = vld [vmem:[%s6760_s12 + $0x19e0] sm:$0xff]  ;;  %v1004_v57 = vld [vmem:[%s6760_s12 + $0x19e8] sm:$0xff] }
 0x1e4   : > { %v1005_v58 = vld [vmem:[%s6760_s12 + $0x19f0] sm:$0xff]  ;;  %5093 = vst [vmem:[%s6775_s17 + $0x19b0] sm:$0xff] %v3045_v47  ;;  %5094 = vst [vmem:[%s6775_s17 + $0x19b8] sm:$0xff] %v3046_v48  ;;  %v3051_v59 = vadd.f32 1.0, %v1003_v56  ;;  %v3052_v60 = vadd.f32 1.0, %v1004_v57  ;;  %v1006_v62 = vld [vmem:[%s6760_s12 + $0x19f8] sm:$0xff] }
 0x1e5   : > { %5095 = vst [vmem:[%s6775_s17 + $0x19c0] sm:$0xff] %v3047_v49  ;;  %v3053_v61 = vadd.f32 1.0, %v1005_v58  ;;  %v1007_v63 = vld [vmem:[%s6760_s12 + $0x1a00] sm:$0xff]  ;;  %v1008_v0 = vld [vmem:[%s6760_s12 + $0x1a08] sm:$0xff]  ;;  %5096 = vst [vmem:[%s6775_s17 + $0x19c8] sm:$0xff] %v3048_v53  ;;  %v3054_v1 = vadd.f32 1.0, %v1006_v62 }
 0x1e6   : > { %5097 = vst [vmem:[%s6775_s17 + $0x19d0] sm:$0xff] %v3049_v54  ;;  %5098 = vst [vmem:[%s6775_s17 + $0x19d8] sm:$0xff] %v3050_v55  ;;  %v3055_v2 = vadd.f32 1.0, %v1007_v63  ;;  %v3056_v3 = vadd.f32 1.0, %v1008_v0  ;;  %v1009_v4 = vld [vmem:[%s6760_s12 + $0x1a10] sm:$0xff]  ;;  %v1010_v5 = vld [vmem:[%s6760_s12 + $0x1a18] sm:$0xff] }
 0x1e7   : > { %v1011_v6 = vld [vmem:[%s6760_s12 + $0x1a20] sm:$0xff]  ;;  %5099 = vst [vmem:[%s6775_s17 + $0x19e0] sm:$0xff] %v3051_v59  ;;  %5100 = vst [vmem:[%s6775_s17 + $0x19e8] sm:$0xff] %v3052_v60  ;;  %v3057_v7 = vadd.f32 1.0, %v1009_v4  ;;  %v3058_v8 = vadd.f32 1.0, %v1010_v5  ;;  %v1012_v10 = vld [vmem:[%s6760_s12 + $0x1a28] sm:$0xff] }
 0x1e8   : > { %5101 = vst [vmem:[%s6775_s17 + $0x19f0] sm:$0xff] %v3053_v61  ;;  %v3059_v9 = vadd.f32 1.0, %v1011_v6  ;;  %v1013_v11 = vld [vmem:[%s6760_s12 + $0x1a30] sm:$0xff]  ;;  %v1014_v12 = vld [vmem:[%s6760_s12 + $0x1a38] sm:$0xff]  ;;  %5102 = vst [vmem:[%s6775_s17 + $0x19f8] sm:$0xff] %v3054_v1  ;;  %v3060_v13 = vadd.f32 1.0, %v1012_v10 }
 0x1e9   : > { %5103 = vst [vmem:[%s6775_s17 + $0x1a00] sm:$0xff] %v3055_v2  ;;  %5104 = vst [vmem:[%s6775_s17 + $0x1a08] sm:$0xff] %v3056_v3  ;;  %v3061_v14 = vadd.f32 1.0, %v1013_v11  ;;  %v3062_v15 = vadd.f32 1.0, %v1014_v12  ;;  %v1015_v16 = vld [vmem:[%s6760_s12 + $0x1a40] sm:$0xff]  ;;  %v1016_v17 = vld [vmem:[%s6760_s12 + $0x1a48] sm:$0xff] }
 0x1ea   : > { %v1017_v18 = vld [vmem:[%s6760_s12 + $0x1a50] sm:$0xff]  ;;  %5105 = vst [vmem:[%s6775_s17 + $0x1a10] sm:$0xff] %v3057_v7  ;;  %5106 = vst [vmem:[%s6775_s17 + $0x1a18] sm:$0xff] %v3058_v8  ;;  %v3063_v19 = vadd.f32 1.0, %v1015_v16  ;;  %v3064_v20 = vadd.f32 1.0, %v1016_v17  ;;  %v1018_v22 = vld [vmem:[%s6760_s12 + $0x1a58] sm:$0xff] }
 0x1eb   : > { %5107 = vst [vmem:[%s6775_s17 + $0x1a20] sm:$0xff] %v3059_v9  ;;  %v3065_v21 = vadd.f32 1.0, %v1017_v18  ;;  %v1019_v23 = vld [vmem:[%s6760_s12 + $0x1a60] sm:$0xff]  ;;  %v1020_v24 = vld [vmem:[%s6760_s12 + $0x1a68] sm:$0xff]  ;;  %5108 = vst [vmem:[%s6775_s17 + $0x1a28] sm:$0xff] %v3060_v13  ;;  %v3066_v25 = vadd.f32 1.0, %v1018_v22 }
 0x1ec   : > { %5109 = vst [vmem:[%s6775_s17 + $0x1a30] sm:$0xff] %v3061_v14  ;;  %5110 = vst [vmem:[%s6775_s17 + $0x1a38] sm:$0xff] %v3062_v15  ;;  %v3067_v26 = vadd.f32 1.0, %v1019_v23  ;;  %v3068_v27 = vadd.f32 1.0, %v1020_v24  ;;  %v1021_v28 = vld [vmem:[%s6760_s12 + $0x1a70] sm:$0xff]  ;;  %v1022_v29 = vld [vmem:[%s6760_s12 + $0x1a78] sm:$0xff] }
 0x1ed   : > { %v1023_v30 = vld [vmem:[%s6760_s12 + $0x1a80] sm:$0xff]  ;;  %5111 = vst [vmem:[%s6775_s17 + $0x1a40] sm:$0xff] %v3063_v19  ;;  %5112 = vst [vmem:[%s6775_s17 + $0x1a48] sm:$0xff] %v3064_v20  ;;  %v3069_v31 = vadd.f32 1.0, %v1021_v28  ;;  %v3070_v32 = vadd.f32 1.0, %v1022_v29  ;;  %v1024_v34 = vld [vmem:[%s6760_s12 + $0x1a88] sm:$0xff] }
 0x1ee   : > { %5113 = vst [vmem:[%s6775_s17 + $0x1a50] sm:$0xff] %v3065_v21  ;;  %v3071_v33 = vadd.f32 1.0, %v1023_v30  ;;  %v1025_v35 = vld [vmem:[%s6760_s12 + $0x1a90] sm:$0xff]  ;;  %v1026_v36 = vld [vmem:[%s6760_s12 + $0x1a98] sm:$0xff]  ;;  %5114 = vst [vmem:[%s6775_s17 + $0x1a58] sm:$0xff] %v3066_v25  ;;  %v3072_v37 = vadd.f32 1.0, %v1024_v34 }
 0x1ef   : > { %5115 = vst [vmem:[%s6775_s17 + $0x1a60] sm:$0xff] %v3067_v26  ;;  %5116 = vst [vmem:[%s6775_s17 + $0x1a68] sm:$0xff] %v3068_v27  ;;  %v3073_v38 = vadd.f32 1.0, %v1025_v35  ;;  %v3074_v39 = vadd.f32 1.0, %v1026_v36  ;;  %v1027_v40 = vld [vmem:[%s6760_s12 + $0x1aa0] sm:$0xff]  ;;  %v1028_v41 = vld [vmem:[%s6760_s12 + $0x1aa8] sm:$0xff] }
 0x1f0   : > { %v1029_v42 = vld [vmem:[%s6760_s12 + $0x1ab0] sm:$0xff]  ;;  %5117 = vst [vmem:[%s6775_s17 + $0x1a70] sm:$0xff] %v3069_v31  ;;  %5118 = vst [vmem:[%s6775_s17 + $0x1a78] sm:$0xff] %v3070_v32  ;;  %v3075_v43 = vadd.f32 1.0, %v1027_v40  ;;  %v3076_v44 = vadd.f32 1.0, %v1028_v41  ;;  %v1030_v46 = vld [vmem:[%s6760_s12 + $0x1ab8] sm:$0xff] }
 0x1f1   : > { %5119 = vst [vmem:[%s6775_s17 + $0x1a80] sm:$0xff] %v3071_v33  ;;  %v3077_v45 = vadd.f32 1.0, %v1029_v42  ;;  %v1031_v47 = vld [vmem:[%s6760_s12 + $0x1ac0] sm:$0xff]  ;;  %v1032_v48 = vld [vmem:[%s6760_s12 + $0x1ac8] sm:$0xff]  ;;  %5120 = vst [vmem:[%s6775_s17 + $0x1a88] sm:$0xff] %v3072_v37  ;;  %v3078_v49 = vadd.f32 1.0, %v1030_v46 }
 0x1f2   : > { %5121 = vst [vmem:[%s6775_s17 + $0x1a90] sm:$0xff] %v3073_v38  ;;  %5122 = vst [vmem:[%s6775_s17 + $0x1a98] sm:$0xff] %v3074_v39  ;;  %v3079_v50 = vadd.f32 1.0, %v1031_v47  ;;  %v3080_v51 = vadd.f32 1.0, %v1032_v48  ;;  %v1033_v52 = vld [vmem:[%s6760_s12 + $0x1ad0] sm:$0xff]  ;;  %v1034_v53 = vld [vmem:[%s6760_s12 + $0x1ad8] sm:$0xff] }
 0x1f3   : > { %v1035_v54 = vld [vmem:[%s6760_s12 + $0x1ae0] sm:$0xff]  ;;  %5123 = vst [vmem:[%s6775_s17 + $0x1aa0] sm:$0xff] %v3075_v43  ;;  %5124 = vst [vmem:[%s6775_s17 + $0x1aa8] sm:$0xff] %v3076_v44  ;;  %v3081_v55 = vadd.f32 1.0, %v1033_v52  ;;  %v3082_v56 = vadd.f32 1.0, %v1034_v53  ;;  %v1036_v58 = vld [vmem:[%s6760_s12 + $0x1ae8] sm:$0xff] }
 0x1f4   : > { %5125 = vst [vmem:[%s6775_s17 + $0x1ab0] sm:$0xff] %v3077_v45  ;;  %v3083_v57 = vadd.f32 1.0, %v1035_v54  ;;  %v1037_v59 = vld [vmem:[%s6760_s12 + $0x1af0] sm:$0xff]  ;;  %v1038_v60 = vld [vmem:[%s6760_s12 + $0x1af8] sm:$0xff]  ;;  %5126 = vst [vmem:[%s6775_s17 + $0x1ab8] sm:$0xff] %v3078_v49  ;;  %v3084_v61 = vadd.f32 1.0, %v1036_v58 }
 0x1f5   : > { %5127 = vst [vmem:[%s6775_s17 + $0x1ac0] sm:$0xff] %v3079_v50  ;;  %5128 = vst [vmem:[%s6775_s17 + $0x1ac8] sm:$0xff] %v3080_v51  ;;  %v3085_v62 = vadd.f32 1.0, %v1037_v59  ;;  %v3086_v63 = vadd.f32 1.0, %v1038_v60  ;;  %v1039_v0 = vld [vmem:[%s6760_s12 + $0x1b00] sm:$0xff]  ;;  %v1040_v1 = vld [vmem:[%s6760_s12 + $0x1b08] sm:$0xff] }
 0x1f6   : > { %v1041_v2 = vld [vmem:[%s6760_s12 + $0x1b10] sm:$0xff]  ;;  %5129 = vst [vmem:[%s6775_s17 + $0x1ad0] sm:$0xff] %v3081_v55  ;;  %5130 = vst [vmem:[%s6775_s17 + $0x1ad8] sm:$0xff] %v3082_v56  ;;  %v3087_v3 = vadd.f32 1.0, %v1039_v0  ;;  %v3088_v4 = vadd.f32 1.0, %v1040_v1  ;;  %v1042_v6 = vld [vmem:[%s6760_s12 + $0x1b18] sm:$0xff] }
 0x1f7   : > { %5131 = vst [vmem:[%s6775_s17 + $0x1ae0] sm:$0xff] %v3083_v57  ;;  %v3089_v5 = vadd.f32 1.0, %v1041_v2  ;;  %v1043_v7 = vld [vmem:[%s6760_s12 + $0x1b20] sm:$0xff]  ;;  %v1044_v8 = vld [vmem:[%s6760_s12 + $0x1b28] sm:$0xff]  ;;  %5132 = vst [vmem:[%s6775_s17 + $0x1ae8] sm:$0xff] %v3084_v61  ;;  %v3090_v9 = vadd.f32 1.0, %v1042_v6 }
 0x1f8   : > { %5133 = vst [vmem:[%s6775_s17 + $0x1af0] sm:$0xff] %v3085_v62  ;;  %5134 = vst [vmem:[%s6775_s17 + $0x1af8] sm:$0xff] %v3086_v63  ;;  %v3091_v10 = vadd.f32 1.0, %v1043_v7  ;;  %v3092_v11 = vadd.f32 1.0, %v1044_v8  ;;  %v1045_v12 = vld [vmem:[%s6760_s12 + $0x1b30] sm:$0xff]  ;;  %v1046_v13 = vld [vmem:[%s6760_s12 + $0x1b38] sm:$0xff] }
 0x1f9   : > { %v1047_v14 = vld [vmem:[%s6760_s12 + $0x1b40] sm:$0xff]  ;;  %5135 = vst [vmem:[%s6775_s17 + $0x1b00] sm:$0xff] %v3087_v3  ;;  %5136 = vst [vmem:[%s6775_s17 + $0x1b08] sm:$0xff] %v3088_v4  ;;  %v3093_v15 = vadd.f32 1.0, %v1045_v12  ;;  %v3094_v16 = vadd.f32 1.0, %v1046_v13  ;;  %v1048_v18 = vld [vmem:[%s6760_s12 + $0x1b48] sm:$0xff] }
 0x1fa   : > { %5137 = vst [vmem:[%s6775_s17 + $0x1b10] sm:$0xff] %v3089_v5  ;;  %v3095_v17 = vadd.f32 1.0, %v1047_v14  ;;  %v1049_v19 = vld [vmem:[%s6760_s12 + $0x1b50] sm:$0xff]  ;;  %v1050_v20 = vld [vmem:[%s6760_s12 + $0x1b58] sm:$0xff]  ;;  %5138 = vst [vmem:[%s6775_s17 + $0x1b18] sm:$0xff] %v3090_v9  ;;  %v3096_v21 = vadd.f32 1.0, %v1048_v18 }
 0x1fb   : > { %5139 = vst [vmem:[%s6775_s17 + $0x1b20] sm:$0xff] %v3091_v10  ;;  %5140 = vst [vmem:[%s6775_s17 + $0x1b28] sm:$0xff] %v3092_v11  ;;  %v3097_v22 = vadd.f32 1.0, %v1049_v19  ;;  %v3098_v23 = vadd.f32 1.0, %v1050_v20  ;;  %v1051_v24 = vld [vmem:[%s6760_s12 + $0x1b60] sm:$0xff]  ;;  %v1052_v25 = vld [vmem:[%s6760_s12 + $0x1b68] sm:$0xff] }
 0x1fc   : > { %v1053_v26 = vld [vmem:[%s6760_s12 + $0x1b70] sm:$0xff]  ;;  %5141 = vst [vmem:[%s6775_s17 + $0x1b30] sm:$0xff] %v3093_v15  ;;  %5142 = vst [vmem:[%s6775_s17 + $0x1b38] sm:$0xff] %v3094_v16  ;;  %v3099_v27 = vadd.f32 1.0, %v1051_v24  ;;  %v3100_v28 = vadd.f32 1.0, %v1052_v25  ;;  %v1054_v30 = vld [vmem:[%s6760_s12 + $0x1b78] sm:$0xff] }
 0x1fd   : > { %5143 = vst [vmem:[%s6775_s17 + $0x1b40] sm:$0xff] %v3095_v17  ;;  %v3101_v29 = vadd.f32 1.0, %v1053_v26  ;;  %v1055_v31 = vld [vmem:[%s6760_s12 + $0x1b80] sm:$0xff]  ;;  %v1056_v32 = vld [vmem:[%s6760_s12 + $0x1b88] sm:$0xff]  ;;  %5144 = vst [vmem:[%s6775_s17 + $0x1b48] sm:$0xff] %v3096_v21  ;;  %v3102_v33 = vadd.f32 1.0, %v1054_v30 }
 0x1fe   : > { %5145 = vst [vmem:[%s6775_s17 + $0x1b50] sm:$0xff] %v3097_v22  ;;  %5146 = vst [vmem:[%s6775_s17 + $0x1b58] sm:$0xff] %v3098_v23  ;;  %v3103_v34 = vadd.f32 1.0, %v1055_v31  ;;  %v3104_v35 = vadd.f32 1.0, %v1056_v32  ;;  %v1057_v36 = vld [vmem:[%s6760_s12 + $0x1b90] sm:$0xff]  ;;  %v1058_v37 = vld [vmem:[%s6760_s12 + $0x1b98] sm:$0xff] }
 0x1ff   : > { %v1059_v38 = vld [vmem:[%s6760_s12 + $0x1ba0] sm:$0xff]  ;;  %5147 = vst [vmem:[%s6775_s17 + $0x1b60] sm:$0xff] %v3099_v27  ;;  %5148 = vst [vmem:[%s6775_s17 + $0x1b68] sm:$0xff] %v3100_v28  ;;  %v3105_v39 = vadd.f32 1.0, %v1057_v36  ;;  %v3106_v40 = vadd.f32 1.0, %v1058_v37  ;;  %v1060_v42 = vld [vmem:[%s6760_s12 + $0x1ba8] sm:$0xff] }
 0x200   : > { %5149 = vst [vmem:[%s6775_s17 + $0x1b70] sm:$0xff] %v3101_v29  ;;  %v3107_v41 = vadd.f32 1.0, %v1059_v38  ;;  %v1061_v43 = vld [vmem:[%s6760_s12 + $0x1bb0] sm:$0xff]  ;;  %v1062_v44 = vld [vmem:[%s6760_s12 + $0x1bb8] sm:$0xff]  ;;  %5150 = vst [vmem:[%s6775_s17 + $0x1b78] sm:$0xff] %v3102_v33  ;;  %v3108_v45 = vadd.f32 1.0, %v1060_v42 }
 0x201   : > { %5151 = vst [vmem:[%s6775_s17 + $0x1b80] sm:$0xff] %v3103_v34  ;;  %5152 = vst [vmem:[%s6775_s17 + $0x1b88] sm:$0xff] %v3104_v35  ;;  %v3109_v46 = vadd.f32 1.0, %v1061_v43  ;;  %v3110_v47 = vadd.f32 1.0, %v1062_v44  ;;  %v1063_v48 = vld [vmem:[%s6760_s12 + $0x1bc0] sm:$0xff]  ;;  %v1064_v49 = vld [vmem:[%s6760_s12 + $0x1bc8] sm:$0xff] }
 0x202   : > { %v1065_v50 = vld [vmem:[%s6760_s12 + $0x1bd0] sm:$0xff]  ;;  %5153 = vst [vmem:[%s6775_s17 + $0x1b90] sm:$0xff] %v3105_v39  ;;  %5154 = vst [vmem:[%s6775_s17 + $0x1b98] sm:$0xff] %v3106_v40  ;;  %v3111_v51 = vadd.f32 1.0, %v1063_v48  ;;  %v3112_v52 = vadd.f32 1.0, %v1064_v49  ;;  %v1066_v54 = vld [vmem:[%s6760_s12 + $0x1bd8] sm:$0xff] }
 0x203   : > { %5155 = vst [vmem:[%s6775_s17 + $0x1ba0] sm:$0xff] %v3107_v41  ;;  %v3113_v53 = vadd.f32 1.0, %v1065_v50  ;;  %v1067_v55 = vld [vmem:[%s6760_s12 + $0x1be0] sm:$0xff]  ;;  %v1068_v56 = vld [vmem:[%s6760_s12 + $0x1be8] sm:$0xff]  ;;  %5156 = vst [vmem:[%s6775_s17 + $0x1ba8] sm:$0xff] %v3108_v45  ;;  %v3114_v57 = vadd.f32 1.0, %v1066_v54 }
 0x204   : > { %5157 = vst [vmem:[%s6775_s17 + $0x1bb0] sm:$0xff] %v3109_v46  ;;  %5158 = vst [vmem:[%s6775_s17 + $0x1bb8] sm:$0xff] %v3110_v47  ;;  %v3115_v58 = vadd.f32 1.0, %v1067_v55  ;;  %v3116_v59 = vadd.f32 1.0, %v1068_v56  ;;  %v1069_v60 = vld [vmem:[%s6760_s12 + $0x1bf0] sm:$0xff]  ;;  %v1070_v61 = vld [vmem:[%s6760_s12 + $0x1bf8] sm:$0xff] }
 0x205   : > { %v1071_v62 = vld [vmem:[%s6760_s12 + $0x1c00] sm:$0xff]  ;;  %5159 = vst [vmem:[%s6775_s17 + $0x1bc0] sm:$0xff] %v3111_v51  ;;  %5160 = vst [vmem:[%s6775_s17 + $0x1bc8] sm:$0xff] %v3112_v52  ;;  %v3117_v63 = vadd.f32 1.0, %v1069_v60  ;;  %v3118_v0 = vadd.f32 1.0, %v1070_v61  ;;  %v1072_v2 = vld [vmem:[%s6760_s12 + $0x1c08] sm:$0xff] }
 0x206   : > { %5161 = vst [vmem:[%s6775_s17 + $0x1bd0] sm:$0xff] %v3113_v53  ;;  %v3119_v1 = vadd.f32 1.0, %v1071_v62  ;;  %v1073_v3 = vld [vmem:[%s6760_s12 + $0x1c10] sm:$0xff]  ;;  %v1074_v4 = vld [vmem:[%s6760_s12 + $0x1c18] sm:$0xff]  ;;  %5162 = vst [vmem:[%s6775_s17 + $0x1bd8] sm:$0xff] %v3114_v57  ;;  %v3120_v5 = vadd.f32 1.0, %v1072_v2 }
 0x207   : > { %5163 = vst [vmem:[%s6775_s17 + $0x1be0] sm:$0xff] %v3115_v58  ;;  %5164 = vst [vmem:[%s6775_s17 + $0x1be8] sm:$0xff] %v3116_v59  ;;  %v3121_v6 = vadd.f32 1.0, %v1073_v3  ;;  %v3122_v7 = vadd.f32 1.0, %v1074_v4  ;;  %v1075_v8 = vld [vmem:[%s6760_s12 + $0x1c20] sm:$0xff]  ;;  %v1076_v9 = vld [vmem:[%s6760_s12 + $0x1c28] sm:$0xff] }
 0x208   : > { %v1077_v10 = vld [vmem:[%s6760_s12 + $0x1c30] sm:$0xff]  ;;  %5165 = vst [vmem:[%s6775_s17 + $0x1bf0] sm:$0xff] %v3117_v63  ;;  %5166 = vst [vmem:[%s6775_s17 + $0x1bf8] sm:$0xff] %v3118_v0  ;;  %v3123_v11 = vadd.f32 1.0, %v1075_v8  ;;  %v3124_v12 = vadd.f32 1.0, %v1076_v9  ;;  %v1078_v14 = vld [vmem:[%s6760_s12 + $0x1c38] sm:$0xff] }
 0x209   : > { %5167 = vst [vmem:[%s6775_s17 + $0x1c00] sm:$0xff] %v3119_v1  ;;  %v3125_v13 = vadd.f32 1.0, %v1077_v10  ;;  %v1079_v15 = vld [vmem:[%s6760_s12 + $0x1c40] sm:$0xff]  ;;  %v1080_v16 = vld [vmem:[%s6760_s12 + $0x1c48] sm:$0xff]  ;;  %5168 = vst [vmem:[%s6775_s17 + $0x1c08] sm:$0xff] %v3120_v5  ;;  %v3126_v17 = vadd.f32 1.0, %v1078_v14 }
 0x20a   : > { %5169 = vst [vmem:[%s6775_s17 + $0x1c10] sm:$0xff] %v3121_v6  ;;  %5170 = vst [vmem:[%s6775_s17 + $0x1c18] sm:$0xff] %v3122_v7  ;;  %v3127_v18 = vadd.f32 1.0, %v1079_v15  ;;  %v3128_v19 = vadd.f32 1.0, %v1080_v16  ;;  %v1081_v20 = vld [vmem:[%s6760_s12 + $0x1c50] sm:$0xff]  ;;  %v1082_v21 = vld [vmem:[%s6760_s12 + $0x1c58] sm:$0xff] }
 0x20b   : > { %v1083_v22 = vld [vmem:[%s6760_s12 + $0x1c60] sm:$0xff]  ;;  %5171 = vst [vmem:[%s6775_s17 + $0x1c20] sm:$0xff] %v3123_v11  ;;  %5172 = vst [vmem:[%s6775_s17 + $0x1c28] sm:$0xff] %v3124_v12  ;;  %v3129_v23 = vadd.f32 1.0, %v1081_v20  ;;  %v3130_v24 = vadd.f32 1.0, %v1082_v21  ;;  %v1084_v26 = vld [vmem:[%s6760_s12 + $0x1c68] sm:$0xff] }
 0x20c   : > { %5173 = vst [vmem:[%s6775_s17 + $0x1c30] sm:$0xff] %v3125_v13  ;;  %v3131_v25 = vadd.f32 1.0, %v1083_v22  ;;  %v1085_v27 = vld [vmem:[%s6760_s12 + $0x1c70] sm:$0xff]  ;;  %v1086_v28 = vld [vmem:[%s6760_s12 + $0x1c78] sm:$0xff]  ;;  %5174 = vst [vmem:[%s6775_s17 + $0x1c38] sm:$0xff] %v3126_v17  ;;  %v3132_v29 = vadd.f32 1.0, %v1084_v26 }
 0x20d   : > { %5175 = vst [vmem:[%s6775_s17 + $0x1c40] sm:$0xff] %v3127_v18  ;;  %5176 = vst [vmem:[%s6775_s17 + $0x1c48] sm:$0xff] %v3128_v19  ;;  %v3133_v30 = vadd.f32 1.0, %v1085_v27  ;;  %v3134_v31 = vadd.f32 1.0, %v1086_v28  ;;  %v1087_v32 = vld [vmem:[%s6760_s12 + $0x1c80] sm:$0xff]  ;;  %v1088_v33 = vld [vmem:[%s6760_s12 + $0x1c88] sm:$0xff] }
 0x20e   : > { %v1089_v34 = vld [vmem:[%s6760_s12 + $0x1c90] sm:$0xff]  ;;  %5177 = vst [vmem:[%s6775_s17 + $0x1c50] sm:$0xff] %v3129_v23  ;;  %5178 = vst [vmem:[%s6775_s17 + $0x1c58] sm:$0xff] %v3130_v24  ;;  %v3135_v35 = vadd.f32 1.0, %v1087_v32  ;;  %v3136_v36 = vadd.f32 1.0, %v1088_v33  ;;  %v1090_v38 = vld [vmem:[%s6760_s12 + $0x1c98] sm:$0xff] }
 0x20f   : > { %5179 = vst [vmem:[%s6775_s17 + $0x1c60] sm:$0xff] %v3131_v25  ;;  %v3137_v37 = vadd.f32 1.0, %v1089_v34  ;;  %v1091_v39 = vld [vmem:[%s6760_s12 + $0x1ca0] sm:$0xff]  ;;  %v1092_v40 = vld [vmem:[%s6760_s12 + $0x1ca8] sm:$0xff]  ;;  %5180 = vst [vmem:[%s6775_s17 + $0x1c68] sm:$0xff] %v3132_v29  ;;  %v3138_v41 = vadd.f32 1.0, %v1090_v38 }
 0x210   : > { %5181 = vst [vmem:[%s6775_s17 + $0x1c70] sm:$0xff] %v3133_v30  ;;  %5182 = vst [vmem:[%s6775_s17 + $0x1c78] sm:$0xff] %v3134_v31  ;;  %v3139_v42 = vadd.f32 1.0, %v1091_v39  ;;  %v3140_v43 = vadd.f32 1.0, %v1092_v40  ;;  %v1093_v44 = vld [vmem:[%s6760_s12 + $0x1cb0] sm:$0xff]  ;;  %v1094_v45 = vld [vmem:[%s6760_s12 + $0x1cb8] sm:$0xff] }
 0x211   : > { %v1095_v46 = vld [vmem:[%s6760_s12 + $0x1cc0] sm:$0xff]  ;;  %5183 = vst [vmem:[%s6775_s17 + $0x1c80] sm:$0xff] %v3135_v35  ;;  %5184 = vst [vmem:[%s6775_s17 + $0x1c88] sm:$0xff] %v3136_v36  ;;  %v3141_v47 = vadd.f32 1.0, %v1093_v44  ;;  %v3142_v48 = vadd.f32 1.0, %v1094_v45  ;;  %v1096_v50 = vld [vmem:[%s6760_s12 + $0x1cc8] sm:$0xff] }
 0x212   : > { %5185 = vst [vmem:[%s6775_s17 + $0x1c90] sm:$0xff] %v3137_v37  ;;  %v3143_v49 = vadd.f32 1.0, %v1095_v46  ;;  %v1097_v51 = vld [vmem:[%s6760_s12 + $0x1cd0] sm:$0xff]  ;;  %v1098_v52 = vld [vmem:[%s6760_s12 + $0x1cd8] sm:$0xff]  ;;  %5186 = vst [vmem:[%s6775_s17 + $0x1c98] sm:$0xff] %v3138_v41  ;;  %v3144_v53 = vadd.f32 1.0, %v1096_v50 }
 0x213   : > { %5187 = vst [vmem:[%s6775_s17 + $0x1ca0] sm:$0xff] %v3139_v42  ;;  %5188 = vst [vmem:[%s6775_s17 + $0x1ca8] sm:$0xff] %v3140_v43  ;;  %v3145_v54 = vadd.f32 1.0, %v1097_v51  ;;  %v3146_v55 = vadd.f32 1.0, %v1098_v52  ;;  %v1099_v56 = vld [vmem:[%s6760_s12 + $0x1ce0] sm:$0xff]  ;;  %v1100_v57 = vld [vmem:[%s6760_s12 + $0x1ce8] sm:$0xff] }
 0x214   : > { %v1101_v58 = vld [vmem:[%s6760_s12 + $0x1cf0] sm:$0xff]  ;;  %5189 = vst [vmem:[%s6775_s17 + $0x1cb0] sm:$0xff] %v3141_v47  ;;  %5190 = vst [vmem:[%s6775_s17 + $0x1cb8] sm:$0xff] %v3142_v48  ;;  %v3147_v59 = vadd.f32 1.0, %v1099_v56  ;;  %v3148_v60 = vadd.f32 1.0, %v1100_v57  ;;  %v1102_v62 = vld [vmem:[%s6760_s12 + $0x1cf8] sm:$0xff] }
 0x215   : > { %5191 = vst [vmem:[%s6775_s17 + $0x1cc0] sm:$0xff] %v3143_v49  ;;  %v3149_v61 = vadd.f32 1.0, %v1101_v58  ;;  %v1103_v63 = vld [vmem:[%s6760_s12 + $0x1d00] sm:$0xff]  ;;  %v1104_v0 = vld [vmem:[%s6760_s12 + $0x1d08] sm:$0xff]  ;;  %5192 = vst [vmem:[%s6775_s17 + $0x1cc8] sm:$0xff] %v3144_v53  ;;  %v3150_v1 = vadd.f32 1.0, %v1102_v62 }
 0x216   : > { %5193 = vst [vmem:[%s6775_s17 + $0x1cd0] sm:$0xff] %v3145_v54  ;;  %5194 = vst [vmem:[%s6775_s17 + $0x1cd8] sm:$0xff] %v3146_v55  ;;  %v3151_v2 = vadd.f32 1.0, %v1103_v63  ;;  %v3152_v3 = vadd.f32 1.0, %v1104_v0  ;;  %v1105_v4 = vld [vmem:[%s6760_s12 + $0x1d10] sm:$0xff]  ;;  %v1106_v5 = vld [vmem:[%s6760_s12 + $0x1d18] sm:$0xff] }
 0x217   : > { %v1107_v6 = vld [vmem:[%s6760_s12 + $0x1d20] sm:$0xff]  ;;  %5195 = vst [vmem:[%s6775_s17 + $0x1ce0] sm:$0xff] %v3147_v59  ;;  %5196 = vst [vmem:[%s6775_s17 + $0x1ce8] sm:$0xff] %v3148_v60  ;;  %v3153_v7 = vadd.f32 1.0, %v1105_v4  ;;  %v3154_v8 = vadd.f32 1.0, %v1106_v5  ;;  %v1108_v10 = vld [vmem:[%s6760_s12 + $0x1d28] sm:$0xff] }
 0x218   : > { %5197 = vst [vmem:[%s6775_s17 + $0x1cf0] sm:$0xff] %v3149_v61  ;;  %v3155_v9 = vadd.f32 1.0, %v1107_v6  ;;  %v1109_v11 = vld [vmem:[%s6760_s12 + $0x1d30] sm:$0xff]  ;;  %v1110_v12 = vld [vmem:[%s6760_s12 + $0x1d38] sm:$0xff]  ;;  %5198 = vst [vmem:[%s6775_s17 + $0x1cf8] sm:$0xff] %v3150_v1  ;;  %v3156_v13 = vadd.f32 1.0, %v1108_v10 }
 0x219   : > { %5199 = vst [vmem:[%s6775_s17 + $0x1d00] sm:$0xff] %v3151_v2  ;;  %5200 = vst [vmem:[%s6775_s17 + $0x1d08] sm:$0xff] %v3152_v3  ;;  %v3157_v14 = vadd.f32 1.0, %v1109_v11  ;;  %v3158_v15 = vadd.f32 1.0, %v1110_v12  ;;  %v1111_v16 = vld [vmem:[%s6760_s12 + $0x1d40] sm:$0xff]  ;;  %v1112_v17 = vld [vmem:[%s6760_s12 + $0x1d48] sm:$0xff] }
 0x21a   : > { %v1113_v18 = vld [vmem:[%s6760_s12 + $0x1d50] sm:$0xff]  ;;  %5201 = vst [vmem:[%s6775_s17 + $0x1d10] sm:$0xff] %v3153_v7  ;;  %5202 = vst [vmem:[%s6775_s17 + $0x1d18] sm:$0xff] %v3154_v8  ;;  %v3159_v19 = vadd.f32 1.0, %v1111_v16  ;;  %v3160_v20 = vadd.f32 1.0, %v1112_v17  ;;  %v1114_v22 = vld [vmem:[%s6760_s12 + $0x1d58] sm:$0xff] }
 0x21b   : > { %5203 = vst [vmem:[%s6775_s17 + $0x1d20] sm:$0xff] %v3155_v9  ;;  %v3161_v21 = vadd.f32 1.0, %v1113_v18  ;;  %v1115_v23 = vld [vmem:[%s6760_s12 + $0x1d60] sm:$0xff]  ;;  %v1116_v24 = vld [vmem:[%s6760_s12 + $0x1d68] sm:$0xff]  ;;  %5204 = vst [vmem:[%s6775_s17 + $0x1d28] sm:$0xff] %v3156_v13  ;;  %v3162_v25 = vadd.f32 1.0, %v1114_v22 }
 0x21c   : > { %5205 = vst [vmem:[%s6775_s17 + $0x1d30] sm:$0xff] %v3157_v14  ;;  %5206 = vst [vmem:[%s6775_s17 + $0x1d38] sm:$0xff] %v3158_v15  ;;  %v3163_v26 = vadd.f32 1.0, %v1115_v23  ;;  %v3164_v27 = vadd.f32 1.0, %v1116_v24  ;;  %v1117_v28 = vld [vmem:[%s6760_s12 + $0x1d70] sm:$0xff]  ;;  %v1118_v29 = vld [vmem:[%s6760_s12 + $0x1d78] sm:$0xff] }
 0x21d   : > { %v1119_v30 = vld [vmem:[%s6760_s12 + $0x1d80] sm:$0xff]  ;;  %5207 = vst [vmem:[%s6775_s17 + $0x1d40] sm:$0xff] %v3159_v19  ;;  %5208 = vst [vmem:[%s6775_s17 + $0x1d48] sm:$0xff] %v3160_v20  ;;  %v3165_v31 = vadd.f32 1.0, %v1117_v28  ;;  %v3166_v32 = vadd.f32 1.0, %v1118_v29  ;;  %v1120_v34 = vld [vmem:[%s6760_s12 + $0x1d88] sm:$0xff] }
 0x21e   : > { %5209 = vst [vmem:[%s6775_s17 + $0x1d50] sm:$0xff] %v3161_v21  ;;  %v3167_v33 = vadd.f32 1.0, %v1119_v30  ;;  %v1121_v35 = vld [vmem:[%s6760_s12 + $0x1d90] sm:$0xff]  ;;  %v1122_v36 = vld [vmem:[%s6760_s12 + $0x1d98] sm:$0xff]  ;;  %5210 = vst [vmem:[%s6775_s17 + $0x1d58] sm:$0xff] %v3162_v25  ;;  %v3168_v37 = vadd.f32 1.0, %v1120_v34 }
 0x21f   : > { %5211 = vst [vmem:[%s6775_s17 + $0x1d60] sm:$0xff] %v3163_v26  ;;  %5212 = vst [vmem:[%s6775_s17 + $0x1d68] sm:$0xff] %v3164_v27  ;;  %v3169_v38 = vadd.f32 1.0, %v1121_v35  ;;  %v3170_v39 = vadd.f32 1.0, %v1122_v36  ;;  %v1123_v40 = vld [vmem:[%s6760_s12 + $0x1da0] sm:$0xff]  ;;  %v1124_v41 = vld [vmem:[%s6760_s12 + $0x1da8] sm:$0xff] }
 0x220   : > { %v1125_v42 = vld [vmem:[%s6760_s12 + $0x1db0] sm:$0xff]  ;;  %5213 = vst [vmem:[%s6775_s17 + $0x1d70] sm:$0xff] %v3165_v31  ;;  %5214 = vst [vmem:[%s6775_s17 + $0x1d78] sm:$0xff] %v3166_v32  ;;  %v3171_v43 = vadd.f32 1.0, %v1123_v40  ;;  %v3172_v44 = vadd.f32 1.0, %v1124_v41  ;;  %v1126_v46 = vld [vmem:[%s6760_s12 + $0x1db8] sm:$0xff] }
 0x221   : > { %5215 = vst [vmem:[%s6775_s17 + $0x1d80] sm:$0xff] %v3167_v33  ;;  %v3173_v45 = vadd.f32 1.0, %v1125_v42  ;;  %v1127_v47 = vld [vmem:[%s6760_s12 + $0x1dc0] sm:$0xff]  ;;  %v1128_v48 = vld [vmem:[%s6760_s12 + $0x1dc8] sm:$0xff]  ;;  %5216 = vst [vmem:[%s6775_s17 + $0x1d88] sm:$0xff] %v3168_v37  ;;  %v3174_v49 = vadd.f32 1.0, %v1126_v46 }
 0x222   : > { %5217 = vst [vmem:[%s6775_s17 + $0x1d90] sm:$0xff] %v3169_v38  ;;  %5218 = vst [vmem:[%s6775_s17 + $0x1d98] sm:$0xff] %v3170_v39  ;;  %v3175_v50 = vadd.f32 1.0, %v1127_v47  ;;  %v3176_v51 = vadd.f32 1.0, %v1128_v48  ;;  %v1129_v52 = vld [vmem:[%s6760_s12 + $0x1dd0] sm:$0xff]  ;;  %v1130_v53 = vld [vmem:[%s6760_s12 + $0x1dd8] sm:$0xff] }
 0x223   : > { %v1131_v54 = vld [vmem:[%s6760_s12 + $0x1de0] sm:$0xff]  ;;  %5219 = vst [vmem:[%s6775_s17 + $0x1da0] sm:$0xff] %v3171_v43  ;;  %5220 = vst [vmem:[%s6775_s17 + $0x1da8] sm:$0xff] %v3172_v44  ;;  %v3177_v55 = vadd.f32 1.0, %v1129_v52  ;;  %v3178_v56 = vadd.f32 1.0, %v1130_v53  ;;  %v1132_v58 = vld [vmem:[%s6760_s12 + $0x1de8] sm:$0xff] }
 0x224   : > { %5221 = vst [vmem:[%s6775_s17 + $0x1db0] sm:$0xff] %v3173_v45  ;;  %v3179_v57 = vadd.f32 1.0, %v1131_v54  ;;  %v1133_v59 = vld [vmem:[%s6760_s12 + $0x1df0] sm:$0xff]  ;;  %v1134_v60 = vld [vmem:[%s6760_s12 + $0x1df8] sm:$0xff]  ;;  %5222 = vst [vmem:[%s6775_s17 + $0x1db8] sm:$0xff] %v3174_v49  ;;  %v3180_v61 = vadd.f32 1.0, %v1132_v58 }
 0x225   : > { %5223 = vst [vmem:[%s6775_s17 + $0x1dc0] sm:$0xff] %v3175_v50  ;;  %5224 = vst [vmem:[%s6775_s17 + $0x1dc8] sm:$0xff] %v3176_v51  ;;  %v3181_v62 = vadd.f32 1.0, %v1133_v59  ;;  %v3182_v63 = vadd.f32 1.0, %v1134_v60  ;;  %v1135_v0 = vld [vmem:[%s6760_s12 + $0x1e00] sm:$0xff]  ;;  %v1136_v1 = vld [vmem:[%s6760_s12 + $0x1e08] sm:$0xff] }
 0x226   : > { %v1137_v2 = vld [vmem:[%s6760_s12 + $0x1e10] sm:$0xff]  ;;  %5225 = vst [vmem:[%s6775_s17 + $0x1dd0] sm:$0xff] %v3177_v55  ;;  %5226 = vst [vmem:[%s6775_s17 + $0x1dd8] sm:$0xff] %v3178_v56  ;;  %v3183_v3 = vadd.f32 1.0, %v1135_v0  ;;  %v3184_v4 = vadd.f32 1.0, %v1136_v1  ;;  %v1138_v6 = vld [vmem:[%s6760_s12 + $0x1e18] sm:$0xff] }
 0x227   : > { %5227 = vst [vmem:[%s6775_s17 + $0x1de0] sm:$0xff] %v3179_v57  ;;  %v3185_v5 = vadd.f32 1.0, %v1137_v2  ;;  %v1139_v7 = vld [vmem:[%s6760_s12 + $0x1e20] sm:$0xff]  ;;  %v1140_v8 = vld [vmem:[%s6760_s12 + $0x1e28] sm:$0xff]  ;;  %5228 = vst [vmem:[%s6775_s17 + $0x1de8] sm:$0xff] %v3180_v61  ;;  %v3186_v9 = vadd.f32 1.0, %v1138_v6 }
 0x228   : > { %5229 = vst [vmem:[%s6775_s17 + $0x1df0] sm:$0xff] %v3181_v62  ;;  %5230 = vst [vmem:[%s6775_s17 + $0x1df8] sm:$0xff] %v3182_v63  ;;  %v3187_v10 = vadd.f32 1.0, %v1139_v7  ;;  %v3188_v11 = vadd.f32 1.0, %v1140_v8  ;;  %v1141_v12 = vld [vmem:[%s6760_s12 + $0x1e30] sm:$0xff]  ;;  %v1142_v13 = vld [vmem:[%s6760_s12 + $0x1e38] sm:$0xff] }
 0x229   : > { %v1143_v14 = vld [vmem:[%s6760_s12 + $0x1e40] sm:$0xff]  ;;  %5231 = vst [vmem:[%s6775_s17 + $0x1e00] sm:$0xff] %v3183_v3  ;;  %5232 = vst [vmem:[%s6775_s17 + $0x1e08] sm:$0xff] %v3184_v4  ;;  %v3189_v15 = vadd.f32 1.0, %v1141_v12  ;;  %v3190_v16 = vadd.f32 1.0, %v1142_v13  ;;  %v1144_v18 = vld [vmem:[%s6760_s12 + $0x1e48] sm:$0xff] }
 0x22a   : > { %5233 = vst [vmem:[%s6775_s17 + $0x1e10] sm:$0xff] %v3185_v5  ;;  %v3191_v17 = vadd.f32 1.0, %v1143_v14  ;;  %v1145_v19 = vld [vmem:[%s6760_s12 + $0x1e50] sm:$0xff]  ;;  %v1146_v20 = vld [vmem:[%s6760_s12 + $0x1e58] sm:$0xff]  ;;  %5234 = vst [vmem:[%s6775_s17 + $0x1e18] sm:$0xff] %v3186_v9  ;;  %v3192_v21 = vadd.f32 1.0, %v1144_v18 }
 0x22b   : > { %5235 = vst [vmem:[%s6775_s17 + $0x1e20] sm:$0xff] %v3187_v10  ;;  %5236 = vst [vmem:[%s6775_s17 + $0x1e28] sm:$0xff] %v3188_v11  ;;  %v3193_v22 = vadd.f32 1.0, %v1145_v19  ;;  %v3194_v23 = vadd.f32 1.0, %v1146_v20  ;;  %v1147_v24 = vld [vmem:[%s6760_s12 + $0x1e60] sm:$0xff]  ;;  %v1148_v25 = vld [vmem:[%s6760_s12 + $0x1e68] sm:$0xff] }
 0x22c   : > { %v1149_v26 = vld [vmem:[%s6760_s12 + $0x1e70] sm:$0xff]  ;;  %5237 = vst [vmem:[%s6775_s17 + $0x1e30] sm:$0xff] %v3189_v15  ;;  %5238 = vst [vmem:[%s6775_s17 + $0x1e38] sm:$0xff] %v3190_v16  ;;  %v3195_v27 = vadd.f32 1.0, %v1147_v24  ;;  %v3196_v28 = vadd.f32 1.0, %v1148_v25  ;;  %v1150_v30 = vld [vmem:[%s6760_s12 + $0x1e78] sm:$0xff] }
 0x22d   : > { %5239 = vst [vmem:[%s6775_s17 + $0x1e40] sm:$0xff] %v3191_v17  ;;  %v3197_v29 = vadd.f32 1.0, %v1149_v26  ;;  %v1151_v31 = vld [vmem:[%s6760_s12 + $0x1e80] sm:$0xff]  ;;  %v1152_v32 = vld [vmem:[%s6760_s12 + $0x1e88] sm:$0xff]  ;;  %5240 = vst [vmem:[%s6775_s17 + $0x1e48] sm:$0xff] %v3192_v21  ;;  %v3198_v33 = vadd.f32 1.0, %v1150_v30 }
 0x22e   : > { %5241 = vst [vmem:[%s6775_s17 + $0x1e50] sm:$0xff] %v3193_v22  ;;  %5242 = vst [vmem:[%s6775_s17 + $0x1e58] sm:$0xff] %v3194_v23  ;;  %v3199_v34 = vadd.f32 1.0, %v1151_v31  ;;  %v3200_v35 = vadd.f32 1.0, %v1152_v32  ;;  %v1153_v36 = vld [vmem:[%s6760_s12 + $0x1e90] sm:$0xff]  ;;  %v1154_v37 = vld [vmem:[%s6760_s12 + $0x1e98] sm:$0xff] }
 0x22f   : > { %v1155_v38 = vld [vmem:[%s6760_s12 + $0x1ea0] sm:$0xff]  ;;  %5243 = vst [vmem:[%s6775_s17 + $0x1e60] sm:$0xff] %v3195_v27  ;;  %5244 = vst [vmem:[%s6775_s17 + $0x1e68] sm:$0xff] %v3196_v28  ;;  %v3201_v39 = vadd.f32 1.0, %v1153_v36  ;;  %v3202_v40 = vadd.f32 1.0, %v1154_v37  ;;  %v1156_v42 = vld [vmem:[%s6760_s12 + $0x1ea8] sm:$0xff] }
 0x230   : > { %5245 = vst [vmem:[%s6775_s17 + $0x1e70] sm:$0xff] %v3197_v29  ;;  %v3203_v41 = vadd.f32 1.0, %v1155_v38  ;;  %v1157_v43 = vld [vmem:[%s6760_s12 + $0x1eb0] sm:$0xff]  ;;  %v1158_v44 = vld [vmem:[%s6760_s12 + $0x1eb8] sm:$0xff]  ;;  %5246 = vst [vmem:[%s6775_s17 + $0x1e78] sm:$0xff] %v3198_v33  ;;  %v3204_v45 = vadd.f32 1.0, %v1156_v42 }
 0x231   : > { %5247 = vst [vmem:[%s6775_s17 + $0x1e80] sm:$0xff] %v3199_v34  ;;  %5248 = vst [vmem:[%s6775_s17 + $0x1e88] sm:$0xff] %v3200_v35  ;;  %v3205_v46 = vadd.f32 1.0, %v1157_v43  ;;  %v3206_v47 = vadd.f32 1.0, %v1158_v44  ;;  %v1159_v48 = vld [vmem:[%s6760_s12 + $0x1ec0] sm:$0xff]  ;;  %v1160_v49 = vld [vmem:[%s6760_s12 + $0x1ec8] sm:$0xff] }
 0x232   : > { %v1161_v50 = vld [vmem:[%s6760_s12 + $0x1ed0] sm:$0xff]  ;;  %5249 = vst [vmem:[%s6775_s17 + $0x1e90] sm:$0xff] %v3201_v39  ;;  %5250 = vst [vmem:[%s6775_s17 + $0x1e98] sm:$0xff] %v3202_v40  ;;  %v3207_v51 = vadd.f32 1.0, %v1159_v48  ;;  %v3208_v52 = vadd.f32 1.0, %v1160_v49  ;;  %v1162_v54 = vld [vmem:[%s6760_s12 + $0x1ed8] sm:$0xff] }
 0x233   : > { %5251 = vst [vmem:[%s6775_s17 + $0x1ea0] sm:$0xff] %v3203_v41  ;;  %v3209_v53 = vadd.f32 1.0, %v1161_v50  ;;  %v1163_v55 = vld [vmem:[%s6760_s12 + $0x1ee0] sm:$0xff]  ;;  %v1164_v56 = vld [vmem:[%s6760_s12 + $0x1ee8] sm:$0xff]  ;;  %5252 = vst [vmem:[%s6775_s17 + $0x1ea8] sm:$0xff] %v3204_v45  ;;  %v3210_v57 = vadd.f32 1.0, %v1162_v54 }
 0x234   : > { %5253 = vst [vmem:[%s6775_s17 + $0x1eb0] sm:$0xff] %v3205_v46  ;;  %5254 = vst [vmem:[%s6775_s17 + $0x1eb8] sm:$0xff] %v3206_v47  ;;  %v3211_v58 = vadd.f32 1.0, %v1163_v55  ;;  %v3212_v59 = vadd.f32 1.0, %v1164_v56  ;;  %v1165_v60 = vld [vmem:[%s6760_s12 + $0x1ef0] sm:$0xff]  ;;  %v1166_v61 = vld [vmem:[%s6760_s12 + $0x1ef8] sm:$0xff] }
 0x235   : > { %v1167_v62 = vld [vmem:[%s6760_s12 + $0x1f00] sm:$0xff]  ;;  %5255 = vst [vmem:[%s6775_s17 + $0x1ec0] sm:$0xff] %v3207_v51  ;;  %5256 = vst [vmem:[%s6775_s17 + $0x1ec8] sm:$0xff] %v3208_v52  ;;  %v3213_v63 = vadd.f32 1.0, %v1165_v60  ;;  %v3214_v0 = vadd.f32 1.0, %v1166_v61  ;;  %v1168_v2 = vld [vmem:[%s6760_s12 + $0x1f08] sm:$0xff] }
 0x236   : > { %5257 = vst [vmem:[%s6775_s17 + $0x1ed0] sm:$0xff] %v3209_v53  ;;  %v3215_v1 = vadd.f32 1.0, %v1167_v62  ;;  %v1169_v3 = vld [vmem:[%s6760_s12 + $0x1f10] sm:$0xff]  ;;  %v1170_v4 = vld [vmem:[%s6760_s12 + $0x1f18] sm:$0xff]  ;;  %5258 = vst [vmem:[%s6775_s17 + $0x1ed8] sm:$0xff] %v3210_v57  ;;  %v3216_v5 = vadd.f32 1.0, %v1168_v2 }
 0x237   : > { %5259 = vst [vmem:[%s6775_s17 + $0x1ee0] sm:$0xff] %v3211_v58  ;;  %5260 = vst [vmem:[%s6775_s17 + $0x1ee8] sm:$0xff] %v3212_v59  ;;  %v3217_v6 = vadd.f32 1.0, %v1169_v3  ;;  %v3218_v7 = vadd.f32 1.0, %v1170_v4  ;;  %v1171_v8 = vld [vmem:[%s6760_s12 + $0x1f20] sm:$0xff]  ;;  %v1172_v9 = vld [vmem:[%s6760_s12 + $0x1f28] sm:$0xff] }
 0x238   : > { %v1173_v10 = vld [vmem:[%s6760_s12 + $0x1f30] sm:$0xff]  ;;  %5261 = vst [vmem:[%s6775_s17 + $0x1ef0] sm:$0xff] %v3213_v63  ;;  %5262 = vst [vmem:[%s6775_s17 + $0x1ef8] sm:$0xff] %v3214_v0  ;;  %v3219_v11 = vadd.f32 1.0, %v1171_v8  ;;  %v3220_v12 = vadd.f32 1.0, %v1172_v9  ;;  %v1174_v14 = vld [vmem:[%s6760_s12 + $0x1f38] sm:$0xff] }
 0x239   : > { %5263 = vst [vmem:[%s6775_s17 + $0x1f00] sm:$0xff] %v3215_v1  ;;  %v3221_v13 = vadd.f32 1.0, %v1173_v10  ;;  %v1175_v15 = vld [vmem:[%s6760_s12 + $0x1f40] sm:$0xff]  ;;  %v1176_v16 = vld [vmem:[%s6760_s12 + $0x1f48] sm:$0xff]  ;;  %5264 = vst [vmem:[%s6775_s17 + $0x1f08] sm:$0xff] %v3216_v5  ;;  %v3222_v17 = vadd.f32 1.0, %v1174_v14 }
 0x23a   : > { %5265 = vst [vmem:[%s6775_s17 + $0x1f10] sm:$0xff] %v3217_v6  ;;  %5266 = vst [vmem:[%s6775_s17 + $0x1f18] sm:$0xff] %v3218_v7  ;;  %v3223_v18 = vadd.f32 1.0, %v1175_v15  ;;  %v3224_v19 = vadd.f32 1.0, %v1176_v16  ;;  %v1177_v20 = vld [vmem:[%s6760_s12 + $0x1f50] sm:$0xff]  ;;  %v1178_v21 = vld [vmem:[%s6760_s12 + $0x1f58] sm:$0xff] }
 0x23b   : > { %v1179_v22 = vld [vmem:[%s6760_s12 + $0x1f60] sm:$0xff]  ;;  %5267 = vst [vmem:[%s6775_s17 + $0x1f20] sm:$0xff] %v3219_v11  ;;  %5268 = vst [vmem:[%s6775_s17 + $0x1f28] sm:$0xff] %v3220_v12  ;;  %v3225_v23 = vadd.f32 1.0, %v1177_v20  ;;  %v3226_v24 = vadd.f32 1.0, %v1178_v21  ;;  %v1180_v26 = vld [vmem:[%s6760_s12 + $0x1f68] sm:$0xff] }
 0x23c   : > { %5269 = vst [vmem:[%s6775_s17 + $0x1f30] sm:$0xff] %v3221_v13  ;;  %v3227_v25 = vadd.f32 1.0, %v1179_v22  ;;  %v1181_v27 = vld [vmem:[%s6760_s12 + $0x1f70] sm:$0xff]  ;;  %v1182_v28 = vld [vmem:[%s6760_s12 + $0x1f78] sm:$0xff]  ;;  %5270 = vst [vmem:[%s6775_s17 + $0x1f38] sm:$0xff] %v3222_v17  ;;  %v3228_v29 = vadd.f32 1.0, %v1180_v26 }
 0x23d   : > { %5271 = vst [vmem:[%s6775_s17 + $0x1f40] sm:$0xff] %v3223_v18  ;;  %5272 = vst [vmem:[%s6775_s17 + $0x1f48] sm:$0xff] %v3224_v19  ;;  %v3229_v30 = vadd.f32 1.0, %v1181_v27  ;;  %v3230_v31 = vadd.f32 1.0, %v1182_v28  ;;  %v1183_v32 = vld [vmem:[%s6760_s12 + $0x1f80] sm:$0xff]  ;;  %v1184_v33 = vld [vmem:[%s6760_s12 + $0x1f88] sm:$0xff] }
 0x23e   : > { %v1185_v34 = vld [vmem:[%s6760_s12 + $0x1f90] sm:$0xff]  ;;  %5273 = vst [vmem:[%s6775_s17 + $0x1f50] sm:$0xff] %v3225_v23  ;;  %5274 = vst [vmem:[%s6775_s17 + $0x1f58] sm:$0xff] %v3226_v24  ;;  %v3231_v35 = vadd.f32 1.0, %v1183_v32  ;;  %v3232_v36 = vadd.f32 1.0, %v1184_v33  ;;  %v1186_v38 = vld [vmem:[%s6760_s12 + $0x1f98] sm:$0xff] }
 0x23f   : > { %5275 = vst [vmem:[%s6775_s17 + $0x1f60] sm:$0xff] %v3227_v25  ;;  %v3233_v37 = vadd.f32 1.0, %v1185_v34  ;;  %v1187_v39 = vld [vmem:[%s6760_s12 + $0x1fa0] sm:$0xff]  ;;  %v1188_v40 = vld [vmem:[%s6760_s12 + $0x1fa8] sm:$0xff]  ;;  %5276 = vst [vmem:[%s6775_s17 + $0x1f68] sm:$0xff] %v3228_v29  ;;  %v3234_v41 = vadd.f32 1.0, %v1186_v38 }
 0x240   : > { %5277 = vst [vmem:[%s6775_s17 + $0x1f70] sm:$0xff] %v3229_v30  ;;  %5278 = vst [vmem:[%s6775_s17 + $0x1f78] sm:$0xff] %v3230_v31  ;;  %v3235_v42 = vadd.f32 1.0, %v1187_v39  ;;  %v3236_v43 = vadd.f32 1.0, %v1188_v40  ;;  %v1189_v44 = vld [vmem:[%s6760_s12 + $0x1fb0] sm:$0xff]  ;;  %v1190_v45 = vld [vmem:[%s6760_s12 + $0x1fb8] sm:$0xff] }
 0x241   : > { %v1191_v46 = vld [vmem:[%s6760_s12 + $0x1fc0] sm:$0xff]  ;;  %5279 = vst [vmem:[%s6775_s17 + $0x1f80] sm:$0xff] %v3231_v35  ;;  %5280 = vst [vmem:[%s6775_s17 + $0x1f88] sm:$0xff] %v3232_v36  ;;  %v3237_v47 = vadd.f32 1.0, %v1189_v44  ;;  %v3238_v48 = vadd.f32 1.0, %v1190_v45  ;;  %v1192_v50 = vld [vmem:[%s6760_s12 + $0x1fc8] sm:$0xff] }
 0x242   : > { %5281 = vst [vmem:[%s6775_s17 + $0x1f90] sm:$0xff] %v3233_v37  ;;  %v3239_v49 = vadd.f32 1.0, %v1191_v46  ;;  %v1193_v51 = vld [vmem:[%s6760_s12 + $0x1fd0] sm:$0xff]  ;;  %v1194_v52 = vld [vmem:[%s6760_s12 + $0x1fd8] sm:$0xff]  ;;  %5282 = vst [vmem:[%s6775_s17 + $0x1f98] sm:$0xff] %v3234_v41  ;;  %v3240_v53 = vadd.f32 1.0, %v1192_v50 }
 0x243   : > { %5283 = vst [vmem:[%s6775_s17 + $0x1fa0] sm:$0xff] %v3235_v42  ;;  %5284 = vst [vmem:[%s6775_s17 + $0x1fa8] sm:$0xff] %v3236_v43  ;;  %v3241_v54 = vadd.f32 1.0, %v1193_v51  ;;  %v3242_v55 = vadd.f32 1.0, %v1194_v52  ;;  %v1195_v56 = vld [vmem:[%s6760_s12 + $0x1fe0] sm:$0xff]  ;;  %v1196_v57 = vld [vmem:[%s6760_s12 + $0x1fe8] sm:$0xff] }
 0x244   : > { %v1197_v58 = vld [vmem:[%s6760_s12 + $0x1ff0] sm:$0xff]  ;;  %5285 = vst [vmem:[%s6775_s17 + $0x1fb0] sm:$0xff] %v3237_v47  ;;  %5286 = vst [vmem:[%s6775_s17 + $0x1fb8] sm:$0xff] %v3238_v48  ;;  %v3243_v59 = vadd.f32 1.0, %v1195_v56  ;;  %v3244_v60 = vadd.f32 1.0, %v1196_v57  ;;  %v1198_v62 = vld [vmem:[%s6760_s12 + $0x1ff8] sm:$0xff] }
 0x245   : > { %5287 = vst [vmem:[%s6775_s17 + $0x1fc0] sm:$0xff] %v3239_v49  ;;  %v3245_v61 = vadd.f32 1.0, %v1197_v58  ;;  %v1199_v63 = vld [vmem:[%s6760_s12 + $0x2000] sm:$0xff]  ;;  %v1200_v0 = vld [vmem:[%s6760_s12 + $0x2008] sm:$0xff]  ;;  %5288 = vst [vmem:[%s6775_s17 + $0x1fc8] sm:$0xff] %v3240_v53  ;;  %v3246_v1 = vadd.f32 1.0, %v1198_v62 }
 0x246   : > { %5289 = vst [vmem:[%s6775_s17 + $0x1fd0] sm:$0xff] %v3241_v54  ;;  %5290 = vst [vmem:[%s6775_s17 + $0x1fd8] sm:$0xff] %v3242_v55  ;;  %v3247_v2 = vadd.f32 1.0, %v1199_v63  ;;  %v3248_v3 = vadd.f32 1.0, %v1200_v0  ;;  %v1201_v4 = vld [vmem:[%s6760_s12 + $0x2010] sm:$0xff]  ;;  %v1202_v5 = vld [vmem:[%s6760_s12 + $0x2018] sm:$0xff] }
 0x247   : > { %v1203_v6 = vld [vmem:[%s6760_s12 + $0x2020] sm:$0xff]  ;;  %5291 = vst [vmem:[%s6775_s17 + $0x1fe0] sm:$0xff] %v3243_v59  ;;  %5292 = vst [vmem:[%s6775_s17 + $0x1fe8] sm:$0xff] %v3244_v60  ;;  %v3249_v7 = vadd.f32 1.0, %v1201_v4  ;;  %v3250_v8 = vadd.f32 1.0, %v1202_v5  ;;  %v1204_v10 = vld [vmem:[%s6760_s12 + $0x2028] sm:$0xff] }
 0x248   : > { %5293 = vst [vmem:[%s6775_s17 + $0x1ff0] sm:$0xff] %v3245_v61  ;;  %v3251_v9 = vadd.f32 1.0, %v1203_v6  ;;  %v1205_v11 = vld [vmem:[%s6760_s12 + $0x2030] sm:$0xff]  ;;  %v1206_v12 = vld [vmem:[%s6760_s12 + $0x2038] sm:$0xff]  ;;  %5294 = vst [vmem:[%s6775_s17 + $0x1ff8] sm:$0xff] %v3246_v1  ;;  %v3252_v13 = vadd.f32 1.0, %v1204_v10 }
 0x249   : > { %5295 = vst [vmem:[%s6775_s17 + $0x2000] sm:$0xff] %v3247_v2  ;;  %5296 = vst [vmem:[%s6775_s17 + $0x2008] sm:$0xff] %v3248_v3  ;;  %v3253_v14 = vadd.f32 1.0, %v1205_v11  ;;  %v3254_v15 = vadd.f32 1.0, %v1206_v12  ;;  %v1207_v16 = vld [vmem:[%s6760_s12 + $0x2040] sm:$0xff]  ;;  %v1208_v17 = vld [vmem:[%s6760_s12 + $0x2048] sm:$0xff] }
 0x24a   : > { %v1209_v18 = vld [vmem:[%s6760_s12 + $0x2050] sm:$0xff]  ;;  %5297 = vst [vmem:[%s6775_s17 + $0x2010] sm:$0xff] %v3249_v7  ;;  %5298 = vst [vmem:[%s6775_s17 + $0x2018] sm:$0xff] %v3250_v8  ;;  %v3255_v19 = vadd.f32 1.0, %v1207_v16  ;;  %v3256_v20 = vadd.f32 1.0, %v1208_v17  ;;  %v1210_v22 = vld [vmem:[%s6760_s12 + $0x2058] sm:$0xff] }
 0x24b   : > { %5299 = vst [vmem:[%s6775_s17 + $0x2020] sm:$0xff] %v3251_v9  ;;  %v3257_v21 = vadd.f32 1.0, %v1209_v18  ;;  %v1211_v23 = vld [vmem:[%s6760_s12 + $0x2060] sm:$0xff]  ;;  %v1212_v24 = vld [vmem:[%s6760_s12 + $0x2068] sm:$0xff]  ;;  %5300 = vst [vmem:[%s6775_s17 + $0x2028] sm:$0xff] %v3252_v13  ;;  %v3258_v25 = vadd.f32 1.0, %v1210_v22 }
 0x24c   : > { %5301 = vst [vmem:[%s6775_s17 + $0x2030] sm:$0xff] %v3253_v14  ;;  %5302 = vst [vmem:[%s6775_s17 + $0x2038] sm:$0xff] %v3254_v15  ;;  %v3259_v26 = vadd.f32 1.0, %v1211_v23  ;;  %v3260_v27 = vadd.f32 1.0, %v1212_v24  ;;  %v1213_v28 = vld [vmem:[%s6760_s12 + $0x2070] sm:$0xff]  ;;  %v1214_v29 = vld [vmem:[%s6760_s12 + $0x2078] sm:$0xff] }
 0x24d   : > { %v1215_v30 = vld [vmem:[%s6760_s12 + $0x2080] sm:$0xff]  ;;  %5303 = vst [vmem:[%s6775_s17 + $0x2040] sm:$0xff] %v3255_v19  ;;  %5304 = vst [vmem:[%s6775_s17 + $0x2048] sm:$0xff] %v3256_v20  ;;  %v3261_v31 = vadd.f32 1.0, %v1213_v28  ;;  %v3262_v32 = vadd.f32 1.0, %v1214_v29  ;;  %v1216_v34 = vld [vmem:[%s6760_s12 + $0x2088] sm:$0xff] }
 0x24e   : > { %5305 = vst [vmem:[%s6775_s17 + $0x2050] sm:$0xff] %v3257_v21  ;;  %v3263_v33 = vadd.f32 1.0, %v1215_v30  ;;  %v1217_v35 = vld [vmem:[%s6760_s12 + $0x2090] sm:$0xff]  ;;  %v1218_v36 = vld [vmem:[%s6760_s12 + $0x2098] sm:$0xff]  ;;  %5306 = vst [vmem:[%s6775_s17 + $0x2058] sm:$0xff] %v3258_v25  ;;  %v3264_v37 = vadd.f32 1.0, %v1216_v34 }
 0x24f   : > { %5307 = vst [vmem:[%s6775_s17 + $0x2060] sm:$0xff] %v3259_v26  ;;  %5308 = vst [vmem:[%s6775_s17 + $0x2068] sm:$0xff] %v3260_v27  ;;  %v3265_v38 = vadd.f32 1.0, %v1217_v35  ;;  %v3266_v39 = vadd.f32 1.0, %v1218_v36  ;;  %v1219_v40 = vld [vmem:[%s6760_s12 + $0x20a0] sm:$0xff]  ;;  %v1220_v41 = vld [vmem:[%s6760_s12 + $0x20a8] sm:$0xff] }
 0x250   : > { %v1221_v42 = vld [vmem:[%s6760_s12 + $0x20b0] sm:$0xff]  ;;  %5309 = vst [vmem:[%s6775_s17 + $0x2070] sm:$0xff] %v3261_v31  ;;  %5310 = vst [vmem:[%s6775_s17 + $0x2078] sm:$0xff] %v3262_v32  ;;  %v3267_v43 = vadd.f32 1.0, %v1219_v40  ;;  %v3268_v44 = vadd.f32 1.0, %v1220_v41  ;;  %v1222_v46 = vld [vmem:[%s6760_s12 + $0x20b8] sm:$0xff] }
 0x251   : > { %5311 = vst [vmem:[%s6775_s17 + $0x2080] sm:$0xff] %v3263_v33  ;;  %v3269_v45 = vadd.f32 1.0, %v1221_v42  ;;  %v1223_v47 = vld [vmem:[%s6760_s12 + $0x20c0] sm:$0xff]  ;;  %v1224_v48 = vld [vmem:[%s6760_s12 + $0x20c8] sm:$0xff]  ;;  %5312 = vst [vmem:[%s6775_s17 + $0x2088] sm:$0xff] %v3264_v37  ;;  %v3270_v49 = vadd.f32 1.0, %v1222_v46 }
 0x252   : > { %5313 = vst [vmem:[%s6775_s17 + $0x2090] sm:$0xff] %v3265_v38  ;;  %5314 = vst [vmem:[%s6775_s17 + $0x2098] sm:$0xff] %v3266_v39  ;;  %v3271_v50 = vadd.f32 1.0, %v1223_v47  ;;  %v3272_v51 = vadd.f32 1.0, %v1224_v48  ;;  %v1225_v52 = vld [vmem:[%s6760_s12 + $0x20d0] sm:$0xff]  ;;  %v1226_v53 = vld [vmem:[%s6760_s12 + $0x20d8] sm:$0xff] }
 0x253   : > { %v1227_v54 = vld [vmem:[%s6760_s12 + $0x20e0] sm:$0xff]  ;;  %5315 = vst [vmem:[%s6775_s17 + $0x20a0] sm:$0xff] %v3267_v43  ;;  %5316 = vst [vmem:[%s6775_s17 + $0x20a8] sm:$0xff] %v3268_v44  ;;  %v3273_v55 = vadd.f32 1.0, %v1225_v52  ;;  %v3274_v56 = vadd.f32 1.0, %v1226_v53  ;;  %v1228_v58 = vld [vmem:[%s6760_s12 + $0x20e8] sm:$0xff] }
 0x254   : > { %5317 = vst [vmem:[%s6775_s17 + $0x20b0] sm:$0xff] %v3269_v45  ;;  %v3275_v57 = vadd.f32 1.0, %v1227_v54  ;;  %v1229_v59 = vld [vmem:[%s6760_s12 + $0x20f0] sm:$0xff]  ;;  %v1230_v60 = vld [vmem:[%s6760_s12 + $0x20f8] sm:$0xff]  ;;  %5318 = vst [vmem:[%s6775_s17 + $0x20b8] sm:$0xff] %v3270_v49  ;;  %v3276_v61 = vadd.f32 1.0, %v1228_v58 }
 0x255   : > { %5319 = vst [vmem:[%s6775_s17 + $0x20c0] sm:$0xff] %v3271_v50  ;;  %5320 = vst [vmem:[%s6775_s17 + $0x20c8] sm:$0xff] %v3272_v51  ;;  %v3277_v62 = vadd.f32 1.0, %v1229_v59  ;;  %v3278_v63 = vadd.f32 1.0, %v1230_v60  ;;  %v1231_v0 = vld [vmem:[%s6760_s12 + $0x2100] sm:$0xff]  ;;  %v1232_v1 = vld [vmem:[%s6760_s12 + $0x2108] sm:$0xff] }
 0x256   : > { %v1233_v2 = vld [vmem:[%s6760_s12 + $0x2110] sm:$0xff]  ;;  %5321 = vst [vmem:[%s6775_s17 + $0x20d0] sm:$0xff] %v3273_v55  ;;  %5322 = vst [vmem:[%s6775_s17 + $0x20d8] sm:$0xff] %v3274_v56  ;;  %v3279_v3 = vadd.f32 1.0, %v1231_v0  ;;  %v3280_v4 = vadd.f32 1.0, %v1232_v1  ;;  %v1234_v6 = vld [vmem:[%s6760_s12 + $0x2118] sm:$0xff] }
 0x257   : > { %5323 = vst [vmem:[%s6775_s17 + $0x20e0] sm:$0xff] %v3275_v57  ;;  %v3281_v5 = vadd.f32 1.0, %v1233_v2  ;;  %v1235_v7 = vld [vmem:[%s6760_s12 + $0x2120] sm:$0xff]  ;;  %v1236_v8 = vld [vmem:[%s6760_s12 + $0x2128] sm:$0xff]  ;;  %5324 = vst [vmem:[%s6775_s17 + $0x20e8] sm:$0xff] %v3276_v61  ;;  %v3282_v9 = vadd.f32 1.0, %v1234_v6 }
 0x258   : > { %5325 = vst [vmem:[%s6775_s17 + $0x20f0] sm:$0xff] %v3277_v62  ;;  %5326 = vst [vmem:[%s6775_s17 + $0x20f8] sm:$0xff] %v3278_v63  ;;  %v3283_v10 = vadd.f32 1.0, %v1235_v7  ;;  %v3284_v11 = vadd.f32 1.0, %v1236_v8  ;;  %v1237_v12 = vld [vmem:[%s6760_s12 + $0x2130] sm:$0xff]  ;;  %v1238_v13 = vld [vmem:[%s6760_s12 + $0x2138] sm:$0xff] }
 0x259   : > { %v1239_v14 = vld [vmem:[%s6760_s12 + $0x2140] sm:$0xff]  ;;  %5327 = vst [vmem:[%s6775_s17 + $0x2100] sm:$0xff] %v3279_v3  ;;  %5328 = vst [vmem:[%s6775_s17 + $0x2108] sm:$0xff] %v3280_v4  ;;  %v3285_v15 = vadd.f32 1.0, %v1237_v12  ;;  %v3286_v16 = vadd.f32 1.0, %v1238_v13  ;;  %v1240_v18 = vld [vmem:[%s6760_s12 + $0x2148] sm:$0xff] }
 0x25a   : > { %5329 = vst [vmem:[%s6775_s17 + $0x2110] sm:$0xff] %v3281_v5  ;;  %v3287_v17 = vadd.f32 1.0, %v1239_v14  ;;  %v1241_v19 = vld [vmem:[%s6760_s12 + $0x2150] sm:$0xff]  ;;  %v1242_v20 = vld [vmem:[%s6760_s12 + $0x2158] sm:$0xff]  ;;  %5330 = vst [vmem:[%s6775_s17 + $0x2118] sm:$0xff] %v3282_v9  ;;  %v3288_v21 = vadd.f32 1.0, %v1240_v18 }
 0x25b   : > { %5331 = vst [vmem:[%s6775_s17 + $0x2120] sm:$0xff] %v3283_v10  ;;  %5332 = vst [vmem:[%s6775_s17 + $0x2128] sm:$0xff] %v3284_v11  ;;  %v3289_v22 = vadd.f32 1.0, %v1241_v19  ;;  %v3290_v23 = vadd.f32 1.0, %v1242_v20  ;;  %v1243_v24 = vld [vmem:[%s6760_s12 + $0x2160] sm:$0xff]  ;;  %v1244_v25 = vld [vmem:[%s6760_s12 + $0x2168] sm:$0xff] }
 0x25c   : > { %v1245_v26 = vld [vmem:[%s6760_s12 + $0x2170] sm:$0xff]  ;;  %5333 = vst [vmem:[%s6775_s17 + $0x2130] sm:$0xff] %v3285_v15  ;;  %5334 = vst [vmem:[%s6775_s17 + $0x2138] sm:$0xff] %v3286_v16  ;;  %v3291_v27 = vadd.f32 1.0, %v1243_v24  ;;  %v3292_v28 = vadd.f32 1.0, %v1244_v25  ;;  %v1246_v30 = vld [vmem:[%s6760_s12 + $0x2178] sm:$0xff] }
 0x25d   : > { %5335 = vst [vmem:[%s6775_s17 + $0x2140] sm:$0xff] %v3287_v17  ;;  %v3293_v29 = vadd.f32 1.0, %v1245_v26  ;;  %v1247_v31 = vld [vmem:[%s6760_s12 + $0x2180] sm:$0xff]  ;;  %v1248_v32 = vld [vmem:[%s6760_s12 + $0x2188] sm:$0xff]  ;;  %5336 = vst [vmem:[%s6775_s17 + $0x2148] sm:$0xff] %v3288_v21  ;;  %v3294_v33 = vadd.f32 1.0, %v1246_v30 }
 0x25e   : > { %5337 = vst [vmem:[%s6775_s17 + $0x2150] sm:$0xff] %v3289_v22  ;;  %5338 = vst [vmem:[%s6775_s17 + $0x2158] sm:$0xff] %v3290_v23  ;;  %v3295_v34 = vadd.f32 1.0, %v1247_v31  ;;  %v3296_v35 = vadd.f32 1.0, %v1248_v32  ;;  %v1249_v36 = vld [vmem:[%s6760_s12 + $0x2190] sm:$0xff]  ;;  %v1250_v37 = vld [vmem:[%s6760_s12 + $0x2198] sm:$0xff] }
 0x25f   : > { %v1251_v38 = vld [vmem:[%s6760_s12 + $0x21a0] sm:$0xff]  ;;  %5339 = vst [vmem:[%s6775_s17 + $0x2160] sm:$0xff] %v3291_v27  ;;  %5340 = vst [vmem:[%s6775_s17 + $0x2168] sm:$0xff] %v3292_v28  ;;  %v3297_v39 = vadd.f32 1.0, %v1249_v36  ;;  %v3298_v40 = vadd.f32 1.0, %v1250_v37  ;;  %v1252_v42 = vld [vmem:[%s6760_s12 + $0x21a8] sm:$0xff] }
 0x260   : > { %5341 = vst [vmem:[%s6775_s17 + $0x2170] sm:$0xff] %v3293_v29  ;;  %v3299_v41 = vadd.f32 1.0, %v1251_v38  ;;  %v1253_v43 = vld [vmem:[%s6760_s12 + $0x21b0] sm:$0xff]  ;;  %v1254_v44 = vld [vmem:[%s6760_s12 + $0x21b8] sm:$0xff]  ;;  %5342 = vst [vmem:[%s6775_s17 + $0x2178] sm:$0xff] %v3294_v33  ;;  %v3300_v45 = vadd.f32 1.0, %v1252_v42 }
 0x261   : > { %5343 = vst [vmem:[%s6775_s17 + $0x2180] sm:$0xff] %v3295_v34  ;;  %5344 = vst [vmem:[%s6775_s17 + $0x2188] sm:$0xff] %v3296_v35  ;;  %v3301_v46 = vadd.f32 1.0, %v1253_v43  ;;  %v3302_v47 = vadd.f32 1.0, %v1254_v44  ;;  %v1255_v48 = vld [vmem:[%s6760_s12 + $0x21c0] sm:$0xff]  ;;  %v1256_v49 = vld [vmem:[%s6760_s12 + $0x21c8] sm:$0xff] }
 0x262   : > { %v1257_v50 = vld [vmem:[%s6760_s12 + $0x21d0] sm:$0xff]  ;;  %5345 = vst [vmem:[%s6775_s17 + $0x2190] sm:$0xff] %v3297_v39  ;;  %5346 = vst [vmem:[%s6775_s17 + $0x2198] sm:$0xff] %v3298_v40  ;;  %v3303_v51 = vadd.f32 1.0, %v1255_v48  ;;  %v3304_v52 = vadd.f32 1.0, %v1256_v49  ;;  %v1258_v54 = vld [vmem:[%s6760_s12 + $0x21d8] sm:$0xff] }
 0x263   : > { %5347 = vst [vmem:[%s6775_s17 + $0x21a0] sm:$0xff] %v3299_v41  ;;  %v3305_v53 = vadd.f32 1.0, %v1257_v50  ;;  %v1259_v55 = vld [vmem:[%s6760_s12 + $0x21e0] sm:$0xff]  ;;  %v1260_v56 = vld [vmem:[%s6760_s12 + $0x21e8] sm:$0xff]  ;;  %5348 = vst [vmem:[%s6775_s17 + $0x21a8] sm:$0xff] %v3300_v45  ;;  %v3306_v57 = vadd.f32 1.0, %v1258_v54 }
 0x264   : > { %5349 = vst [vmem:[%s6775_s17 + $0x21b0] sm:$0xff] %v3301_v46  ;;  %5350 = vst [vmem:[%s6775_s17 + $0x21b8] sm:$0xff] %v3302_v47  ;;  %v3307_v58 = vadd.f32 1.0, %v1259_v55  ;;  %v3308_v59 = vadd.f32 1.0, %v1260_v56  ;;  %v1261_v60 = vld [vmem:[%s6760_s12 + $0x21f0] sm:$0xff]  ;;  %v1262_v61 = vld [vmem:[%s6760_s12 + $0x21f8] sm:$0xff] }
 0x265   : > { %v1263_v62 = vld [vmem:[%s6760_s12 + $0x2200] sm:$0xff]  ;;  %5351 = vst [vmem:[%s6775_s17 + $0x21c0] sm:$0xff] %v3303_v51  ;;  %5352 = vst [vmem:[%s6775_s17 + $0x21c8] sm:$0xff] %v3304_v52  ;;  %v3309_v63 = vadd.f32 1.0, %v1261_v60  ;;  %v3310_v0 = vadd.f32 1.0, %v1262_v61  ;;  %v1264_v2 = vld [vmem:[%s6760_s12 + $0x2208] sm:$0xff] }
 0x266   : > { %5353 = vst [vmem:[%s6775_s17 + $0x21d0] sm:$0xff] %v3305_v53  ;;  %v3311_v1 = vadd.f32 1.0, %v1263_v62  ;;  %v1265_v3 = vld [vmem:[%s6760_s12 + $0x2210] sm:$0xff]  ;;  %v1266_v4 = vld [vmem:[%s6760_s12 + $0x2218] sm:$0xff]  ;;  %5354 = vst [vmem:[%s6775_s17 + $0x21d8] sm:$0xff] %v3306_v57  ;;  %v3312_v5 = vadd.f32 1.0, %v1264_v2 }
 0x267   : > { %5355 = vst [vmem:[%s6775_s17 + $0x21e0] sm:$0xff] %v3307_v58  ;;  %5356 = vst [vmem:[%s6775_s17 + $0x21e8] sm:$0xff] %v3308_v59  ;;  %v3313_v6 = vadd.f32 1.0, %v1265_v3  ;;  %v3314_v7 = vadd.f32 1.0, %v1266_v4  ;;  %v1267_v8 = vld [vmem:[%s6760_s12 + $0x2220] sm:$0xff]  ;;  %v1268_v9 = vld [vmem:[%s6760_s12 + $0x2228] sm:$0xff] }
 0x268   : > { %v1269_v10 = vld [vmem:[%s6760_s12 + $0x2230] sm:$0xff]  ;;  %5357 = vst [vmem:[%s6775_s17 + $0x21f0] sm:$0xff] %v3309_v63  ;;  %5358 = vst [vmem:[%s6775_s17 + $0x21f8] sm:$0xff] %v3310_v0  ;;  %v3315_v11 = vadd.f32 1.0, %v1267_v8  ;;  %v3316_v12 = vadd.f32 1.0, %v1268_v9  ;;  %v1270_v14 = vld [vmem:[%s6760_s12 + $0x2238] sm:$0xff] }
 0x269   : > { %5359 = vst [vmem:[%s6775_s17 + $0x2200] sm:$0xff] %v3311_v1  ;;  %v3317_v13 = vadd.f32 1.0, %v1269_v10  ;;  %v1271_v15 = vld [vmem:[%s6760_s12 + $0x2240] sm:$0xff]  ;;  %v1272_v16 = vld [vmem:[%s6760_s12 + $0x2248] sm:$0xff]  ;;  %5360 = vst [vmem:[%s6775_s17 + $0x2208] sm:$0xff] %v3312_v5  ;;  %v3318_v17 = vadd.f32 1.0, %v1270_v14 }
 0x26a   : > { %5361 = vst [vmem:[%s6775_s17 + $0x2210] sm:$0xff] %v3313_v6  ;;  %5362 = vst [vmem:[%s6775_s17 + $0x2218] sm:$0xff] %v3314_v7  ;;  %v3319_v18 = vadd.f32 1.0, %v1271_v15  ;;  %v3320_v19 = vadd.f32 1.0, %v1272_v16  ;;  %v1273_v20 = vld [vmem:[%s6760_s12 + $0x2250] sm:$0xff]  ;;  %v1274_v21 = vld [vmem:[%s6760_s12 + $0x2258] sm:$0xff] }
 0x26b   : > { %v1275_v22 = vld [vmem:[%s6760_s12 + $0x2260] sm:$0xff]  ;;  %5363 = vst [vmem:[%s6775_s17 + $0x2220] sm:$0xff] %v3315_v11  ;;  %5364 = vst [vmem:[%s6775_s17 + $0x2228] sm:$0xff] %v3316_v12  ;;  %v3321_v23 = vadd.f32 1.0, %v1273_v20  ;;  %v3322_v24 = vadd.f32 1.0, %v1274_v21  ;;  %v1276_v26 = vld [vmem:[%s6760_s12 + $0x2268] sm:$0xff] }
 0x26c   : > { %5365 = vst [vmem:[%s6775_s17 + $0x2230] sm:$0xff] %v3317_v13  ;;  %v3323_v25 = vadd.f32 1.0, %v1275_v22  ;;  %v1277_v27 = vld [vmem:[%s6760_s12 + $0x2270] sm:$0xff]  ;;  %v1278_v28 = vld [vmem:[%s6760_s12 + $0x2278] sm:$0xff]  ;;  %5366 = vst [vmem:[%s6775_s17 + $0x2238] sm:$0xff] %v3318_v17  ;;  %v3324_v29 = vadd.f32 1.0, %v1276_v26 }
 0x26d   : > { %5367 = vst [vmem:[%s6775_s17 + $0x2240] sm:$0xff] %v3319_v18  ;;  %5368 = vst [vmem:[%s6775_s17 + $0x2248] sm:$0xff] %v3320_v19  ;;  %v3325_v30 = vadd.f32 1.0, %v1277_v27  ;;  %v3326_v31 = vadd.f32 1.0, %v1278_v28  ;;  %v1279_v32 = vld [vmem:[%s6760_s12 + $0x2280] sm:$0xff]  ;;  %v1280_v33 = vld [vmem:[%s6760_s12 + $0x2288] sm:$0xff] }
 0x26e   : > { %v1281_v34 = vld [vmem:[%s6760_s12 + $0x2290] sm:$0xff]  ;;  %5369 = vst [vmem:[%s6775_s17 + $0x2250] sm:$0xff] %v3321_v23  ;;  %5370 = vst [vmem:[%s6775_s17 + $0x2258] sm:$0xff] %v3322_v24  ;;  %v3327_v35 = vadd.f32 1.0, %v1279_v32  ;;  %v3328_v36 = vadd.f32 1.0, %v1280_v33  ;;  %v1282_v38 = vld [vmem:[%s6760_s12 + $0x2298] sm:$0xff] }
 0x26f   : > { %5371 = vst [vmem:[%s6775_s17 + $0x2260] sm:$0xff] %v3323_v25  ;;  %v3329_v37 = vadd.f32 1.0, %v1281_v34  ;;  %v1283_v39 = vld [vmem:[%s6760_s12 + $0x22a0] sm:$0xff]  ;;  %v1284_v40 = vld [vmem:[%s6760_s12 + $0x22a8] sm:$0xff]  ;;  %5372 = vst [vmem:[%s6775_s17 + $0x2268] sm:$0xff] %v3324_v29  ;;  %v3330_v41 = vadd.f32 1.0, %v1282_v38 }
 0x270   : > { %5373 = vst [vmem:[%s6775_s17 + $0x2270] sm:$0xff] %v3325_v30  ;;  %5374 = vst [vmem:[%s6775_s17 + $0x2278] sm:$0xff] %v3326_v31  ;;  %v3331_v42 = vadd.f32 1.0, %v1283_v39  ;;  %v3332_v43 = vadd.f32 1.0, %v1284_v40  ;;  %v1285_v44 = vld [vmem:[%s6760_s12 + $0x22b0] sm:$0xff]  ;;  %v1286_v45 = vld [vmem:[%s6760_s12 + $0x22b8] sm:$0xff] }
 0x271   : > { %v1287_v46 = vld [vmem:[%s6760_s12 + $0x22c0] sm:$0xff]  ;;  %5375 = vst [vmem:[%s6775_s17 + $0x2280] sm:$0xff] %v3327_v35  ;;  %5376 = vst [vmem:[%s6775_s17 + $0x2288] sm:$0xff] %v3328_v36  ;;  %v3333_v47 = vadd.f32 1.0, %v1285_v44  ;;  %v3334_v48 = vadd.f32 1.0, %v1286_v45  ;;  %v1288_v50 = vld [vmem:[%s6760_s12 + $0x22c8] sm:$0xff] }
 0x272   : > { %5377 = vst [vmem:[%s6775_s17 + $0x2290] sm:$0xff] %v3329_v37  ;;  %v3335_v49 = vadd.f32 1.0, %v1287_v46  ;;  %v1289_v51 = vld [vmem:[%s6760_s12 + $0x22d0] sm:$0xff]  ;;  %v1290_v52 = vld [vmem:[%s6760_s12 + $0x22d8] sm:$0xff]  ;;  %5378 = vst [vmem:[%s6775_s17 + $0x2298] sm:$0xff] %v3330_v41  ;;  %v3336_v53 = vadd.f32 1.0, %v1288_v50 }
 0x273   : > { %5379 = vst [vmem:[%s6775_s17 + $0x22a0] sm:$0xff] %v3331_v42  ;;  %5380 = vst [vmem:[%s6775_s17 + $0x22a8] sm:$0xff] %v3332_v43  ;;  %v3337_v54 = vadd.f32 1.0, %v1289_v51  ;;  %v3338_v55 = vadd.f32 1.0, %v1290_v52  ;;  %v1291_v56 = vld [vmem:[%s6760_s12 + $0x22e0] sm:$0xff]  ;;  %v1292_v57 = vld [vmem:[%s6760_s12 + $0x22e8] sm:$0xff] }
 0x274   : > { %v1293_v58 = vld [vmem:[%s6760_s12 + $0x22f0] sm:$0xff]  ;;  %5381 = vst [vmem:[%s6775_s17 + $0x22b0] sm:$0xff] %v3333_v47  ;;  %5382 = vst [vmem:[%s6775_s17 + $0x22b8] sm:$0xff] %v3334_v48  ;;  %v3339_v59 = vadd.f32 1.0, %v1291_v56  ;;  %v3340_v60 = vadd.f32 1.0, %v1292_v57  ;;  %v1294_v62 = vld [vmem:[%s6760_s12 + $0x22f8] sm:$0xff] }
 0x275   : > { %5383 = vst [vmem:[%s6775_s17 + $0x22c0] sm:$0xff] %v3335_v49  ;;  %v3341_v61 = vadd.f32 1.0, %v1293_v58  ;;  %v1295_v63 = vld [vmem:[%s6760_s12 + $0x2300] sm:$0xff]  ;;  %v1296_v0 = vld [vmem:[%s6760_s12 + $0x2308] sm:$0xff]  ;;  %5384 = vst [vmem:[%s6775_s17 + $0x22c8] sm:$0xff] %v3336_v53  ;;  %v3342_v1 = vadd.f32 1.0, %v1294_v62 }
 0x276   : > { %5385 = vst [vmem:[%s6775_s17 + $0x22d0] sm:$0xff] %v3337_v54  ;;  %5386 = vst [vmem:[%s6775_s17 + $0x22d8] sm:$0xff] %v3338_v55  ;;  %v3343_v2 = vadd.f32 1.0, %v1295_v63  ;;  %v3344_v3 = vadd.f32 1.0, %v1296_v0  ;;  %v1297_v4 = vld [vmem:[%s6760_s12 + $0x2310] sm:$0xff]  ;;  %v1298_v5 = vld [vmem:[%s6760_s12 + $0x2318] sm:$0xff] }
 0x277   : > { %v1299_v6 = vld [vmem:[%s6760_s12 + $0x2320] sm:$0xff]  ;;  %5387 = vst [vmem:[%s6775_s17 + $0x22e0] sm:$0xff] %v3339_v59  ;;  %5388 = vst [vmem:[%s6775_s17 + $0x22e8] sm:$0xff] %v3340_v60  ;;  %v3345_v7 = vadd.f32 1.0, %v1297_v4  ;;  %v3346_v8 = vadd.f32 1.0, %v1298_v5  ;;  %v1300_v10 = vld [vmem:[%s6760_s12 + $0x2328] sm:$0xff] }
 0x278   : > { %5389 = vst [vmem:[%s6775_s17 + $0x22f0] sm:$0xff] %v3341_v61  ;;  %v3347_v9 = vadd.f32 1.0, %v1299_v6  ;;  %v1301_v11 = vld [vmem:[%s6760_s12 + $0x2330] sm:$0xff]  ;;  %v1302_v12 = vld [vmem:[%s6760_s12 + $0x2338] sm:$0xff]  ;;  %5390 = vst [vmem:[%s6775_s17 + $0x22f8] sm:$0xff] %v3342_v1  ;;  %v3348_v13 = vadd.f32 1.0, %v1300_v10 }
 0x279   : > { %5391 = vst [vmem:[%s6775_s17 + $0x2300] sm:$0xff] %v3343_v2  ;;  %5392 = vst [vmem:[%s6775_s17 + $0x2308] sm:$0xff] %v3344_v3  ;;  %v3349_v14 = vadd.f32 1.0, %v1301_v11  ;;  %v3350_v15 = vadd.f32 1.0, %v1302_v12  ;;  %v1303_v16 = vld [vmem:[%s6760_s12 + $0x2340] sm:$0xff]  ;;  %v1304_v17 = vld [vmem:[%s6760_s12 + $0x2348] sm:$0xff] }
 0x27a   : > { %v1305_v18 = vld [vmem:[%s6760_s12 + $0x2350] sm:$0xff]  ;;  %5393 = vst [vmem:[%s6775_s17 + $0x2310] sm:$0xff] %v3345_v7  ;;  %5394 = vst [vmem:[%s6775_s17 + $0x2318] sm:$0xff] %v3346_v8  ;;  %v3351_v19 = vadd.f32 1.0, %v1303_v16  ;;  %v3352_v20 = vadd.f32 1.0, %v1304_v17  ;;  %v1306_v22 = vld [vmem:[%s6760_s12 + $0x2358] sm:$0xff] }
 0x27b   : > { %5395 = vst [vmem:[%s6775_s17 + $0x2320] sm:$0xff] %v3347_v9  ;;  %v3353_v21 = vadd.f32 1.0, %v1305_v18  ;;  %v1307_v23 = vld [vmem:[%s6760_s12 + $0x2360] sm:$0xff]  ;;  %v1308_v24 = vld [vmem:[%s6760_s12 + $0x2368] sm:$0xff]  ;;  %5396 = vst [vmem:[%s6775_s17 + $0x2328] sm:$0xff] %v3348_v13  ;;  %v3354_v25 = vadd.f32 1.0, %v1306_v22 }
 0x27c   : > { %5397 = vst [vmem:[%s6775_s17 + $0x2330] sm:$0xff] %v3349_v14  ;;  %5398 = vst [vmem:[%s6775_s17 + $0x2338] sm:$0xff] %v3350_v15  ;;  %v3355_v26 = vadd.f32 1.0, %v1307_v23  ;;  %v3356_v27 = vadd.f32 1.0, %v1308_v24  ;;  %v1309_v28 = vld [vmem:[%s6760_s12 + $0x2370] sm:$0xff]  ;;  %v1310_v29 = vld [vmem:[%s6760_s12 + $0x2378] sm:$0xff] }
 0x27d   : > { %v1311_v30 = vld [vmem:[%s6760_s12 + $0x2380] sm:$0xff]  ;;  %5399 = vst [vmem:[%s6775_s17 + $0x2340] sm:$0xff] %v3351_v19  ;;  %5400 = vst [vmem:[%s6775_s17 + $0x2348] sm:$0xff] %v3352_v20  ;;  %v3357_v31 = vadd.f32 1.0, %v1309_v28  ;;  %v3358_v32 = vadd.f32 1.0, %v1310_v29  ;;  %v1312_v34 = vld [vmem:[%s6760_s12 + $0x2388] sm:$0xff] }
 0x27e   : > { %5401 = vst [vmem:[%s6775_s17 + $0x2350] sm:$0xff] %v3353_v21  ;;  %v3359_v33 = vadd.f32 1.0, %v1311_v30  ;;  %v1313_v35 = vld [vmem:[%s6760_s12 + $0x2390] sm:$0xff]  ;;  %v1314_v36 = vld [vmem:[%s6760_s12 + $0x2398] sm:$0xff]  ;;  %5402 = vst [vmem:[%s6775_s17 + $0x2358] sm:$0xff] %v3354_v25  ;;  %v3360_v37 = vadd.f32 1.0, %v1312_v34 }
 0x27f   : > { %5403 = vst [vmem:[%s6775_s17 + $0x2360] sm:$0xff] %v3355_v26  ;;  %5404 = vst [vmem:[%s6775_s17 + $0x2368] sm:$0xff] %v3356_v27  ;;  %v3361_v38 = vadd.f32 1.0, %v1313_v35  ;;  %v3362_v39 = vadd.f32 1.0, %v1314_v36  ;;  %v1315_v40 = vld [vmem:[%s6760_s12 + $0x23a0] sm:$0xff]  ;;  %v1316_v41 = vld [vmem:[%s6760_s12 + $0x23a8] sm:$0xff] }
 0x280   : > { %v1317_v42 = vld [vmem:[%s6760_s12 + $0x23b0] sm:$0xff]  ;;  %5405 = vst [vmem:[%s6775_s17 + $0x2370] sm:$0xff] %v3357_v31  ;;  %5406 = vst [vmem:[%s6775_s17 + $0x2378] sm:$0xff] %v3358_v32  ;;  %v3363_v43 = vadd.f32 1.0, %v1315_v40  ;;  %v3364_v44 = vadd.f32 1.0, %v1316_v41  ;;  %v1318_v46 = vld [vmem:[%s6760_s12 + $0x23b8] sm:$0xff] }
 0x281   : > { %5407 = vst [vmem:[%s6775_s17 + $0x2380] sm:$0xff] %v3359_v33  ;;  %v3365_v45 = vadd.f32 1.0, %v1317_v42  ;;  %v1319_v47 = vld [vmem:[%s6760_s12 + $0x23c0] sm:$0xff]  ;;  %v1320_v48 = vld [vmem:[%s6760_s12 + $0x23c8] sm:$0xff]  ;;  %5408 = vst [vmem:[%s6775_s17 + $0x2388] sm:$0xff] %v3360_v37  ;;  %v3366_v49 = vadd.f32 1.0, %v1318_v46 }
 0x282   : > { %5409 = vst [vmem:[%s6775_s17 + $0x2390] sm:$0xff] %v3361_v38  ;;  %5410 = vst [vmem:[%s6775_s17 + $0x2398] sm:$0xff] %v3362_v39  ;;  %v3367_v50 = vadd.f32 1.0, %v1319_v47  ;;  %v3368_v51 = vadd.f32 1.0, %v1320_v48  ;;  %v1321_v52 = vld [vmem:[%s6760_s12 + $0x23d0] sm:$0xff]  ;;  %v1322_v53 = vld [vmem:[%s6760_s12 + $0x23d8] sm:$0xff] }
 0x283   : > { %v1323_v54 = vld [vmem:[%s6760_s12 + $0x23e0] sm:$0xff]  ;;  %5411 = vst [vmem:[%s6775_s17 + $0x23a0] sm:$0xff] %v3363_v43  ;;  %5412 = vst [vmem:[%s6775_s17 + $0x23a8] sm:$0xff] %v3364_v44  ;;  %v3369_v55 = vadd.f32 1.0, %v1321_v52  ;;  %v3370_v56 = vadd.f32 1.0, %v1322_v53  ;;  %v1324_v58 = vld [vmem:[%s6760_s12 + $0x23e8] sm:$0xff] }
 0x284   : > { %5413 = vst [vmem:[%s6775_s17 + $0x23b0] sm:$0xff] %v3365_v45  ;;  %v3371_v57 = vadd.f32 1.0, %v1323_v54  ;;  %v1325_v59 = vld [vmem:[%s6760_s12 + $0x23f0] sm:$0xff]  ;;  %v1326_v60 = vld [vmem:[%s6760_s12 + $0x23f8] sm:$0xff]  ;;  %5414 = vst [vmem:[%s6775_s17 + $0x23b8] sm:$0xff] %v3366_v49  ;;  %v3372_v61 = vadd.f32 1.0, %v1324_v58 }
 0x285   : > { %5415 = vst [vmem:[%s6775_s17 + $0x23c0] sm:$0xff] %v3367_v50  ;;  %5416 = vst [vmem:[%s6775_s17 + $0x23c8] sm:$0xff] %v3368_v51  ;;  %v3373_v62 = vadd.f32 1.0, %v1325_v59  ;;  %v3374_v63 = vadd.f32 1.0, %v1326_v60  ;;  %v1327_v0 = vld [vmem:[%s6760_s12 + $0x2400] sm:$0xff]  ;;  %v1328_v1 = vld [vmem:[%s6760_s12 + $0x2408] sm:$0xff] }
 0x286   : > { %v1329_v2 = vld [vmem:[%s6760_s12 + $0x2410] sm:$0xff]  ;;  %5417 = vst [vmem:[%s6775_s17 + $0x23d0] sm:$0xff] %v3369_v55  ;;  %5418 = vst [vmem:[%s6775_s17 + $0x23d8] sm:$0xff] %v3370_v56  ;;  %v3375_v3 = vadd.f32 1.0, %v1327_v0  ;;  %v3376_v4 = vadd.f32 1.0, %v1328_v1  ;;  %v1330_v6 = vld [vmem:[%s6760_s12 + $0x2418] sm:$0xff] }
 0x287   : > { %5419 = vst [vmem:[%s6775_s17 + $0x23e0] sm:$0xff] %v3371_v57  ;;  %v3377_v5 = vadd.f32 1.0, %v1329_v2  ;;  %v1331_v7 = vld [vmem:[%s6760_s12 + $0x2420] sm:$0xff]  ;;  %v1332_v8 = vld [vmem:[%s6760_s12 + $0x2428] sm:$0xff]  ;;  %5420 = vst [vmem:[%s6775_s17 + $0x23e8] sm:$0xff] %v3372_v61  ;;  %v3378_v9 = vadd.f32 1.0, %v1330_v6 }
 0x288   : > { %5421 = vst [vmem:[%s6775_s17 + $0x23f0] sm:$0xff] %v3373_v62  ;;  %5422 = vst [vmem:[%s6775_s17 + $0x23f8] sm:$0xff] %v3374_v63  ;;  %v3379_v10 = vadd.f32 1.0, %v1331_v7  ;;  %v3380_v11 = vadd.f32 1.0, %v1332_v8  ;;  %v1333_v12 = vld [vmem:[%s6760_s12 + $0x2430] sm:$0xff]  ;;  %v1334_v13 = vld [vmem:[%s6760_s12 + $0x2438] sm:$0xff] }
 0x289   : > { %v1335_v14 = vld [vmem:[%s6760_s12 + $0x2440] sm:$0xff]  ;;  %5423 = vst [vmem:[%s6775_s17 + $0x2400] sm:$0xff] %v3375_v3  ;;  %5424 = vst [vmem:[%s6775_s17 + $0x2408] sm:$0xff] %v3376_v4  ;;  %v3381_v15 = vadd.f32 1.0, %v1333_v12  ;;  %v3382_v16 = vadd.f32 1.0, %v1334_v13  ;;  %v1336_v18 = vld [vmem:[%s6760_s12 + $0x2448] sm:$0xff] }
 0x28a   : > { %5425 = vst [vmem:[%s6775_s17 + $0x2410] sm:$0xff] %v3377_v5  ;;  %v3383_v17 = vadd.f32 1.0, %v1335_v14  ;;  %v1337_v19 = vld [vmem:[%s6760_s12 + $0x2450] sm:$0xff]  ;;  %v1338_v20 = vld [vmem:[%s6760_s12 + $0x2458] sm:$0xff]  ;;  %5426 = vst [vmem:[%s6775_s17 + $0x2418] sm:$0xff] %v3378_v9  ;;  %v3384_v21 = vadd.f32 1.0, %v1336_v18 }
 0x28b   : > { %5427 = vst [vmem:[%s6775_s17 + $0x2420] sm:$0xff] %v3379_v10  ;;  %5428 = vst [vmem:[%s6775_s17 + $0x2428] sm:$0xff] %v3380_v11  ;;  %v3385_v22 = vadd.f32 1.0, %v1337_v19  ;;  %v3386_v23 = vadd.f32 1.0, %v1338_v20  ;;  %v1339_v24 = vld [vmem:[%s6760_s12 + $0x2460] sm:$0xff]  ;;  %v1340_v25 = vld [vmem:[%s6760_s12 + $0x2468] sm:$0xff] }
 0x28c   : > { %v1341_v26 = vld [vmem:[%s6760_s12 + $0x2470] sm:$0xff]  ;;  %5429 = vst [vmem:[%s6775_s17 + $0x2430] sm:$0xff] %v3381_v15  ;;  %5430 = vst [vmem:[%s6775_s17 + $0x2438] sm:$0xff] %v3382_v16  ;;  %v3387_v27 = vadd.f32 1.0, %v1339_v24  ;;  %v3388_v28 = vadd.f32 1.0, %v1340_v25  ;;  %v1342_v30 = vld [vmem:[%s6760_s12 + $0x2478] sm:$0xff] }
 0x28d   : > { %5431 = vst [vmem:[%s6775_s17 + $0x2440] sm:$0xff] %v3383_v17  ;;  %v3389_v29 = vadd.f32 1.0, %v1341_v26  ;;  %v1343_v31 = vld [vmem:[%s6760_s12 + $0x2480] sm:$0xff]  ;;  %v1344_v32 = vld [vmem:[%s6760_s12 + $0x2488] sm:$0xff]  ;;  %5432 = vst [vmem:[%s6775_s17 + $0x2448] sm:$0xff] %v3384_v21  ;;  %v3390_v33 = vadd.f32 1.0, %v1342_v30 }
 0x28e   : > { %5433 = vst [vmem:[%s6775_s17 + $0x2450] sm:$0xff] %v3385_v22  ;;  %5434 = vst [vmem:[%s6775_s17 + $0x2458] sm:$0xff] %v3386_v23  ;;  %v3391_v34 = vadd.f32 1.0, %v1343_v31  ;;  %v3392_v35 = vadd.f32 1.0, %v1344_v32  ;;  %v1345_v36 = vld [vmem:[%s6760_s12 + $0x2490] sm:$0xff]  ;;  %v1346_v37 = vld [vmem:[%s6760_s12 + $0x2498] sm:$0xff] }
 0x28f   : > { %v1347_v38 = vld [vmem:[%s6760_s12 + $0x24a0] sm:$0xff]  ;;  %5435 = vst [vmem:[%s6775_s17 + $0x2460] sm:$0xff] %v3387_v27  ;;  %5436 = vst [vmem:[%s6775_s17 + $0x2468] sm:$0xff] %v3388_v28  ;;  %v3393_v39 = vadd.f32 1.0, %v1345_v36  ;;  %v3394_v40 = vadd.f32 1.0, %v1346_v37  ;;  %v1348_v42 = vld [vmem:[%s6760_s12 + $0x24a8] sm:$0xff] }
 0x290   : > { %5437 = vst [vmem:[%s6775_s17 + $0x2470] sm:$0xff] %v3389_v29  ;;  %v3395_v41 = vadd.f32 1.0, %v1347_v38  ;;  %v1349_v43 = vld [vmem:[%s6760_s12 + $0x24b0] sm:$0xff]  ;;  %v1350_v44 = vld [vmem:[%s6760_s12 + $0x24b8] sm:$0xff]  ;;  %5438 = vst [vmem:[%s6775_s17 + $0x2478] sm:$0xff] %v3390_v33  ;;  %v3396_v45 = vadd.f32 1.0, %v1348_v42 }
 0x291   : > { %5439 = vst [vmem:[%s6775_s17 + $0x2480] sm:$0xff] %v3391_v34  ;;  %5440 = vst [vmem:[%s6775_s17 + $0x2488] sm:$0xff] %v3392_v35  ;;  %v3397_v46 = vadd.f32 1.0, %v1349_v43  ;;  %v3398_v47 = vadd.f32 1.0, %v1350_v44  ;;  %v1351_v48 = vld [vmem:[%s6760_s12 + $0x24c0] sm:$0xff]  ;;  %v1352_v49 = vld [vmem:[%s6760_s12 + $0x24c8] sm:$0xff] }
 0x292   : > { %v1353_v50 = vld [vmem:[%s6760_s12 + $0x24d0] sm:$0xff]  ;;  %5441 = vst [vmem:[%s6775_s17 + $0x2490] sm:$0xff] %v3393_v39  ;;  %5442 = vst [vmem:[%s6775_s17 + $0x2498] sm:$0xff] %v3394_v40  ;;  %v3399_v51 = vadd.f32 1.0, %v1351_v48  ;;  %v3400_v52 = vadd.f32 1.0, %v1352_v49  ;;  %v1354_v54 = vld [vmem:[%s6760_s12 + $0x24d8] sm:$0xff] }
 0x293   : > { %5443 = vst [vmem:[%s6775_s17 + $0x24a0] sm:$0xff] %v3395_v41  ;;  %v3401_v53 = vadd.f32 1.0, %v1353_v50  ;;  %v1355_v55 = vld [vmem:[%s6760_s12 + $0x24e0] sm:$0xff]  ;;  %v1356_v56 = vld [vmem:[%s6760_s12 + $0x24e8] sm:$0xff]  ;;  %5444 = vst [vmem:[%s6775_s17 + $0x24a8] sm:$0xff] %v3396_v45  ;;  %v3402_v57 = vadd.f32 1.0, %v1354_v54 }
 0x294   : > { %5445 = vst [vmem:[%s6775_s17 + $0x24b0] sm:$0xff] %v3397_v46  ;;  %5446 = vst [vmem:[%s6775_s17 + $0x24b8] sm:$0xff] %v3398_v47  ;;  %v3403_v58 = vadd.f32 1.0, %v1355_v55  ;;  %v3404_v59 = vadd.f32 1.0, %v1356_v56  ;;  %v1357_v60 = vld [vmem:[%s6760_s12 + $0x24f0] sm:$0xff]  ;;  %v1358_v61 = vld [vmem:[%s6760_s12 + $0x24f8] sm:$0xff] }
 0x295   : > { %v1359_v62 = vld [vmem:[%s6760_s12 + $0x2500] sm:$0xff]  ;;  %5447 = vst [vmem:[%s6775_s17 + $0x24c0] sm:$0xff] %v3399_v51  ;;  %5448 = vst [vmem:[%s6775_s17 + $0x24c8] sm:$0xff] %v3400_v52  ;;  %v3405_v63 = vadd.f32 1.0, %v1357_v60  ;;  %v3406_v0 = vadd.f32 1.0, %v1358_v61  ;;  %v1360_v2 = vld [vmem:[%s6760_s12 + $0x2508] sm:$0xff] }
 0x296   : > { %5449 = vst [vmem:[%s6775_s17 + $0x24d0] sm:$0xff] %v3401_v53  ;;  %v3407_v1 = vadd.f32 1.0, %v1359_v62  ;;  %v1361_v3 = vld [vmem:[%s6760_s12 + $0x2510] sm:$0xff]  ;;  %v1362_v4 = vld [vmem:[%s6760_s12 + $0x2518] sm:$0xff]  ;;  %5450 = vst [vmem:[%s6775_s17 + $0x24d8] sm:$0xff] %v3402_v57  ;;  %v3408_v5 = vadd.f32 1.0, %v1360_v2 }
 0x297   : > { %5451 = vst [vmem:[%s6775_s17 + $0x24e0] sm:$0xff] %v3403_v58  ;;  %5452 = vst [vmem:[%s6775_s17 + $0x24e8] sm:$0xff] %v3404_v59  ;;  %v3409_v6 = vadd.f32 1.0, %v1361_v3  ;;  %v3410_v7 = vadd.f32 1.0, %v1362_v4  ;;  %v1363_v8 = vld [vmem:[%s6760_s12 + $0x2520] sm:$0xff]  ;;  %v1364_v9 = vld [vmem:[%s6760_s12 + $0x2528] sm:$0xff] }
 0x298   : > { %v1365_v10 = vld [vmem:[%s6760_s12 + $0x2530] sm:$0xff]  ;;  %5453 = vst [vmem:[%s6775_s17 + $0x24f0] sm:$0xff] %v3405_v63  ;;  %5454 = vst [vmem:[%s6775_s17 + $0x24f8] sm:$0xff] %v3406_v0  ;;  %v3411_v11 = vadd.f32 1.0, %v1363_v8  ;;  %v3412_v12 = vadd.f32 1.0, %v1364_v9  ;;  %v1366_v14 = vld [vmem:[%s6760_s12 + $0x2538] sm:$0xff] }
 0x299   : > { %5455 = vst [vmem:[%s6775_s17 + $0x2500] sm:$0xff] %v3407_v1  ;;  %v3413_v13 = vadd.f32 1.0, %v1365_v10  ;;  %v1367_v15 = vld [vmem:[%s6760_s12 + $0x2540] sm:$0xff]  ;;  %v1368_v16 = vld [vmem:[%s6760_s12 + $0x2548] sm:$0xff]  ;;  %5456 = vst [vmem:[%s6775_s17 + $0x2508] sm:$0xff] %v3408_v5  ;;  %v3414_v17 = vadd.f32 1.0, %v1366_v14 }
 0x29a   : > { %5457 = vst [vmem:[%s6775_s17 + $0x2510] sm:$0xff] %v3409_v6  ;;  %5458 = vst [vmem:[%s6775_s17 + $0x2518] sm:$0xff] %v3410_v7  ;;  %v3415_v18 = vadd.f32 1.0, %v1367_v15  ;;  %v3416_v19 = vadd.f32 1.0, %v1368_v16  ;;  %v1369_v20 = vld [vmem:[%s6760_s12 + $0x2550] sm:$0xff]  ;;  %v1370_v21 = vld [vmem:[%s6760_s12 + $0x2558] sm:$0xff] }
 0x29b   : > { %v1371_v22 = vld [vmem:[%s6760_s12 + $0x2560] sm:$0xff]  ;;  %5459 = vst [vmem:[%s6775_s17 + $0x2520] sm:$0xff] %v3411_v11  ;;  %5460 = vst [vmem:[%s6775_s17 + $0x2528] sm:$0xff] %v3412_v12  ;;  %v3417_v23 = vadd.f32 1.0, %v1369_v20  ;;  %v3418_v24 = vadd.f32 1.0, %v1370_v21  ;;  %v1372_v26 = vld [vmem:[%s6760_s12 + $0x2568] sm:$0xff] }
 0x29c   : > { %5461 = vst [vmem:[%s6775_s17 + $0x2530] sm:$0xff] %v3413_v13  ;;  %v3419_v25 = vadd.f32 1.0, %v1371_v22  ;;  %v1373_v27 = vld [vmem:[%s6760_s12 + $0x2570] sm:$0xff]  ;;  %v1374_v28 = vld [vmem:[%s6760_s12 + $0x2578] sm:$0xff]  ;;  %5462 = vst [vmem:[%s6775_s17 + $0x2538] sm:$0xff] %v3414_v17  ;;  %v3420_v29 = vadd.f32 1.0, %v1372_v26 }
 0x29d   : > { %5463 = vst [vmem:[%s6775_s17 + $0x2540] sm:$0xff] %v3415_v18  ;;  %5464 = vst [vmem:[%s6775_s17 + $0x2548] sm:$0xff] %v3416_v19  ;;  %v3421_v30 = vadd.f32 1.0, %v1373_v27  ;;  %v3422_v31 = vadd.f32 1.0, %v1374_v28  ;;  %v1375_v32 = vld [vmem:[%s6760_s12 + $0x2580] sm:$0xff]  ;;  %v1376_v33 = vld [vmem:[%s6760_s12 + $0x2588] sm:$0xff] }
 0x29e   : > { %v1377_v34 = vld [vmem:[%s6760_s12 + $0x2590] sm:$0xff]  ;;  %5465 = vst [vmem:[%s6775_s17 + $0x2550] sm:$0xff] %v3417_v23  ;;  %5466 = vst [vmem:[%s6775_s17 + $0x2558] sm:$0xff] %v3418_v24  ;;  %v3423_v35 = vadd.f32 1.0, %v1375_v32  ;;  %v3424_v36 = vadd.f32 1.0, %v1376_v33  ;;  %v1378_v38 = vld [vmem:[%s6760_s12 + $0x2598] sm:$0xff] }
 0x29f   : > { %5467 = vst [vmem:[%s6775_s17 + $0x2560] sm:$0xff] %v3419_v25  ;;  %v3425_v37 = vadd.f32 1.0, %v1377_v34  ;;  %v1379_v39 = vld [vmem:[%s6760_s12 + $0x25a0] sm:$0xff]  ;;  %v1380_v40 = vld [vmem:[%s6760_s12 + $0x25a8] sm:$0xff]  ;;  %5468 = vst [vmem:[%s6775_s17 + $0x2568] sm:$0xff] %v3420_v29  ;;  %v3426_v41 = vadd.f32 1.0, %v1378_v38 }
 0x2a0   : > { %5469 = vst [vmem:[%s6775_s17 + $0x2570] sm:$0xff] %v3421_v30  ;;  %5470 = vst [vmem:[%s6775_s17 + $0x2578] sm:$0xff] %v3422_v31  ;;  %v3427_v42 = vadd.f32 1.0, %v1379_v39  ;;  %v3428_v43 = vadd.f32 1.0, %v1380_v40  ;;  %v1381_v44 = vld [vmem:[%s6760_s12 + $0x25b0] sm:$0xff]  ;;  %v1382_v45 = vld [vmem:[%s6760_s12 + $0x25b8] sm:$0xff] }
 0x2a1   : > { %v1383_v46 = vld [vmem:[%s6760_s12 + $0x25c0] sm:$0xff]  ;;  %5471 = vst [vmem:[%s6775_s17 + $0x2580] sm:$0xff] %v3423_v35  ;;  %5472 = vst [vmem:[%s6775_s17 + $0x2588] sm:$0xff] %v3424_v36  ;;  %v3429_v47 = vadd.f32 1.0, %v1381_v44  ;;  %v3430_v48 = vadd.f32 1.0, %v1382_v45  ;;  %v1384_v50 = vld [vmem:[%s6760_s12 + $0x25c8] sm:$0xff] }
 0x2a2   : > { %5473 = vst [vmem:[%s6775_s17 + $0x2590] sm:$0xff] %v3425_v37  ;;  %v3431_v49 = vadd.f32 1.0, %v1383_v46  ;;  %v1385_v51 = vld [vmem:[%s6760_s12 + $0x25d0] sm:$0xff]  ;;  %v1386_v52 = vld [vmem:[%s6760_s12 + $0x25d8] sm:$0xff]  ;;  %5474 = vst [vmem:[%s6775_s17 + $0x2598] sm:$0xff] %v3426_v41  ;;  %v3432_v53 = vadd.f32 1.0, %v1384_v50 }
 0x2a3   : > { %5475 = vst [vmem:[%s6775_s17 + $0x25a0] sm:$0xff] %v3427_v42  ;;  %5476 = vst [vmem:[%s6775_s17 + $0x25a8] sm:$0xff] %v3428_v43  ;;  %v3433_v54 = vadd.f32 1.0, %v1385_v51  ;;  %v3434_v55 = vadd.f32 1.0, %v1386_v52  ;;  %v1387_v56 = vld [vmem:[%s6760_s12 + $0x25e0] sm:$0xff]  ;;  %v1388_v57 = vld [vmem:[%s6760_s12 + $0x25e8] sm:$0xff] }
 0x2a4   : > { %v1389_v58 = vld [vmem:[%s6760_s12 + $0x25f0] sm:$0xff]  ;;  %5477 = vst [vmem:[%s6775_s17 + $0x25b0] sm:$0xff] %v3429_v47  ;;  %5478 = vst [vmem:[%s6775_s17 + $0x25b8] sm:$0xff] %v3430_v48  ;;  %v3435_v59 = vadd.f32 1.0, %v1387_v56  ;;  %v3436_v60 = vadd.f32 1.0, %v1388_v57  ;;  %v1390_v62 = vld [vmem:[%s6760_s12 + $0x25f8] sm:$0xff] }
 0x2a5   : > { %5479 = vst [vmem:[%s6775_s17 + $0x25c0] sm:$0xff] %v3431_v49  ;;  %v3437_v61 = vadd.f32 1.0, %v1389_v58  ;;  %v1391_v63 = vld [vmem:[%s6760_s12 + $0x2600] sm:$0xff]  ;;  %v1392_v0 = vld [vmem:[%s6760_s12 + $0x2608] sm:$0xff]  ;;  %5480 = vst [vmem:[%s6775_s17 + $0x25c8] sm:$0xff] %v3432_v53  ;;  %v3438_v1 = vadd.f32 1.0, %v1390_v62 }
 0x2a6   : > { %5481 = vst [vmem:[%s6775_s17 + $0x25d0] sm:$0xff] %v3433_v54  ;;  %5482 = vst [vmem:[%s6775_s17 + $0x25d8] sm:$0xff] %v3434_v55  ;;  %v3439_v2 = vadd.f32 1.0, %v1391_v63  ;;  %v3440_v3 = vadd.f32 1.0, %v1392_v0  ;;  %v1393_v4 = vld [vmem:[%s6760_s12 + $0x2610] sm:$0xff]  ;;  %v1394_v5 = vld [vmem:[%s6760_s12 + $0x2618] sm:$0xff] }
 0x2a7   : > { %v1395_v6 = vld [vmem:[%s6760_s12 + $0x2620] sm:$0xff]  ;;  %5483 = vst [vmem:[%s6775_s17 + $0x25e0] sm:$0xff] %v3435_v59  ;;  %5484 = vst [vmem:[%s6775_s17 + $0x25e8] sm:$0xff] %v3436_v60  ;;  %v3441_v7 = vadd.f32 1.0, %v1393_v4  ;;  %v3442_v8 = vadd.f32 1.0, %v1394_v5  ;;  %v1396_v10 = vld [vmem:[%s6760_s12 + $0x2628] sm:$0xff] }
 0x2a8   : > { %5485 = vst [vmem:[%s6775_s17 + $0x25f0] sm:$0xff] %v3437_v61  ;;  %v3443_v9 = vadd.f32 1.0, %v1395_v6  ;;  %v1397_v11 = vld [vmem:[%s6760_s12 + $0x2630] sm:$0xff]  ;;  %v1398_v12 = vld [vmem:[%s6760_s12 + $0x2638] sm:$0xff]  ;;  %5486 = vst [vmem:[%s6775_s17 + $0x25f8] sm:$0xff] %v3438_v1  ;;  %v3444_v13 = vadd.f32 1.0, %v1396_v10 }
 0x2a9   : > { %5487 = vst [vmem:[%s6775_s17 + $0x2600] sm:$0xff] %v3439_v2  ;;  %5488 = vst [vmem:[%s6775_s17 + $0x2608] sm:$0xff] %v3440_v3  ;;  %v3445_v14 = vadd.f32 1.0, %v1397_v11  ;;  %v3446_v15 = vadd.f32 1.0, %v1398_v12  ;;  %v1399_v16 = vld [vmem:[%s6760_s12 + $0x2640] sm:$0xff]  ;;  %v1400_v17 = vld [vmem:[%s6760_s12 + $0x2648] sm:$0xff] }
 0x2aa   : > { %v1401_v18 = vld [vmem:[%s6760_s12 + $0x2650] sm:$0xff]  ;;  %5489 = vst [vmem:[%s6775_s17 + $0x2610] sm:$0xff] %v3441_v7  ;;  %5490 = vst [vmem:[%s6775_s17 + $0x2618] sm:$0xff] %v3442_v8  ;;  %v3447_v19 = vadd.f32 1.0, %v1399_v16  ;;  %v3448_v20 = vadd.f32 1.0, %v1400_v17  ;;  %v1402_v22 = vld [vmem:[%s6760_s12 + $0x2658] sm:$0xff] }
 0x2ab   : > { %5491 = vst [vmem:[%s6775_s17 + $0x2620] sm:$0xff] %v3443_v9  ;;  %v3449_v21 = vadd.f32 1.0, %v1401_v18  ;;  %v1403_v23 = vld [vmem:[%s6760_s12 + $0x2660] sm:$0xff]  ;;  %v1404_v24 = vld [vmem:[%s6760_s12 + $0x2668] sm:$0xff]  ;;  %5492 = vst [vmem:[%s6775_s17 + $0x2628] sm:$0xff] %v3444_v13  ;;  %v3450_v25 = vadd.f32 1.0, %v1402_v22 }
 0x2ac   : > { %5493 = vst [vmem:[%s6775_s17 + $0x2630] sm:$0xff] %v3445_v14  ;;  %5494 = vst [vmem:[%s6775_s17 + $0x2638] sm:$0xff] %v3446_v15  ;;  %v3451_v26 = vadd.f32 1.0, %v1403_v23  ;;  %v3452_v27 = vadd.f32 1.0, %v1404_v24  ;;  %v1405_v28 = vld [vmem:[%s6760_s12 + $0x2670] sm:$0xff]  ;;  %v1406_v29 = vld [vmem:[%s6760_s12 + $0x2678] sm:$0xff] }
 0x2ad   : > { %v1407_v30 = vld [vmem:[%s6760_s12 + $0x2680] sm:$0xff]  ;;  %5495 = vst [vmem:[%s6775_s17 + $0x2640] sm:$0xff] %v3447_v19  ;;  %5496 = vst [vmem:[%s6775_s17 + $0x2648] sm:$0xff] %v3448_v20  ;;  %v3453_v31 = vadd.f32 1.0, %v1405_v28  ;;  %v3454_v32 = vadd.f32 1.0, %v1406_v29  ;;  %v1408_v34 = vld [vmem:[%s6760_s12 + $0x2688] sm:$0xff] }
 0x2ae   : > { %5497 = vst [vmem:[%s6775_s17 + $0x2650] sm:$0xff] %v3449_v21  ;;  %v3455_v33 = vadd.f32 1.0, %v1407_v30  ;;  %v1409_v35 = vld [vmem:[%s6760_s12 + $0x2690] sm:$0xff]  ;;  %v1410_v36 = vld [vmem:[%s6760_s12 + $0x2698] sm:$0xff]  ;;  %5498 = vst [vmem:[%s6775_s17 + $0x2658] sm:$0xff] %v3450_v25  ;;  %v3456_v37 = vadd.f32 1.0, %v1408_v34 }
 0x2af   : > { %5499 = vst [vmem:[%s6775_s17 + $0x2660] sm:$0xff] %v3451_v26  ;;  %5500 = vst [vmem:[%s6775_s17 + $0x2668] sm:$0xff] %v3452_v27  ;;  %v3457_v38 = vadd.f32 1.0, %v1409_v35  ;;  %v3458_v39 = vadd.f32 1.0, %v1410_v36  ;;  %v1411_v40 = vld [vmem:[%s6760_s12 + $0x26a0] sm:$0xff]  ;;  %v1412_v41 = vld [vmem:[%s6760_s12 + $0x26a8] sm:$0xff] }
 0x2b0   : > { %v1413_v42 = vld [vmem:[%s6760_s12 + $0x26b0] sm:$0xff]  ;;  %5501 = vst [vmem:[%s6775_s17 + $0x2670] sm:$0xff] %v3453_v31  ;;  %5502 = vst [vmem:[%s6775_s17 + $0x2678] sm:$0xff] %v3454_v32  ;;  %v3459_v43 = vadd.f32 1.0, %v1411_v40  ;;  %v3460_v44 = vadd.f32 1.0, %v1412_v41  ;;  %v1414_v46 = vld [vmem:[%s6760_s12 + $0x26b8] sm:$0xff] }
 0x2b1   : > { %5503 = vst [vmem:[%s6775_s17 + $0x2680] sm:$0xff] %v3455_v33  ;;  %v3461_v45 = vadd.f32 1.0, %v1413_v42  ;;  %v1415_v47 = vld [vmem:[%s6760_s12 + $0x26c0] sm:$0xff]  ;;  %v1416_v48 = vld [vmem:[%s6760_s12 + $0x26c8] sm:$0xff]  ;;  %5504 = vst [vmem:[%s6775_s17 + $0x2688] sm:$0xff] %v3456_v37  ;;  %v3462_v49 = vadd.f32 1.0, %v1414_v46 }
 0x2b2   : > { %5505 = vst [vmem:[%s6775_s17 + $0x2690] sm:$0xff] %v3457_v38  ;;  %5506 = vst [vmem:[%s6775_s17 + $0x2698] sm:$0xff] %v3458_v39  ;;  %v3463_v50 = vadd.f32 1.0, %v1415_v47  ;;  %v3464_v51 = vadd.f32 1.0, %v1416_v48  ;;  %v1417_v52 = vld [vmem:[%s6760_s12 + $0x26d0] sm:$0xff]  ;;  %v1418_v53 = vld [vmem:[%s6760_s12 + $0x26d8] sm:$0xff] }
 0x2b3   : > { %v1419_v54 = vld [vmem:[%s6760_s12 + $0x26e0] sm:$0xff]  ;;  %5507 = vst [vmem:[%s6775_s17 + $0x26a0] sm:$0xff] %v3459_v43  ;;  %5508 = vst [vmem:[%s6775_s17 + $0x26a8] sm:$0xff] %v3460_v44  ;;  %v3465_v55 = vadd.f32 1.0, %v1417_v52  ;;  %v3466_v56 = vadd.f32 1.0, %v1418_v53  ;;  %v1420_v58 = vld [vmem:[%s6760_s12 + $0x26e8] sm:$0xff] }
 0x2b4   : > { %5509 = vst [vmem:[%s6775_s17 + $0x26b0] sm:$0xff] %v3461_v45  ;;  %v3467_v57 = vadd.f32 1.0, %v1419_v54  ;;  %v1421_v59 = vld [vmem:[%s6760_s12 + $0x26f0] sm:$0xff]  ;;  %v1422_v60 = vld [vmem:[%s6760_s12 + $0x26f8] sm:$0xff]  ;;  %5510 = vst [vmem:[%s6775_s17 + $0x26b8] sm:$0xff] %v3462_v49  ;;  %v3468_v61 = vadd.f32 1.0, %v1420_v58 }
 0x2b5   : > { %5511 = vst [vmem:[%s6775_s17 + $0x26c0] sm:$0xff] %v3463_v50  ;;  %5512 = vst [vmem:[%s6775_s17 + $0x26c8] sm:$0xff] %v3464_v51  ;;  %v3469_v62 = vadd.f32 1.0, %v1421_v59  ;;  %v3470_v63 = vadd.f32 1.0, %v1422_v60  ;;  %v1423_v0 = vld [vmem:[%s6760_s12 + $0x2700] sm:$0xff]  ;;  %v1424_v1 = vld [vmem:[%s6760_s12 + $0x2708] sm:$0xff] }
 0x2b6   : > { %v1425_v2 = vld [vmem:[%s6760_s12 + $0x2710] sm:$0xff]  ;;  %5513 = vst [vmem:[%s6775_s17 + $0x26d0] sm:$0xff] %v3465_v55  ;;  %5514 = vst [vmem:[%s6775_s17 + $0x26d8] sm:$0xff] %v3466_v56  ;;  %v3471_v3 = vadd.f32 1.0, %v1423_v0  ;;  %v3472_v4 = vadd.f32 1.0, %v1424_v1  ;;  %v1426_v6 = vld [vmem:[%s6760_s12 + $0x2718] sm:$0xff] }
 0x2b7   : > { %5515 = vst [vmem:[%s6775_s17 + $0x26e0] sm:$0xff] %v3467_v57  ;;  %v3473_v5 = vadd.f32 1.0, %v1425_v2  ;;  %v1427_v7 = vld [vmem:[%s6760_s12 + $0x2720] sm:$0xff]  ;;  %v1428_v8 = vld [vmem:[%s6760_s12 + $0x2728] sm:$0xff]  ;;  %5516 = vst [vmem:[%s6775_s17 + $0x26e8] sm:$0xff] %v3468_v61  ;;  %v3474_v9 = vadd.f32 1.0, %v1426_v6 }
 0x2b8   : > { %5517 = vst [vmem:[%s6775_s17 + $0x26f0] sm:$0xff] %v3469_v62  ;;  %5518 = vst [vmem:[%s6775_s17 + $0x26f8] sm:$0xff] %v3470_v63  ;;  %v3475_v10 = vadd.f32 1.0, %v1427_v7  ;;  %v3476_v11 = vadd.f32 1.0, %v1428_v8  ;;  %v1429_v12 = vld [vmem:[%s6760_s12 + $0x2730] sm:$0xff]  ;;  %v1430_v13 = vld [vmem:[%s6760_s12 + $0x2738] sm:$0xff] }
 0x2b9   : > { %v1431_v14 = vld [vmem:[%s6760_s12 + $0x2740] sm:$0xff]  ;;  %5519 = vst [vmem:[%s6775_s17 + $0x2700] sm:$0xff] %v3471_v3  ;;  %5520 = vst [vmem:[%s6775_s17 + $0x2708] sm:$0xff] %v3472_v4  ;;  %v3477_v15 = vadd.f32 1.0, %v1429_v12  ;;  %v3478_v16 = vadd.f32 1.0, %v1430_v13  ;;  %v1432_v18 = vld [vmem:[%s6760_s12 + $0x2748] sm:$0xff] }
 0x2ba   : > { %5521 = vst [vmem:[%s6775_s17 + $0x2710] sm:$0xff] %v3473_v5  ;;  %v3479_v17 = vadd.f32 1.0, %v1431_v14  ;;  %v1433_v19 = vld [vmem:[%s6760_s12 + $0x2750] sm:$0xff]  ;;  %v1434_v20 = vld [vmem:[%s6760_s12 + $0x2758] sm:$0xff]  ;;  %5522 = vst [vmem:[%s6775_s17 + $0x2718] sm:$0xff] %v3474_v9  ;;  %v3480_v21 = vadd.f32 1.0, %v1432_v18 }
 0x2bb   : > { %5523 = vst [vmem:[%s6775_s17 + $0x2720] sm:$0xff] %v3475_v10  ;;  %5524 = vst [vmem:[%s6775_s17 + $0x2728] sm:$0xff] %v3476_v11  ;;  %v3481_v22 = vadd.f32 1.0, %v1433_v19  ;;  %v3482_v23 = vadd.f32 1.0, %v1434_v20  ;;  %v1435_v24 = vld [vmem:[%s6760_s12 + $0x2760] sm:$0xff]  ;;  %v1436_v25 = vld [vmem:[%s6760_s12 + $0x2768] sm:$0xff] }
 0x2bc   : > { %v1437_v26 = vld [vmem:[%s6760_s12 + $0x2770] sm:$0xff]  ;;  %5525 = vst [vmem:[%s6775_s17 + $0x2730] sm:$0xff] %v3477_v15  ;;  %5526 = vst [vmem:[%s6775_s17 + $0x2738] sm:$0xff] %v3478_v16  ;;  %v3483_v27 = vadd.f32 1.0, %v1435_v24  ;;  %v3484_v28 = vadd.f32 1.0, %v1436_v25  ;;  %v1438_v30 = vld [vmem:[%s6760_s12 + $0x2778] sm:$0xff] }
 0x2bd   : > { %5527 = vst [vmem:[%s6775_s17 + $0x2740] sm:$0xff] %v3479_v17  ;;  %v3485_v29 = vadd.f32 1.0, %v1437_v26  ;;  %v1439_v31 = vld [vmem:[%s6760_s12 + $0x2780] sm:$0xff]  ;;  %v1440_v32 = vld [vmem:[%s6760_s12 + $0x2788] sm:$0xff]  ;;  %5528 = vst [vmem:[%s6775_s17 + $0x2748] sm:$0xff] %v3480_v21  ;;  %v3486_v33 = vadd.f32 1.0, %v1438_v30 }
 0x2be   : > { %5529 = vst [vmem:[%s6775_s17 + $0x2750] sm:$0xff] %v3481_v22  ;;  %5530 = vst [vmem:[%s6775_s17 + $0x2758] sm:$0xff] %v3482_v23  ;;  %v3487_v34 = vadd.f32 1.0, %v1439_v31  ;;  %v3488_v35 = vadd.f32 1.0, %v1440_v32  ;;  %v1441_v36 = vld [vmem:[%s6760_s12 + $0x2790] sm:$0xff]  ;;  %v1442_v37 = vld [vmem:[%s6760_s12 + $0x2798] sm:$0xff] }
 0x2bf   : > { %v1443_v38 = vld [vmem:[%s6760_s12 + $0x27a0] sm:$0xff]  ;;  %5531 = vst [vmem:[%s6775_s17 + $0x2760] sm:$0xff] %v3483_v27  ;;  %5532 = vst [vmem:[%s6775_s17 + $0x2768] sm:$0xff] %v3484_v28  ;;  %v3489_v39 = vadd.f32 1.0, %v1441_v36  ;;  %v3490_v40 = vadd.f32 1.0, %v1442_v37  ;;  %v1444_v42 = vld [vmem:[%s6760_s12 + $0x27a8] sm:$0xff] }
 0x2c0   : > { %5533 = vst [vmem:[%s6775_s17 + $0x2770] sm:$0xff] %v3485_v29  ;;  %v3491_v41 = vadd.f32 1.0, %v1443_v38  ;;  %v1445_v43 = vld [vmem:[%s6760_s12 + $0x27b0] sm:$0xff]  ;;  %v1446_v44 = vld [vmem:[%s6760_s12 + $0x27b8] sm:$0xff]  ;;  %5534 = vst [vmem:[%s6775_s17 + $0x2778] sm:$0xff] %v3486_v33  ;;  %v3492_v45 = vadd.f32 1.0, %v1444_v42 }
 0x2c1   : > { %5535 = vst [vmem:[%s6775_s17 + $0x2780] sm:$0xff] %v3487_v34  ;;  %5536 = vst [vmem:[%s6775_s17 + $0x2788] sm:$0xff] %v3488_v35  ;;  %v3493_v46 = vadd.f32 1.0, %v1445_v43  ;;  %v3494_v47 = vadd.f32 1.0, %v1446_v44  ;;  %v1447_v48 = vld [vmem:[%s6760_s12 + $0x27c0] sm:$0xff]  ;;  %v1448_v49 = vld [vmem:[%s6760_s12 + $0x27c8] sm:$0xff] }
 0x2c2   : > { %v1449_v50 = vld [vmem:[%s6760_s12 + $0x27d0] sm:$0xff]  ;;  %5537 = vst [vmem:[%s6775_s17 + $0x2790] sm:$0xff] %v3489_v39  ;;  %5538 = vst [vmem:[%s6775_s17 + $0x2798] sm:$0xff] %v3490_v40  ;;  %v3495_v51 = vadd.f32 1.0, %v1447_v48  ;;  %v3496_v52 = vadd.f32 1.0, %v1448_v49  ;;  %v1450_v54 = vld [vmem:[%s6760_s12 + $0x27d8] sm:$0xff] }
 0x2c3   : > { %5539 = vst [vmem:[%s6775_s17 + $0x27a0] sm:$0xff] %v3491_v41  ;;  %v3497_v53 = vadd.f32 1.0, %v1449_v50  ;;  %v1451_v55 = vld [vmem:[%s6760_s12 + $0x27e0] sm:$0xff]  ;;  %v1452_v56 = vld [vmem:[%s6760_s12 + $0x27e8] sm:$0xff]  ;;  %5540 = vst [vmem:[%s6775_s17 + $0x27a8] sm:$0xff] %v3492_v45  ;;  %v3498_v57 = vadd.f32 1.0, %v1450_v54 }
 0x2c4   : > { %5541 = vst [vmem:[%s6775_s17 + $0x27b0] sm:$0xff] %v3493_v46  ;;  %5542 = vst [vmem:[%s6775_s17 + $0x27b8] sm:$0xff] %v3494_v47  ;;  %v3499_v58 = vadd.f32 1.0, %v1451_v55  ;;  %v3500_v59 = vadd.f32 1.0, %v1452_v56  ;;  %v1453_v60 = vld [vmem:[%s6760_s12 + $0x27f0] sm:$0xff]  ;;  %v1454_v61 = vld [vmem:[%s6760_s12 + $0x27f8] sm:$0xff] }
 0x2c5   : > { %v1455_v62 = vld [vmem:[%s6760_s12 + $0x2800] sm:$0xff]  ;;  %5543 = vst [vmem:[%s6775_s17 + $0x27c0] sm:$0xff] %v3495_v51  ;;  %5544 = vst [vmem:[%s6775_s17 + $0x27c8] sm:$0xff] %v3496_v52  ;;  %v3501_v63 = vadd.f32 1.0, %v1453_v60  ;;  %v3502_v0 = vadd.f32 1.0, %v1454_v61  ;;  %v1456_v2 = vld [vmem:[%s6760_s12 + $0x2808] sm:$0xff] }
 0x2c6   : > { %5545 = vst [vmem:[%s6775_s17 + $0x27d0] sm:$0xff] %v3497_v53  ;;  %v3503_v1 = vadd.f32 1.0, %v1455_v62  ;;  %v1457_v3 = vld [vmem:[%s6760_s12 + $0x2810] sm:$0xff]  ;;  %v1458_v4 = vld [vmem:[%s6760_s12 + $0x2818] sm:$0xff]  ;;  %5546 = vst [vmem:[%s6775_s17 + $0x27d8] sm:$0xff] %v3498_v57  ;;  %v3504_v5 = vadd.f32 1.0, %v1456_v2 }
 0x2c7   : > { %5547 = vst [vmem:[%s6775_s17 + $0x27e0] sm:$0xff] %v3499_v58  ;;  %5548 = vst [vmem:[%s6775_s17 + $0x27e8] sm:$0xff] %v3500_v59  ;;  %v3505_v6 = vadd.f32 1.0, %v1457_v3  ;;  %v3506_v7 = vadd.f32 1.0, %v1458_v4  ;;  %v1459_v8 = vld [vmem:[%s6760_s12 + $0x2820] sm:$0xff]  ;;  %v1460_v9 = vld [vmem:[%s6760_s12 + $0x2828] sm:$0xff] }
 0x2c8   : > { %v1461_v10 = vld [vmem:[%s6760_s12 + $0x2830] sm:$0xff]  ;;  %5549 = vst [vmem:[%s6775_s17 + $0x27f0] sm:$0xff] %v3501_v63  ;;  %5550 = vst [vmem:[%s6775_s17 + $0x27f8] sm:$0xff] %v3502_v0  ;;  %v3507_v11 = vadd.f32 1.0, %v1459_v8  ;;  %v3508_v12 = vadd.f32 1.0, %v1460_v9  ;;  %v1462_v14 = vld [vmem:[%s6760_s12 + $0x2838] sm:$0xff] }
 0x2c9   : > { %5551 = vst [vmem:[%s6775_s17 + $0x2800] sm:$0xff] %v3503_v1  ;;  %v3509_v13 = vadd.f32 1.0, %v1461_v10  ;;  %v1463_v15 = vld [vmem:[%s6760_s12 + $0x2840] sm:$0xff]  ;;  %v1464_v16 = vld [vmem:[%s6760_s12 + $0x2848] sm:$0xff]  ;;  %5552 = vst [vmem:[%s6775_s17 + $0x2808] sm:$0xff] %v3504_v5  ;;  %v3510_v17 = vadd.f32 1.0, %v1462_v14 }
 0x2ca   : > { %5553 = vst [vmem:[%s6775_s17 + $0x2810] sm:$0xff] %v3505_v6  ;;  %5554 = vst [vmem:[%s6775_s17 + $0x2818] sm:$0xff] %v3506_v7  ;;  %v3511_v18 = vadd.f32 1.0, %v1463_v15  ;;  %v3512_v19 = vadd.f32 1.0, %v1464_v16  ;;  %v1465_v20 = vld [vmem:[%s6760_s12 + $0x2850] sm:$0xff]  ;;  %v1466_v21 = vld [vmem:[%s6760_s12 + $0x2858] sm:$0xff] }
 0x2cb   : > { %v1467_v22 = vld [vmem:[%s6760_s12 + $0x2860] sm:$0xff]  ;;  %5555 = vst [vmem:[%s6775_s17 + $0x2820] sm:$0xff] %v3507_v11  ;;  %5556 = vst [vmem:[%s6775_s17 + $0x2828] sm:$0xff] %v3508_v12  ;;  %v3513_v23 = vadd.f32 1.0, %v1465_v20  ;;  %v3514_v24 = vadd.f32 1.0, %v1466_v21  ;;  %v1468_v26 = vld [vmem:[%s6760_s12 + $0x2868] sm:$0xff] }
 0x2cc   : > { %5557 = vst [vmem:[%s6775_s17 + $0x2830] sm:$0xff] %v3509_v13  ;;  %v3515_v25 = vadd.f32 1.0, %v1467_v22  ;;  %v1469_v27 = vld [vmem:[%s6760_s12 + $0x2870] sm:$0xff]  ;;  %v1470_v28 = vld [vmem:[%s6760_s12 + $0x2878] sm:$0xff]  ;;  %5558 = vst [vmem:[%s6775_s17 + $0x2838] sm:$0xff] %v3510_v17  ;;  %v3516_v29 = vadd.f32 1.0, %v1468_v26 }
 0x2cd   : > { %5559 = vst [vmem:[%s6775_s17 + $0x2840] sm:$0xff] %v3511_v18  ;;  %5560 = vst [vmem:[%s6775_s17 + $0x2848] sm:$0xff] %v3512_v19  ;;  %v3517_v30 = vadd.f32 1.0, %v1469_v27  ;;  %v3518_v31 = vadd.f32 1.0, %v1470_v28  ;;  %v1471_v32 = vld [vmem:[%s6760_s12 + $0x2880] sm:$0xff]  ;;  %v1472_v33 = vld [vmem:[%s6760_s12 + $0x2888] sm:$0xff] }
 0x2ce   : > { %v1473_v34 = vld [vmem:[%s6760_s12 + $0x2890] sm:$0xff]  ;;  %5561 = vst [vmem:[%s6775_s17 + $0x2850] sm:$0xff] %v3513_v23  ;;  %5562 = vst [vmem:[%s6775_s17 + $0x2858] sm:$0xff] %v3514_v24  ;;  %v3519_v35 = vadd.f32 1.0, %v1471_v32  ;;  %v3520_v36 = vadd.f32 1.0, %v1472_v33  ;;  %v1474_v38 = vld [vmem:[%s6760_s12 + $0x2898] sm:$0xff] }
 0x2cf   : > { %5563 = vst [vmem:[%s6775_s17 + $0x2860] sm:$0xff] %v3515_v25  ;;  %v3521_v37 = vadd.f32 1.0, %v1473_v34  ;;  %v1475_v39 = vld [vmem:[%s6760_s12 + $0x28a0] sm:$0xff]  ;;  %v1476_v40 = vld [vmem:[%s6760_s12 + $0x28a8] sm:$0xff]  ;;  %5564 = vst [vmem:[%s6775_s17 + $0x2868] sm:$0xff] %v3516_v29  ;;  %v3522_v41 = vadd.f32 1.0, %v1474_v38 }
 0x2d0   : > { %5565 = vst [vmem:[%s6775_s17 + $0x2870] sm:$0xff] %v3517_v30  ;;  %5566 = vst [vmem:[%s6775_s17 + $0x2878] sm:$0xff] %v3518_v31  ;;  %v3523_v42 = vadd.f32 1.0, %v1475_v39  ;;  %v3524_v43 = vadd.f32 1.0, %v1476_v40  ;;  %v1477_v44 = vld [vmem:[%s6760_s12 + $0x28b0] sm:$0xff]  ;;  %v1478_v45 = vld [vmem:[%s6760_s12 + $0x28b8] sm:$0xff] }
 0x2d1   : > { %v1479_v46 = vld [vmem:[%s6760_s12 + $0x28c0] sm:$0xff]  ;;  %5567 = vst [vmem:[%s6775_s17 + $0x2880] sm:$0xff] %v3519_v35  ;;  %5568 = vst [vmem:[%s6775_s17 + $0x2888] sm:$0xff] %v3520_v36  ;;  %v3525_v47 = vadd.f32 1.0, %v1477_v44  ;;  %v3526_v48 = vadd.f32 1.0, %v1478_v45  ;;  %v1480_v50 = vld [vmem:[%s6760_s12 + $0x28c8] sm:$0xff] }
 0x2d2   : > { %5569 = vst [vmem:[%s6775_s17 + $0x2890] sm:$0xff] %v3521_v37  ;;  %v3527_v49 = vadd.f32 1.0, %v1479_v46  ;;  %v1481_v51 = vld [vmem:[%s6760_s12 + $0x28d0] sm:$0xff]  ;;  %v1482_v52 = vld [vmem:[%s6760_s12 + $0x28d8] sm:$0xff]  ;;  %5570 = vst [vmem:[%s6775_s17 + $0x2898] sm:$0xff] %v3522_v41  ;;  %v3528_v53 = vadd.f32 1.0, %v1480_v50 }
 0x2d3   : > { %5571 = vst [vmem:[%s6775_s17 + $0x28a0] sm:$0xff] %v3523_v42  ;;  %5572 = vst [vmem:[%s6775_s17 + $0x28a8] sm:$0xff] %v3524_v43  ;;  %v3529_v54 = vadd.f32 1.0, %v1481_v51  ;;  %v3530_v55 = vadd.f32 1.0, %v1482_v52  ;;  %v1483_v56 = vld [vmem:[%s6760_s12 + $0x28e0] sm:$0xff]  ;;  %v1484_v57 = vld [vmem:[%s6760_s12 + $0x28e8] sm:$0xff] }
 0x2d4   : > { %v1485_v58 = vld [vmem:[%s6760_s12 + $0x28f0] sm:$0xff]  ;;  %5573 = vst [vmem:[%s6775_s17 + $0x28b0] sm:$0xff] %v3525_v47  ;;  %5574 = vst [vmem:[%s6775_s17 + $0x28b8] sm:$0xff] %v3526_v48  ;;  %v3531_v59 = vadd.f32 1.0, %v1483_v56  ;;  %v3532_v60 = vadd.f32 1.0, %v1484_v57  ;;  %v1486_v62 = vld [vmem:[%s6760_s12 + $0x28f8] sm:$0xff] }
 0x2d5   : > { %5575 = vst [vmem:[%s6775_s17 + $0x28c0] sm:$0xff] %v3527_v49  ;;  %v3533_v61 = vadd.f32 1.0, %v1485_v58  ;;  %v1487_v63 = vld [vmem:[%s6760_s12 + $0x2900] sm:$0xff]  ;;  %v1488_v0 = vld [vmem:[%s6760_s12 + $0x2908] sm:$0xff]  ;;  %5576 = vst [vmem:[%s6775_s17 + $0x28c8] sm:$0xff] %v3528_v53  ;;  %v3534_v1 = vadd.f32 1.0, %v1486_v62 }
 0x2d6   : > { %5577 = vst [vmem:[%s6775_s17 + $0x28d0] sm:$0xff] %v3529_v54  ;;  %5578 = vst [vmem:[%s6775_s17 + $0x28d8] sm:$0xff] %v3530_v55  ;;  %v3535_v2 = vadd.f32 1.0, %v1487_v63  ;;  %v3536_v3 = vadd.f32 1.0, %v1488_v0  ;;  %v1489_v4 = vld [vmem:[%s6760_s12 + $0x2910] sm:$0xff]  ;;  %v1490_v5 = vld [vmem:[%s6760_s12 + $0x2918] sm:$0xff] }
 0x2d7   : > { %v1491_v6 = vld [vmem:[%s6760_s12 + $0x2920] sm:$0xff]  ;;  %5579 = vst [vmem:[%s6775_s17 + $0x28e0] sm:$0xff] %v3531_v59  ;;  %5580 = vst [vmem:[%s6775_s17 + $0x28e8] sm:$0xff] %v3532_v60  ;;  %v3537_v7 = vadd.f32 1.0, %v1489_v4  ;;  %v3538_v8 = vadd.f32 1.0, %v1490_v5  ;;  %v1492_v10 = vld [vmem:[%s6760_s12 + $0x2928] sm:$0xff] }
 0x2d8   : > { %5581 = vst [vmem:[%s6775_s17 + $0x28f0] sm:$0xff] %v3533_v61  ;;  %v3539_v9 = vadd.f32 1.0, %v1491_v6  ;;  %v1493_v11 = vld [vmem:[%s6760_s12 + $0x2930] sm:$0xff]  ;;  %v1494_v12 = vld [vmem:[%s6760_s12 + $0x2938] sm:$0xff]  ;;  %5582 = vst [vmem:[%s6775_s17 + $0x28f8] sm:$0xff] %v3534_v1  ;;  %v3540_v13 = vadd.f32 1.0, %v1492_v10 }
 0x2d9   : > { %5583 = vst [vmem:[%s6775_s17 + $0x2900] sm:$0xff] %v3535_v2  ;;  %5584 = vst [vmem:[%s6775_s17 + $0x2908] sm:$0xff] %v3536_v3  ;;  %v3541_v14 = vadd.f32 1.0, %v1493_v11  ;;  %v3542_v15 = vadd.f32 1.0, %v1494_v12  ;;  %v1495_v16 = vld [vmem:[%s6760_s12 + $0x2940] sm:$0xff]  ;;  %v1496_v17 = vld [vmem:[%s6760_s12 + $0x2948] sm:$0xff] }
 0x2da   : > { %v1497_v18 = vld [vmem:[%s6760_s12 + $0x2950] sm:$0xff]  ;;  %5585 = vst [vmem:[%s6775_s17 + $0x2910] sm:$0xff] %v3537_v7  ;;  %5586 = vst [vmem:[%s6775_s17 + $0x2918] sm:$0xff] %v3538_v8  ;;  %v3543_v19 = vadd.f32 1.0, %v1495_v16  ;;  %v3544_v20 = vadd.f32 1.0, %v1496_v17  ;;  %v1498_v22 = vld [vmem:[%s6760_s12 + $0x2958] sm:$0xff] }
 0x2db   : > { %5587 = vst [vmem:[%s6775_s17 + $0x2920] sm:$0xff] %v3539_v9  ;;  %v3545_v21 = vadd.f32 1.0, %v1497_v18  ;;  %v1499_v23 = vld [vmem:[%s6760_s12 + $0x2960] sm:$0xff]  ;;  %v1500_v24 = vld [vmem:[%s6760_s12 + $0x2968] sm:$0xff]  ;;  %5588 = vst [vmem:[%s6775_s17 + $0x2928] sm:$0xff] %v3540_v13  ;;  %v3546_v25 = vadd.f32 1.0, %v1498_v22 }
 0x2dc   : > { %5589 = vst [vmem:[%s6775_s17 + $0x2930] sm:$0xff] %v3541_v14  ;;  %5590 = vst [vmem:[%s6775_s17 + $0x2938] sm:$0xff] %v3542_v15  ;;  %v3547_v26 = vadd.f32 1.0, %v1499_v23  ;;  %v3548_v27 = vadd.f32 1.0, %v1500_v24  ;;  %v1501_v28 = vld [vmem:[%s6760_s12 + $0x2970] sm:$0xff]  ;;  %v1502_v29 = vld [vmem:[%s6760_s12 + $0x2978] sm:$0xff] }
 0x2dd   : > { %v1503_v30 = vld [vmem:[%s6760_s12 + $0x2980] sm:$0xff]  ;;  %5591 = vst [vmem:[%s6775_s17 + $0x2940] sm:$0xff] %v3543_v19  ;;  %5592 = vst [vmem:[%s6775_s17 + $0x2948] sm:$0xff] %v3544_v20  ;;  %v3549_v31 = vadd.f32 1.0, %v1501_v28  ;;  %v3550_v32 = vadd.f32 1.0, %v1502_v29  ;;  %v1504_v34 = vld [vmem:[%s6760_s12 + $0x2988] sm:$0xff] }
 0x2de   : > { %5593 = vst [vmem:[%s6775_s17 + $0x2950] sm:$0xff] %v3545_v21  ;;  %v3551_v33 = vadd.f32 1.0, %v1503_v30  ;;  %v1505_v35 = vld [vmem:[%s6760_s12 + $0x2990] sm:$0xff]  ;;  %v1506_v36 = vld [vmem:[%s6760_s12 + $0x2998] sm:$0xff]  ;;  %5594 = vst [vmem:[%s6775_s17 + $0x2958] sm:$0xff] %v3546_v25  ;;  %v3552_v37 = vadd.f32 1.0, %v1504_v34 }
 0x2df   : > { %5595 = vst [vmem:[%s6775_s17 + $0x2960] sm:$0xff] %v3547_v26  ;;  %5596 = vst [vmem:[%s6775_s17 + $0x2968] sm:$0xff] %v3548_v27  ;;  %v3553_v38 = vadd.f32 1.0, %v1505_v35  ;;  %v3554_v39 = vadd.f32 1.0, %v1506_v36  ;;  %v1507_v40 = vld [vmem:[%s6760_s12 + $0x29a0] sm:$0xff]  ;;  %v1508_v41 = vld [vmem:[%s6760_s12 + $0x29a8] sm:$0xff] }
 0x2e0   : > { %v1509_v42 = vld [vmem:[%s6760_s12 + $0x29b0] sm:$0xff]  ;;  %5597 = vst [vmem:[%s6775_s17 + $0x2970] sm:$0xff] %v3549_v31  ;;  %5598 = vst [vmem:[%s6775_s17 + $0x2978] sm:$0xff] %v3550_v32  ;;  %v3555_v43 = vadd.f32 1.0, %v1507_v40  ;;  %v3556_v44 = vadd.f32 1.0, %v1508_v41  ;;  %v1510_v46 = vld [vmem:[%s6760_s12 + $0x29b8] sm:$0xff] }
 0x2e1   : > { %5599 = vst [vmem:[%s6775_s17 + $0x2980] sm:$0xff] %v3551_v33  ;;  %v3557_v45 = vadd.f32 1.0, %v1509_v42  ;;  %v1511_v47 = vld [vmem:[%s6760_s12 + $0x29c0] sm:$0xff]  ;;  %v1512_v48 = vld [vmem:[%s6760_s12 + $0x29c8] sm:$0xff]  ;;  %5600 = vst [vmem:[%s6775_s17 + $0x2988] sm:$0xff] %v3552_v37  ;;  %v3558_v49 = vadd.f32 1.0, %v1510_v46 }
 0x2e2   : > { %5601 = vst [vmem:[%s6775_s17 + $0x2990] sm:$0xff] %v3553_v38  ;;  %5602 = vst [vmem:[%s6775_s17 + $0x2998] sm:$0xff] %v3554_v39  ;;  %v3559_v50 = vadd.f32 1.0, %v1511_v47  ;;  %v3560_v51 = vadd.f32 1.0, %v1512_v48  ;;  %v1513_v52 = vld [vmem:[%s6760_s12 + $0x29d0] sm:$0xff]  ;;  %v1514_v53 = vld [vmem:[%s6760_s12 + $0x29d8] sm:$0xff] }
 0x2e3   : > { %v1515_v54 = vld [vmem:[%s6760_s12 + $0x29e0] sm:$0xff]  ;;  %5603 = vst [vmem:[%s6775_s17 + $0x29a0] sm:$0xff] %v3555_v43  ;;  %5604 = vst [vmem:[%s6775_s17 + $0x29a8] sm:$0xff] %v3556_v44  ;;  %v3561_v55 = vadd.f32 1.0, %v1513_v52  ;;  %v3562_v56 = vadd.f32 1.0, %v1514_v53  ;;  %v1516_v58 = vld [vmem:[%s6760_s12 + $0x29e8] sm:$0xff] }
 0x2e4   : > { %5605 = vst [vmem:[%s6775_s17 + $0x29b0] sm:$0xff] %v3557_v45  ;;  %v3563_v57 = vadd.f32 1.0, %v1515_v54  ;;  %v1517_v59 = vld [vmem:[%s6760_s12 + $0x29f0] sm:$0xff]  ;;  %v1518_v60 = vld [vmem:[%s6760_s12 + $0x29f8] sm:$0xff]  ;;  %5606 = vst [vmem:[%s6775_s17 + $0x29b8] sm:$0xff] %v3558_v49  ;;  %v3564_v61 = vadd.f32 1.0, %v1516_v58 }
 0x2e5   : > { %5607 = vst [vmem:[%s6775_s17 + $0x29c0] sm:$0xff] %v3559_v50  ;;  %5608 = vst [vmem:[%s6775_s17 + $0x29c8] sm:$0xff] %v3560_v51  ;;  %v3565_v62 = vadd.f32 1.0, %v1517_v59  ;;  %v3566_v63 = vadd.f32 1.0, %v1518_v60  ;;  %v1519_v0 = vld [vmem:[%s6760_s12 + $0x2a00] sm:$0xff]  ;;  %v1520_v1 = vld [vmem:[%s6760_s12 + $0x2a08] sm:$0xff] }
 0x2e6   : > { %v1521_v2 = vld [vmem:[%s6760_s12 + $0x2a10] sm:$0xff]  ;;  %5609 = vst [vmem:[%s6775_s17 + $0x29d0] sm:$0xff] %v3561_v55  ;;  %5610 = vst [vmem:[%s6775_s17 + $0x29d8] sm:$0xff] %v3562_v56  ;;  %v3567_v3 = vadd.f32 1.0, %v1519_v0  ;;  %v3568_v4 = vadd.f32 1.0, %v1520_v1  ;;  %v1522_v6 = vld [vmem:[%s6760_s12 + $0x2a18] sm:$0xff] }
 0x2e7   : > { %5611 = vst [vmem:[%s6775_s17 + $0x29e0] sm:$0xff] %v3563_v57  ;;  %v3569_v5 = vadd.f32 1.0, %v1521_v2  ;;  %v1523_v7 = vld [vmem:[%s6760_s12 + $0x2a20] sm:$0xff]  ;;  %v1524_v8 = vld [vmem:[%s6760_s12 + $0x2a28] sm:$0xff]  ;;  %5612 = vst [vmem:[%s6775_s17 + $0x29e8] sm:$0xff] %v3564_v61  ;;  %v3570_v9 = vadd.f32 1.0, %v1522_v6 }
 0x2e8   : > { %5613 = vst [vmem:[%s6775_s17 + $0x29f0] sm:$0xff] %v3565_v62  ;;  %5614 = vst [vmem:[%s6775_s17 + $0x29f8] sm:$0xff] %v3566_v63  ;;  %v3571_v10 = vadd.f32 1.0, %v1523_v7  ;;  %v3572_v11 = vadd.f32 1.0, %v1524_v8  ;;  %v1525_v12 = vld [vmem:[%s6760_s12 + $0x2a30] sm:$0xff]  ;;  %v1526_v13 = vld [vmem:[%s6760_s12 + $0x2a38] sm:$0xff] }
 0x2e9   : > { %v1527_v14 = vld [vmem:[%s6760_s12 + $0x2a40] sm:$0xff]  ;;  %5615 = vst [vmem:[%s6775_s17 + $0x2a00] sm:$0xff] %v3567_v3  ;;  %5616 = vst [vmem:[%s6775_s17 + $0x2a08] sm:$0xff] %v3568_v4  ;;  %v3573_v15 = vadd.f32 1.0, %v1525_v12  ;;  %v3574_v16 = vadd.f32 1.0, %v1526_v13  ;;  %v1528_v18 = vld [vmem:[%s6760_s12 + $0x2a48] sm:$0xff] }
 0x2ea   : > { %5617 = vst [vmem:[%s6775_s17 + $0x2a10] sm:$0xff] %v3569_v5  ;;  %v3575_v17 = vadd.f32 1.0, %v1527_v14  ;;  %v1529_v19 = vld [vmem:[%s6760_s12 + $0x2a50] sm:$0xff]  ;;  %v1530_v20 = vld [vmem:[%s6760_s12 + $0x2a58] sm:$0xff]  ;;  %5618 = vst [vmem:[%s6775_s17 + $0x2a18] sm:$0xff] %v3570_v9  ;;  %v3576_v21 = vadd.f32 1.0, %v1528_v18 }
 0x2eb   : > { %5619 = vst [vmem:[%s6775_s17 + $0x2a20] sm:$0xff] %v3571_v10  ;;  %5620 = vst [vmem:[%s6775_s17 + $0x2a28] sm:$0xff] %v3572_v11  ;;  %v3577_v22 = vadd.f32 1.0, %v1529_v19  ;;  %v3578_v23 = vadd.f32 1.0, %v1530_v20  ;;  %v1531_v24 = vld [vmem:[%s6760_s12 + $0x2a60] sm:$0xff]  ;;  %v1532_v25 = vld [vmem:[%s6760_s12 + $0x2a68] sm:$0xff] }
 0x2ec   : > { %v1533_v26 = vld [vmem:[%s6760_s12 + $0x2a70] sm:$0xff]  ;;  %5621 = vst [vmem:[%s6775_s17 + $0x2a30] sm:$0xff] %v3573_v15  ;;  %5622 = vst [vmem:[%s6775_s17 + $0x2a38] sm:$0xff] %v3574_v16  ;;  %v3579_v27 = vadd.f32 1.0, %v1531_v24  ;;  %v3580_v28 = vadd.f32 1.0, %v1532_v25  ;;  %v1534_v30 = vld [vmem:[%s6760_s12 + $0x2a78] sm:$0xff] }
 0x2ed   : > { %5623 = vst [vmem:[%s6775_s17 + $0x2a40] sm:$0xff] %v3575_v17  ;;  %v3581_v29 = vadd.f32 1.0, %v1533_v26  ;;  %v1535_v31 = vld [vmem:[%s6760_s12 + $0x2a80] sm:$0xff]  ;;  %v1536_v32 = vld [vmem:[%s6760_s12 + $0x2a88] sm:$0xff]  ;;  %5624 = vst [vmem:[%s6775_s17 + $0x2a48] sm:$0xff] %v3576_v21  ;;  %v3582_v33 = vadd.f32 1.0, %v1534_v30 }
 0x2ee   : > { %5625 = vst [vmem:[%s6775_s17 + $0x2a50] sm:$0xff] %v3577_v22  ;;  %5626 = vst [vmem:[%s6775_s17 + $0x2a58] sm:$0xff] %v3578_v23  ;;  %v3583_v34 = vadd.f32 1.0, %v1535_v31  ;;  %v3584_v35 = vadd.f32 1.0, %v1536_v32  ;;  %v1537_v36 = vld [vmem:[%s6760_s12 + $0x2a90] sm:$0xff]  ;;  %v1538_v37 = vld [vmem:[%s6760_s12 + $0x2a98] sm:$0xff] }
 0x2ef   : > { %v1539_v38 = vld [vmem:[%s6760_s12 + $0x2aa0] sm:$0xff]  ;;  %5627 = vst [vmem:[%s6775_s17 + $0x2a60] sm:$0xff] %v3579_v27  ;;  %5628 = vst [vmem:[%s6775_s17 + $0x2a68] sm:$0xff] %v3580_v28  ;;  %v3585_v39 = vadd.f32 1.0, %v1537_v36  ;;  %v3586_v40 = vadd.f32 1.0, %v1538_v37  ;;  %v1540_v42 = vld [vmem:[%s6760_s12 + $0x2aa8] sm:$0xff] }
 0x2f0   : > { %5629 = vst [vmem:[%s6775_s17 + $0x2a70] sm:$0xff] %v3581_v29  ;;  %v3587_v41 = vadd.f32 1.0, %v1539_v38  ;;  %v1541_v43 = vld [vmem:[%s6760_s12 + $0x2ab0] sm:$0xff]  ;;  %v1542_v44 = vld [vmem:[%s6760_s12 + $0x2ab8] sm:$0xff]  ;;  %5630 = vst [vmem:[%s6775_s17 + $0x2a78] sm:$0xff] %v3582_v33  ;;  %v3588_v45 = vadd.f32 1.0, %v1540_v42 }
 0x2f1   : > { %5631 = vst [vmem:[%s6775_s17 + $0x2a80] sm:$0xff] %v3583_v34  ;;  %5632 = vst [vmem:[%s6775_s17 + $0x2a88] sm:$0xff] %v3584_v35  ;;  %v3589_v46 = vadd.f32 1.0, %v1541_v43  ;;  %v3590_v47 = vadd.f32 1.0, %v1542_v44  ;;  %v1543_v48 = vld [vmem:[%s6760_s12 + $0x2ac0] sm:$0xff]  ;;  %v1544_v49 = vld [vmem:[%s6760_s12 + $0x2ac8] sm:$0xff] }
 0x2f2   : > { %v1545_v50 = vld [vmem:[%s6760_s12 + $0x2ad0] sm:$0xff]  ;;  %5633 = vst [vmem:[%s6775_s17 + $0x2a90] sm:$0xff] %v3585_v39  ;;  %5634 = vst [vmem:[%s6775_s17 + $0x2a98] sm:$0xff] %v3586_v40  ;;  %v3591_v51 = vadd.f32 1.0, %v1543_v48  ;;  %v3592_v52 = vadd.f32 1.0, %v1544_v49  ;;  %v1546_v54 = vld [vmem:[%s6760_s12 + $0x2ad8] sm:$0xff] }
 0x2f3   : > { %5635 = vst [vmem:[%s6775_s17 + $0x2aa0] sm:$0xff] %v3587_v41  ;;  %v3593_v53 = vadd.f32 1.0, %v1545_v50  ;;  %v1547_v55 = vld [vmem:[%s6760_s12 + $0x2ae0] sm:$0xff]  ;;  %v1548_v56 = vld [vmem:[%s6760_s12 + $0x2ae8] sm:$0xff]  ;;  %5636 = vst [vmem:[%s6775_s17 + $0x2aa8] sm:$0xff] %v3588_v45  ;;  %v3594_v57 = vadd.f32 1.0, %v1546_v54 }
 0x2f4   : > { %5637 = vst [vmem:[%s6775_s17 + $0x2ab0] sm:$0xff] %v3589_v46  ;;  %5638 = vst [vmem:[%s6775_s17 + $0x2ab8] sm:$0xff] %v3590_v47  ;;  %v3595_v58 = vadd.f32 1.0, %v1547_v55  ;;  %v3596_v59 = vadd.f32 1.0, %v1548_v56  ;;  %v1549_v60 = vld [vmem:[%s6760_s12 + $0x2af0] sm:$0xff]  ;;  %v1550_v61 = vld [vmem:[%s6760_s12 + $0x2af8] sm:$0xff] }
 0x2f5   : > { %v1551_v62 = vld [vmem:[%s6760_s12 + $0x2b00] sm:$0xff]  ;;  %5639 = vst [vmem:[%s6775_s17 + $0x2ac0] sm:$0xff] %v3591_v51  ;;  %5640 = vst [vmem:[%s6775_s17 + $0x2ac8] sm:$0xff] %v3592_v52  ;;  %v3597_v63 = vadd.f32 1.0, %v1549_v60  ;;  %v3598_v0 = vadd.f32 1.0, %v1550_v61  ;;  %v1552_v2 = vld [vmem:[%s6760_s12 + $0x2b08] sm:$0xff] }
 0x2f6   : > { %5641 = vst [vmem:[%s6775_s17 + $0x2ad0] sm:$0xff] %v3593_v53  ;;  %v3599_v1 = vadd.f32 1.0, %v1551_v62  ;;  %v1553_v3 = vld [vmem:[%s6760_s12 + $0x2b10] sm:$0xff]  ;;  %v1554_v4 = vld [vmem:[%s6760_s12 + $0x2b18] sm:$0xff]  ;;  %5642 = vst [vmem:[%s6775_s17 + $0x2ad8] sm:$0xff] %v3594_v57  ;;  %v3600_v5 = vadd.f32 1.0, %v1552_v2 }
 0x2f7   : > { %5643 = vst [vmem:[%s6775_s17 + $0x2ae0] sm:$0xff] %v3595_v58  ;;  %5644 = vst [vmem:[%s6775_s17 + $0x2ae8] sm:$0xff] %v3596_v59  ;;  %v3601_v6 = vadd.f32 1.0, %v1553_v3  ;;  %v3602_v7 = vadd.f32 1.0, %v1554_v4  ;;  %v1555_v8 = vld [vmem:[%s6760_s12 + $0x2b20] sm:$0xff]  ;;  %v1556_v9 = vld [vmem:[%s6760_s12 + $0x2b28] sm:$0xff] }
 0x2f8   : > { %v1557_v10 = vld [vmem:[%s6760_s12 + $0x2b30] sm:$0xff]  ;;  %5645 = vst [vmem:[%s6775_s17 + $0x2af0] sm:$0xff] %v3597_v63  ;;  %5646 = vst [vmem:[%s6775_s17 + $0x2af8] sm:$0xff] %v3598_v0  ;;  %v3603_v11 = vadd.f32 1.0, %v1555_v8  ;;  %v3604_v12 = vadd.f32 1.0, %v1556_v9  ;;  %v1558_v14 = vld [vmem:[%s6760_s12 + $0x2b38] sm:$0xff] }
 0x2f9   : > { %5647 = vst [vmem:[%s6775_s17 + $0x2b00] sm:$0xff] %v3599_v1  ;;  %v3605_v13 = vadd.f32 1.0, %v1557_v10  ;;  %v1559_v15 = vld [vmem:[%s6760_s12 + $0x2b40] sm:$0xff]  ;;  %v1560_v16 = vld [vmem:[%s6760_s12 + $0x2b48] sm:$0xff]  ;;  %5648 = vst [vmem:[%s6775_s17 + $0x2b08] sm:$0xff] %v3600_v5  ;;  %v3606_v17 = vadd.f32 1.0, %v1558_v14 }
 0x2fa   : > { %5649 = vst [vmem:[%s6775_s17 + $0x2b10] sm:$0xff] %v3601_v6  ;;  %5650 = vst [vmem:[%s6775_s17 + $0x2b18] sm:$0xff] %v3602_v7  ;;  %v3607_v18 = vadd.f32 1.0, %v1559_v15  ;;  %v3608_v19 = vadd.f32 1.0, %v1560_v16  ;;  %v1561_v20 = vld [vmem:[%s6760_s12 + $0x2b50] sm:$0xff]  ;;  %v1562_v21 = vld [vmem:[%s6760_s12 + $0x2b58] sm:$0xff] }
 0x2fb   : > { %v1563_v22 = vld [vmem:[%s6760_s12 + $0x2b60] sm:$0xff]  ;;  %5651 = vst [vmem:[%s6775_s17 + $0x2b20] sm:$0xff] %v3603_v11  ;;  %5652 = vst [vmem:[%s6775_s17 + $0x2b28] sm:$0xff] %v3604_v12  ;;  %v3609_v23 = vadd.f32 1.0, %v1561_v20  ;;  %v3610_v24 = vadd.f32 1.0, %v1562_v21  ;;  %v1564_v26 = vld [vmem:[%s6760_s12 + $0x2b68] sm:$0xff] }
 0x2fc   : > { %5653 = vst [vmem:[%s6775_s17 + $0x2b30] sm:$0xff] %v3605_v13  ;;  %v3611_v25 = vadd.f32 1.0, %v1563_v22  ;;  %v1565_v27 = vld [vmem:[%s6760_s12 + $0x2b70] sm:$0xff]  ;;  %v1566_v28 = vld [vmem:[%s6760_s12 + $0x2b78] sm:$0xff]  ;;  %5654 = vst [vmem:[%s6775_s17 + $0x2b38] sm:$0xff] %v3606_v17  ;;  %v3612_v29 = vadd.f32 1.0, %v1564_v26 }
 0x2fd   : > { %5655 = vst [vmem:[%s6775_s17 + $0x2b40] sm:$0xff] %v3607_v18  ;;  %5656 = vst [vmem:[%s6775_s17 + $0x2b48] sm:$0xff] %v3608_v19  ;;  %v3613_v30 = vadd.f32 1.0, %v1565_v27  ;;  %v3614_v31 = vadd.f32 1.0, %v1566_v28  ;;  %v1567_v32 = vld [vmem:[%s6760_s12 + $0x2b80] sm:$0xff]  ;;  %v1568_v33 = vld [vmem:[%s6760_s12 + $0x2b88] sm:$0xff] }
 0x2fe   : > { %v1569_v34 = vld [vmem:[%s6760_s12 + $0x2b90] sm:$0xff]  ;;  %5657 = vst [vmem:[%s6775_s17 + $0x2b50] sm:$0xff] %v3609_v23  ;;  %5658 = vst [vmem:[%s6775_s17 + $0x2b58] sm:$0xff] %v3610_v24  ;;  %v3615_v35 = vadd.f32 1.0, %v1567_v32  ;;  %v3616_v36 = vadd.f32 1.0, %v1568_v33  ;;  %v1570_v38 = vld [vmem:[%s6760_s12 + $0x2b98] sm:$0xff] }
 0x2ff   : > { %5659 = vst [vmem:[%s6775_s17 + $0x2b60] sm:$0xff] %v3611_v25  ;;  %v3617_v37 = vadd.f32 1.0, %v1569_v34  ;;  %v1571_v39 = vld [vmem:[%s6760_s12 + $0x2ba0] sm:$0xff]  ;;  %v1572_v40 = vld [vmem:[%s6760_s12 + $0x2ba8] sm:$0xff]  ;;  %5660 = vst [vmem:[%s6775_s17 + $0x2b68] sm:$0xff] %v3612_v29  ;;  %v3618_v41 = vadd.f32 1.0, %v1570_v38 }
 0x300   : > { %5661 = vst [vmem:[%s6775_s17 + $0x2b70] sm:$0xff] %v3613_v30  ;;  %5662 = vst [vmem:[%s6775_s17 + $0x2b78] sm:$0xff] %v3614_v31  ;;  %v3619_v42 = vadd.f32 1.0, %v1571_v39  ;;  %v3620_v43 = vadd.f32 1.0, %v1572_v40  ;;  %v1573_v44 = vld [vmem:[%s6760_s12 + $0x2bb0] sm:$0xff]  ;;  %v1574_v45 = vld [vmem:[%s6760_s12 + $0x2bb8] sm:$0xff] }
 0x301   : > { %v1575_v46 = vld [vmem:[%s6760_s12 + $0x2bc0] sm:$0xff]  ;;  %5663 = vst [vmem:[%s6775_s17 + $0x2b80] sm:$0xff] %v3615_v35  ;;  %5664 = vst [vmem:[%s6775_s17 + $0x2b88] sm:$0xff] %v3616_v36  ;;  %v3621_v47 = vadd.f32 1.0, %v1573_v44  ;;  %v3622_v48 = vadd.f32 1.0, %v1574_v45  ;;  %v1576_v50 = vld [vmem:[%s6760_s12 + $0x2bc8] sm:$0xff] }
 0x302   : > { %5665 = vst [vmem:[%s6775_s17 + $0x2b90] sm:$0xff] %v3617_v37  ;;  %v3623_v49 = vadd.f32 1.0, %v1575_v46  ;;  %v1577_v51 = vld [vmem:[%s6760_s12 + $0x2bd0] sm:$0xff]  ;;  %v1578_v52 = vld [vmem:[%s6760_s12 + $0x2bd8] sm:$0xff]  ;;  %5666 = vst [vmem:[%s6775_s17 + $0x2b98] sm:$0xff] %v3618_v41  ;;  %v3624_v53 = vadd.f32 1.0, %v1576_v50 }
 0x303   : > { %5667 = vst [vmem:[%s6775_s17 + $0x2ba0] sm:$0xff] %v3619_v42  ;;  %5668 = vst [vmem:[%s6775_s17 + $0x2ba8] sm:$0xff] %v3620_v43  ;;  %v3625_v54 = vadd.f32 1.0, %v1577_v51  ;;  %v3626_v55 = vadd.f32 1.0, %v1578_v52  ;;  %v1579_v56 = vld [vmem:[%s6760_s12 + $0x2be0] sm:$0xff]  ;;  %v1580_v57 = vld [vmem:[%s6760_s12 + $0x2be8] sm:$0xff] }
 0x304   : > { %v1581_v58 = vld [vmem:[%s6760_s12 + $0x2bf0] sm:$0xff]  ;;  %5669 = vst [vmem:[%s6775_s17 + $0x2bb0] sm:$0xff] %v3621_v47  ;;  %5670 = vst [vmem:[%s6775_s17 + $0x2bb8] sm:$0xff] %v3622_v48  ;;  %v3627_v59 = vadd.f32 1.0, %v1579_v56  ;;  %v3628_v60 = vadd.f32 1.0, %v1580_v57  ;;  %v1582_v62 = vld [vmem:[%s6760_s12 + $0x2bf8] sm:$0xff] }
 0x305   : > { %5671 = vst [vmem:[%s6775_s17 + $0x2bc0] sm:$0xff] %v3623_v49  ;;  %v3629_v61 = vadd.f32 1.0, %v1581_v58  ;;  %v1583_v63 = vld [vmem:[%s6760_s12 + $0x2c00] sm:$0xff]  ;;  %v1584_v0 = vld [vmem:[%s6760_s12 + $0x2c08] sm:$0xff]  ;;  %5672 = vst [vmem:[%s6775_s17 + $0x2bc8] sm:$0xff] %v3624_v53  ;;  %v3630_v1 = vadd.f32 1.0, %v1582_v62 }
 0x306   : > { %5673 = vst [vmem:[%s6775_s17 + $0x2bd0] sm:$0xff] %v3625_v54  ;;  %5674 = vst [vmem:[%s6775_s17 + $0x2bd8] sm:$0xff] %v3626_v55  ;;  %v3631_v2 = vadd.f32 1.0, %v1583_v63  ;;  %v3632_v3 = vadd.f32 1.0, %v1584_v0  ;;  %v1585_v4 = vld [vmem:[%s6760_s12 + $0x2c10] sm:$0xff]  ;;  %v1586_v5 = vld [vmem:[%s6760_s12 + $0x2c18] sm:$0xff] }
 0x307   : > { %v1587_v6 = vld [vmem:[%s6760_s12 + $0x2c20] sm:$0xff]  ;;  %5675 = vst [vmem:[%s6775_s17 + $0x2be0] sm:$0xff] %v3627_v59  ;;  %5676 = vst [vmem:[%s6775_s17 + $0x2be8] sm:$0xff] %v3628_v60  ;;  %v3633_v7 = vadd.f32 1.0, %v1585_v4  ;;  %v3634_v8 = vadd.f32 1.0, %v1586_v5  ;;  %v1588_v10 = vld [vmem:[%s6760_s12 + $0x2c28] sm:$0xff] }
 0x308   : > { %5677 = vst [vmem:[%s6775_s17 + $0x2bf0] sm:$0xff] %v3629_v61  ;;  %v3635_v9 = vadd.f32 1.0, %v1587_v6  ;;  %v1589_v11 = vld [vmem:[%s6760_s12 + $0x2c30] sm:$0xff]  ;;  %v1590_v12 = vld [vmem:[%s6760_s12 + $0x2c38] sm:$0xff]  ;;  %5678 = vst [vmem:[%s6775_s17 + $0x2bf8] sm:$0xff] %v3630_v1  ;;  %v3636_v13 = vadd.f32 1.0, %v1588_v10 }
 0x309   : > { %5679 = vst [vmem:[%s6775_s17 + $0x2c00] sm:$0xff] %v3631_v2  ;;  %5680 = vst [vmem:[%s6775_s17 + $0x2c08] sm:$0xff] %v3632_v3  ;;  %v3637_v14 = vadd.f32 1.0, %v1589_v11  ;;  %v3638_v15 = vadd.f32 1.0, %v1590_v12  ;;  %v1591_v16 = vld [vmem:[%s6760_s12 + $0x2c40] sm:$0xff]  ;;  %v1592_v17 = vld [vmem:[%s6760_s12 + $0x2c48] sm:$0xff] }
 0x30a   : > { %v1593_v18 = vld [vmem:[%s6760_s12 + $0x2c50] sm:$0xff]  ;;  %5681 = vst [vmem:[%s6775_s17 + $0x2c10] sm:$0xff] %v3633_v7  ;;  %5682 = vst [vmem:[%s6775_s17 + $0x2c18] sm:$0xff] %v3634_v8  ;;  %v3639_v19 = vadd.f32 1.0, %v1591_v16  ;;  %v3640_v20 = vadd.f32 1.0, %v1592_v17  ;;  %v1594_v22 = vld [vmem:[%s6760_s12 + $0x2c58] sm:$0xff] }
 0x30b   : > { %5683 = vst [vmem:[%s6775_s17 + $0x2c20] sm:$0xff] %v3635_v9  ;;  %v3641_v21 = vadd.f32 1.0, %v1593_v18  ;;  %v1595_v23 = vld [vmem:[%s6760_s12 + $0x2c60] sm:$0xff]  ;;  %v1596_v24 = vld [vmem:[%s6760_s12 + $0x2c68] sm:$0xff]  ;;  %5684 = vst [vmem:[%s6775_s17 + $0x2c28] sm:$0xff] %v3636_v13  ;;  %v3642_v25 = vadd.f32 1.0, %v1594_v22 }
 0x30c   : > { %5685 = vst [vmem:[%s6775_s17 + $0x2c30] sm:$0xff] %v3637_v14  ;;  %5686 = vst [vmem:[%s6775_s17 + $0x2c38] sm:$0xff] %v3638_v15  ;;  %v3643_v26 = vadd.f32 1.0, %v1595_v23  ;;  %v3644_v27 = vadd.f32 1.0, %v1596_v24  ;;  %v1597_v28 = vld [vmem:[%s6760_s12 + $0x2c70] sm:$0xff]  ;;  %v1598_v29 = vld [vmem:[%s6760_s12 + $0x2c78] sm:$0xff] }
 0x30d   : > { %v1599_v30 = vld [vmem:[%s6760_s12 + $0x2c80] sm:$0xff]  ;;  %5687 = vst [vmem:[%s6775_s17 + $0x2c40] sm:$0xff] %v3639_v19  ;;  %5688 = vst [vmem:[%s6775_s17 + $0x2c48] sm:$0xff] %v3640_v20  ;;  %v3645_v31 = vadd.f32 1.0, %v1597_v28  ;;  %v3646_v32 = vadd.f32 1.0, %v1598_v29  ;;  %v1600_v34 = vld [vmem:[%s6760_s12 + $0x2c88] sm:$0xff] }
 0x30e   : > { %5689 = vst [vmem:[%s6775_s17 + $0x2c50] sm:$0xff] %v3641_v21  ;;  %v3647_v33 = vadd.f32 1.0, %v1599_v30  ;;  %v1601_v35 = vld [vmem:[%s6760_s12 + $0x2c90] sm:$0xff]  ;;  %v1602_v36 = vld [vmem:[%s6760_s12 + $0x2c98] sm:$0xff]  ;;  %5690 = vst [vmem:[%s6775_s17 + $0x2c58] sm:$0xff] %v3642_v25  ;;  %v3648_v37 = vadd.f32 1.0, %v1600_v34 }
 0x30f   : > { %5691 = vst [vmem:[%s6775_s17 + $0x2c60] sm:$0xff] %v3643_v26  ;;  %5692 = vst [vmem:[%s6775_s17 + $0x2c68] sm:$0xff] %v3644_v27  ;;  %v3649_v38 = vadd.f32 1.0, %v1601_v35  ;;  %v3650_v39 = vadd.f32 1.0, %v1602_v36  ;;  %v1603_v40 = vld [vmem:[%s6760_s12 + $0x2ca0] sm:$0xff]  ;;  %v1604_v41 = vld [vmem:[%s6760_s12 + $0x2ca8] sm:$0xff] }
 0x310   : > { %v1605_v42 = vld [vmem:[%s6760_s12 + $0x2cb0] sm:$0xff]  ;;  %5693 = vst [vmem:[%s6775_s17 + $0x2c70] sm:$0xff] %v3645_v31  ;;  %5694 = vst [vmem:[%s6775_s17 + $0x2c78] sm:$0xff] %v3646_v32  ;;  %v3651_v43 = vadd.f32 1.0, %v1603_v40  ;;  %v3652_v44 = vadd.f32 1.0, %v1604_v41  ;;  %v1606_v46 = vld [vmem:[%s6760_s12 + $0x2cb8] sm:$0xff] }
 0x311   : > { %5695 = vst [vmem:[%s6775_s17 + $0x2c80] sm:$0xff] %v3647_v33  ;;  %v3653_v45 = vadd.f32 1.0, %v1605_v42  ;;  %v1607_v47 = vld [vmem:[%s6760_s12 + $0x2cc0] sm:$0xff]  ;;  %v1608_v48 = vld [vmem:[%s6760_s12 + $0x2cc8] sm:$0xff]  ;;  %5696 = vst [vmem:[%s6775_s17 + $0x2c88] sm:$0xff] %v3648_v37  ;;  %v3654_v49 = vadd.f32 1.0, %v1606_v46 }
 0x312   : > { %5697 = vst [vmem:[%s6775_s17 + $0x2c90] sm:$0xff] %v3649_v38  ;;  %5698 = vst [vmem:[%s6775_s17 + $0x2c98] sm:$0xff] %v3650_v39  ;;  %v3655_v50 = vadd.f32 1.0, %v1607_v47  ;;  %v3656_v51 = vadd.f32 1.0, %v1608_v48  ;;  %v1609_v52 = vld [vmem:[%s6760_s12 + $0x2cd0] sm:$0xff]  ;;  %v1610_v53 = vld [vmem:[%s6760_s12 + $0x2cd8] sm:$0xff] }
 0x313   : > { %v1611_v54 = vld [vmem:[%s6760_s12 + $0x2ce0] sm:$0xff]  ;;  %5699 = vst [vmem:[%s6775_s17 + $0x2ca0] sm:$0xff] %v3651_v43  ;;  %5700 = vst [vmem:[%s6775_s17 + $0x2ca8] sm:$0xff] %v3652_v44  ;;  %v3657_v55 = vadd.f32 1.0, %v1609_v52  ;;  %v3658_v56 = vadd.f32 1.0, %v1610_v53  ;;  %v1612_v58 = vld [vmem:[%s6760_s12 + $0x2ce8] sm:$0xff] }
 0x314   : > { %5701 = vst [vmem:[%s6775_s17 + $0x2cb0] sm:$0xff] %v3653_v45  ;;  %v3659_v57 = vadd.f32 1.0, %v1611_v54  ;;  %v1613_v59 = vld [vmem:[%s6760_s12 + $0x2cf0] sm:$0xff]  ;;  %v1614_v60 = vld [vmem:[%s6760_s12 + $0x2cf8] sm:$0xff]  ;;  %5702 = vst [vmem:[%s6775_s17 + $0x2cb8] sm:$0xff] %v3654_v49  ;;  %v3660_v61 = vadd.f32 1.0, %v1612_v58 }
 0x315   : > { %5703 = vst [vmem:[%s6775_s17 + $0x2cc0] sm:$0xff] %v3655_v50  ;;  %5704 = vst [vmem:[%s6775_s17 + $0x2cc8] sm:$0xff] %v3656_v51  ;;  %v3661_v62 = vadd.f32 1.0, %v1613_v59  ;;  %v3662_v63 = vadd.f32 1.0, %v1614_v60  ;;  %v1615_v0 = vld [vmem:[%s6760_s12 + $0x2d00] sm:$0xff]  ;;  %v1616_v1 = vld [vmem:[%s6760_s12 + $0x2d08] sm:$0xff] }
 0x316   : > { %v1617_v2 = vld [vmem:[%s6760_s12 + $0x2d10] sm:$0xff]  ;;  %5705 = vst [vmem:[%s6775_s17 + $0x2cd0] sm:$0xff] %v3657_v55  ;;  %5706 = vst [vmem:[%s6775_s17 + $0x2cd8] sm:$0xff] %v3658_v56  ;;  %v3663_v3 = vadd.f32 1.0, %v1615_v0  ;;  %v3664_v4 = vadd.f32 1.0, %v1616_v1  ;;  %v1618_v6 = vld [vmem:[%s6760_s12 + $0x2d18] sm:$0xff] }
 0x317   : > { %5707 = vst [vmem:[%s6775_s17 + $0x2ce0] sm:$0xff] %v3659_v57  ;;  %v3665_v5 = vadd.f32 1.0, %v1617_v2  ;;  %v1619_v7 = vld [vmem:[%s6760_s12 + $0x2d20] sm:$0xff]  ;;  %v1620_v8 = vld [vmem:[%s6760_s12 + $0x2d28] sm:$0xff]  ;;  %5708 = vst [vmem:[%s6775_s17 + $0x2ce8] sm:$0xff] %v3660_v61  ;;  %v3666_v9 = vadd.f32 1.0, %v1618_v6 }
 0x318   : > { %5709 = vst [vmem:[%s6775_s17 + $0x2cf0] sm:$0xff] %v3661_v62  ;;  %5710 = vst [vmem:[%s6775_s17 + $0x2cf8] sm:$0xff] %v3662_v63  ;;  %v3667_v10 = vadd.f32 1.0, %v1619_v7  ;;  %v3668_v11 = vadd.f32 1.0, %v1620_v8  ;;  %v1621_v12 = vld [vmem:[%s6760_s12 + $0x2d30] sm:$0xff]  ;;  %v1622_v13 = vld [vmem:[%s6760_s12 + $0x2d38] sm:$0xff] }
 0x319   : > { %v1623_v14 = vld [vmem:[%s6760_s12 + $0x2d40] sm:$0xff]  ;;  %5711 = vst [vmem:[%s6775_s17 + $0x2d00] sm:$0xff] %v3663_v3  ;;  %5712 = vst [vmem:[%s6775_s17 + $0x2d08] sm:$0xff] %v3664_v4  ;;  %v3669_v15 = vadd.f32 1.0, %v1621_v12  ;;  %v3670_v16 = vadd.f32 1.0, %v1622_v13  ;;  %v1624_v18 = vld [vmem:[%s6760_s12 + $0x2d48] sm:$0xff] }
 0x31a   : > { %5713 = vst [vmem:[%s6775_s17 + $0x2d10] sm:$0xff] %v3665_v5  ;;  %v3671_v17 = vadd.f32 1.0, %v1623_v14  ;;  %v1625_v19 = vld [vmem:[%s6760_s12 + $0x2d50] sm:$0xff]  ;;  %v1626_v20 = vld [vmem:[%s6760_s12 + $0x2d58] sm:$0xff]  ;;  %5714 = vst [vmem:[%s6775_s17 + $0x2d18] sm:$0xff] %v3666_v9  ;;  %v3672_v21 = vadd.f32 1.0, %v1624_v18 }
 0x31b   : > { %5715 = vst [vmem:[%s6775_s17 + $0x2d20] sm:$0xff] %v3667_v10  ;;  %5716 = vst [vmem:[%s6775_s17 + $0x2d28] sm:$0xff] %v3668_v11  ;;  %v3673_v22 = vadd.f32 1.0, %v1625_v19  ;;  %v3674_v23 = vadd.f32 1.0, %v1626_v20  ;;  %v1627_v24 = vld [vmem:[%s6760_s12 + $0x2d60] sm:$0xff]  ;;  %v1628_v25 = vld [vmem:[%s6760_s12 + $0x2d68] sm:$0xff] }
 0x31c   : > { %v1629_v26 = vld [vmem:[%s6760_s12 + $0x2d70] sm:$0xff]  ;;  %5717 = vst [vmem:[%s6775_s17 + $0x2d30] sm:$0xff] %v3669_v15  ;;  %5718 = vst [vmem:[%s6775_s17 + $0x2d38] sm:$0xff] %v3670_v16  ;;  %v3675_v27 = vadd.f32 1.0, %v1627_v24  ;;  %v3676_v28 = vadd.f32 1.0, %v1628_v25  ;;  %v1630_v30 = vld [vmem:[%s6760_s12 + $0x2d78] sm:$0xff] }
 0x31d   : > { %5719 = vst [vmem:[%s6775_s17 + $0x2d40] sm:$0xff] %v3671_v17  ;;  %v3677_v29 = vadd.f32 1.0, %v1629_v26  ;;  %v1631_v31 = vld [vmem:[%s6760_s12 + $0x2d80] sm:$0xff]  ;;  %v1632_v32 = vld [vmem:[%s6760_s12 + $0x2d88] sm:$0xff]  ;;  %5720 = vst [vmem:[%s6775_s17 + $0x2d48] sm:$0xff] %v3672_v21  ;;  %v3678_v33 = vadd.f32 1.0, %v1630_v30 }
 0x31e   : > { %5721 = vst [vmem:[%s6775_s17 + $0x2d50] sm:$0xff] %v3673_v22  ;;  %5722 = vst [vmem:[%s6775_s17 + $0x2d58] sm:$0xff] %v3674_v23  ;;  %v3679_v34 = vadd.f32 1.0, %v1631_v31  ;;  %v3680_v35 = vadd.f32 1.0, %v1632_v32  ;;  %v1633_v36 = vld [vmem:[%s6760_s12 + $0x2d90] sm:$0xff]  ;;  %v1634_v37 = vld [vmem:[%s6760_s12 + $0x2d98] sm:$0xff] }
 0x31f   : > { %v1635_v38 = vld [vmem:[%s6760_s12 + $0x2da0] sm:$0xff]  ;;  %5723 = vst [vmem:[%s6775_s17 + $0x2d60] sm:$0xff] %v3675_v27  ;;  %5724 = vst [vmem:[%s6775_s17 + $0x2d68] sm:$0xff] %v3676_v28  ;;  %v3681_v39 = vadd.f32 1.0, %v1633_v36  ;;  %v3682_v40 = vadd.f32 1.0, %v1634_v37  ;;  %v1636_v42 = vld [vmem:[%s6760_s12 + $0x2da8] sm:$0xff] }
 0x320   : > { %5725 = vst [vmem:[%s6775_s17 + $0x2d70] sm:$0xff] %v3677_v29  ;;  %v3683_v41 = vadd.f32 1.0, %v1635_v38  ;;  %v1637_v43 = vld [vmem:[%s6760_s12 + $0x2db0] sm:$0xff]  ;;  %v1638_v44 = vld [vmem:[%s6760_s12 + $0x2db8] sm:$0xff]  ;;  %5726 = vst [vmem:[%s6775_s17 + $0x2d78] sm:$0xff] %v3678_v33  ;;  %v3684_v45 = vadd.f32 1.0, %v1636_v42 }
 0x321   : > { %5727 = vst [vmem:[%s6775_s17 + $0x2d80] sm:$0xff] %v3679_v34  ;;  %5728 = vst [vmem:[%s6775_s17 + $0x2d88] sm:$0xff] %v3680_v35  ;;  %v3685_v46 = vadd.f32 1.0, %v1637_v43  ;;  %v3686_v47 = vadd.f32 1.0, %v1638_v44  ;;  %v1639_v48 = vld [vmem:[%s6760_s12 + $0x2dc0] sm:$0xff]  ;;  %v1640_v49 = vld [vmem:[%s6760_s12 + $0x2dc8] sm:$0xff] }
 0x322   : > { %v1641_v50 = vld [vmem:[%s6760_s12 + $0x2dd0] sm:$0xff]  ;;  %5729 = vst [vmem:[%s6775_s17 + $0x2d90] sm:$0xff] %v3681_v39  ;;  %5730 = vst [vmem:[%s6775_s17 + $0x2d98] sm:$0xff] %v3682_v40  ;;  %v3687_v51 = vadd.f32 1.0, %v1639_v48  ;;  %v3688_v52 = vadd.f32 1.0, %v1640_v49  ;;  %v1642_v54 = vld [vmem:[%s6760_s12 + $0x2dd8] sm:$0xff] }
 0x323   : > { %5731 = vst [vmem:[%s6775_s17 + $0x2da0] sm:$0xff] %v3683_v41  ;;  %v3689_v53 = vadd.f32 1.0, %v1641_v50  ;;  %v1643_v55 = vld [vmem:[%s6760_s12 + $0x2de0] sm:$0xff]  ;;  %v1644_v56 = vld [vmem:[%s6760_s12 + $0x2de8] sm:$0xff]  ;;  %5732 = vst [vmem:[%s6775_s17 + $0x2da8] sm:$0xff] %v3684_v45  ;;  %v3690_v57 = vadd.f32 1.0, %v1642_v54 }
 0x324   : > { %5733 = vst [vmem:[%s6775_s17 + $0x2db0] sm:$0xff] %v3685_v46  ;;  %5734 = vst [vmem:[%s6775_s17 + $0x2db8] sm:$0xff] %v3686_v47  ;;  %v3691_v58 = vadd.f32 1.0, %v1643_v55  ;;  %v3692_v59 = vadd.f32 1.0, %v1644_v56  ;;  %v1645_v60 = vld [vmem:[%s6760_s12 + $0x2df0] sm:$0xff]  ;;  %v1646_v61 = vld [vmem:[%s6760_s12 + $0x2df8] sm:$0xff] }
 0x325   : > { %v1647_v62 = vld [vmem:[%s6760_s12 + $0x2e00] sm:$0xff]  ;;  %5735 = vst [vmem:[%s6775_s17 + $0x2dc0] sm:$0xff] %v3687_v51  ;;  %5736 = vst [vmem:[%s6775_s17 + $0x2dc8] sm:$0xff] %v3688_v52  ;;  %v3693_v63 = vadd.f32 1.0, %v1645_v60  ;;  %v3694_v0 = vadd.f32 1.0, %v1646_v61  ;;  %v1648_v2 = vld [vmem:[%s6760_s12 + $0x2e08] sm:$0xff] }
 0x326   : > { %5737 = vst [vmem:[%s6775_s17 + $0x2dd0] sm:$0xff] %v3689_v53  ;;  %v3695_v1 = vadd.f32 1.0, %v1647_v62  ;;  %v1649_v3 = vld [vmem:[%s6760_s12 + $0x2e10] sm:$0xff]  ;;  %v1650_v4 = vld [vmem:[%s6760_s12 + $0x2e18] sm:$0xff]  ;;  %5738 = vst [vmem:[%s6775_s17 + $0x2dd8] sm:$0xff] %v3690_v57  ;;  %v3696_v5 = vadd.f32 1.0, %v1648_v2 }
 0x327   : > { %5739 = vst [vmem:[%s6775_s17 + $0x2de0] sm:$0xff] %v3691_v58  ;;  %5740 = vst [vmem:[%s6775_s17 + $0x2de8] sm:$0xff] %v3692_v59  ;;  %v3697_v6 = vadd.f32 1.0, %v1649_v3  ;;  %v3698_v7 = vadd.f32 1.0, %v1650_v4  ;;  %v1651_v8 = vld [vmem:[%s6760_s12 + $0x2e20] sm:$0xff]  ;;  %v1652_v9 = vld [vmem:[%s6760_s12 + $0x2e28] sm:$0xff] }
 0x328   : > { %v1653_v10 = vld [vmem:[%s6760_s12 + $0x2e30] sm:$0xff]  ;;  %5741 = vst [vmem:[%s6775_s17 + $0x2df0] sm:$0xff] %v3693_v63  ;;  %5742 = vst [vmem:[%s6775_s17 + $0x2df8] sm:$0xff] %v3694_v0  ;;  %v3699_v11 = vadd.f32 1.0, %v1651_v8  ;;  %v3700_v12 = vadd.f32 1.0, %v1652_v9  ;;  %v1654_v14 = vld [vmem:[%s6760_s12 + $0x2e38] sm:$0xff] }
 0x329   : > { %5743 = vst [vmem:[%s6775_s17 + $0x2e00] sm:$0xff] %v3695_v1  ;;  %v3701_v13 = vadd.f32 1.0, %v1653_v10  ;;  %v1655_v15 = vld [vmem:[%s6760_s12 + $0x2e40] sm:$0xff]  ;;  %v1656_v16 = vld [vmem:[%s6760_s12 + $0x2e48] sm:$0xff]  ;;  %5744 = vst [vmem:[%s6775_s17 + $0x2e08] sm:$0xff] %v3696_v5  ;;  %v3702_v17 = vadd.f32 1.0, %v1654_v14 }
 0x32a   : > { %5745 = vst [vmem:[%s6775_s17 + $0x2e10] sm:$0xff] %v3697_v6  ;;  %5746 = vst [vmem:[%s6775_s17 + $0x2e18] sm:$0xff] %v3698_v7  ;;  %v3703_v18 = vadd.f32 1.0, %v1655_v15  ;;  %v3704_v19 = vadd.f32 1.0, %v1656_v16  ;;  %v1657_v20 = vld [vmem:[%s6760_s12 + $0x2e50] sm:$0xff]  ;;  %v1658_v21 = vld [vmem:[%s6760_s12 + $0x2e58] sm:$0xff] }
 0x32b   : > { %v1659_v22 = vld [vmem:[%s6760_s12 + $0x2e60] sm:$0xff]  ;;  %5747 = vst [vmem:[%s6775_s17 + $0x2e20] sm:$0xff] %v3699_v11  ;;  %5748 = vst [vmem:[%s6775_s17 + $0x2e28] sm:$0xff] %v3700_v12  ;;  %v3705_v23 = vadd.f32 1.0, %v1657_v20  ;;  %v3706_v24 = vadd.f32 1.0, %v1658_v21  ;;  %v1660_v26 = vld [vmem:[%s6760_s12 + $0x2e68] sm:$0xff] }
 0x32c   : > { %5749 = vst [vmem:[%s6775_s17 + $0x2e30] sm:$0xff] %v3701_v13  ;;  %v3707_v25 = vadd.f32 1.0, %v1659_v22  ;;  %v1661_v27 = vld [vmem:[%s6760_s12 + $0x2e70] sm:$0xff]  ;;  %v1662_v28 = vld [vmem:[%s6760_s12 + $0x2e78] sm:$0xff]  ;;  %5750 = vst [vmem:[%s6775_s17 + $0x2e38] sm:$0xff] %v3702_v17  ;;  %v3708_v29 = vadd.f32 1.0, %v1660_v26 }
 0x32d   : > { %5751 = vst [vmem:[%s6775_s17 + $0x2e40] sm:$0xff] %v3703_v18  ;;  %5752 = vst [vmem:[%s6775_s17 + $0x2e48] sm:$0xff] %v3704_v19  ;;  %v3709_v30 = vadd.f32 1.0, %v1661_v27  ;;  %v3710_v31 = vadd.f32 1.0, %v1662_v28  ;;  %v1663_v32 = vld [vmem:[%s6760_s12 + $0x2e80] sm:$0xff]  ;;  %v1664_v33 = vld [vmem:[%s6760_s12 + $0x2e88] sm:$0xff] }
 0x32e   : > { %v1665_v34 = vld [vmem:[%s6760_s12 + $0x2e90] sm:$0xff]  ;;  %5753 = vst [vmem:[%s6775_s17 + $0x2e50] sm:$0xff] %v3705_v23  ;;  %5754 = vst [vmem:[%s6775_s17 + $0x2e58] sm:$0xff] %v3706_v24  ;;  %v3711_v35 = vadd.f32 1.0, %v1663_v32  ;;  %v3712_v36 = vadd.f32 1.0, %v1664_v33  ;;  %v1666_v38 = vld [vmem:[%s6760_s12 + $0x2e98] sm:$0xff] }
 0x32f   : > { %5755 = vst [vmem:[%s6775_s17 + $0x2e60] sm:$0xff] %v3707_v25  ;;  %v3713_v37 = vadd.f32 1.0, %v1665_v34  ;;  %v1667_v39 = vld [vmem:[%s6760_s12 + $0x2ea0] sm:$0xff]  ;;  %v1668_v40 = vld [vmem:[%s6760_s12 + $0x2ea8] sm:$0xff]  ;;  %5756 = vst [vmem:[%s6775_s17 + $0x2e68] sm:$0xff] %v3708_v29  ;;  %v3714_v41 = vadd.f32 1.0, %v1666_v38 }
 0x330   : > { %5757 = vst [vmem:[%s6775_s17 + $0x2e70] sm:$0xff] %v3709_v30  ;;  %5758 = vst [vmem:[%s6775_s17 + $0x2e78] sm:$0xff] %v3710_v31  ;;  %v3715_v42 = vadd.f32 1.0, %v1667_v39  ;;  %v3716_v43 = vadd.f32 1.0, %v1668_v40  ;;  %v1669_v44 = vld [vmem:[%s6760_s12 + $0x2eb0] sm:$0xff]  ;;  %v1670_v45 = vld [vmem:[%s6760_s12 + $0x2eb8] sm:$0xff] }
 0x331   : > { %v1671_v46 = vld [vmem:[%s6760_s12 + $0x2ec0] sm:$0xff]  ;;  %5759 = vst [vmem:[%s6775_s17 + $0x2e80] sm:$0xff] %v3711_v35  ;;  %5760 = vst [vmem:[%s6775_s17 + $0x2e88] sm:$0xff] %v3712_v36  ;;  %v3717_v47 = vadd.f32 1.0, %v1669_v44  ;;  %v3718_v48 = vadd.f32 1.0, %v1670_v45  ;;  %v1672_v50 = vld [vmem:[%s6760_s12 + $0x2ec8] sm:$0xff] }
 0x332   : > { %5761 = vst [vmem:[%s6775_s17 + $0x2e90] sm:$0xff] %v3713_v37  ;;  %v3719_v49 = vadd.f32 1.0, %v1671_v46  ;;  %v1673_v51 = vld [vmem:[%s6760_s12 + $0x2ed0] sm:$0xff]  ;;  %v1674_v52 = vld [vmem:[%s6760_s12 + $0x2ed8] sm:$0xff]  ;;  %5762 = vst [vmem:[%s6775_s17 + $0x2e98] sm:$0xff] %v3714_v41  ;;  %v3720_v53 = vadd.f32 1.0, %v1672_v50 }
 0x333   : > { %5763 = vst [vmem:[%s6775_s17 + $0x2ea0] sm:$0xff] %v3715_v42  ;;  %5764 = vst [vmem:[%s6775_s17 + $0x2ea8] sm:$0xff] %v3716_v43  ;;  %v3721_v54 = vadd.f32 1.0, %v1673_v51  ;;  %v3722_v55 = vadd.f32 1.0, %v1674_v52  ;;  %v1675_v56 = vld [vmem:[%s6760_s12 + $0x2ee0] sm:$0xff]  ;;  %v1676_v57 = vld [vmem:[%s6760_s12 + $0x2ee8] sm:$0xff] }
 0x334   : > { %v1677_v58 = vld [vmem:[%s6760_s12 + $0x2ef0] sm:$0xff]  ;;  %5765 = vst [vmem:[%s6775_s17 + $0x2eb0] sm:$0xff] %v3717_v47  ;;  %5766 = vst [vmem:[%s6775_s17 + $0x2eb8] sm:$0xff] %v3718_v48  ;;  %v3723_v59 = vadd.f32 1.0, %v1675_v56  ;;  %v3724_v60 = vadd.f32 1.0, %v1676_v57  ;;  %v1678_v62 = vld [vmem:[%s6760_s12 + $0x2ef8] sm:$0xff] }
 0x335   : > { %5767 = vst [vmem:[%s6775_s17 + $0x2ec0] sm:$0xff] %v3719_v49  ;;  %v3725_v61 = vadd.f32 1.0, %v1677_v58  ;;  %v1679_v63 = vld [vmem:[%s6760_s12 + $0x2f00] sm:$0xff]  ;;  %v1680_v0 = vld [vmem:[%s6760_s12 + $0x2f08] sm:$0xff]  ;;  %5768 = vst [vmem:[%s6775_s17 + $0x2ec8] sm:$0xff] %v3720_v53  ;;  %v3726_v1 = vadd.f32 1.0, %v1678_v62 }
 0x336   : > { %5769 = vst [vmem:[%s6775_s17 + $0x2ed0] sm:$0xff] %v3721_v54  ;;  %5770 = vst [vmem:[%s6775_s17 + $0x2ed8] sm:$0xff] %v3722_v55  ;;  %v3727_v2 = vadd.f32 1.0, %v1679_v63  ;;  %v3728_v3 = vadd.f32 1.0, %v1680_v0  ;;  %v1681_v4 = vld [vmem:[%s6760_s12 + $0x2f10] sm:$0xff]  ;;  %v1682_v5 = vld [vmem:[%s6760_s12 + $0x2f18] sm:$0xff] }
 0x337   : > { %v1683_v6 = vld [vmem:[%s6760_s12 + $0x2f20] sm:$0xff]  ;;  %5771 = vst [vmem:[%s6775_s17 + $0x2ee0] sm:$0xff] %v3723_v59  ;;  %5772 = vst [vmem:[%s6775_s17 + $0x2ee8] sm:$0xff] %v3724_v60  ;;  %v3729_v7 = vadd.f32 1.0, %v1681_v4  ;;  %v3730_v8 = vadd.f32 1.0, %v1682_v5  ;;  %v1684_v10 = vld [vmem:[%s6760_s12 + $0x2f28] sm:$0xff] }
 0x338   : > { %5773 = vst [vmem:[%s6775_s17 + $0x2ef0] sm:$0xff] %v3725_v61  ;;  %v3731_v9 = vadd.f32 1.0, %v1683_v6  ;;  %v1685_v11 = vld [vmem:[%s6760_s12 + $0x2f30] sm:$0xff]  ;;  %v1686_v12 = vld [vmem:[%s6760_s12 + $0x2f38] sm:$0xff]  ;;  %5774 = vst [vmem:[%s6775_s17 + $0x2ef8] sm:$0xff] %v3726_v1  ;;  %v3732_v13 = vadd.f32 1.0, %v1684_v10 }
 0x339   : > { %5775 = vst [vmem:[%s6775_s17 + $0x2f00] sm:$0xff] %v3727_v2  ;;  %5776 = vst [vmem:[%s6775_s17 + $0x2f08] sm:$0xff] %v3728_v3  ;;  %v3733_v14 = vadd.f32 1.0, %v1685_v11  ;;  %v3734_v15 = vadd.f32 1.0, %v1686_v12  ;;  %v1687_v16 = vld [vmem:[%s6760_s12 + $0x2f40] sm:$0xff]  ;;  %v1688_v17 = vld [vmem:[%s6760_s12 + $0x2f48] sm:$0xff] }
 0x33a   : > { %v1689_v18 = vld [vmem:[%s6760_s12 + $0x2f50] sm:$0xff]  ;;  %5777 = vst [vmem:[%s6775_s17 + $0x2f10] sm:$0xff] %v3729_v7  ;;  %5778 = vst [vmem:[%s6775_s17 + $0x2f18] sm:$0xff] %v3730_v8  ;;  %v3735_v19 = vadd.f32 1.0, %v1687_v16  ;;  %v3736_v20 = vadd.f32 1.0, %v1688_v17  ;;  %v1690_v22 = vld [vmem:[%s6760_s12 + $0x2f58] sm:$0xff] }
 0x33b   : > { %5779 = vst [vmem:[%s6775_s17 + $0x2f20] sm:$0xff] %v3731_v9  ;;  %v3737_v21 = vadd.f32 1.0, %v1689_v18  ;;  %v1691_v23 = vld [vmem:[%s6760_s12 + $0x2f60] sm:$0xff]  ;;  %v1692_v24 = vld [vmem:[%s6760_s12 + $0x2f68] sm:$0xff]  ;;  %5780 = vst [vmem:[%s6775_s17 + $0x2f28] sm:$0xff] %v3732_v13  ;;  %v3738_v25 = vadd.f32 1.0, %v1690_v22 }
 0x33c   : > { %5781 = vst [vmem:[%s6775_s17 + $0x2f30] sm:$0xff] %v3733_v14  ;;  %5782 = vst [vmem:[%s6775_s17 + $0x2f38] sm:$0xff] %v3734_v15  ;;  %v3739_v26 = vadd.f32 1.0, %v1691_v23  ;;  %v3740_v27 = vadd.f32 1.0, %v1692_v24  ;;  %v1693_v28 = vld [vmem:[%s6760_s12 + $0x2f70] sm:$0xff]  ;;  %v1694_v29 = vld [vmem:[%s6760_s12 + $0x2f78] sm:$0xff] }
 0x33d   : > { %v1695_v30 = vld [vmem:[%s6760_s12 + $0x2f80] sm:$0xff]  ;;  %5783 = vst [vmem:[%s6775_s17 + $0x2f40] sm:$0xff] %v3735_v19  ;;  %5784 = vst [vmem:[%s6775_s17 + $0x2f48] sm:$0xff] %v3736_v20  ;;  %v3741_v31 = vadd.f32 1.0, %v1693_v28  ;;  %v3742_v32 = vadd.f32 1.0, %v1694_v29  ;;  %v1696_v34 = vld [vmem:[%s6760_s12 + $0x2f88] sm:$0xff] }
 0x33e   : > { %5785 = vst [vmem:[%s6775_s17 + $0x2f50] sm:$0xff] %v3737_v21  ;;  %v3743_v33 = vadd.f32 1.0, %v1695_v30  ;;  %v1697_v35 = vld [vmem:[%s6760_s12 + $0x2f90] sm:$0xff]  ;;  %v1698_v36 = vld [vmem:[%s6760_s12 + $0x2f98] sm:$0xff]  ;;  %5786 = vst [vmem:[%s6775_s17 + $0x2f58] sm:$0xff] %v3738_v25  ;;  %v3744_v37 = vadd.f32 1.0, %v1696_v34 }
 0x33f   : > { %5787 = vst [vmem:[%s6775_s17 + $0x2f60] sm:$0xff] %v3739_v26  ;;  %5788 = vst [vmem:[%s6775_s17 + $0x2f68] sm:$0xff] %v3740_v27  ;;  %v3745_v38 = vadd.f32 1.0, %v1697_v35  ;;  %v3746_v39 = vadd.f32 1.0, %v1698_v36  ;;  %v1699_v40 = vld [vmem:[%s6760_s12 + $0x2fa0] sm:$0xff]  ;;  %v1700_v41 = vld [vmem:[%s6760_s12 + $0x2fa8] sm:$0xff] }
 0x340   : > { %v1701_v42 = vld [vmem:[%s6760_s12 + $0x2fb0] sm:$0xff]  ;;  %5789 = vst [vmem:[%s6775_s17 + $0x2f70] sm:$0xff] %v3741_v31  ;;  %5790 = vst [vmem:[%s6775_s17 + $0x2f78] sm:$0xff] %v3742_v32  ;;  %v3747_v43 = vadd.f32 1.0, %v1699_v40  ;;  %v3748_v44 = vadd.f32 1.0, %v1700_v41  ;;  %v1702_v46 = vld [vmem:[%s6760_s12 + $0x2fb8] sm:$0xff] }
 0x341   : > { %5791 = vst [vmem:[%s6775_s17 + $0x2f80] sm:$0xff] %v3743_v33  ;;  %v3749_v45 = vadd.f32 1.0, %v1701_v42  ;;  %v1703_v47 = vld [vmem:[%s6760_s12 + $0x2fc0] sm:$0xff]  ;;  %v1704_v48 = vld [vmem:[%s6760_s12 + $0x2fc8] sm:$0xff]  ;;  %5792 = vst [vmem:[%s6775_s17 + $0x2f88] sm:$0xff] %v3744_v37  ;;  %v3750_v49 = vadd.f32 1.0, %v1702_v46 }
 0x342   : > { %5793 = vst [vmem:[%s6775_s17 + $0x2f90] sm:$0xff] %v3745_v38  ;;  %5794 = vst [vmem:[%s6775_s17 + $0x2f98] sm:$0xff] %v3746_v39  ;;  %v3751_v50 = vadd.f32 1.0, %v1703_v47  ;;  %v3752_v51 = vadd.f32 1.0, %v1704_v48  ;;  %v1705_v52 = vld [vmem:[%s6760_s12 + $0x2fd0] sm:$0xff]  ;;  %v1706_v53 = vld [vmem:[%s6760_s12 + $0x2fd8] sm:$0xff] }
 0x343   : > { %v1707_v54 = vld [vmem:[%s6760_s12 + $0x2fe0] sm:$0xff]  ;;  %5795 = vst [vmem:[%s6775_s17 + $0x2fa0] sm:$0xff] %v3747_v43  ;;  %5796 = vst [vmem:[%s6775_s17 + $0x2fa8] sm:$0xff] %v3748_v44  ;;  %v3753_v55 = vadd.f32 1.0, %v1705_v52  ;;  %v3754_v56 = vadd.f32 1.0, %v1706_v53  ;;  %v1708_v58 = vld [vmem:[%s6760_s12 + $0x2fe8] sm:$0xff] }
 0x344   : > { %5797 = vst [vmem:[%s6775_s17 + $0x2fb0] sm:$0xff] %v3749_v45  ;;  %v3755_v57 = vadd.f32 1.0, %v1707_v54  ;;  %v1709_v59 = vld [vmem:[%s6760_s12 + $0x2ff0] sm:$0xff]  ;;  %v1710_v60 = vld [vmem:[%s6760_s12 + $0x2ff8] sm:$0xff]  ;;  %5798 = vst [vmem:[%s6775_s17 + $0x2fb8] sm:$0xff] %v3750_v49  ;;  %v3756_v61 = vadd.f32 1.0, %v1708_v58 }
 0x345   : > { %5799 = vst [vmem:[%s6775_s17 + $0x2fc0] sm:$0xff] %v3751_v50  ;;  %5800 = vst [vmem:[%s6775_s17 + $0x2fc8] sm:$0xff] %v3752_v51  ;;  %v3757_v62 = vadd.f32 1.0, %v1709_v59  ;;  %v3758_v63 = vadd.f32 1.0, %v1710_v60  ;;  %v1711_v0 = vld [vmem:[%s6760_s12 + $0x3000] sm:$0xff]  ;;  %v1712_v1 = vld [vmem:[%s6760_s12 + $0x3008] sm:$0xff] }
 0x346   : > { %v1713_v2 = vld [vmem:[%s6760_s12 + $0x3010] sm:$0xff]  ;;  %5801 = vst [vmem:[%s6775_s17 + $0x2fd0] sm:$0xff] %v3753_v55  ;;  %5802 = vst [vmem:[%s6775_s17 + $0x2fd8] sm:$0xff] %v3754_v56  ;;  %v3759_v3 = vadd.f32 1.0, %v1711_v0  ;;  %v3760_v4 = vadd.f32 1.0, %v1712_v1  ;;  %v1714_v6 = vld [vmem:[%s6760_s12 + $0x3018] sm:$0xff] }
 0x347   : > { %5803 = vst [vmem:[%s6775_s17 + $0x2fe0] sm:$0xff] %v3755_v57  ;;  %v3761_v5 = vadd.f32 1.0, %v1713_v2  ;;  %v1715_v7 = vld [vmem:[%s6760_s12 + $0x3020] sm:$0xff]  ;;  %v1716_v8 = vld [vmem:[%s6760_s12 + $0x3028] sm:$0xff]  ;;  %5804 = vst [vmem:[%s6775_s17 + $0x2fe8] sm:$0xff] %v3756_v61  ;;  %v3762_v9 = vadd.f32 1.0, %v1714_v6 }
 0x348   : > { %5805 = vst [vmem:[%s6775_s17 + $0x2ff0] sm:$0xff] %v3757_v62  ;;  %5806 = vst [vmem:[%s6775_s17 + $0x2ff8] sm:$0xff] %v3758_v63  ;;  %v3763_v10 = vadd.f32 1.0, %v1715_v7  ;;  %v3764_v11 = vadd.f32 1.0, %v1716_v8  ;;  %v1717_v12 = vld [vmem:[%s6760_s12 + $0x3030] sm:$0xff]  ;;  %v1718_v13 = vld [vmem:[%s6760_s12 + $0x3038] sm:$0xff] }
 0x349   : > { %v1719_v14 = vld [vmem:[%s6760_s12 + $0x3040] sm:$0xff]  ;;  %5807 = vst [vmem:[%s6775_s17 + $0x3000] sm:$0xff] %v3759_v3  ;;  %5808 = vst [vmem:[%s6775_s17 + $0x3008] sm:$0xff] %v3760_v4  ;;  %v3765_v15 = vadd.f32 1.0, %v1717_v12  ;;  %v3766_v16 = vadd.f32 1.0, %v1718_v13  ;;  %v1720_v18 = vld [vmem:[%s6760_s12 + $0x3048] sm:$0xff] }
 0x34a   : > { %5809 = vst [vmem:[%s6775_s17 + $0x3010] sm:$0xff] %v3761_v5  ;;  %v3767_v17 = vadd.f32 1.0, %v1719_v14  ;;  %v1721_v19 = vld [vmem:[%s6760_s12 + $0x3050] sm:$0xff]  ;;  %v1722_v20 = vld [vmem:[%s6760_s12 + $0x3058] sm:$0xff]  ;;  %5810 = vst [vmem:[%s6775_s17 + $0x3018] sm:$0xff] %v3762_v9  ;;  %v3768_v21 = vadd.f32 1.0, %v1720_v18 }
 0x34b   : > { %5811 = vst [vmem:[%s6775_s17 + $0x3020] sm:$0xff] %v3763_v10  ;;  %5812 = vst [vmem:[%s6775_s17 + $0x3028] sm:$0xff] %v3764_v11  ;;  %v3769_v22 = vadd.f32 1.0, %v1721_v19  ;;  %v3770_v23 = vadd.f32 1.0, %v1722_v20  ;;  %v1723_v24 = vld [vmem:[%s6760_s12 + $0x3060] sm:$0xff]  ;;  %v1724_v25 = vld [vmem:[%s6760_s12 + $0x3068] sm:$0xff] }
 0x34c   : > { %v1725_v26 = vld [vmem:[%s6760_s12 + $0x3070] sm:$0xff]  ;;  %5813 = vst [vmem:[%s6775_s17 + $0x3030] sm:$0xff] %v3765_v15  ;;  %5814 = vst [vmem:[%s6775_s17 + $0x3038] sm:$0xff] %v3766_v16  ;;  %v3771_v27 = vadd.f32 1.0, %v1723_v24  ;;  %v3772_v28 = vadd.f32 1.0, %v1724_v25  ;;  %v1726_v30 = vld [vmem:[%s6760_s12 + $0x3078] sm:$0xff] }
 0x34d   : > { %5815 = vst [vmem:[%s6775_s17 + $0x3040] sm:$0xff] %v3767_v17  ;;  %v3773_v29 = vadd.f32 1.0, %v1725_v26  ;;  %v1727_v31 = vld [vmem:[%s6760_s12 + $0x3080] sm:$0xff]  ;;  %v1728_v32 = vld [vmem:[%s6760_s12 + $0x3088] sm:$0xff]  ;;  %5816 = vst [vmem:[%s6775_s17 + $0x3048] sm:$0xff] %v3768_v21  ;;  %v3774_v33 = vadd.f32 1.0, %v1726_v30 }
 0x34e   : > { %5817 = vst [vmem:[%s6775_s17 + $0x3050] sm:$0xff] %v3769_v22  ;;  %5818 = vst [vmem:[%s6775_s17 + $0x3058] sm:$0xff] %v3770_v23  ;;  %v3775_v34 = vadd.f32 1.0, %v1727_v31  ;;  %v3776_v35 = vadd.f32 1.0, %v1728_v32  ;;  %v1729_v36 = vld [vmem:[%s6760_s12 + $0x3090] sm:$0xff]  ;;  %v1730_v37 = vld [vmem:[%s6760_s12 + $0x3098] sm:$0xff] }
 0x34f   : > { %v1731_v38 = vld [vmem:[%s6760_s12 + $0x30a0] sm:$0xff]  ;;  %5819 = vst [vmem:[%s6775_s17 + $0x3060] sm:$0xff] %v3771_v27  ;;  %5820 = vst [vmem:[%s6775_s17 + $0x3068] sm:$0xff] %v3772_v28  ;;  %v3777_v39 = vadd.f32 1.0, %v1729_v36  ;;  %v3778_v40 = vadd.f32 1.0, %v1730_v37  ;;  %v1732_v42 = vld [vmem:[%s6760_s12 + $0x30a8] sm:$0xff] }
 0x350   : > { %5821 = vst [vmem:[%s6775_s17 + $0x3070] sm:$0xff] %v3773_v29  ;;  %v3779_v41 = vadd.f32 1.0, %v1731_v38  ;;  %v1733_v43 = vld [vmem:[%s6760_s12 + $0x30b0] sm:$0xff]  ;;  %v1734_v44 = vld [vmem:[%s6760_s12 + $0x30b8] sm:$0xff]  ;;  %5822 = vst [vmem:[%s6775_s17 + $0x3078] sm:$0xff] %v3774_v33  ;;  %v3780_v45 = vadd.f32 1.0, %v1732_v42 }
 0x351   : > { %5823 = vst [vmem:[%s6775_s17 + $0x3080] sm:$0xff] %v3775_v34  ;;  %5824 = vst [vmem:[%s6775_s17 + $0x3088] sm:$0xff] %v3776_v35  ;;  %v3781_v46 = vadd.f32 1.0, %v1733_v43  ;;  %v3782_v47 = vadd.f32 1.0, %v1734_v44  ;;  %v1735_v48 = vld [vmem:[%s6760_s12 + $0x30c0] sm:$0xff]  ;;  %v1736_v49 = vld [vmem:[%s6760_s12 + $0x30c8] sm:$0xff] }
 0x352   : > { %v1737_v50 = vld [vmem:[%s6760_s12 + $0x30d0] sm:$0xff]  ;;  %5825 = vst [vmem:[%s6775_s17 + $0x3090] sm:$0xff] %v3777_v39  ;;  %5826 = vst [vmem:[%s6775_s17 + $0x3098] sm:$0xff] %v3778_v40  ;;  %v3783_v51 = vadd.f32 1.0, %v1735_v48  ;;  %v3784_v52 = vadd.f32 1.0, %v1736_v49  ;;  %v1738_v54 = vld [vmem:[%s6760_s12 + $0x30d8] sm:$0xff] }
 0x353   : > { %5827 = vst [vmem:[%s6775_s17 + $0x30a0] sm:$0xff] %v3779_v41  ;;  %v3785_v53 = vadd.f32 1.0, %v1737_v50  ;;  %v1739_v55 = vld [vmem:[%s6760_s12 + $0x30e0] sm:$0xff]  ;;  %v1740_v56 = vld [vmem:[%s6760_s12 + $0x30e8] sm:$0xff]  ;;  %5828 = vst [vmem:[%s6775_s17 + $0x30a8] sm:$0xff] %v3780_v45  ;;  %v3786_v57 = vadd.f32 1.0, %v1738_v54 }
 0x354   : > { %5829 = vst [vmem:[%s6775_s17 + $0x30b0] sm:$0xff] %v3781_v46  ;;  %5830 = vst [vmem:[%s6775_s17 + $0x30b8] sm:$0xff] %v3782_v47  ;;  %v3787_v58 = vadd.f32 1.0, %v1739_v55  ;;  %v3788_v59 = vadd.f32 1.0, %v1740_v56  ;;  %v1741_v60 = vld [vmem:[%s6760_s12 + $0x30f0] sm:$0xff]  ;;  %v1742_v61 = vld [vmem:[%s6760_s12 + $0x30f8] sm:$0xff] }
 0x355   : > { %v1743_v62 = vld [vmem:[%s6760_s12 + $0x3100] sm:$0xff]  ;;  %5831 = vst [vmem:[%s6775_s17 + $0x30c0] sm:$0xff] %v3783_v51  ;;  %5832 = vst [vmem:[%s6775_s17 + $0x30c8] sm:$0xff] %v3784_v52  ;;  %v3789_v63 = vadd.f32 1.0, %v1741_v60  ;;  %v3790_v0 = vadd.f32 1.0, %v1742_v61  ;;  %v1744_v2 = vld [vmem:[%s6760_s12 + $0x3108] sm:$0xff] }
 0x356   : > { %5833 = vst [vmem:[%s6775_s17 + $0x30d0] sm:$0xff] %v3785_v53  ;;  %v3791_v1 = vadd.f32 1.0, %v1743_v62  ;;  %v1745_v3 = vld [vmem:[%s6760_s12 + $0x3110] sm:$0xff]  ;;  %v1746_v4 = vld [vmem:[%s6760_s12 + $0x3118] sm:$0xff]  ;;  %5834 = vst [vmem:[%s6775_s17 + $0x30d8] sm:$0xff] %v3786_v57  ;;  %v3792_v5 = vadd.f32 1.0, %v1744_v2 }
 0x357   : > { %5835 = vst [vmem:[%s6775_s17 + $0x30e0] sm:$0xff] %v3787_v58  ;;  %5836 = vst [vmem:[%s6775_s17 + $0x30e8] sm:$0xff] %v3788_v59  ;;  %v3793_v6 = vadd.f32 1.0, %v1745_v3  ;;  %v3794_v7 = vadd.f32 1.0, %v1746_v4  ;;  %v1747_v8 = vld [vmem:[%s6760_s12 + $0x3120] sm:$0xff]  ;;  %v1748_v9 = vld [vmem:[%s6760_s12 + $0x3128] sm:$0xff] }
 0x358   : > { %v1749_v10 = vld [vmem:[%s6760_s12 + $0x3130] sm:$0xff]  ;;  %5837 = vst [vmem:[%s6775_s17 + $0x30f0] sm:$0xff] %v3789_v63  ;;  %5838 = vst [vmem:[%s6775_s17 + $0x30f8] sm:$0xff] %v3790_v0  ;;  %v3795_v11 = vadd.f32 1.0, %v1747_v8  ;;  %v3796_v12 = vadd.f32 1.0, %v1748_v9  ;;  %v1750_v14 = vld [vmem:[%s6760_s12 + $0x3138] sm:$0xff] }
 0x359   : > { %5839 = vst [vmem:[%s6775_s17 + $0x3100] sm:$0xff] %v3791_v1  ;;  %v3797_v13 = vadd.f32 1.0, %v1749_v10  ;;  %v1751_v15 = vld [vmem:[%s6760_s12 + $0x3140] sm:$0xff]  ;;  %v1752_v16 = vld [vmem:[%s6760_s12 + $0x3148] sm:$0xff]  ;;  %5840 = vst [vmem:[%s6775_s17 + $0x3108] sm:$0xff] %v3792_v5  ;;  %v3798_v17 = vadd.f32 1.0, %v1750_v14 }
 0x35a   : > { %5841 = vst [vmem:[%s6775_s17 + $0x3110] sm:$0xff] %v3793_v6  ;;  %5842 = vst [vmem:[%s6775_s17 + $0x3118] sm:$0xff] %v3794_v7  ;;  %v3799_v18 = vadd.f32 1.0, %v1751_v15  ;;  %v3800_v19 = vadd.f32 1.0, %v1752_v16  ;;  %v1753_v20 = vld [vmem:[%s6760_s12 + $0x3150] sm:$0xff]  ;;  %v1754_v21 = vld [vmem:[%s6760_s12 + $0x3158] sm:$0xff] }
 0x35b   : > { %v1755_v22 = vld [vmem:[%s6760_s12 + $0x3160] sm:$0xff]  ;;  %5843 = vst [vmem:[%s6775_s17 + $0x3120] sm:$0xff] %v3795_v11  ;;  %5844 = vst [vmem:[%s6775_s17 + $0x3128] sm:$0xff] %v3796_v12  ;;  %v3801_v23 = vadd.f32 1.0, %v1753_v20  ;;  %v3802_v24 = vadd.f32 1.0, %v1754_v21  ;;  %v1756_v26 = vld [vmem:[%s6760_s12 + $0x3168] sm:$0xff] }
 0x35c   : > { %5845 = vst [vmem:[%s6775_s17 + $0x3130] sm:$0xff] %v3797_v13  ;;  %v3803_v25 = vadd.f32 1.0, %v1755_v22  ;;  %v1757_v27 = vld [vmem:[%s6760_s12 + $0x3170] sm:$0xff]  ;;  %v1758_v28 = vld [vmem:[%s6760_s12 + $0x3178] sm:$0xff]  ;;  %5846 = vst [vmem:[%s6775_s17 + $0x3138] sm:$0xff] %v3798_v17  ;;  %v3804_v29 = vadd.f32 1.0, %v1756_v26 }
 0x35d   : > { %5847 = vst [vmem:[%s6775_s17 + $0x3140] sm:$0xff] %v3799_v18  ;;  %5848 = vst [vmem:[%s6775_s17 + $0x3148] sm:$0xff] %v3800_v19  ;;  %v3805_v30 = vadd.f32 1.0, %v1757_v27  ;;  %v3806_v31 = vadd.f32 1.0, %v1758_v28  ;;  %v1759_v32 = vld [vmem:[%s6760_s12 + $0x3180] sm:$0xff]  ;;  %v1760_v33 = vld [vmem:[%s6760_s12 + $0x3188] sm:$0xff] }
 0x35e   : > { %v1761_v34 = vld [vmem:[%s6760_s12 + $0x3190] sm:$0xff]  ;;  %5849 = vst [vmem:[%s6775_s17 + $0x3150] sm:$0xff] %v3801_v23  ;;  %5850 = vst [vmem:[%s6775_s17 + $0x3158] sm:$0xff] %v3802_v24  ;;  %v3807_v35 = vadd.f32 1.0, %v1759_v32  ;;  %v3808_v36 = vadd.f32 1.0, %v1760_v33  ;;  %v1762_v38 = vld [vmem:[%s6760_s12 + $0x3198] sm:$0xff] }
 0x35f   : > { %5851 = vst [vmem:[%s6775_s17 + $0x3160] sm:$0xff] %v3803_v25  ;;  %v3809_v37 = vadd.f32 1.0, %v1761_v34  ;;  %v1763_v39 = vld [vmem:[%s6760_s12 + $0x31a0] sm:$0xff]  ;;  %v1764_v40 = vld [vmem:[%s6760_s12 + $0x31a8] sm:$0xff]  ;;  %5852 = vst [vmem:[%s6775_s17 + $0x3168] sm:$0xff] %v3804_v29  ;;  %v3810_v41 = vadd.f32 1.0, %v1762_v38 }
 0x360   : > { %5853 = vst [vmem:[%s6775_s17 + $0x3170] sm:$0xff] %v3805_v30  ;;  %5854 = vst [vmem:[%s6775_s17 + $0x3178] sm:$0xff] %v3806_v31  ;;  %v3811_v42 = vadd.f32 1.0, %v1763_v39  ;;  %v3812_v43 = vadd.f32 1.0, %v1764_v40  ;;  %v1765_v44 = vld [vmem:[%s6760_s12 + $0x31b0] sm:$0xff]  ;;  %v1766_v45 = vld [vmem:[%s6760_s12 + $0x31b8] sm:$0xff] }
 0x361   : > { %v1767_v46 = vld [vmem:[%s6760_s12 + $0x31c0] sm:$0xff]  ;;  %5855 = vst [vmem:[%s6775_s17 + $0x3180] sm:$0xff] %v3807_v35  ;;  %5856 = vst [vmem:[%s6775_s17 + $0x3188] sm:$0xff] %v3808_v36  ;;  %v3813_v47 = vadd.f32 1.0, %v1765_v44  ;;  %v3814_v48 = vadd.f32 1.0, %v1766_v45  ;;  %v1768_v50 = vld [vmem:[%s6760_s12 + $0x31c8] sm:$0xff] }
 0x362   : > { %5857 = vst [vmem:[%s6775_s17 + $0x3190] sm:$0xff] %v3809_v37  ;;  %v3815_v49 = vadd.f32 1.0, %v1767_v46  ;;  %v1769_v51 = vld [vmem:[%s6760_s12 + $0x31d0] sm:$0xff]  ;;  %v1770_v52 = vld [vmem:[%s6760_s12 + $0x31d8] sm:$0xff]  ;;  %5858 = vst [vmem:[%s6775_s17 + $0x3198] sm:$0xff] %v3810_v41  ;;  %v3816_v53 = vadd.f32 1.0, %v1768_v50 }
 0x363   : > { %5859 = vst [vmem:[%s6775_s17 + $0x31a0] sm:$0xff] %v3811_v42  ;;  %5860 = vst [vmem:[%s6775_s17 + $0x31a8] sm:$0xff] %v3812_v43  ;;  %v3817_v54 = vadd.f32 1.0, %v1769_v51  ;;  %v3818_v55 = vadd.f32 1.0, %v1770_v52  ;;  %v1771_v56 = vld [vmem:[%s6760_s12 + $0x31e0] sm:$0xff]  ;;  %v1772_v57 = vld [vmem:[%s6760_s12 + $0x31e8] sm:$0xff] }
 0x364   : > { %v1773_v58 = vld [vmem:[%s6760_s12 + $0x31f0] sm:$0xff]  ;;  %5861 = vst [vmem:[%s6775_s17 + $0x31b0] sm:$0xff] %v3813_v47  ;;  %5862 = vst [vmem:[%s6775_s17 + $0x31b8] sm:$0xff] %v3814_v48  ;;  %v3819_v59 = vadd.f32 1.0, %v1771_v56  ;;  %v3820_v60 = vadd.f32 1.0, %v1772_v57  ;;  %v1774_v62 = vld [vmem:[%s6760_s12 + $0x31f8] sm:$0xff] }
 0x365   : > { %5863 = vst [vmem:[%s6775_s17 + $0x31c0] sm:$0xff] %v3815_v49  ;;  %v3821_v61 = vadd.f32 1.0, %v1773_v58  ;;  %v1775_v63 = vld [vmem:[%s6760_s12 + $0x3200] sm:$0xff]  ;;  %v1776_v0 = vld [vmem:[%s6760_s12 + $0x3208] sm:$0xff]  ;;  %5864 = vst [vmem:[%s6775_s17 + $0x31c8] sm:$0xff] %v3816_v53  ;;  %v3822_v1 = vadd.f32 1.0, %v1774_v62 }
 0x366   : > { %5865 = vst [vmem:[%s6775_s17 + $0x31d0] sm:$0xff] %v3817_v54  ;;  %5866 = vst [vmem:[%s6775_s17 + $0x31d8] sm:$0xff] %v3818_v55  ;;  %v3823_v2 = vadd.f32 1.0, %v1775_v63  ;;  %v3824_v3 = vadd.f32 1.0, %v1776_v0  ;;  %v1777_v4 = vld [vmem:[%s6760_s12 + $0x3210] sm:$0xff]  ;;  %v1778_v5 = vld [vmem:[%s6760_s12 + $0x3218] sm:$0xff] }
 0x367   : > { %v1779_v6 = vld [vmem:[%s6760_s12 + $0x3220] sm:$0xff]  ;;  %5867 = vst [vmem:[%s6775_s17 + $0x31e0] sm:$0xff] %v3819_v59  ;;  %5868 = vst [vmem:[%s6775_s17 + $0x31e8] sm:$0xff] %v3820_v60  ;;  %v3825_v7 = vadd.f32 1.0, %v1777_v4  ;;  %v3826_v8 = vadd.f32 1.0, %v1778_v5  ;;  %v1780_v10 = vld [vmem:[%s6760_s12 + $0x3228] sm:$0xff] }
 0x368   : > { %5869 = vst [vmem:[%s6775_s17 + $0x31f0] sm:$0xff] %v3821_v61  ;;  %v3827_v9 = vadd.f32 1.0, %v1779_v6  ;;  %v1781_v11 = vld [vmem:[%s6760_s12 + $0x3230] sm:$0xff]  ;;  %v1782_v12 = vld [vmem:[%s6760_s12 + $0x3238] sm:$0xff]  ;;  %5870 = vst [vmem:[%s6775_s17 + $0x31f8] sm:$0xff] %v3822_v1  ;;  %v3828_v13 = vadd.f32 1.0, %v1780_v10 }
 0x369   : > { %5871 = vst [vmem:[%s6775_s17 + $0x3200] sm:$0xff] %v3823_v2  ;;  %5872 = vst [vmem:[%s6775_s17 + $0x3208] sm:$0xff] %v3824_v3  ;;  %v3829_v14 = vadd.f32 1.0, %v1781_v11  ;;  %v3830_v15 = vadd.f32 1.0, %v1782_v12  ;;  %v1783_v16 = vld [vmem:[%s6760_s12 + $0x3240] sm:$0xff]  ;;  %v1784_v17 = vld [vmem:[%s6760_s12 + $0x3248] sm:$0xff] }
 0x36a   : > { %v1785_v18 = vld [vmem:[%s6760_s12 + $0x3250] sm:$0xff]  ;;  %5873 = vst [vmem:[%s6775_s17 + $0x3210] sm:$0xff] %v3825_v7  ;;  %5874 = vst [vmem:[%s6775_s17 + $0x3218] sm:$0xff] %v3826_v8  ;;  %v3831_v19 = vadd.f32 1.0, %v1783_v16  ;;  %v3832_v20 = vadd.f32 1.0, %v1784_v17  ;;  %v1786_v22 = vld [vmem:[%s6760_s12 + $0x3258] sm:$0xff] }
 0x36b   : > { %5875 = vst [vmem:[%s6775_s17 + $0x3220] sm:$0xff] %v3827_v9  ;;  %v3833_v21 = vadd.f32 1.0, %v1785_v18  ;;  %v1787_v23 = vld [vmem:[%s6760_s12 + $0x3260] sm:$0xff]  ;;  %v1788_v24 = vld [vmem:[%s6760_s12 + $0x3268] sm:$0xff]  ;;  %5876 = vst [vmem:[%s6775_s17 + $0x3228] sm:$0xff] %v3828_v13  ;;  %v3834_v25 = vadd.f32 1.0, %v1786_v22 }
 0x36c   : > { %5877 = vst [vmem:[%s6775_s17 + $0x3230] sm:$0xff] %v3829_v14  ;;  %5878 = vst [vmem:[%s6775_s17 + $0x3238] sm:$0xff] %v3830_v15  ;;  %v3835_v26 = vadd.f32 1.0, %v1787_v23  ;;  %v3836_v27 = vadd.f32 1.0, %v1788_v24  ;;  %v1789_v28 = vld [vmem:[%s6760_s12 + $0x3270] sm:$0xff]  ;;  %v1790_v29 = vld [vmem:[%s6760_s12 + $0x3278] sm:$0xff] }
 0x36d   : > { %v1791_v30 = vld [vmem:[%s6760_s12 + $0x3280] sm:$0xff]  ;;  %5879 = vst [vmem:[%s6775_s17 + $0x3240] sm:$0xff] %v3831_v19  ;;  %5880 = vst [vmem:[%s6775_s17 + $0x3248] sm:$0xff] %v3832_v20  ;;  %v3837_v31 = vadd.f32 1.0, %v1789_v28  ;;  %v3838_v32 = vadd.f32 1.0, %v1790_v29  ;;  %v1792_v34 = vld [vmem:[%s6760_s12 + $0x3288] sm:$0xff] }
 0x36e   : > { %5881 = vst [vmem:[%s6775_s17 + $0x3250] sm:$0xff] %v3833_v21  ;;  %v3839_v33 = vadd.f32 1.0, %v1791_v30  ;;  %v1793_v35 = vld [vmem:[%s6760_s12 + $0x3290] sm:$0xff]  ;;  %v1794_v36 = vld [vmem:[%s6760_s12 + $0x3298] sm:$0xff]  ;;  %5882 = vst [vmem:[%s6775_s17 + $0x3258] sm:$0xff] %v3834_v25  ;;  %v3840_v37 = vadd.f32 1.0, %v1792_v34 }
 0x36f   : > { %5883 = vst [vmem:[%s6775_s17 + $0x3260] sm:$0xff] %v3835_v26  ;;  %5884 = vst [vmem:[%s6775_s17 + $0x3268] sm:$0xff] %v3836_v27  ;;  %v3841_v38 = vadd.f32 1.0, %v1793_v35  ;;  %v3842_v39 = vadd.f32 1.0, %v1794_v36  ;;  %v1795_v40 = vld [vmem:[%s6760_s12 + $0x32a0] sm:$0xff]  ;;  %v1796_v41 = vld [vmem:[%s6760_s12 + $0x32a8] sm:$0xff] }
 0x370   : > { %v1797_v42 = vld [vmem:[%s6760_s12 + $0x32b0] sm:$0xff]  ;;  %5885 = vst [vmem:[%s6775_s17 + $0x3270] sm:$0xff] %v3837_v31  ;;  %5886 = vst [vmem:[%s6775_s17 + $0x3278] sm:$0xff] %v3838_v32  ;;  %v3843_v43 = vadd.f32 1.0, %v1795_v40  ;;  %v3844_v44 = vadd.f32 1.0, %v1796_v41  ;;  %v1798_v46 = vld [vmem:[%s6760_s12 + $0x32b8] sm:$0xff] }
 0x371   : > { %5887 = vst [vmem:[%s6775_s17 + $0x3280] sm:$0xff] %v3839_v33  ;;  %v3845_v45 = vadd.f32 1.0, %v1797_v42  ;;  %v1799_v47 = vld [vmem:[%s6760_s12 + $0x32c0] sm:$0xff]  ;;  %v1800_v48 = vld [vmem:[%s6760_s12 + $0x32c8] sm:$0xff]  ;;  %5888 = vst [vmem:[%s6775_s17 + $0x3288] sm:$0xff] %v3840_v37  ;;  %v3846_v49 = vadd.f32 1.0, %v1798_v46 }
 0x372   : > { %5889 = vst [vmem:[%s6775_s17 + $0x3290] sm:$0xff] %v3841_v38  ;;  %5890 = vst [vmem:[%s6775_s17 + $0x3298] sm:$0xff] %v3842_v39  ;;  %v3847_v50 = vadd.f32 1.0, %v1799_v47  ;;  %v3848_v51 = vadd.f32 1.0, %v1800_v48  ;;  %v1801_v52 = vld [vmem:[%s6760_s12 + $0x32d0] sm:$0xff]  ;;  %v1802_v53 = vld [vmem:[%s6760_s12 + $0x32d8] sm:$0xff] }
 0x373   : > { %v1803_v54 = vld [vmem:[%s6760_s12 + $0x32e0] sm:$0xff]  ;;  %5891 = vst [vmem:[%s6775_s17 + $0x32a0] sm:$0xff] %v3843_v43  ;;  %5892 = vst [vmem:[%s6775_s17 + $0x32a8] sm:$0xff] %v3844_v44  ;;  %v3849_v55 = vadd.f32 1.0, %v1801_v52  ;;  %v3850_v56 = vadd.f32 1.0, %v1802_v53  ;;  %v1804_v58 = vld [vmem:[%s6760_s12 + $0x32e8] sm:$0xff] }
 0x374   : > { %5893 = vst [vmem:[%s6775_s17 + $0x32b0] sm:$0xff] %v3845_v45  ;;  %v3851_v57 = vadd.f32 1.0, %v1803_v54  ;;  %v1805_v59 = vld [vmem:[%s6760_s12 + $0x32f0] sm:$0xff]  ;;  %v1806_v60 = vld [vmem:[%s6760_s12 + $0x32f8] sm:$0xff]  ;;  %5894 = vst [vmem:[%s6775_s17 + $0x32b8] sm:$0xff] %v3846_v49  ;;  %v3852_v61 = vadd.f32 1.0, %v1804_v58 }
 0x375   : > { %5895 = vst [vmem:[%s6775_s17 + $0x32c0] sm:$0xff] %v3847_v50  ;;  %5896 = vst [vmem:[%s6775_s17 + $0x32c8] sm:$0xff] %v3848_v51  ;;  %v3853_v62 = vadd.f32 1.0, %v1805_v59  ;;  %v3854_v63 = vadd.f32 1.0, %v1806_v60  ;;  %v1807_v0 = vld [vmem:[%s6760_s12 + $0x3300] sm:$0xff]  ;;  %v1808_v1 = vld [vmem:[%s6760_s12 + $0x3308] sm:$0xff] }
 0x376   : > { %v1809_v2 = vld [vmem:[%s6760_s12 + $0x3310] sm:$0xff]  ;;  %5897 = vst [vmem:[%s6775_s17 + $0x32d0] sm:$0xff] %v3849_v55  ;;  %5898 = vst [vmem:[%s6775_s17 + $0x32d8] sm:$0xff] %v3850_v56  ;;  %v3855_v3 = vadd.f32 1.0, %v1807_v0  ;;  %v3856_v4 = vadd.f32 1.0, %v1808_v1  ;;  %v1810_v6 = vld [vmem:[%s6760_s12 + $0x3318] sm:$0xff] }
 0x377   : > { %5899 = vst [vmem:[%s6775_s17 + $0x32e0] sm:$0xff] %v3851_v57  ;;  %v3857_v5 = vadd.f32 1.0, %v1809_v2  ;;  %v1811_v7 = vld [vmem:[%s6760_s12 + $0x3320] sm:$0xff]  ;;  %v1812_v8 = vld [vmem:[%s6760_s12 + $0x3328] sm:$0xff]  ;;  %5900 = vst [vmem:[%s6775_s17 + $0x32e8] sm:$0xff] %v3852_v61  ;;  %v3858_v9 = vadd.f32 1.0, %v1810_v6 }
 0x378   : > { %5901 = vst [vmem:[%s6775_s17 + $0x32f0] sm:$0xff] %v3853_v62  ;;  %5902 = vst [vmem:[%s6775_s17 + $0x32f8] sm:$0xff] %v3854_v63  ;;  %v3859_v10 = vadd.f32 1.0, %v1811_v7  ;;  %v3860_v11 = vadd.f32 1.0, %v1812_v8  ;;  %v1813_v12 = vld [vmem:[%s6760_s12 + $0x3330] sm:$0xff]  ;;  %v1814_v13 = vld [vmem:[%s6760_s12 + $0x3338] sm:$0xff] }
 0x379   : > { %v1815_v14 = vld [vmem:[%s6760_s12 + $0x3340] sm:$0xff]  ;;  %5903 = vst [vmem:[%s6775_s17 + $0x3300] sm:$0xff] %v3855_v3  ;;  %5904 = vst [vmem:[%s6775_s17 + $0x3308] sm:$0xff] %v3856_v4  ;;  %v3861_v15 = vadd.f32 1.0, %v1813_v12  ;;  %v3862_v16 = vadd.f32 1.0, %v1814_v13  ;;  %v1816_v18 = vld [vmem:[%s6760_s12 + $0x3348] sm:$0xff] }
 0x37a   : > { %5905 = vst [vmem:[%s6775_s17 + $0x3310] sm:$0xff] %v3857_v5  ;;  %v3863_v17 = vadd.f32 1.0, %v1815_v14  ;;  %v1817_v19 = vld [vmem:[%s6760_s12 + $0x3350] sm:$0xff]  ;;  %v1818_v20 = vld [vmem:[%s6760_s12 + $0x3358] sm:$0xff]  ;;  %5906 = vst [vmem:[%s6775_s17 + $0x3318] sm:$0xff] %v3858_v9  ;;  %v3864_v21 = vadd.f32 1.0, %v1816_v18 }
 0x37b   : > { %5907 = vst [vmem:[%s6775_s17 + $0x3320] sm:$0xff] %v3859_v10  ;;  %5908 = vst [vmem:[%s6775_s17 + $0x3328] sm:$0xff] %v3860_v11  ;;  %v3865_v22 = vadd.f32 1.0, %v1817_v19  ;;  %v3866_v23 = vadd.f32 1.0, %v1818_v20  ;;  %v1819_v24 = vld [vmem:[%s6760_s12 + $0x3360] sm:$0xff]  ;;  %v1820_v25 = vld [vmem:[%s6760_s12 + $0x3368] sm:$0xff] }
 0x37c   : > { %v1821_v26 = vld [vmem:[%s6760_s12 + $0x3370] sm:$0xff]  ;;  %5909 = vst [vmem:[%s6775_s17 + $0x3330] sm:$0xff] %v3861_v15  ;;  %5910 = vst [vmem:[%s6775_s17 + $0x3338] sm:$0xff] %v3862_v16  ;;  %v3867_v27 = vadd.f32 1.0, %v1819_v24  ;;  %v3868_v28 = vadd.f32 1.0, %v1820_v25  ;;  %v1822_v30 = vld [vmem:[%s6760_s12 + $0x3378] sm:$0xff] }
 0x37d   : > { %5911 = vst [vmem:[%s6775_s17 + $0x3340] sm:$0xff] %v3863_v17  ;;  %v3869_v29 = vadd.f32 1.0, %v1821_v26  ;;  %v1823_v31 = vld [vmem:[%s6760_s12 + $0x3380] sm:$0xff]  ;;  %v1824_v32 = vld [vmem:[%s6760_s12 + $0x3388] sm:$0xff]  ;;  %5912 = vst [vmem:[%s6775_s17 + $0x3348] sm:$0xff] %v3864_v21  ;;  %v3870_v33 = vadd.f32 1.0, %v1822_v30 }
 0x37e   : > { %5913 = vst [vmem:[%s6775_s17 + $0x3350] sm:$0xff] %v3865_v22  ;;  %5914 = vst [vmem:[%s6775_s17 + $0x3358] sm:$0xff] %v3866_v23  ;;  %v3871_v34 = vadd.f32 1.0, %v1823_v31  ;;  %v3872_v35 = vadd.f32 1.0, %v1824_v32  ;;  %v1825_v36 = vld [vmem:[%s6760_s12 + $0x3390] sm:$0xff]  ;;  %v1826_v37 = vld [vmem:[%s6760_s12 + $0x3398] sm:$0xff] }
 0x37f   : > { %v1827_v38 = vld [vmem:[%s6760_s12 + $0x33a0] sm:$0xff]  ;;  %5915 = vst [vmem:[%s6775_s17 + $0x3360] sm:$0xff] %v3867_v27  ;;  %5916 = vst [vmem:[%s6775_s17 + $0x3368] sm:$0xff] %v3868_v28  ;;  %v3873_v39 = vadd.f32 1.0, %v1825_v36  ;;  %v3874_v40 = vadd.f32 1.0, %v1826_v37  ;;  %v1828_v42 = vld [vmem:[%s6760_s12 + $0x33a8] sm:$0xff] }
 0x380   : > { %5917 = vst [vmem:[%s6775_s17 + $0x3370] sm:$0xff] %v3869_v29  ;;  %v3875_v41 = vadd.f32 1.0, %v1827_v38  ;;  %v1829_v43 = vld [vmem:[%s6760_s12 + $0x33b0] sm:$0xff]  ;;  %v1830_v44 = vld [vmem:[%s6760_s12 + $0x33b8] sm:$0xff]  ;;  %5918 = vst [vmem:[%s6775_s17 + $0x3378] sm:$0xff] %v3870_v33  ;;  %v3876_v45 = vadd.f32 1.0, %v1828_v42 }
 0x381   : > { %5919 = vst [vmem:[%s6775_s17 + $0x3380] sm:$0xff] %v3871_v34  ;;  %5920 = vst [vmem:[%s6775_s17 + $0x3388] sm:$0xff] %v3872_v35  ;;  %v3877_v46 = vadd.f32 1.0, %v1829_v43  ;;  %v3878_v47 = vadd.f32 1.0, %v1830_v44  ;;  %v1831_v48 = vld [vmem:[%s6760_s12 + $0x33c0] sm:$0xff]  ;;  %v1832_v49 = vld [vmem:[%s6760_s12 + $0x33c8] sm:$0xff] }
 0x382   : > { %v1833_v50 = vld [vmem:[%s6760_s12 + $0x33d0] sm:$0xff]  ;;  %5921 = vst [vmem:[%s6775_s17 + $0x3390] sm:$0xff] %v3873_v39  ;;  %5922 = vst [vmem:[%s6775_s17 + $0x3398] sm:$0xff] %v3874_v40  ;;  %v3879_v51 = vadd.f32 1.0, %v1831_v48  ;;  %v3880_v52 = vadd.f32 1.0, %v1832_v49  ;;  %v1834_v54 = vld [vmem:[%s6760_s12 + $0x33d8] sm:$0xff] }
 0x383   : > { %5923 = vst [vmem:[%s6775_s17 + $0x33a0] sm:$0xff] %v3875_v41  ;;  %v3881_v53 = vadd.f32 1.0, %v1833_v50  ;;  %v1835_v55 = vld [vmem:[%s6760_s12 + $0x33e0] sm:$0xff]  ;;  %v1836_v56 = vld [vmem:[%s6760_s12 + $0x33e8] sm:$0xff]  ;;  %5924 = vst [vmem:[%s6775_s17 + $0x33a8] sm:$0xff] %v3876_v45  ;;  %v3882_v57 = vadd.f32 1.0, %v1834_v54 }
 0x384   : > { %5925 = vst [vmem:[%s6775_s17 + $0x33b0] sm:$0xff] %v3877_v46  ;;  %5926 = vst [vmem:[%s6775_s17 + $0x33b8] sm:$0xff] %v3878_v47  ;;  %v3883_v58 = vadd.f32 1.0, %v1835_v55  ;;  %v3884_v59 = vadd.f32 1.0, %v1836_v56  ;;  %v1837_v60 = vld [vmem:[%s6760_s12 + $0x33f0] sm:$0xff]  ;;  %v1838_v61 = vld [vmem:[%s6760_s12 + $0x33f8] sm:$0xff] }
 0x385   : > { %v1839_v62 = vld [vmem:[%s6760_s12 + $0x3400] sm:$0xff]  ;;  %5927 = vst [vmem:[%s6775_s17 + $0x33c0] sm:$0xff] %v3879_v51  ;;  %5928 = vst [vmem:[%s6775_s17 + $0x33c8] sm:$0xff] %v3880_v52  ;;  %v3885_v63 = vadd.f32 1.0, %v1837_v60  ;;  %v3886_v0 = vadd.f32 1.0, %v1838_v61  ;;  %v1840_v2 = vld [vmem:[%s6760_s12 + $0x3408] sm:$0xff] }
 0x386   : > { %5929 = vst [vmem:[%s6775_s17 + $0x33d0] sm:$0xff] %v3881_v53  ;;  %v3887_v1 = vadd.f32 1.0, %v1839_v62  ;;  %v1841_v3 = vld [vmem:[%s6760_s12 + $0x3410] sm:$0xff]  ;;  %v1842_v4 = vld [vmem:[%s6760_s12 + $0x3418] sm:$0xff]  ;;  %5930 = vst [vmem:[%s6775_s17 + $0x33d8] sm:$0xff] %v3882_v57  ;;  %v3888_v5 = vadd.f32 1.0, %v1840_v2 }
 0x387   : > { %5931 = vst [vmem:[%s6775_s17 + $0x33e0] sm:$0xff] %v3883_v58  ;;  %5932 = vst [vmem:[%s6775_s17 + $0x33e8] sm:$0xff] %v3884_v59  ;;  %v3889_v6 = vadd.f32 1.0, %v1841_v3  ;;  %v3890_v7 = vadd.f32 1.0, %v1842_v4  ;;  %v1843_v8 = vld [vmem:[%s6760_s12 + $0x3420] sm:$0xff]  ;;  %v1844_v9 = vld [vmem:[%s6760_s12 + $0x3428] sm:$0xff] }
 0x388   : > { %v1845_v10 = vld [vmem:[%s6760_s12 + $0x3430] sm:$0xff]  ;;  %5933 = vst [vmem:[%s6775_s17 + $0x33f0] sm:$0xff] %v3885_v63  ;;  %5934 = vst [vmem:[%s6775_s17 + $0x33f8] sm:$0xff] %v3886_v0  ;;  %v3891_v11 = vadd.f32 1.0, %v1843_v8  ;;  %v3892_v12 = vadd.f32 1.0, %v1844_v9  ;;  %v1846_v14 = vld [vmem:[%s6760_s12 + $0x3438] sm:$0xff] }
 0x389   : > { %5935 = vst [vmem:[%s6775_s17 + $0x3400] sm:$0xff] %v3887_v1  ;;  %v3893_v13 = vadd.f32 1.0, %v1845_v10  ;;  %v1847_v15 = vld [vmem:[%s6760_s12 + $0x3440] sm:$0xff]  ;;  %v1848_v16 = vld [vmem:[%s6760_s12 + $0x3448] sm:$0xff]  ;;  %5936 = vst [vmem:[%s6775_s17 + $0x3408] sm:$0xff] %v3888_v5  ;;  %v3894_v17 = vadd.f32 1.0, %v1846_v14 }
 0x38a   : > { %5937 = vst [vmem:[%s6775_s17 + $0x3410] sm:$0xff] %v3889_v6  ;;  %5938 = vst [vmem:[%s6775_s17 + $0x3418] sm:$0xff] %v3890_v7  ;;  %v3895_v18 = vadd.f32 1.0, %v1847_v15  ;;  %v3896_v19 = vadd.f32 1.0, %v1848_v16  ;;  %v1849_v20 = vld [vmem:[%s6760_s12 + $0x3450] sm:$0xff]  ;;  %v1850_v21 = vld [vmem:[%s6760_s12 + $0x3458] sm:$0xff] }
 0x38b   : > { %v1851_v22 = vld [vmem:[%s6760_s12 + $0x3460] sm:$0xff]  ;;  %5939 = vst [vmem:[%s6775_s17 + $0x3420] sm:$0xff] %v3891_v11  ;;  %5940 = vst [vmem:[%s6775_s17 + $0x3428] sm:$0xff] %v3892_v12  ;;  %v3897_v23 = vadd.f32 1.0, %v1849_v20  ;;  %v3898_v24 = vadd.f32 1.0, %v1850_v21  ;;  %v1852_v26 = vld [vmem:[%s6760_s12 + $0x3468] sm:$0xff] }
 0x38c   : > { %5941 = vst [vmem:[%s6775_s17 + $0x3430] sm:$0xff] %v3893_v13  ;;  %v3899_v25 = vadd.f32 1.0, %v1851_v22  ;;  %v1853_v27 = vld [vmem:[%s6760_s12 + $0x3470] sm:$0xff]  ;;  %v1854_v28 = vld [vmem:[%s6760_s12 + $0x3478] sm:$0xff]  ;;  %5942 = vst [vmem:[%s6775_s17 + $0x3438] sm:$0xff] %v3894_v17  ;;  %v3900_v29 = vadd.f32 1.0, %v1852_v26 }
 0x38d   : > { %5943 = vst [vmem:[%s6775_s17 + $0x3440] sm:$0xff] %v3895_v18  ;;  %5944 = vst [vmem:[%s6775_s17 + $0x3448] sm:$0xff] %v3896_v19  ;;  %v3901_v30 = vadd.f32 1.0, %v1853_v27  ;;  %v3902_v31 = vadd.f32 1.0, %v1854_v28  ;;  %v1855_v32 = vld [vmem:[%s6760_s12 + $0x3480] sm:$0xff]  ;;  %v1856_v33 = vld [vmem:[%s6760_s12 + $0x3488] sm:$0xff] }
 0x38e   : > { %v1857_v34 = vld [vmem:[%s6760_s12 + $0x3490] sm:$0xff]  ;;  %5945 = vst [vmem:[%s6775_s17 + $0x3450] sm:$0xff] %v3897_v23  ;;  %5946 = vst [vmem:[%s6775_s17 + $0x3458] sm:$0xff] %v3898_v24  ;;  %v3903_v35 = vadd.f32 1.0, %v1855_v32  ;;  %v3904_v36 = vadd.f32 1.0, %v1856_v33  ;;  %v1858_v38 = vld [vmem:[%s6760_s12 + $0x3498] sm:$0xff] }
 0x38f   : > { %5947 = vst [vmem:[%s6775_s17 + $0x3460] sm:$0xff] %v3899_v25  ;;  %v3905_v37 = vadd.f32 1.0, %v1857_v34  ;;  %v1859_v39 = vld [vmem:[%s6760_s12 + $0x34a0] sm:$0xff]  ;;  %v1860_v40 = vld [vmem:[%s6760_s12 + $0x34a8] sm:$0xff]  ;;  %5948 = vst [vmem:[%s6775_s17 + $0x3468] sm:$0xff] %v3900_v29  ;;  %v3906_v41 = vadd.f32 1.0, %v1858_v38 }
 0x390   : > { %5949 = vst [vmem:[%s6775_s17 + $0x3470] sm:$0xff] %v3901_v30  ;;  %5950 = vst [vmem:[%s6775_s17 + $0x3478] sm:$0xff] %v3902_v31  ;;  %v3907_v42 = vadd.f32 1.0, %v1859_v39  ;;  %v3908_v43 = vadd.f32 1.0, %v1860_v40  ;;  %v1861_v44 = vld [vmem:[%s6760_s12 + $0x34b0] sm:$0xff]  ;;  %v1862_v45 = vld [vmem:[%s6760_s12 + $0x34b8] sm:$0xff] }
 0x391   : > { %v1863_v46 = vld [vmem:[%s6760_s12 + $0x34c0] sm:$0xff]  ;;  %5951 = vst [vmem:[%s6775_s17 + $0x3480] sm:$0xff] %v3903_v35  ;;  %5952 = vst [vmem:[%s6775_s17 + $0x3488] sm:$0xff] %v3904_v36  ;;  %v3909_v47 = vadd.f32 1.0, %v1861_v44  ;;  %v3910_v48 = vadd.f32 1.0, %v1862_v45  ;;  %v1864_v50 = vld [vmem:[%s6760_s12 + $0x34c8] sm:$0xff] }
 0x392   : > { %5953 = vst [vmem:[%s6775_s17 + $0x3490] sm:$0xff] %v3905_v37  ;;  %v3911_v49 = vadd.f32 1.0, %v1863_v46  ;;  %v1865_v51 = vld [vmem:[%s6760_s12 + $0x34d0] sm:$0xff]  ;;  %v1866_v52 = vld [vmem:[%s6760_s12 + $0x34d8] sm:$0xff]  ;;  %5954 = vst [vmem:[%s6775_s17 + $0x3498] sm:$0xff] %v3906_v41  ;;  %v3912_v53 = vadd.f32 1.0, %v1864_v50 }
 0x393   : > { %5955 = vst [vmem:[%s6775_s17 + $0x34a0] sm:$0xff] %v3907_v42  ;;  %5956 = vst [vmem:[%s6775_s17 + $0x34a8] sm:$0xff] %v3908_v43  ;;  %v3913_v54 = vadd.f32 1.0, %v1865_v51  ;;  %v3914_v55 = vadd.f32 1.0, %v1866_v52  ;;  %v1867_v56 = vld [vmem:[%s6760_s12 + $0x34e0] sm:$0xff]  ;;  %v1868_v57 = vld [vmem:[%s6760_s12 + $0x34e8] sm:$0xff] }
 0x394   : > { %v1869_v58 = vld [vmem:[%s6760_s12 + $0x34f0] sm:$0xff]  ;;  %5957 = vst [vmem:[%s6775_s17 + $0x34b0] sm:$0xff] %v3909_v47  ;;  %5958 = vst [vmem:[%s6775_s17 + $0x34b8] sm:$0xff] %v3910_v48  ;;  %v3915_v59 = vadd.f32 1.0, %v1867_v56  ;;  %v3916_v60 = vadd.f32 1.0, %v1868_v57  ;;  %v1870_v62 = vld [vmem:[%s6760_s12 + $0x34f8] sm:$0xff] }
 0x395   : > { %5959 = vst [vmem:[%s6775_s17 + $0x34c0] sm:$0xff] %v3911_v49  ;;  %v3917_v61 = vadd.f32 1.0, %v1869_v58  ;;  %v1871_v63 = vld [vmem:[%s6760_s12 + $0x3500] sm:$0xff]  ;;  %v1872_v0 = vld [vmem:[%s6760_s12 + $0x3508] sm:$0xff]  ;;  %5960 = vst [vmem:[%s6775_s17 + $0x34c8] sm:$0xff] %v3912_v53  ;;  %v3918_v1 = vadd.f32 1.0, %v1870_v62 }
 0x396   : > { %5961 = vst [vmem:[%s6775_s17 + $0x34d0] sm:$0xff] %v3913_v54  ;;  %5962 = vst [vmem:[%s6775_s17 + $0x34d8] sm:$0xff] %v3914_v55  ;;  %v3919_v2 = vadd.f32 1.0, %v1871_v63  ;;  %v3920_v3 = vadd.f32 1.0, %v1872_v0  ;;  %v1873_v4 = vld [vmem:[%s6760_s12 + $0x3510] sm:$0xff]  ;;  %v1874_v5 = vld [vmem:[%s6760_s12 + $0x3518] sm:$0xff] }
 0x397   : > { %v1875_v6 = vld [vmem:[%s6760_s12 + $0x3520] sm:$0xff]  ;;  %5963 = vst [vmem:[%s6775_s17 + $0x34e0] sm:$0xff] %v3915_v59  ;;  %5964 = vst [vmem:[%s6775_s17 + $0x34e8] sm:$0xff] %v3916_v60  ;;  %v3921_v7 = vadd.f32 1.0, %v1873_v4  ;;  %v3922_v8 = vadd.f32 1.0, %v1874_v5  ;;  %v1876_v10 = vld [vmem:[%s6760_s12 + $0x3528] sm:$0xff] }
 0x398   : > { %5965 = vst [vmem:[%s6775_s17 + $0x34f0] sm:$0xff] %v3917_v61  ;;  %v3923_v9 = vadd.f32 1.0, %v1875_v6  ;;  %v1877_v11 = vld [vmem:[%s6760_s12 + $0x3530] sm:$0xff]  ;;  %v1878_v12 = vld [vmem:[%s6760_s12 + $0x3538] sm:$0xff]  ;;  %5966 = vst [vmem:[%s6775_s17 + $0x34f8] sm:$0xff] %v3918_v1  ;;  %v3924_v13 = vadd.f32 1.0, %v1876_v10 }
 0x399   : > { %5967 = vst [vmem:[%s6775_s17 + $0x3500] sm:$0xff] %v3919_v2  ;;  %5968 = vst [vmem:[%s6775_s17 + $0x3508] sm:$0xff] %v3920_v3  ;;  %v3925_v14 = vadd.f32 1.0, %v1877_v11  ;;  %v3926_v15 = vadd.f32 1.0, %v1878_v12  ;;  %v1879_v16 = vld [vmem:[%s6760_s12 + $0x3540] sm:$0xff]  ;;  %v1880_v17 = vld [vmem:[%s6760_s12 + $0x3548] sm:$0xff] }
 0x39a   : > { %v1881_v18 = vld [vmem:[%s6760_s12 + $0x3550] sm:$0xff]  ;;  %5969 = vst [vmem:[%s6775_s17 + $0x3510] sm:$0xff] %v3921_v7  ;;  %5970 = vst [vmem:[%s6775_s17 + $0x3518] sm:$0xff] %v3922_v8  ;;  %v3927_v19 = vadd.f32 1.0, %v1879_v16  ;;  %v3928_v20 = vadd.f32 1.0, %v1880_v17  ;;  %v1882_v22 = vld [vmem:[%s6760_s12 + $0x3558] sm:$0xff] }
 0x39b   : > { %5971 = vst [vmem:[%s6775_s17 + $0x3520] sm:$0xff] %v3923_v9  ;;  %v3929_v21 = vadd.f32 1.0, %v1881_v18  ;;  %v1883_v23 = vld [vmem:[%s6760_s12 + $0x3560] sm:$0xff]  ;;  %v1884_v24 = vld [vmem:[%s6760_s12 + $0x3568] sm:$0xff]  ;;  %5972 = vst [vmem:[%s6775_s17 + $0x3528] sm:$0xff] %v3924_v13  ;;  %v3930_v25 = vadd.f32 1.0, %v1882_v22 }
 0x39c   : > { %5973 = vst [vmem:[%s6775_s17 + $0x3530] sm:$0xff] %v3925_v14  ;;  %5974 = vst [vmem:[%s6775_s17 + $0x3538] sm:$0xff] %v3926_v15  ;;  %v3931_v26 = vadd.f32 1.0, %v1883_v23  ;;  %v3932_v27 = vadd.f32 1.0, %v1884_v24  ;;  %v1885_v28 = vld [vmem:[%s6760_s12 + $0x3570] sm:$0xff]  ;;  %v1886_v29 = vld [vmem:[%s6760_s12 + $0x3578] sm:$0xff] }
 0x39d   : > { %v1887_v30 = vld [vmem:[%s6760_s12 + $0x3580] sm:$0xff]  ;;  %5975 = vst [vmem:[%s6775_s17 + $0x3540] sm:$0xff] %v3927_v19  ;;  %5976 = vst [vmem:[%s6775_s17 + $0x3548] sm:$0xff] %v3928_v20  ;;  %v3933_v31 = vadd.f32 1.0, %v1885_v28  ;;  %v3934_v32 = vadd.f32 1.0, %v1886_v29  ;;  %v1888_v34 = vld [vmem:[%s6760_s12 + $0x3588] sm:$0xff] }
 0x39e   : > { %5977 = vst [vmem:[%s6775_s17 + $0x3550] sm:$0xff] %v3929_v21  ;;  %v3935_v33 = vadd.f32 1.0, %v1887_v30  ;;  %v1889_v35 = vld [vmem:[%s6760_s12 + $0x3590] sm:$0xff]  ;;  %v1890_v36 = vld [vmem:[%s6760_s12 + $0x3598] sm:$0xff]  ;;  %5978 = vst [vmem:[%s6775_s17 + $0x3558] sm:$0xff] %v3930_v25  ;;  %v3936_v37 = vadd.f32 1.0, %v1888_v34 }
 0x39f   : > { %5979 = vst [vmem:[%s6775_s17 + $0x3560] sm:$0xff] %v3931_v26  ;;  %5980 = vst [vmem:[%s6775_s17 + $0x3568] sm:$0xff] %v3932_v27  ;;  %v3937_v38 = vadd.f32 1.0, %v1889_v35  ;;  %v3938_v39 = vadd.f32 1.0, %v1890_v36  ;;  %v1891_v40 = vld [vmem:[%s6760_s12 + $0x35a0] sm:$0xff]  ;;  %v1892_v41 = vld [vmem:[%s6760_s12 + $0x35a8] sm:$0xff] }
 0x3a0   : > { %v1893_v42 = vld [vmem:[%s6760_s12 + $0x35b0] sm:$0xff]  ;;  %5981 = vst [vmem:[%s6775_s17 + $0x3570] sm:$0xff] %v3933_v31  ;;  %5982 = vst [vmem:[%s6775_s17 + $0x3578] sm:$0xff] %v3934_v32  ;;  %v3939_v43 = vadd.f32 1.0, %v1891_v40  ;;  %v3940_v44 = vadd.f32 1.0, %v1892_v41  ;;  %v1894_v46 = vld [vmem:[%s6760_s12 + $0x35b8] sm:$0xff] }
 0x3a1   : > { %5983 = vst [vmem:[%s6775_s17 + $0x3580] sm:$0xff] %v3935_v33  ;;  %v3941_v45 = vadd.f32 1.0, %v1893_v42  ;;  %v1895_v47 = vld [vmem:[%s6760_s12 + $0x35c0] sm:$0xff]  ;;  %v1896_v48 = vld [vmem:[%s6760_s12 + $0x35c8] sm:$0xff]  ;;  %5984 = vst [vmem:[%s6775_s17 + $0x3588] sm:$0xff] %v3936_v37  ;;  %v3942_v49 = vadd.f32 1.0, %v1894_v46 }
 0x3a2   : > { %5985 = vst [vmem:[%s6775_s17 + $0x3590] sm:$0xff] %v3937_v38  ;;  %5986 = vst [vmem:[%s6775_s17 + $0x3598] sm:$0xff] %v3938_v39  ;;  %v3943_v50 = vadd.f32 1.0, %v1895_v47  ;;  %v3944_v51 = vadd.f32 1.0, %v1896_v48  ;;  %v1897_v52 = vld [vmem:[%s6760_s12 + $0x35d0] sm:$0xff]  ;;  %v1898_v53 = vld [vmem:[%s6760_s12 + $0x35d8] sm:$0xff] }
 0x3a3   : > { %v1899_v54 = vld [vmem:[%s6760_s12 + $0x35e0] sm:$0xff]  ;;  %5987 = vst [vmem:[%s6775_s17 + $0x35a0] sm:$0xff] %v3939_v43  ;;  %5988 = vst [vmem:[%s6775_s17 + $0x35a8] sm:$0xff] %v3940_v44  ;;  %v3945_v55 = vadd.f32 1.0, %v1897_v52  ;;  %v3946_v56 = vadd.f32 1.0, %v1898_v53  ;;  %v1900_v58 = vld [vmem:[%s6760_s12 + $0x35e8] sm:$0xff] }
 0x3a4   : > { %5989 = vst [vmem:[%s6775_s17 + $0x35b0] sm:$0xff] %v3941_v45  ;;  %v3947_v57 = vadd.f32 1.0, %v1899_v54  ;;  %v1901_v59 = vld [vmem:[%s6760_s12 + $0x35f0] sm:$0xff]  ;;  %v1902_v60 = vld [vmem:[%s6760_s12 + $0x35f8] sm:$0xff]  ;;  %5990 = vst [vmem:[%s6775_s17 + $0x35b8] sm:$0xff] %v3942_v49  ;;  %v3948_v61 = vadd.f32 1.0, %v1900_v58 }
 0x3a5   : > { %5991 = vst [vmem:[%s6775_s17 + $0x35c0] sm:$0xff] %v3943_v50  ;;  %5992 = vst [vmem:[%s6775_s17 + $0x35c8] sm:$0xff] %v3944_v51  ;;  %v3949_v62 = vadd.f32 1.0, %v1901_v59  ;;  %v3950_v63 = vadd.f32 1.0, %v1902_v60  ;;  %v1903_v0 = vld [vmem:[%s6760_s12 + $0x3600] sm:$0xff]  ;;  %v1904_v1 = vld [vmem:[%s6760_s12 + $0x3608] sm:$0xff] }
 0x3a6   : > { %v1905_v2 = vld [vmem:[%s6760_s12 + $0x3610] sm:$0xff]  ;;  %5993 = vst [vmem:[%s6775_s17 + $0x35d0] sm:$0xff] %v3945_v55  ;;  %5994 = vst [vmem:[%s6775_s17 + $0x35d8] sm:$0xff] %v3946_v56  ;;  %v3951_v3 = vadd.f32 1.0, %v1903_v0  ;;  %v3952_v4 = vadd.f32 1.0, %v1904_v1  ;;  %v1906_v6 = vld [vmem:[%s6760_s12 + $0x3618] sm:$0xff] }
 0x3a7   : > { %5995 = vst [vmem:[%s6775_s17 + $0x35e0] sm:$0xff] %v3947_v57  ;;  %v3953_v5 = vadd.f32 1.0, %v1905_v2  ;;  %v1907_v7 = vld [vmem:[%s6760_s12 + $0x3620] sm:$0xff]  ;;  %v1908_v8 = vld [vmem:[%s6760_s12 + $0x3628] sm:$0xff]  ;;  %5996 = vst [vmem:[%s6775_s17 + $0x35e8] sm:$0xff] %v3948_v61  ;;  %v3954_v9 = vadd.f32 1.0, %v1906_v6 }
 0x3a8   : > { %5997 = vst [vmem:[%s6775_s17 + $0x35f0] sm:$0xff] %v3949_v62  ;;  %5998 = vst [vmem:[%s6775_s17 + $0x35f8] sm:$0xff] %v3950_v63  ;;  %v3955_v10 = vadd.f32 1.0, %v1907_v7  ;;  %v3956_v11 = vadd.f32 1.0, %v1908_v8  ;;  %v1909_v12 = vld [vmem:[%s6760_s12 + $0x3630] sm:$0xff]  ;;  %v1910_v13 = vld [vmem:[%s6760_s12 + $0x3638] sm:$0xff] }
 0x3a9   : > { %v1911_v14 = vld [vmem:[%s6760_s12 + $0x3640] sm:$0xff]  ;;  %5999 = vst [vmem:[%s6775_s17 + $0x3600] sm:$0xff] %v3951_v3  ;;  %6000 = vst [vmem:[%s6775_s17 + $0x3608] sm:$0xff] %v3952_v4  ;;  %v3957_v15 = vadd.f32 1.0, %v1909_v12  ;;  %v3958_v16 = vadd.f32 1.0, %v1910_v13  ;;  %v1912_v18 = vld [vmem:[%s6760_s12 + $0x3648] sm:$0xff] }
 0x3aa   : > { %6001 = vst [vmem:[%s6775_s17 + $0x3610] sm:$0xff] %v3953_v5  ;;  %v3959_v17 = vadd.f32 1.0, %v1911_v14  ;;  %v1913_v19 = vld [vmem:[%s6760_s12 + $0x3650] sm:$0xff]  ;;  %v1914_v20 = vld [vmem:[%s6760_s12 + $0x3658] sm:$0xff]  ;;  %6002 = vst [vmem:[%s6775_s17 + $0x3618] sm:$0xff] %v3954_v9  ;;  %v3960_v21 = vadd.f32 1.0, %v1912_v18 }
 0x3ab   : > { %6003 = vst [vmem:[%s6775_s17 + $0x3620] sm:$0xff] %v3955_v10  ;;  %6004 = vst [vmem:[%s6775_s17 + $0x3628] sm:$0xff] %v3956_v11  ;;  %v3961_v22 = vadd.f32 1.0, %v1913_v19  ;;  %v3962_v23 = vadd.f32 1.0, %v1914_v20  ;;  %v1915_v24 = vld [vmem:[%s6760_s12 + $0x3660] sm:$0xff]  ;;  %v1916_v25 = vld [vmem:[%s6760_s12 + $0x3668] sm:$0xff] }
 0x3ac   : > { %v1917_v26 = vld [vmem:[%s6760_s12 + $0x3670] sm:$0xff]  ;;  %6005 = vst [vmem:[%s6775_s17 + $0x3630] sm:$0xff] %v3957_v15  ;;  %6006 = vst [vmem:[%s6775_s17 + $0x3638] sm:$0xff] %v3958_v16  ;;  %v3963_v27 = vadd.f32 1.0, %v1915_v24  ;;  %v3964_v28 = vadd.f32 1.0, %v1916_v25  ;;  %v1918_v30 = vld [vmem:[%s6760_s12 + $0x3678] sm:$0xff] }
 0x3ad   : > { %6007 = vst [vmem:[%s6775_s17 + $0x3640] sm:$0xff] %v3959_v17  ;;  %v3965_v29 = vadd.f32 1.0, %v1917_v26  ;;  %v1919_v31 = vld [vmem:[%s6760_s12 + $0x3680] sm:$0xff]  ;;  %v1920_v32 = vld [vmem:[%s6760_s12 + $0x3688] sm:$0xff]  ;;  %6008 = vst [vmem:[%s6775_s17 + $0x3648] sm:$0xff] %v3960_v21  ;;  %v3966_v33 = vadd.f32 1.0, %v1918_v30 }
 0x3ae   : > { %6009 = vst [vmem:[%s6775_s17 + $0x3650] sm:$0xff] %v3961_v22  ;;  %6010 = vst [vmem:[%s6775_s17 + $0x3658] sm:$0xff] %v3962_v23  ;;  %v3967_v34 = vadd.f32 1.0, %v1919_v31  ;;  %v3968_v35 = vadd.f32 1.0, %v1920_v32  ;;  %v1921_v36 = vld [vmem:[%s6760_s12 + $0x3690] sm:$0xff]  ;;  %v1922_v37 = vld [vmem:[%s6760_s12 + $0x3698] sm:$0xff] }
 0x3af   : > { %v1923_v38 = vld [vmem:[%s6760_s12 + $0x36a0] sm:$0xff]  ;;  %6011 = vst [vmem:[%s6775_s17 + $0x3660] sm:$0xff] %v3963_v27  ;;  %6012 = vst [vmem:[%s6775_s17 + $0x3668] sm:$0xff] %v3964_v28  ;;  %v3969_v39 = vadd.f32 1.0, %v1921_v36  ;;  %v3970_v40 = vadd.f32 1.0, %v1922_v37  ;;  %v1924_v42 = vld [vmem:[%s6760_s12 + $0x36a8] sm:$0xff] }
 0x3b0   : > { %6013 = vst [vmem:[%s6775_s17 + $0x3670] sm:$0xff] %v3965_v29  ;;  %v3971_v41 = vadd.f32 1.0, %v1923_v38  ;;  %v1925_v43 = vld [vmem:[%s6760_s12 + $0x36b0] sm:$0xff]  ;;  %v1926_v44 = vld [vmem:[%s6760_s12 + $0x36b8] sm:$0xff]  ;;  %6014 = vst [vmem:[%s6775_s17 + $0x3678] sm:$0xff] %v3966_v33  ;;  %v3972_v45 = vadd.f32 1.0, %v1924_v42 }
 0x3b1   : > { %6015 = vst [vmem:[%s6775_s17 + $0x3680] sm:$0xff] %v3967_v34  ;;  %6016 = vst [vmem:[%s6775_s17 + $0x3688] sm:$0xff] %v3968_v35  ;;  %v3973_v46 = vadd.f32 1.0, %v1925_v43  ;;  %v3974_v47 = vadd.f32 1.0, %v1926_v44  ;;  %v1927_v48 = vld [vmem:[%s6760_s12 + $0x36c0] sm:$0xff]  ;;  %v1928_v49 = vld [vmem:[%s6760_s12 + $0x36c8] sm:$0xff] }
 0x3b2   : > { %v1929_v50 = vld [vmem:[%s6760_s12 + $0x36d0] sm:$0xff]  ;;  %6017 = vst [vmem:[%s6775_s17 + $0x3690] sm:$0xff] %v3969_v39  ;;  %6018 = vst [vmem:[%s6775_s17 + $0x3698] sm:$0xff] %v3970_v40  ;;  %v3975_v51 = vadd.f32 1.0, %v1927_v48  ;;  %v3976_v52 = vadd.f32 1.0, %v1928_v49  ;;  %v1930_v54 = vld [vmem:[%s6760_s12 + $0x36d8] sm:$0xff] }
 0x3b3   : > { %6019 = vst [vmem:[%s6775_s17 + $0x36a0] sm:$0xff] %v3971_v41  ;;  %v3977_v53 = vadd.f32 1.0, %v1929_v50  ;;  %v1931_v55 = vld [vmem:[%s6760_s12 + $0x36e0] sm:$0xff]  ;;  %v1932_v56 = vld [vmem:[%s6760_s12 + $0x36e8] sm:$0xff]  ;;  %6020 = vst [vmem:[%s6775_s17 + $0x36a8] sm:$0xff] %v3972_v45  ;;  %v3978_v57 = vadd.f32 1.0, %v1930_v54 }
 0x3b4   : > { %6021 = vst [vmem:[%s6775_s17 + $0x36b0] sm:$0xff] %v3973_v46  ;;  %6022 = vst [vmem:[%s6775_s17 + $0x36b8] sm:$0xff] %v3974_v47  ;;  %v3979_v58 = vadd.f32 1.0, %v1931_v55  ;;  %v3980_v59 = vadd.f32 1.0, %v1932_v56  ;;  %v1933_v60 = vld [vmem:[%s6760_s12 + $0x36f0] sm:$0xff]  ;;  %v1934_v61 = vld [vmem:[%s6760_s12 + $0x36f8] sm:$0xff] }
 0x3b5   : > { %v1935_v62 = vld [vmem:[%s6760_s12 + $0x3700] sm:$0xff]  ;;  %6023 = vst [vmem:[%s6775_s17 + $0x36c0] sm:$0xff] %v3975_v51  ;;  %6024 = vst [vmem:[%s6775_s17 + $0x36c8] sm:$0xff] %v3976_v52  ;;  %v3981_v63 = vadd.f32 1.0, %v1933_v60  ;;  %v3982_v0 = vadd.f32 1.0, %v1934_v61  ;;  %v1936_v2 = vld [vmem:[%s6760_s12 + $0x3708] sm:$0xff] }
 0x3b6   : > { %6025 = vst [vmem:[%s6775_s17 + $0x36d0] sm:$0xff] %v3977_v53  ;;  %v3983_v1 = vadd.f32 1.0, %v1935_v62  ;;  %v1937_v3 = vld [vmem:[%s6760_s12 + $0x3710] sm:$0xff]  ;;  %v1938_v4 = vld [vmem:[%s6760_s12 + $0x3718] sm:$0xff]  ;;  %6026 = vst [vmem:[%s6775_s17 + $0x36d8] sm:$0xff] %v3978_v57  ;;  %v3984_v5 = vadd.f32 1.0, %v1936_v2 }
 0x3b7   : > { %6027 = vst [vmem:[%s6775_s17 + $0x36e0] sm:$0xff] %v3979_v58  ;;  %6028 = vst [vmem:[%s6775_s17 + $0x36e8] sm:$0xff] %v3980_v59  ;;  %v3985_v6 = vadd.f32 1.0, %v1937_v3  ;;  %v3986_v7 = vadd.f32 1.0, %v1938_v4  ;;  %v1939_v8 = vld [vmem:[%s6760_s12 + $0x3720] sm:$0xff]  ;;  %v1940_v9 = vld [vmem:[%s6760_s12 + $0x3728] sm:$0xff] }
 0x3b8   : > { %v1941_v10 = vld [vmem:[%s6760_s12 + $0x3730] sm:$0xff]  ;;  %6029 = vst [vmem:[%s6775_s17 + $0x36f0] sm:$0xff] %v3981_v63  ;;  %6030 = vst [vmem:[%s6775_s17 + $0x36f8] sm:$0xff] %v3982_v0  ;;  %v3987_v11 = vadd.f32 1.0, %v1939_v8  ;;  %v3988_v12 = vadd.f32 1.0, %v1940_v9  ;;  %v1942_v14 = vld [vmem:[%s6760_s12 + $0x3738] sm:$0xff] }
 0x3b9   : > { %6031 = vst [vmem:[%s6775_s17 + $0x3700] sm:$0xff] %v3983_v1  ;;  %v3989_v13 = vadd.f32 1.0, %v1941_v10  ;;  %v1943_v15 = vld [vmem:[%s6760_s12 + $0x3740] sm:$0xff]  ;;  %v1944_v16 = vld [vmem:[%s6760_s12 + $0x3748] sm:$0xff]  ;;  %6032 = vst [vmem:[%s6775_s17 + $0x3708] sm:$0xff] %v3984_v5  ;;  %v3990_v17 = vadd.f32 1.0, %v1942_v14 }
 0x3ba   : > { %6033 = vst [vmem:[%s6775_s17 + $0x3710] sm:$0xff] %v3985_v6  ;;  %6034 = vst [vmem:[%s6775_s17 + $0x3718] sm:$0xff] %v3986_v7  ;;  %v3991_v18 = vadd.f32 1.0, %v1943_v15  ;;  %v3992_v19 = vadd.f32 1.0, %v1944_v16  ;;  %v1945_v20 = vld [vmem:[%s6760_s12 + $0x3750] sm:$0xff]  ;;  %v1946_v21 = vld [vmem:[%s6760_s12 + $0x3758] sm:$0xff] }
 0x3bb   : > { %v1947_v22 = vld [vmem:[%s6760_s12 + $0x3760] sm:$0xff]  ;;  %6035 = vst [vmem:[%s6775_s17 + $0x3720] sm:$0xff] %v3987_v11  ;;  %6036 = vst [vmem:[%s6775_s17 + $0x3728] sm:$0xff] %v3988_v12  ;;  %v3993_v23 = vadd.f32 1.0, %v1945_v20  ;;  %v3994_v24 = vadd.f32 1.0, %v1946_v21  ;;  %v1948_v26 = vld [vmem:[%s6760_s12 + $0x3768] sm:$0xff] }
 0x3bc   : > { %6037 = vst [vmem:[%s6775_s17 + $0x3730] sm:$0xff] %v3989_v13  ;;  %v3995_v25 = vadd.f32 1.0, %v1947_v22  ;;  %v1949_v27 = vld [vmem:[%s6760_s12 + $0x3770] sm:$0xff]  ;;  %v1950_v28 = vld [vmem:[%s6760_s12 + $0x3778] sm:$0xff]  ;;  %6038 = vst [vmem:[%s6775_s17 + $0x3738] sm:$0xff] %v3990_v17  ;;  %v3996_v29 = vadd.f32 1.0, %v1948_v26 }
 0x3bd   : > { %6039 = vst [vmem:[%s6775_s17 + $0x3740] sm:$0xff] %v3991_v18  ;;  %6040 = vst [vmem:[%s6775_s17 + $0x3748] sm:$0xff] %v3992_v19  ;;  %v3997_v30 = vadd.f32 1.0, %v1949_v27  ;;  %v3998_v31 = vadd.f32 1.0, %v1950_v28  ;;  %v1951_v32 = vld [vmem:[%s6760_s12 + $0x3780] sm:$0xff]  ;;  %v1952_v33 = vld [vmem:[%s6760_s12 + $0x3788] sm:$0xff] }
 0x3be   : > { %v1953_v34 = vld [vmem:[%s6760_s12 + $0x3790] sm:$0xff]  ;;  %6041 = vst [vmem:[%s6775_s17 + $0x3750] sm:$0xff] %v3993_v23  ;;  %6042 = vst [vmem:[%s6775_s17 + $0x3758] sm:$0xff] %v3994_v24  ;;  %v3999_v35 = vadd.f32 1.0, %v1951_v32  ;;  %v4000_v36 = vadd.f32 1.0, %v1952_v33  ;;  %v1954_v38 = vld [vmem:[%s6760_s12 + $0x3798] sm:$0xff] }
 0x3bf   : > { %6043 = vst [vmem:[%s6775_s17 + $0x3760] sm:$0xff] %v3995_v25  ;;  %v4001_v37 = vadd.f32 1.0, %v1953_v34  ;;  %v1955_v39 = vld [vmem:[%s6760_s12 + $0x37a0] sm:$0xff]  ;;  %v1956_v40 = vld [vmem:[%s6760_s12 + $0x37a8] sm:$0xff]  ;;  %6044 = vst [vmem:[%s6775_s17 + $0x3768] sm:$0xff] %v3996_v29  ;;  %v4002_v41 = vadd.f32 1.0, %v1954_v38 }
 0x3c0   : > { %6045 = vst [vmem:[%s6775_s17 + $0x3770] sm:$0xff] %v3997_v30  ;;  %6046 = vst [vmem:[%s6775_s17 + $0x3778] sm:$0xff] %v3998_v31  ;;  %v4003_v42 = vadd.f32 1.0, %v1955_v39  ;;  %v4004_v43 = vadd.f32 1.0, %v1956_v40  ;;  %v1957_v44 = vld [vmem:[%s6760_s12 + $0x37b0] sm:$0xff]  ;;  %v1958_v45 = vld [vmem:[%s6760_s12 + $0x37b8] sm:$0xff] }
 0x3c1   : > { %v1959_v46 = vld [vmem:[%s6760_s12 + $0x37c0] sm:$0xff]  ;;  %6047 = vst [vmem:[%s6775_s17 + $0x3780] sm:$0xff] %v3999_v35  ;;  %6048 = vst [vmem:[%s6775_s17 + $0x3788] sm:$0xff] %v4000_v36  ;;  %v4005_v47 = vadd.f32 1.0, %v1957_v44  ;;  %v4006_v48 = vadd.f32 1.0, %v1958_v45  ;;  %v1960_v50 = vld [vmem:[%s6760_s12 + $0x37c8] sm:$0xff] }
 0x3c2   : > { %6049 = vst [vmem:[%s6775_s17 + $0x3790] sm:$0xff] %v4001_v37  ;;  %v4007_v49 = vadd.f32 1.0, %v1959_v46  ;;  %v1961_v51 = vld [vmem:[%s6760_s12 + $0x37d0] sm:$0xff]  ;;  %v1962_v52 = vld [vmem:[%s6760_s12 + $0x37d8] sm:$0xff]  ;;  %6050 = vst [vmem:[%s6775_s17 + $0x3798] sm:$0xff] %v4002_v41  ;;  %v4008_v53 = vadd.f32 1.0, %v1960_v50 }
 0x3c3   : > { %6051 = vst [vmem:[%s6775_s17 + $0x37a0] sm:$0xff] %v4003_v42  ;;  %6052 = vst [vmem:[%s6775_s17 + $0x37a8] sm:$0xff] %v4004_v43  ;;  %v4009_v54 = vadd.f32 1.0, %v1961_v51  ;;  %v4010_v55 = vadd.f32 1.0, %v1962_v52  ;;  %v1963_v56 = vld [vmem:[%s6760_s12 + $0x37e0] sm:$0xff]  ;;  %v1964_v57 = vld [vmem:[%s6760_s12 + $0x37e8] sm:$0xff] }
 0x3c4   : > { %v1965_v58 = vld [vmem:[%s6760_s12 + $0x37f0] sm:$0xff]  ;;  %6053 = vst [vmem:[%s6775_s17 + $0x37b0] sm:$0xff] %v4005_v47  ;;  %6054 = vst [vmem:[%s6775_s17 + $0x37b8] sm:$0xff] %v4006_v48  ;;  %v4011_v59 = vadd.f32 1.0, %v1963_v56  ;;  %v4012_v60 = vadd.f32 1.0, %v1964_v57  ;;  %v1966_v62 = vld [vmem:[%s6760_s12 + $0x37f8] sm:$0xff] }
 0x3c5   : > { %6055 = vst [vmem:[%s6775_s17 + $0x37c0] sm:$0xff] %v4007_v49  ;;  %v4013_v61 = vadd.f32 1.0, %v1965_v58  ;;  %v1967_v63 = vld [vmem:[%s6760_s12 + $0x3800] sm:$0xff]  ;;  %v1968_v0 = vld [vmem:[%s6760_s12 + $0x3808] sm:$0xff]  ;;  %6056 = vst [vmem:[%s6775_s17 + $0x37c8] sm:$0xff] %v4008_v53  ;;  %v4014_v1 = vadd.f32 1.0, %v1966_v62 }
 0x3c6   : > { %6057 = vst [vmem:[%s6775_s17 + $0x37d0] sm:$0xff] %v4009_v54  ;;  %6058 = vst [vmem:[%s6775_s17 + $0x37d8] sm:$0xff] %v4010_v55  ;;  %v4015_v2 = vadd.f32 1.0, %v1967_v63  ;;  %v4016_v3 = vadd.f32 1.0, %v1968_v0  ;;  %v1969_v4 = vld [vmem:[%s6760_s12 + $0x3810] sm:$0xff]  ;;  %v1970_v5 = vld [vmem:[%s6760_s12 + $0x3818] sm:$0xff] }
 0x3c7   : > { %v1971_v6 = vld [vmem:[%s6760_s12 + $0x3820] sm:$0xff]  ;;  %6059 = vst [vmem:[%s6775_s17 + $0x37e0] sm:$0xff] %v4011_v59  ;;  %6060 = vst [vmem:[%s6775_s17 + $0x37e8] sm:$0xff] %v4012_v60  ;;  %v4017_v7 = vadd.f32 1.0, %v1969_v4  ;;  %v4018_v8 = vadd.f32 1.0, %v1970_v5  ;;  %v1972_v10 = vld [vmem:[%s6760_s12 + $0x3828] sm:$0xff] }
 0x3c8   : > { %6061 = vst [vmem:[%s6775_s17 + $0x37f0] sm:$0xff] %v4013_v61  ;;  %v4019_v9 = vadd.f32 1.0, %v1971_v6  ;;  %v1973_v11 = vld [vmem:[%s6760_s12 + $0x3830] sm:$0xff]  ;;  %v1974_v12 = vld [vmem:[%s6760_s12 + $0x3838] sm:$0xff]  ;;  %6062 = vst [vmem:[%s6775_s17 + $0x37f8] sm:$0xff] %v4014_v1  ;;  %v4020_v13 = vadd.f32 1.0, %v1972_v10 }
 0x3c9   : > { %6063 = vst [vmem:[%s6775_s17 + $0x3800] sm:$0xff] %v4015_v2  ;;  %6064 = vst [vmem:[%s6775_s17 + $0x3808] sm:$0xff] %v4016_v3  ;;  %v4021_v14 = vadd.f32 1.0, %v1973_v11  ;;  %v4022_v15 = vadd.f32 1.0, %v1974_v12  ;;  %v1975_v16 = vld [vmem:[%s6760_s12 + $0x3840] sm:$0xff]  ;;  %v1976_v17 = vld [vmem:[%s6760_s12 + $0x3848] sm:$0xff] }
 0x3ca   : > { %v1977_v18 = vld [vmem:[%s6760_s12 + $0x3850] sm:$0xff]  ;;  %6065 = vst [vmem:[%s6775_s17 + $0x3810] sm:$0xff] %v4017_v7  ;;  %6066 = vst [vmem:[%s6775_s17 + $0x3818] sm:$0xff] %v4018_v8  ;;  %v4023_v19 = vadd.f32 1.0, %v1975_v16  ;;  %v4024_v20 = vadd.f32 1.0, %v1976_v17  ;;  %v1978_v22 = vld [vmem:[%s6760_s12 + $0x3858] sm:$0xff] }
 0x3cb   : > { %6067 = vst [vmem:[%s6775_s17 + $0x3820] sm:$0xff] %v4019_v9  ;;  %v4025_v21 = vadd.f32 1.0, %v1977_v18  ;;  %v1979_v23 = vld [vmem:[%s6760_s12 + $0x3860] sm:$0xff]  ;;  %v1980_v24 = vld [vmem:[%s6760_s12 + $0x3868] sm:$0xff]  ;;  %6068 = vst [vmem:[%s6775_s17 + $0x3828] sm:$0xff] %v4020_v13  ;;  %v4026_v25 = vadd.f32 1.0, %v1978_v22 }
 0x3cc   : > { %6069 = vst [vmem:[%s6775_s17 + $0x3830] sm:$0xff] %v4021_v14  ;;  %6070 = vst [vmem:[%s6775_s17 + $0x3838] sm:$0xff] %v4022_v15  ;;  %v4027_v26 = vadd.f32 1.0, %v1979_v23  ;;  %v4028_v27 = vadd.f32 1.0, %v1980_v24  ;;  %v1981_v28 = vld [vmem:[%s6760_s12 + $0x3870] sm:$0xff]  ;;  %v1982_v29 = vld [vmem:[%s6760_s12 + $0x3878] sm:$0xff] }
 0x3cd   : > { %v1983_v30 = vld [vmem:[%s6760_s12 + $0x3880] sm:$0xff]  ;;  %6071 = vst [vmem:[%s6775_s17 + $0x3840] sm:$0xff] %v4023_v19  ;;  %6072 = vst [vmem:[%s6775_s17 + $0x3848] sm:$0xff] %v4024_v20  ;;  %v4029_v31 = vadd.f32 1.0, %v1981_v28  ;;  %v4030_v32 = vadd.f32 1.0, %v1982_v29  ;;  %v1984_v34 = vld [vmem:[%s6760_s12 + $0x3888] sm:$0xff] }
 0x3ce   : > { %6073 = vst [vmem:[%s6775_s17 + $0x3850] sm:$0xff] %v4025_v21  ;;  %v4031_v33 = vadd.f32 1.0, %v1983_v30  ;;  %v1985_v35 = vld [vmem:[%s6760_s12 + $0x3890] sm:$0xff]  ;;  %v1986_v36 = vld [vmem:[%s6760_s12 + $0x3898] sm:$0xff]  ;;  %6074 = vst [vmem:[%s6775_s17 + $0x3858] sm:$0xff] %v4026_v25  ;;  %v4032_v37 = vadd.f32 1.0, %v1984_v34 }
 0x3cf   : > { %6075 = vst [vmem:[%s6775_s17 + $0x3860] sm:$0xff] %v4027_v26  ;;  %6076 = vst [vmem:[%s6775_s17 + $0x3868] sm:$0xff] %v4028_v27  ;;  %v4033_v38 = vadd.f32 1.0, %v1985_v35  ;;  %v4034_v39 = vadd.f32 1.0, %v1986_v36  ;;  %v1987_v40 = vld [vmem:[%s6760_s12 + $0x38a0] sm:$0xff]  ;;  %v1988_v41 = vld [vmem:[%s6760_s12 + $0x38a8] sm:$0xff] }
 0x3d0   : > { %v1989_v42 = vld [vmem:[%s6760_s12 + $0x38b0] sm:$0xff]  ;;  %6077 = vst [vmem:[%s6775_s17 + $0x3870] sm:$0xff] %v4029_v31  ;;  %6078 = vst [vmem:[%s6775_s17 + $0x3878] sm:$0xff] %v4030_v32  ;;  %v4035_v43 = vadd.f32 1.0, %v1987_v40  ;;  %v4036_v44 = vadd.f32 1.0, %v1988_v41  ;;  %v1990_v46 = vld [vmem:[%s6760_s12 + $0x38b8] sm:$0xff] }
 0x3d1   : > { %6079 = vst [vmem:[%s6775_s17 + $0x3880] sm:$0xff] %v4031_v33  ;;  %v4037_v45 = vadd.f32 1.0, %v1989_v42  ;;  %v1991_v47 = vld [vmem:[%s6760_s12 + $0x38c0] sm:$0xff]  ;;  %v1992_v48 = vld [vmem:[%s6760_s12 + $0x38c8] sm:$0xff]  ;;  %6080 = vst [vmem:[%s6775_s17 + $0x3888] sm:$0xff] %v4032_v37  ;;  %v4038_v49 = vadd.f32 1.0, %v1990_v46 }
 0x3d2   : > { %6081 = vst [vmem:[%s6775_s17 + $0x3890] sm:$0xff] %v4033_v38  ;;  %6082 = vst [vmem:[%s6775_s17 + $0x3898] sm:$0xff] %v4034_v39  ;;  %v4039_v50 = vadd.f32 1.0, %v1991_v47  ;;  %v4040_v51 = vadd.f32 1.0, %v1992_v48  ;;  %v1993_v52 = vld [vmem:[%s6760_s12 + $0x38d0] sm:$0xff]  ;;  %v1994_v53 = vld [vmem:[%s6760_s12 + $0x38d8] sm:$0xff] }
 0x3d3   : > { %v1995_v54 = vld [vmem:[%s6760_s12 + $0x38e0] sm:$0xff]  ;;  %6083 = vst [vmem:[%s6775_s17 + $0x38a0] sm:$0xff] %v4035_v43  ;;  %6084 = vst [vmem:[%s6775_s17 + $0x38a8] sm:$0xff] %v4036_v44  ;;  %v4041_v55 = vadd.f32 1.0, %v1993_v52  ;;  %v4042_v56 = vadd.f32 1.0, %v1994_v53  ;;  %v1996_v58 = vld [vmem:[%s6760_s12 + $0x38e8] sm:$0xff] }
 0x3d4   : > { %6085 = vst [vmem:[%s6775_s17 + $0x38b0] sm:$0xff] %v4037_v45  ;;  %v4043_v57 = vadd.f32 1.0, %v1995_v54  ;;  %v1997_v59 = vld [vmem:[%s6760_s12 + $0x38f0] sm:$0xff]  ;;  %v1998_v60 = vld [vmem:[%s6760_s12 + $0x38f8] sm:$0xff]  ;;  %6086 = vst [vmem:[%s6775_s17 + $0x38b8] sm:$0xff] %v4038_v49  ;;  %v4044_v61 = vadd.f32 1.0, %v1996_v58 }
 0x3d5   : > { %6087 = vst [vmem:[%s6775_s17 + $0x38c0] sm:$0xff] %v4039_v50  ;;  %6088 = vst [vmem:[%s6775_s17 + $0x38c8] sm:$0xff] %v4040_v51  ;;  %v4045_v62 = vadd.f32 1.0, %v1997_v59  ;;  %v4046_v63 = vadd.f32 1.0, %v1998_v60  ;;  %v1999_v0 = vld [vmem:[%s6760_s12 + $0x3900] sm:$0xff]  ;;  %v2000_v1 = vld [vmem:[%s6760_s12 + $0x3908] sm:$0xff] }
 0x3d6   : > { %v2001_v2 = vld [vmem:[%s6760_s12 + $0x3910] sm:$0xff]  ;;  %6089 = vst [vmem:[%s6775_s17 + $0x38d0] sm:$0xff] %v4041_v55  ;;  %6090 = vst [vmem:[%s6775_s17 + $0x38d8] sm:$0xff] %v4042_v56  ;;  %v4047_v3 = vadd.f32 1.0, %v1999_v0  ;;  %v4048_v4 = vadd.f32 1.0, %v2000_v1  ;;  %v2002_v6 = vld [vmem:[%s6760_s12 + $0x3918] sm:$0xff] }
 0x3d7   : > { %6091 = vst [vmem:[%s6775_s17 + $0x38e0] sm:$0xff] %v4043_v57  ;;  %v4049_v5 = vadd.f32 1.0, %v2001_v2  ;;  %v2003_v7 = vld [vmem:[%s6760_s12 + $0x3920] sm:$0xff]  ;;  %v2004_v8 = vld [vmem:[%s6760_s12 + $0x3928] sm:$0xff]  ;;  %6092 = vst [vmem:[%s6775_s17 + $0x38e8] sm:$0xff] %v4044_v61  ;;  %v4050_v9 = vadd.f32 1.0, %v2002_v6 }
 0x3d8   : > { %6093 = vst [vmem:[%s6775_s17 + $0x38f0] sm:$0xff] %v4045_v62  ;;  %6094 = vst [vmem:[%s6775_s17 + $0x38f8] sm:$0xff] %v4046_v63  ;;  %v4051_v10 = vadd.f32 1.0, %v2003_v7  ;;  %v4052_v11 = vadd.f32 1.0, %v2004_v8  ;;  %v2005_v12 = vld [vmem:[%s6760_s12 + $0x3930] sm:$0xff]  ;;  %v2006_v13 = vld [vmem:[%s6760_s12 + $0x3938] sm:$0xff] }
 0x3d9   : > { %v2007_v14 = vld [vmem:[%s6760_s12 + $0x3940] sm:$0xff]  ;;  %6095 = vst [vmem:[%s6775_s17 + $0x3900] sm:$0xff] %v4047_v3  ;;  %6096 = vst [vmem:[%s6775_s17 + $0x3908] sm:$0xff] %v4048_v4  ;;  %v4053_v15 = vadd.f32 1.0, %v2005_v12  ;;  %v4054_v16 = vadd.f32 1.0, %v2006_v13  ;;  %v2008_v18 = vld [vmem:[%s6760_s12 + $0x3948] sm:$0xff] }
 0x3da   : > { %6097 = vst [vmem:[%s6775_s17 + $0x3910] sm:$0xff] %v4049_v5  ;;  %v4055_v17 = vadd.f32 1.0, %v2007_v14  ;;  %v2009_v19 = vld [vmem:[%s6760_s12 + $0x3950] sm:$0xff]  ;;  %v2010_v20 = vld [vmem:[%s6760_s12 + $0x3958] sm:$0xff]  ;;  %6098 = vst [vmem:[%s6775_s17 + $0x3918] sm:$0xff] %v4050_v9  ;;  %v4056_v21 = vadd.f32 1.0, %v2008_v18 }
 0x3db   : > { %6099 = vst [vmem:[%s6775_s17 + $0x3920] sm:$0xff] %v4051_v10  ;;  %6100 = vst [vmem:[%s6775_s17 + $0x3928] sm:$0xff] %v4052_v11  ;;  %v4057_v22 = vadd.f32 1.0, %v2009_v19  ;;  %v4058_v23 = vadd.f32 1.0, %v2010_v20  ;;  %v2011_v24 = vld [vmem:[%s6760_s12 + $0x3960] sm:$0xff]  ;;  %v2012_v25 = vld [vmem:[%s6760_s12 + $0x3968] sm:$0xff] }
 0x3dc   : > { %v2013_v26 = vld [vmem:[%s6760_s12 + $0x3970] sm:$0xff]  ;;  %6101 = vst [vmem:[%s6775_s17 + $0x3930] sm:$0xff] %v4053_v15  ;;  %6102 = vst [vmem:[%s6775_s17 + $0x3938] sm:$0xff] %v4054_v16  ;;  %v4059_v27 = vadd.f32 1.0, %v2011_v24  ;;  %v4060_v28 = vadd.f32 1.0, %v2012_v25  ;;  %v2014_v30 = vld [vmem:[%s6760_s12 + $0x3978] sm:$0xff] }
 0x3dd   : > { %6103 = vst [vmem:[%s6775_s17 + $0x3940] sm:$0xff] %v4055_v17  ;;  %v4061_v29 = vadd.f32 1.0, %v2013_v26  ;;  %v2015_v31 = vld [vmem:[%s6760_s12 + $0x3980] sm:$0xff]  ;;  %v2016_v32 = vld [vmem:[%s6760_s12 + $0x3988] sm:$0xff]  ;;  %6104 = vst [vmem:[%s6775_s17 + $0x3948] sm:$0xff] %v4056_v21  ;;  %v4062_v33 = vadd.f32 1.0, %v2014_v30 }
 0x3de   : > { %6105 = vst [vmem:[%s6775_s17 + $0x3950] sm:$0xff] %v4057_v22  ;;  %6106 = vst [vmem:[%s6775_s17 + $0x3958] sm:$0xff] %v4058_v23  ;;  %v4063_v34 = vadd.f32 1.0, %v2015_v31  ;;  %v4064_v35 = vadd.f32 1.0, %v2016_v32  ;;  %v2017_v36 = vld [vmem:[%s6760_s12 + $0x3990] sm:$0xff]  ;;  %v2018_v37 = vld [vmem:[%s6760_s12 + $0x3998] sm:$0xff] }
 0x3df   : > { %v2019_v38 = vld [vmem:[%s6760_s12 + $0x39a0] sm:$0xff]  ;;  %6107 = vst [vmem:[%s6775_s17 + $0x3960] sm:$0xff] %v4059_v27  ;;  %6108 = vst [vmem:[%s6775_s17 + $0x3968] sm:$0xff] %v4060_v28  ;;  %v4065_v39 = vadd.f32 1.0, %v2017_v36  ;;  %v4066_v40 = vadd.f32 1.0, %v2018_v37  ;;  %v2020_v42 = vld [vmem:[%s6760_s12 + $0x39a8] sm:$0xff] }
 0x3e0   : > { %6109 = vst [vmem:[%s6775_s17 + $0x3970] sm:$0xff] %v4061_v29  ;;  %v4067_v41 = vadd.f32 1.0, %v2019_v38  ;;  %v2021_v43 = vld [vmem:[%s6760_s12 + $0x39b0] sm:$0xff]  ;;  %v2022_v44 = vld [vmem:[%s6760_s12 + $0x39b8] sm:$0xff]  ;;  %6110 = vst [vmem:[%s6775_s17 + $0x3978] sm:$0xff] %v4062_v33  ;;  %v4068_v45 = vadd.f32 1.0, %v2020_v42 }
 0x3e1   : > { %6111 = vst [vmem:[%s6775_s17 + $0x3980] sm:$0xff] %v4063_v34  ;;  %6112 = vst [vmem:[%s6775_s17 + $0x3988] sm:$0xff] %v4064_v35  ;;  %v4069_v46 = vadd.f32 1.0, %v2021_v43  ;;  %v4070_v47 = vadd.f32 1.0, %v2022_v44  ;;  %v2023_v48 = vld [vmem:[%s6760_s12 + $0x39c0] sm:$0xff]  ;;  %v2024_v49 = vld [vmem:[%s6760_s12 + $0x39c8] sm:$0xff] }
 0x3e2   : > { %v2025_v50 = vld [vmem:[%s6760_s12 + $0x39d0] sm:$0xff]  ;;  %6113 = vst [vmem:[%s6775_s17 + $0x3990] sm:$0xff] %v4065_v39  ;;  %6114 = vst [vmem:[%s6775_s17 + $0x3998] sm:$0xff] %v4066_v40  ;;  %v4071_v51 = vadd.f32 1.0, %v2023_v48  ;;  %v4072_v52 = vadd.f32 1.0, %v2024_v49  ;;  %v2026_v54 = vld [vmem:[%s6760_s12 + $0x39d8] sm:$0xff] }
 0x3e3   : > { %6115 = vst [vmem:[%s6775_s17 + $0x39a0] sm:$0xff] %v4067_v41  ;;  %v4073_v53 = vadd.f32 1.0, %v2025_v50  ;;  %v2027_v55 = vld [vmem:[%s6760_s12 + $0x39e0] sm:$0xff]  ;;  %v2028_v56 = vld [vmem:[%s6760_s12 + $0x39e8] sm:$0xff]  ;;  %6116 = vst [vmem:[%s6775_s17 + $0x39a8] sm:$0xff] %v4068_v45  ;;  %v4074_v57 = vadd.f32 1.0, %v2026_v54 }
 0x3e4   : > { %6117 = vst [vmem:[%s6775_s17 + $0x39b0] sm:$0xff] %v4069_v46  ;;  %6118 = vst [vmem:[%s6775_s17 + $0x39b8] sm:$0xff] %v4070_v47  ;;  %v4075_v58 = vadd.f32 1.0, %v2027_v55  ;;  %v4076_v59 = vadd.f32 1.0, %v2028_v56  ;;  %v2029_v60 = vld [vmem:[%s6760_s12 + $0x39f0] sm:$0xff]  ;;  %v2030_v61 = vld [vmem:[%s6760_s12 + $0x39f8] sm:$0xff] }
 0x3e5   : > { %v2031_v62 = vld [vmem:[%s6760_s12 + $0x3a00] sm:$0xff]  ;;  %6119 = vst [vmem:[%s6775_s17 + $0x39c0] sm:$0xff] %v4071_v51  ;;  %6120 = vst [vmem:[%s6775_s17 + $0x39c8] sm:$0xff] %v4072_v52  ;;  %v4077_v63 = vadd.f32 1.0, %v2029_v60  ;;  %v4078_v0 = vadd.f32 1.0, %v2030_v61  ;;  %v2032_v2 = vld [vmem:[%s6760_s12 + $0x3a08] sm:$0xff] }
 0x3e6   : > { %6121 = vst [vmem:[%s6775_s17 + $0x39d0] sm:$0xff] %v4073_v53  ;;  %v4079_v1 = vadd.f32 1.0, %v2031_v62  ;;  %v2033_v3 = vld [vmem:[%s6760_s12 + $0x3a10] sm:$0xff]  ;;  %v2034_v4 = vld [vmem:[%s6760_s12 + $0x3a18] sm:$0xff]  ;;  %6122 = vst [vmem:[%s6775_s17 + $0x39d8] sm:$0xff] %v4074_v57  ;;  %v4080_v5 = vadd.f32 1.0, %v2032_v2 }
 0x3e7   : > { %6123 = vst [vmem:[%s6775_s17 + $0x39e0] sm:$0xff] %v4075_v58  ;;  %6124 = vst [vmem:[%s6775_s17 + $0x39e8] sm:$0xff] %v4076_v59  ;;  %v4081_v6 = vadd.f32 1.0, %v2033_v3  ;;  %v4082_v7 = vadd.f32 1.0, %v2034_v4  ;;  %v2035_v8 = vld [vmem:[%s6760_s12 + $0x3a20] sm:$0xff]  ;;  %v2036_v9 = vld [vmem:[%s6760_s12 + $0x3a28] sm:$0xff] }
 0x3e8   : > { %v2037_v10 = vld [vmem:[%s6760_s12 + $0x3a30] sm:$0xff]  ;;  %6125 = vst [vmem:[%s6775_s17 + $0x39f0] sm:$0xff] %v4077_v63  ;;  %6126 = vst [vmem:[%s6775_s17 + $0x39f8] sm:$0xff] %v4078_v0  ;;  %v4083_v11 = vadd.f32 1.0, %v2035_v8  ;;  %v4084_v12 = vadd.f32 1.0, %v2036_v9  ;;  %v2038_v14 = vld [vmem:[%s6760_s12 + $0x3a38] sm:$0xff] }
 0x3e9   : > { %6127 = vst [vmem:[%s6775_s17 + $0x3a00] sm:$0xff] %v4079_v1  ;;  %v4085_v13 = vadd.f32 1.0, %v2037_v10  ;;  %v2039_v15 = vld [vmem:[%s6760_s12 + $0x3a40] sm:$0xff]  ;;  %v2040_v16 = vld [vmem:[%s6760_s12 + $0x3a48] sm:$0xff]  ;;  %6128 = vst [vmem:[%s6775_s17 + $0x3a08] sm:$0xff] %v4080_v5  ;;  %v4086_v17 = vadd.f32 1.0, %v2038_v14 }
 0x3ea   : > { %6129 = vst [vmem:[%s6775_s17 + $0x3a10] sm:$0xff] %v4081_v6  ;;  %6130 = vst [vmem:[%s6775_s17 + $0x3a18] sm:$0xff] %v4082_v7  ;;  %v4087_v18 = vadd.f32 1.0, %v2039_v15  ;;  %v4088_v19 = vadd.f32 1.0, %v2040_v16  ;;  %v2041_v20 = vld [vmem:[%s6760_s12 + $0x3a50] sm:$0xff]  ;;  %v2042_v21 = vld [vmem:[%s6760_s12 + $0x3a58] sm:$0xff] }
 0x3eb   : > { %v2043_v22 = vld [vmem:[%s6760_s12 + $0x3a60] sm:$0xff]  ;;  %6131 = vst [vmem:[%s6775_s17 + $0x3a20] sm:$0xff] %v4083_v11  ;;  %6132 = vst [vmem:[%s6775_s17 + $0x3a28] sm:$0xff] %v4084_v12  ;;  %v4089_v23 = vadd.f32 1.0, %v2041_v20  ;;  %v4090_v24 = vadd.f32 1.0, %v2042_v21  ;;  %v2044_v26 = vld [vmem:[%s6760_s12 + $0x3a68] sm:$0xff] }
 0x3ec   : > { %6133 = vst [vmem:[%s6775_s17 + $0x3a30] sm:$0xff] %v4085_v13  ;;  %v4091_v25 = vadd.f32 1.0, %v2043_v22  ;;  %v2045_v27 = vld [vmem:[%s6760_s12 + $0x3a70] sm:$0xff]  ;;  %v2046_v28 = vld [vmem:[%s6760_s12 + $0x3a78] sm:$0xff]  ;;  %6134 = vst [vmem:[%s6775_s17 + $0x3a38] sm:$0xff] %v4086_v17  ;;  %v4092_v29 = vadd.f32 1.0, %v2044_v26 }
 0x3ed   : > { %6135 = vst [vmem:[%s6775_s17 + $0x3a40] sm:$0xff] %v4087_v18  ;;  %6136 = vst [vmem:[%s6775_s17 + $0x3a48] sm:$0xff] %v4088_v19  ;;  %v4093_v30 = vadd.f32 1.0, %v2045_v27  ;;  %v4094_v31 = vadd.f32 1.0, %v2046_v28  ;;  %v2047_v32 = vld [vmem:[%s6760_s12 + $0x3a80] sm:$0xff]  ;;  %v2048_v33 = vld [vmem:[%s6760_s12 + $0x3a88] sm:$0xff] }
 0x3ee   : > { %v2049_v34 = vld [vmem:[%s6760_s12 + $0x3a90] sm:$0xff]  ;;  %6137 = vst [vmem:[%s6775_s17 + $0x3a50] sm:$0xff] %v4089_v23  ;;  %6138 = vst [vmem:[%s6775_s17 + $0x3a58] sm:$0xff] %v4090_v24  ;;  %v4095_v35 = vadd.f32 1.0, %v2047_v32  ;;  %v4096_v36 = vadd.f32 1.0, %v2048_v33  ;;  %v2050_v38 = vld [vmem:[%s6760_s12 + $0x3a98] sm:$0xff] }
 0x3ef   : > { %6139 = vst [vmem:[%s6775_s17 + $0x3a60] sm:$0xff] %v4091_v25  ;;  %v4097_v37 = vadd.f32 1.0, %v2049_v34  ;;  %v2051_v39 = vld [vmem:[%s6760_s12 + $0x3aa0] sm:$0xff]  ;;  %v2052_v40 = vld [vmem:[%s6760_s12 + $0x3aa8] sm:$0xff]  ;;  %6140 = vst [vmem:[%s6775_s17 + $0x3a68] sm:$0xff] %v4092_v29  ;;  %v4098_v41 = vadd.f32 1.0, %v2050_v38 }
 0x3f0   : > { %6141 = vst [vmem:[%s6775_s17 + $0x3a70] sm:$0xff] %v4093_v30  ;;  %6142 = vst [vmem:[%s6775_s17 + $0x3a78] sm:$0xff] %v4094_v31  ;;  %v4099_v42 = vadd.f32 1.0, %v2051_v39  ;;  %v4100_v43 = vadd.f32 1.0, %v2052_v40  ;;  %v2053_v44 = vld [vmem:[%s6760_s12 + $0x3ab0] sm:$0xff]  ;;  %v2054_v45 = vld [vmem:[%s6760_s12 + $0x3ab8] sm:$0xff] }
 0x3f1   : > { %v2055_v46 = vld [vmem:[%s6760_s12 + $0x3ac0] sm:$0xff]  ;;  %6143 = vst [vmem:[%s6775_s17 + $0x3a80] sm:$0xff] %v4095_v35  ;;  %6144 = vst [vmem:[%s6775_s17 + $0x3a88] sm:$0xff] %v4096_v36  ;;  %v4101_v47 = vadd.f32 1.0, %v2053_v44  ;;  %v4102_v48 = vadd.f32 1.0, %v2054_v45  ;;  %v2056_v50 = vld [vmem:[%s6760_s12 + $0x3ac8] sm:$0xff] }
 0x3f2   : > { %6145 = vst [vmem:[%s6775_s17 + $0x3a90] sm:$0xff] %v4097_v37  ;;  %v4103_v49 = vadd.f32 1.0, %v2055_v46  ;;  %v2057_v51 = vld [vmem:[%s6760_s12 + $0x3ad0] sm:$0xff]  ;;  %v2058_v52 = vld [vmem:[%s6760_s12 + $0x3ad8] sm:$0xff]  ;;  %6146 = vst [vmem:[%s6775_s17 + $0x3a98] sm:$0xff] %v4098_v41  ;;  %v4104_v53 = vadd.f32 1.0, %v2056_v50 }
 0x3f3   : > { %6147 = vst [vmem:[%s6775_s17 + $0x3aa0] sm:$0xff] %v4099_v42  ;;  %6148 = vst [vmem:[%s6775_s17 + $0x3aa8] sm:$0xff] %v4100_v43  ;;  %v4105_v54 = vadd.f32 1.0, %v2057_v51  ;;  %v4106_v55 = vadd.f32 1.0, %v2058_v52  ;;  %v2059_v56 = vld [vmem:[%s6760_s12 + $0x3ae0] sm:$0xff]  ;;  %v2060_v57 = vld [vmem:[%s6760_s12 + $0x3ae8] sm:$0xff] }
 0x3f4   : > { %v2061_v58 = vld [vmem:[%s6760_s12 + $0x3af0] sm:$0xff]  ;;  %6149 = vst [vmem:[%s6775_s17 + $0x3ab0] sm:$0xff] %v4101_v47  ;;  %6150 = vst [vmem:[%s6775_s17 + $0x3ab8] sm:$0xff] %v4102_v48  ;;  %v4107_v59 = vadd.f32 1.0, %v2059_v56  ;;  %v4108_v60 = vadd.f32 1.0, %v2060_v57  ;;  %v2062_v62 = vld [vmem:[%s6760_s12 + $0x3af8] sm:$0xff] }
 0x3f5   : > { %6151 = vst [vmem:[%s6775_s17 + $0x3ac0] sm:$0xff] %v4103_v49  ;;  %v4109_v61 = vadd.f32 1.0, %v2061_v58  ;;  %v2063_v63 = vld [vmem:[%s6760_s12 + $0x3b00] sm:$0xff]  ;;  %v2064_v0 = vld [vmem:[%s6760_s12 + $0x3b08] sm:$0xff]  ;;  %6152 = vst [vmem:[%s6775_s17 + $0x3ac8] sm:$0xff] %v4104_v53  ;;  %v4110_v1 = vadd.f32 1.0, %v2062_v62 }
 0x3f6   : > { %6153 = vst [vmem:[%s6775_s17 + $0x3ad0] sm:$0xff] %v4105_v54  ;;  %6154 = vst [vmem:[%s6775_s17 + $0x3ad8] sm:$0xff] %v4106_v55  ;;  %v4111_v2 = vadd.f32 1.0, %v2063_v63  ;;  %v4112_v3 = vadd.f32 1.0, %v2064_v0  ;;  %v2065_v4 = vld [vmem:[%s6760_s12 + $0x3b10] sm:$0xff]  ;;  %v2066_v5 = vld [vmem:[%s6760_s12 + $0x3b18] sm:$0xff] }
 0x3f7   : > { %v2067_v6 = vld [vmem:[%s6760_s12 + $0x3b20] sm:$0xff]  ;;  %6155 = vst [vmem:[%s6775_s17 + $0x3ae0] sm:$0xff] %v4107_v59  ;;  %6156 = vst [vmem:[%s6775_s17 + $0x3ae8] sm:$0xff] %v4108_v60  ;;  %v4113_v7 = vadd.f32 1.0, %v2065_v4  ;;  %v4114_v8 = vadd.f32 1.0, %v2066_v5  ;;  %v2068_v10 = vld [vmem:[%s6760_s12 + $0x3b28] sm:$0xff] }
 0x3f8   : > { %6157 = vst [vmem:[%s6775_s17 + $0x3af0] sm:$0xff] %v4109_v61  ;;  %v4115_v9 = vadd.f32 1.0, %v2067_v6  ;;  %v2069_v11 = vld [vmem:[%s6760_s12 + $0x3b30] sm:$0xff]  ;;  %v2070_v12 = vld [vmem:[%s6760_s12 + $0x3b38] sm:$0xff]  ;;  %6158 = vst [vmem:[%s6775_s17 + $0x3af8] sm:$0xff] %v4110_v1  ;;  %v4116_v13 = vadd.f32 1.0, %v2068_v10 }
 0x3f9   : > { %6159 = vst [vmem:[%s6775_s17 + $0x3b00] sm:$0xff] %v4111_v2  ;;  %6160 = vst [vmem:[%s6775_s17 + $0x3b08] sm:$0xff] %v4112_v3  ;;  %v4117_v14 = vadd.f32 1.0, %v2069_v11  ;;  %v4118_v15 = vadd.f32 1.0, %v2070_v12  ;;  %v2071_v16 = vld [vmem:[%s6760_s12 + $0x3b40] sm:$0xff]  ;;  %v2072_v17 = vld [vmem:[%s6760_s12 + $0x3b48] sm:$0xff] }
 0x3fa   : > { %v2073_v18 = vld [vmem:[%s6760_s12 + $0x3b50] sm:$0xff]  ;;  %6161 = vst [vmem:[%s6775_s17 + $0x3b10] sm:$0xff] %v4113_v7  ;;  %6162 = vst [vmem:[%s6775_s17 + $0x3b18] sm:$0xff] %v4114_v8  ;;  %v4119_v19 = vadd.f32 1.0, %v2071_v16  ;;  %v4120_v20 = vadd.f32 1.0, %v2072_v17  ;;  %v2074_v22 = vld [vmem:[%s6760_s12 + $0x3b58] sm:$0xff] }
 0x3fb   : > { %6163 = vst [vmem:[%s6775_s17 + $0x3b20] sm:$0xff] %v4115_v9  ;;  %v4121_v21 = vadd.f32 1.0, %v2073_v18  ;;  %v2075_v23 = vld [vmem:[%s6760_s12 + $0x3b60] sm:$0xff]  ;;  %v2076_v24 = vld [vmem:[%s6760_s12 + $0x3b68] sm:$0xff]  ;;  %6164 = vst [vmem:[%s6775_s17 + $0x3b28] sm:$0xff] %v4116_v13  ;;  %v4122_v25 = vadd.f32 1.0, %v2074_v22 }
 0x3fc   : > { %6165 = vst [vmem:[%s6775_s17 + $0x3b30] sm:$0xff] %v4117_v14  ;;  %6166 = vst [vmem:[%s6775_s17 + $0x3b38] sm:$0xff] %v4118_v15  ;;  %v4123_v26 = vadd.f32 1.0, %v2075_v23  ;;  %v4124_v27 = vadd.f32 1.0, %v2076_v24  ;;  %v2077_v28 = vld [vmem:[%s6760_s12 + $0x3b70] sm:$0xff]  ;;  %v2078_v29 = vld [vmem:[%s6760_s12 + $0x3b78] sm:$0xff] }
 0x3fd   : > { %v2079_v30 = vld [vmem:[%s6760_s12 + $0x3b80] sm:$0xff]  ;;  %6167 = vst [vmem:[%s6775_s17 + $0x3b40] sm:$0xff] %v4119_v19  ;;  %6168 = vst [vmem:[%s6775_s17 + $0x3b48] sm:$0xff] %v4120_v20  ;;  %v4125_v31 = vadd.f32 1.0, %v2077_v28  ;;  %v4126_v32 = vadd.f32 1.0, %v2078_v29  ;;  %v2080_v34 = vld [vmem:[%s6760_s12 + $0x3b88] sm:$0xff] }
 0x3fe   : > { %6169 = vst [vmem:[%s6775_s17 + $0x3b50] sm:$0xff] %v4121_v21  ;;  %v4127_v33 = vadd.f32 1.0, %v2079_v30  ;;  %v2081_v35 = vld [vmem:[%s6760_s12 + $0x3b90] sm:$0xff]  ;;  %v2082_v36 = vld [vmem:[%s6760_s12 + $0x3b98] sm:$0xff]  ;;  %6170 = vst [vmem:[%s6775_s17 + $0x3b58] sm:$0xff] %v4122_v25  ;;  %v4128_v37 = vadd.f32 1.0, %v2080_v34 }
 0x3ff   : > { %6171 = vst [vmem:[%s6775_s17 + $0x3b60] sm:$0xff] %v4123_v26  ;;  %6172 = vst [vmem:[%s6775_s17 + $0x3b68] sm:$0xff] %v4124_v27  ;;  %v4129_v38 = vadd.f32 1.0, %v2081_v35  ;;  %v4130_v39 = vadd.f32 1.0, %v2082_v36  ;;  %v2083_v40 = vld [vmem:[%s6760_s12 + $0x3ba0] sm:$0xff]  ;;  %v2084_v41 = vld [vmem:[%s6760_s12 + $0x3ba8] sm:$0xff] }
 0x400   : > { %v2085_v42 = vld [vmem:[%s6760_s12 + $0x3bb0] sm:$0xff]  ;;  %6173 = vst [vmem:[%s6775_s17 + $0x3b70] sm:$0xff] %v4125_v31  ;;  %6174 = vst [vmem:[%s6775_s17 + $0x3b78] sm:$0xff] %v4126_v32  ;;  %v4131_v43 = vadd.f32 1.0, %v2083_v40  ;;  %v4132_v44 = vadd.f32 1.0, %v2084_v41  ;;  %v2086_v46 = vld [vmem:[%s6760_s12 + $0x3bb8] sm:$0xff] }
 0x401   : > { %6175 = vst [vmem:[%s6775_s17 + $0x3b80] sm:$0xff] %v4127_v33  ;;  %v4133_v45 = vadd.f32 1.0, %v2085_v42  ;;  %v2087_v47 = vld [vmem:[%s6760_s12 + $0x3bc0] sm:$0xff]  ;;  %v2088_v48 = vld [vmem:[%s6760_s12 + $0x3bc8] sm:$0xff]  ;;  %6176 = vst [vmem:[%s6775_s17 + $0x3b88] sm:$0xff] %v4128_v37  ;;  %v4134_v49 = vadd.f32 1.0, %v2086_v46 }
 0x402   : > { %6177 = vst [vmem:[%s6775_s17 + $0x3b90] sm:$0xff] %v4129_v38  ;;  %6178 = vst [vmem:[%s6775_s17 + $0x3b98] sm:$0xff] %v4130_v39  ;;  %v4135_v50 = vadd.f32 1.0, %v2087_v47  ;;  %v4136_v51 = vadd.f32 1.0, %v2088_v48  ;;  %v2089_v52 = vld [vmem:[%s6760_s12 + $0x3bd0] sm:$0xff]  ;;  %v2090_v53 = vld [vmem:[%s6760_s12 + $0x3bd8] sm:$0xff] }
 0x403   : > { %v2091_v54 = vld [vmem:[%s6760_s12 + $0x3be0] sm:$0xff]  ;;  %6179 = vst [vmem:[%s6775_s17 + $0x3ba0] sm:$0xff] %v4131_v43  ;;  %6180 = vst [vmem:[%s6775_s17 + $0x3ba8] sm:$0xff] %v4132_v44  ;;  %v4137_v55 = vadd.f32 1.0, %v2089_v52  ;;  %v4138_v56 = vadd.f32 1.0, %v2090_v53  ;;  %v2092_v58 = vld [vmem:[%s6760_s12 + $0x3be8] sm:$0xff] }
 0x404   : > { %6181 = vst [vmem:[%s6775_s17 + $0x3bb0] sm:$0xff] %v4133_v45  ;;  %v4139_v57 = vadd.f32 1.0, %v2091_v54  ;;  %v2093_v59 = vld [vmem:[%s6760_s12 + $0x3bf0] sm:$0xff]  ;;  %v2094_v60 = vld [vmem:[%s6760_s12 + $0x3bf8] sm:$0xff]  ;;  %6182 = vst [vmem:[%s6775_s17 + $0x3bb8] sm:$0xff] %v4134_v49  ;;  %v4140_v61 = vadd.f32 1.0, %v2092_v58 }
 0x405   : > { %6183 = vst [vmem:[%s6775_s17 + $0x3bc0] sm:$0xff] %v4135_v50  ;;  %6184 = vst [vmem:[%s6775_s17 + $0x3bc8] sm:$0xff] %v4136_v51  ;;  %v4141_v62 = vadd.f32 1.0, %v2093_v59  ;;  %v4142_v63 = vadd.f32 1.0, %v2094_v60  ;;  %v2095_v0 = vld [vmem:[%s6760_s12 + $0x3c00] sm:$0xff]  ;;  %v2096_v1 = vld [vmem:[%s6760_s12 + $0x3c08] sm:$0xff] }
 0x406   : > { %v2097_v2 = vld [vmem:[%s6760_s12 + $0x3c10] sm:$0xff]  ;;  %6185 = vst [vmem:[%s6775_s17 + $0x3bd0] sm:$0xff] %v4137_v55  ;;  %6186 = vst [vmem:[%s6775_s17 + $0x3bd8] sm:$0xff] %v4138_v56  ;;  %v4143_v3 = vadd.f32 1.0, %v2095_v0  ;;  %v4144_v4 = vadd.f32 1.0, %v2096_v1  ;;  %v2098_v6 = vld [vmem:[%s6760_s12 + $0x3c18] sm:$0xff] }
 0x407   : > { %6187 = vst [vmem:[%s6775_s17 + $0x3be0] sm:$0xff] %v4139_v57  ;;  %v4145_v5 = vadd.f32 1.0, %v2097_v2  ;;  %v2099_v7 = vld [vmem:[%s6760_s12 + $0x3c20] sm:$0xff]  ;;  %v2100_v8 = vld [vmem:[%s6760_s12 + $0x3c28] sm:$0xff]  ;;  %6188 = vst [vmem:[%s6775_s17 + $0x3be8] sm:$0xff] %v4140_v61  ;;  %v4146_v9 = vadd.f32 1.0, %v2098_v6 }
 0x408   : > { %6189 = vst [vmem:[%s6775_s17 + $0x3bf0] sm:$0xff] %v4141_v62  ;;  %6190 = vst [vmem:[%s6775_s17 + $0x3bf8] sm:$0xff] %v4142_v63  ;;  %v4147_v10 = vadd.f32 1.0, %v2099_v7  ;;  %v4148_v11 = vadd.f32 1.0, %v2100_v8  ;;  %v2101_v12 = vld [vmem:[%s6760_s12 + $0x3c30] sm:$0xff]  ;;  %v2102_v13 = vld [vmem:[%s6760_s12 + $0x3c38] sm:$0xff] }
 0x409   : > { %v2103_v14 = vld [vmem:[%s6760_s12 + $0x3c40] sm:$0xff]  ;;  %6191 = vst [vmem:[%s6775_s17 + $0x3c00] sm:$0xff] %v4143_v3  ;;  %6192 = vst [vmem:[%s6775_s17 + $0x3c08] sm:$0xff] %v4144_v4  ;;  %v4149_v15 = vadd.f32 1.0, %v2101_v12  ;;  %v4150_v16 = vadd.f32 1.0, %v2102_v13  ;;  %v2104_v18 = vld [vmem:[%s6760_s12 + $0x3c48] sm:$0xff] }
 0x40a   : > { %6193 = vst [vmem:[%s6775_s17 + $0x3c10] sm:$0xff] %v4145_v5  ;;  %v4151_v17 = vadd.f32 1.0, %v2103_v14  ;;  %v2105_v19 = vld [vmem:[%s6760_s12 + $0x3c50] sm:$0xff]  ;;  %v2106_v20 = vld [vmem:[%s6760_s12 + $0x3c58] sm:$0xff]  ;;  %6194 = vst [vmem:[%s6775_s17 + $0x3c18] sm:$0xff] %v4146_v9  ;;  %v4152_v21 = vadd.f32 1.0, %v2104_v18 }
 0x40b   : > { %6195 = vst [vmem:[%s6775_s17 + $0x3c20] sm:$0xff] %v4147_v10  ;;  %6196 = vst [vmem:[%s6775_s17 + $0x3c28] sm:$0xff] %v4148_v11  ;;  %v4153_v22 = vadd.f32 1.0, %v2105_v19  ;;  %v4154_v23 = vadd.f32 1.0, %v2106_v20  ;;  %v2107_v24 = vld [vmem:[%s6760_s12 + $0x3c60] sm:$0xff]  ;;  %v2108_v25 = vld [vmem:[%s6760_s12 + $0x3c68] sm:$0xff] }
 0x40c   : > { %v2109_v26 = vld [vmem:[%s6760_s12 + $0x3c70] sm:$0xff]  ;;  %6197 = vst [vmem:[%s6775_s17 + $0x3c30] sm:$0xff] %v4149_v15  ;;  %6198 = vst [vmem:[%s6775_s17 + $0x3c38] sm:$0xff] %v4150_v16  ;;  %v4155_v27 = vadd.f32 1.0, %v2107_v24  ;;  %v4156_v28 = vadd.f32 1.0, %v2108_v25  ;;  %v2110_v30 = vld [vmem:[%s6760_s12 + $0x3c78] sm:$0xff] }
 0x40d   : > { %6199 = vst [vmem:[%s6775_s17 + $0x3c40] sm:$0xff] %v4151_v17  ;;  %v4157_v29 = vadd.f32 1.0, %v2109_v26  ;;  %v2111_v31 = vld [vmem:[%s6760_s12 + $0x3c80] sm:$0xff]  ;;  %v2112_v32 = vld [vmem:[%s6760_s12 + $0x3c88] sm:$0xff]  ;;  %6200 = vst [vmem:[%s6775_s17 + $0x3c48] sm:$0xff] %v4152_v21  ;;  %v4158_v33 = vadd.f32 1.0, %v2110_v30 }
 0x40e   : > { %6201 = vst [vmem:[%s6775_s17 + $0x3c50] sm:$0xff] %v4153_v22  ;;  %6202 = vst [vmem:[%s6775_s17 + $0x3c58] sm:$0xff] %v4154_v23  ;;  %v4159_v34 = vadd.f32 1.0, %v2111_v31  ;;  %v4160_v35 = vadd.f32 1.0, %v2112_v32  ;;  %v2113_v36 = vld [vmem:[%s6760_s12 + $0x3c90] sm:$0xff]  ;;  %v2114_v37 = vld [vmem:[%s6760_s12 + $0x3c98] sm:$0xff] }
 0x40f   : > { %v2115_v38 = vld [vmem:[%s6760_s12 + $0x3ca0] sm:$0xff]  ;;  %6203 = vst [vmem:[%s6775_s17 + $0x3c60] sm:$0xff] %v4155_v27  ;;  %6204 = vst [vmem:[%s6775_s17 + $0x3c68] sm:$0xff] %v4156_v28  ;;  %v4161_v39 = vadd.f32 1.0, %v2113_v36  ;;  %v4162_v40 = vadd.f32 1.0, %v2114_v37  ;;  %v2116_v42 = vld [vmem:[%s6760_s12 + $0x3ca8] sm:$0xff] }
 0x410   : > { %6205 = vst [vmem:[%s6775_s17 + $0x3c70] sm:$0xff] %v4157_v29  ;;  %v4163_v41 = vadd.f32 1.0, %v2115_v38  ;;  %v2117_v43 = vld [vmem:[%s6760_s12 + $0x3cb0] sm:$0xff]  ;;  %v2118_v44 = vld [vmem:[%s6760_s12 + $0x3cb8] sm:$0xff]  ;;  %6206 = vst [vmem:[%s6775_s17 + $0x3c78] sm:$0xff] %v4158_v33  ;;  %v4164_v45 = vadd.f32 1.0, %v2116_v42 }
 0x411   : > { %6207 = vst [vmem:[%s6775_s17 + $0x3c80] sm:$0xff] %v4159_v34  ;;  %6208 = vst [vmem:[%s6775_s17 + $0x3c88] sm:$0xff] %v4160_v35  ;;  %v4165_v46 = vadd.f32 1.0, %v2117_v43  ;;  %v4166_v47 = vadd.f32 1.0, %v2118_v44  ;;  %v2119_v48 = vld [vmem:[%s6760_s12 + $0x3cc0] sm:$0xff]  ;;  %v2120_v49 = vld [vmem:[%s6760_s12 + $0x3cc8] sm:$0xff] }
 0x412   : > { %v2121_v50 = vld [vmem:[%s6760_s12 + $0x3cd0] sm:$0xff]  ;;  %6209 = vst [vmem:[%s6775_s17 + $0x3c90] sm:$0xff] %v4161_v39  ;;  %6210 = vst [vmem:[%s6775_s17 + $0x3c98] sm:$0xff] %v4162_v40  ;;  %v4167_v51 = vadd.f32 1.0, %v2119_v48  ;;  %v4168_v52 = vadd.f32 1.0, %v2120_v49  ;;  %v2122_v54 = vld [vmem:[%s6760_s12 + $0x3cd8] sm:$0xff] }
 0x413   : > { %6211 = vst [vmem:[%s6775_s17 + $0x3ca0] sm:$0xff] %v4163_v41  ;;  %v4169_v53 = vadd.f32 1.0, %v2121_v50  ;;  %v2123_v55 = vld [vmem:[%s6760_s12 + $0x3ce0] sm:$0xff]  ;;  %v2124_v56 = vld [vmem:[%s6760_s12 + $0x3ce8] sm:$0xff]  ;;  %6212 = vst [vmem:[%s6775_s17 + $0x3ca8] sm:$0xff] %v4164_v45  ;;  %v4170_v57 = vadd.f32 1.0, %v2122_v54 }
 0x414   : > { %6213 = vst [vmem:[%s6775_s17 + $0x3cb0] sm:$0xff] %v4165_v46  ;;  %6214 = vst [vmem:[%s6775_s17 + $0x3cb8] sm:$0xff] %v4166_v47  ;;  %v4171_v58 = vadd.f32 1.0, %v2123_v55  ;;  %v4172_v59 = vadd.f32 1.0, %v2124_v56  ;;  %v2125_v60 = vld [vmem:[%s6760_s12 + $0x3cf0] sm:$0xff]  ;;  %v2126_v61 = vld [vmem:[%s6760_s12 + $0x3cf8] sm:$0xff] }
 0x415   : > { %v2127_v62 = vld [vmem:[%s6760_s12 + $0x3d00] sm:$0xff]  ;;  %6215 = vst [vmem:[%s6775_s17 + $0x3cc0] sm:$0xff] %v4167_v51  ;;  %6216 = vst [vmem:[%s6775_s17 + $0x3cc8] sm:$0xff] %v4168_v52  ;;  %v4173_v63 = vadd.f32 1.0, %v2125_v60  ;;  %v4174_v0 = vadd.f32 1.0, %v2126_v61  ;;  %v2128_v2 = vld [vmem:[%s6760_s12 + $0x3d08] sm:$0xff] }
 0x416   : > { %6217 = vst [vmem:[%s6775_s17 + $0x3cd0] sm:$0xff] %v4169_v53  ;;  %v4175_v1 = vadd.f32 1.0, %v2127_v62  ;;  %v2129_v3 = vld [vmem:[%s6760_s12 + $0x3d10] sm:$0xff]  ;;  %v2130_v4 = vld [vmem:[%s6760_s12 + $0x3d18] sm:$0xff]  ;;  %6218 = vst [vmem:[%s6775_s17 + $0x3cd8] sm:$0xff] %v4170_v57  ;;  %v4176_v5 = vadd.f32 1.0, %v2128_v2 }
 0x417   : > { %6219 = vst [vmem:[%s6775_s17 + $0x3ce0] sm:$0xff] %v4171_v58  ;;  %6220 = vst [vmem:[%s6775_s17 + $0x3ce8] sm:$0xff] %v4172_v59  ;;  %v4177_v6 = vadd.f32 1.0, %v2129_v3  ;;  %v4178_v7 = vadd.f32 1.0, %v2130_v4  ;;  %v2131_v8 = vld [vmem:[%s6760_s12 + $0x3d20] sm:$0xff]  ;;  %v2132_v9 = vld [vmem:[%s6760_s12 + $0x3d28] sm:$0xff] }
 0x418   : > { %v2133_v10 = vld [vmem:[%s6760_s12 + $0x3d30] sm:$0xff]  ;;  %6221 = vst [vmem:[%s6775_s17 + $0x3cf0] sm:$0xff] %v4173_v63  ;;  %6222 = vst [vmem:[%s6775_s17 + $0x3cf8] sm:$0xff] %v4174_v0  ;;  %v4179_v11 = vadd.f32 1.0, %v2131_v8  ;;  %v4180_v12 = vadd.f32 1.0, %v2132_v9  ;;  %v2134_v14 = vld [vmem:[%s6760_s12 + $0x3d38] sm:$0xff] }
 0x419   : > { %6223 = vst [vmem:[%s6775_s17 + $0x3d00] sm:$0xff] %v4175_v1  ;;  %v4181_v13 = vadd.f32 1.0, %v2133_v10  ;;  %v2135_v15 = vld [vmem:[%s6760_s12 + $0x3d40] sm:$0xff]  ;;  %v2136_v16 = vld [vmem:[%s6760_s12 + $0x3d48] sm:$0xff]  ;;  %6224 = vst [vmem:[%s6775_s17 + $0x3d08] sm:$0xff] %v4176_v5  ;;  %v4182_v17 = vadd.f32 1.0, %v2134_v14 }
 0x41a   : > { %6225 = vst [vmem:[%s6775_s17 + $0x3d10] sm:$0xff] %v4177_v6  ;;  %6226 = vst [vmem:[%s6775_s17 + $0x3d18] sm:$0xff] %v4178_v7  ;;  %v4183_v18 = vadd.f32 1.0, %v2135_v15  ;;  %v4184_v19 = vadd.f32 1.0, %v2136_v16  ;;  %v2137_v20 = vld [vmem:[%s6760_s12 + $0x3d50] sm:$0xff]  ;;  %v2138_v21 = vld [vmem:[%s6760_s12 + $0x3d58] sm:$0xff] }
 0x41b   : > { %v2139_v22 = vld [vmem:[%s6760_s12 + $0x3d60] sm:$0xff]  ;;  %6227 = vst [vmem:[%s6775_s17 + $0x3d20] sm:$0xff] %v4179_v11  ;;  %6228 = vst [vmem:[%s6775_s17 + $0x3d28] sm:$0xff] %v4180_v12  ;;  %v4185_v23 = vadd.f32 1.0, %v2137_v20  ;;  %v4186_v24 = vadd.f32 1.0, %v2138_v21  ;;  %v2140_v26 = vld [vmem:[%s6760_s12 + $0x3d68] sm:$0xff] }
 0x41c   : > { %6229 = vst [vmem:[%s6775_s17 + $0x3d30] sm:$0xff] %v4181_v13  ;;  %v4187_v25 = vadd.f32 1.0, %v2139_v22  ;;  %v2141_v27 = vld [vmem:[%s6760_s12 + $0x3d70] sm:$0xff]  ;;  %v2142_v28 = vld [vmem:[%s6760_s12 + $0x3d78] sm:$0xff]  ;;  %6230 = vst [vmem:[%s6775_s17 + $0x3d38] sm:$0xff] %v4182_v17  ;;  %v4188_v29 = vadd.f32 1.0, %v2140_v26 }
 0x41d   : > { %6231 = vst [vmem:[%s6775_s17 + $0x3d40] sm:$0xff] %v4183_v18  ;;  %6232 = vst [vmem:[%s6775_s17 + $0x3d48] sm:$0xff] %v4184_v19  ;;  %v4189_v30 = vadd.f32 1.0, %v2141_v27  ;;  %v4190_v31 = vadd.f32 1.0, %v2142_v28  ;;  %v2143_v32 = vld [vmem:[%s6760_s12 + $0x3d80] sm:$0xff]  ;;  %v2144_v33 = vld [vmem:[%s6760_s12 + $0x3d88] sm:$0xff] }
 0x41e   : > { %v2145_v34 = vld [vmem:[%s6760_s12 + $0x3d90] sm:$0xff]  ;;  %6233 = vst [vmem:[%s6775_s17 + $0x3d50] sm:$0xff] %v4185_v23  ;;  %6234 = vst [vmem:[%s6775_s17 + $0x3d58] sm:$0xff] %v4186_v24  ;;  %v4191_v35 = vadd.f32 1.0, %v2143_v32  ;;  %v4192_v36 = vadd.f32 1.0, %v2144_v33  ;;  %v2146_v38 = vld [vmem:[%s6760_s12 + $0x3d98] sm:$0xff] }
 0x41f   : > { %6235 = vst [vmem:[%s6775_s17 + $0x3d60] sm:$0xff] %v4187_v25  ;;  %v4193_v37 = vadd.f32 1.0, %v2145_v34  ;;  %v2147_v39 = vld [vmem:[%s6760_s12 + $0x3da0] sm:$0xff]  ;;  %v2148_v40 = vld [vmem:[%s6760_s12 + $0x3da8] sm:$0xff]  ;;  %6236 = vst [vmem:[%s6775_s17 + $0x3d68] sm:$0xff] %v4188_v29  ;;  %v4194_v41 = vadd.f32 1.0, %v2146_v38 }
 0x420   : > { %6237 = vst [vmem:[%s6775_s17 + $0x3d70] sm:$0xff] %v4189_v30  ;;  %6238 = vst [vmem:[%s6775_s17 + $0x3d78] sm:$0xff] %v4190_v31  ;;  %v4195_v42 = vadd.f32 1.0, %v2147_v39  ;;  %v4196_v43 = vadd.f32 1.0, %v2148_v40  ;;  %v2149_v44 = vld [vmem:[%s6760_s12 + $0x3db0] sm:$0xff]  ;;  %v2150_v45 = vld [vmem:[%s6760_s12 + $0x3db8] sm:$0xff] }
 0x421   : > { %v2151_v46 = vld [vmem:[%s6760_s12 + $0x3dc0] sm:$0xff]  ;;  %6239 = vst [vmem:[%s6775_s17 + $0x3d80] sm:$0xff] %v4191_v35  ;;  %6240 = vst [vmem:[%s6775_s17 + $0x3d88] sm:$0xff] %v4192_v36  ;;  %v4197_v47 = vadd.f32 1.0, %v2149_v44  ;;  %v4198_v48 = vadd.f32 1.0, %v2150_v45  ;;  %v2152_v50 = vld [vmem:[%s6760_s12 + $0x3dc8] sm:$0xff] }
 0x422   : > { %6241 = vst [vmem:[%s6775_s17 + $0x3d90] sm:$0xff] %v4193_v37  ;;  %v4199_v49 = vadd.f32 1.0, %v2151_v46  ;;  %v2153_v51 = vld [vmem:[%s6760_s12 + $0x3dd0] sm:$0xff]  ;;  %v2154_v52 = vld [vmem:[%s6760_s12 + $0x3dd8] sm:$0xff]  ;;  %6242 = vst [vmem:[%s6775_s17 + $0x3d98] sm:$0xff] %v4194_v41  ;;  %v4200_v53 = vadd.f32 1.0, %v2152_v50 }
 0x423   : > { %6243 = vst [vmem:[%s6775_s17 + $0x3da0] sm:$0xff] %v4195_v42  ;;  %6244 = vst [vmem:[%s6775_s17 + $0x3da8] sm:$0xff] %v4196_v43  ;;  %v4201_v54 = vadd.f32 1.0, %v2153_v51  ;;  %v4202_v55 = vadd.f32 1.0, %v2154_v52  ;;  %v2155_v56 = vld [vmem:[%s6760_s12 + $0x3de0] sm:$0xff]  ;;  %v2156_v57 = vld [vmem:[%s6760_s12 + $0x3de8] sm:$0xff] }
 0x424   : > { %v2157_v58 = vld [vmem:[%s6760_s12 + $0x3df0] sm:$0xff]  ;;  %6245 = vst [vmem:[%s6775_s17 + $0x3db0] sm:$0xff] %v4197_v47  ;;  %6246 = vst [vmem:[%s6775_s17 + $0x3db8] sm:$0xff] %v4198_v48  ;;  %v4203_v59 = vadd.f32 1.0, %v2155_v56  ;;  %v4204_v60 = vadd.f32 1.0, %v2156_v57  ;;  %v2158_v62 = vld [vmem:[%s6760_s12 + $0x3df8] sm:$0xff] }
 0x425   : > { %6247 = vst [vmem:[%s6775_s17 + $0x3dc0] sm:$0xff] %v4199_v49  ;;  %v4205_v61 = vadd.f32 1.0, %v2157_v58  ;;  %v2159_v63 = vld [vmem:[%s6760_s12 + $0x3e00] sm:$0xff]  ;;  %v2160_v0 = vld [vmem:[%s6760_s12 + $0x3e08] sm:$0xff]  ;;  %6248 = vst [vmem:[%s6775_s17 + $0x3dc8] sm:$0xff] %v4200_v53  ;;  %v4206_v1 = vadd.f32 1.0, %v2158_v62 }
 0x426   : > { %6249 = vst [vmem:[%s6775_s17 + $0x3dd0] sm:$0xff] %v4201_v54  ;;  %6250 = vst [vmem:[%s6775_s17 + $0x3dd8] sm:$0xff] %v4202_v55  ;;  %v4207_v2 = vadd.f32 1.0, %v2159_v63  ;;  %v4208_v3 = vadd.f32 1.0, %v2160_v0  ;;  %v2161_v4 = vld [vmem:[%s6760_s12 + $0x3e10] sm:$0xff]  ;;  %v2162_v5 = vld [vmem:[%s6760_s12 + $0x3e18] sm:$0xff] }
 0x427   : > { %v2163_v6 = vld [vmem:[%s6760_s12 + $0x3e20] sm:$0xff]  ;;  %6251 = vst [vmem:[%s6775_s17 + $0x3de0] sm:$0xff] %v4203_v59  ;;  %6252 = vst [vmem:[%s6775_s17 + $0x3de8] sm:$0xff] %v4204_v60  ;;  %v4209_v7 = vadd.f32 1.0, %v2161_v4  ;;  %v4210_v8 = vadd.f32 1.0, %v2162_v5  ;;  %v2164_v10 = vld [vmem:[%s6760_s12 + $0x3e28] sm:$0xff] }
 0x428   : > { %6253 = vst [vmem:[%s6775_s17 + $0x3df0] sm:$0xff] %v4205_v61  ;;  %v4211_v9 = vadd.f32 1.0, %v2163_v6  ;;  %v2165_v11 = vld [vmem:[%s6760_s12 + $0x3e30] sm:$0xff]  ;;  %v2166_v12 = vld [vmem:[%s6760_s12 + $0x3e38] sm:$0xff]  ;;  %6254 = vst [vmem:[%s6775_s17 + $0x3df8] sm:$0xff] %v4206_v1  ;;  %v4212_v13 = vadd.f32 1.0, %v2164_v10 }
 0x429   : > { %6255 = vst [vmem:[%s6775_s17 + $0x3e00] sm:$0xff] %v4207_v2  ;;  %6256 = vst [vmem:[%s6775_s17 + $0x3e08] sm:$0xff] %v4208_v3  ;;  %v4213_v14 = vadd.f32 1.0, %v2165_v11  ;;  %v4214_v15 = vadd.f32 1.0, %v2166_v12  ;;  %v2167_v16 = vld [vmem:[%s6760_s12 + $0x3e40] sm:$0xff]  ;;  %v2168_v17 = vld [vmem:[%s6760_s12 + $0x3e48] sm:$0xff] }
 0x42a   : > { %v2169_v18 = vld [vmem:[%s6760_s12 + $0x3e50] sm:$0xff]  ;;  %6257 = vst [vmem:[%s6775_s17 + $0x3e10] sm:$0xff] %v4209_v7  ;;  %6258 = vst [vmem:[%s6775_s17 + $0x3e18] sm:$0xff] %v4210_v8  ;;  %v4215_v19 = vadd.f32 1.0, %v2167_v16  ;;  %v4216_v20 = vadd.f32 1.0, %v2168_v17  ;;  %v2170_v22 = vld [vmem:[%s6760_s12 + $0x3e58] sm:$0xff] }
 0x42b   : > { %6259 = vst [vmem:[%s6775_s17 + $0x3e20] sm:$0xff] %v4211_v9  ;;  %v4217_v21 = vadd.f32 1.0, %v2169_v18  ;;  %v2171_v23 = vld [vmem:[%s6760_s12 + $0x3e60] sm:$0xff]  ;;  %v2172_v24 = vld [vmem:[%s6760_s12 + $0x3e68] sm:$0xff]  ;;  %6260 = vst [vmem:[%s6775_s17 + $0x3e28] sm:$0xff] %v4212_v13  ;;  %v4218_v25 = vadd.f32 1.0, %v2170_v22 }
 0x42c   : > { %6261 = vst [vmem:[%s6775_s17 + $0x3e30] sm:$0xff] %v4213_v14  ;;  %6262 = vst [vmem:[%s6775_s17 + $0x3e38] sm:$0xff] %v4214_v15  ;;  %v4219_v26 = vadd.f32 1.0, %v2171_v23  ;;  %v4220_v27 = vadd.f32 1.0, %v2172_v24  ;;  %v2173_v28 = vld [vmem:[%s6760_s12 + $0x3e70] sm:$0xff]  ;;  %v2174_v29 = vld [vmem:[%s6760_s12 + $0x3e78] sm:$0xff] }
 0x42d   : > { %v2175_v30 = vld [vmem:[%s6760_s12 + $0x3e80] sm:$0xff]  ;;  %6263 = vst [vmem:[%s6775_s17 + $0x3e40] sm:$0xff] %v4215_v19  ;;  %6264 = vst [vmem:[%s6775_s17 + $0x3e48] sm:$0xff] %v4216_v20  ;;  %v4221_v31 = vadd.f32 1.0, %v2173_v28  ;;  %v4222_v32 = vadd.f32 1.0, %v2174_v29  ;;  %v2176_v34 = vld [vmem:[%s6760_s12 + $0x3e88] sm:$0xff] }
 0x42e   : > { %6265 = vst [vmem:[%s6775_s17 + $0x3e50] sm:$0xff] %v4217_v21  ;;  %v4223_v33 = vadd.f32 1.0, %v2175_v30  ;;  %v2177_v35 = vld [vmem:[%s6760_s12 + $0x3e90] sm:$0xff]  ;;  %v2178_v36 = vld [vmem:[%s6760_s12 + $0x3e98] sm:$0xff]  ;;  %6266 = vst [vmem:[%s6775_s17 + $0x3e58] sm:$0xff] %v4218_v25  ;;  %v4224_v37 = vadd.f32 1.0, %v2176_v34 }
 0x42f   : > { %6267 = vst [vmem:[%s6775_s17 + $0x3e60] sm:$0xff] %v4219_v26  ;;  %6268 = vst [vmem:[%s6775_s17 + $0x3e68] sm:$0xff] %v4220_v27  ;;  %v4225_v38 = vadd.f32 1.0, %v2177_v35  ;;  %v4226_v39 = vadd.f32 1.0, %v2178_v36  ;;  %v2179_v40 = vld [vmem:[%s6760_s12 + $0x3ea0] sm:$0xff]  ;;  %v2180_v41 = vld [vmem:[%s6760_s12 + $0x3ea8] sm:$0xff] }
 0x430   : > { %v2181_v42 = vld [vmem:[%s6760_s12 + $0x3eb0] sm:$0xff]  ;;  %6269 = vst [vmem:[%s6775_s17 + $0x3e70] sm:$0xff] %v4221_v31  ;;  %6270 = vst [vmem:[%s6775_s17 + $0x3e78] sm:$0xff] %v4222_v32  ;;  %v4227_v43 = vadd.f32 1.0, %v2179_v40  ;;  %v4228_v44 = vadd.f32 1.0, %v2180_v41  ;;  %v2182_v46 = vld [vmem:[%s6760_s12 + $0x3eb8] sm:$0xff] }
 0x431   : > { %6271 = vst [vmem:[%s6775_s17 + $0x3e80] sm:$0xff] %v4223_v33  ;;  %v4229_v45 = vadd.f32 1.0, %v2181_v42  ;;  %v2183_v47 = vld [vmem:[%s6760_s12 + $0x3ec0] sm:$0xff]  ;;  %v2184_v48 = vld [vmem:[%s6760_s12 + $0x3ec8] sm:$0xff]  ;;  %6272 = vst [vmem:[%s6775_s17 + $0x3e88] sm:$0xff] %v4224_v37  ;;  %v4230_v49 = vadd.f32 1.0, %v2182_v46 }
 0x432   : > { %6273 = vst [vmem:[%s6775_s17 + $0x3e90] sm:$0xff] %v4225_v38  ;;  %6274 = vst [vmem:[%s6775_s17 + $0x3e98] sm:$0xff] %v4226_v39  ;;  %v4231_v50 = vadd.f32 1.0, %v2183_v47  ;;  %v4232_v51 = vadd.f32 1.0, %v2184_v48  ;;  %v2185_v52 = vld [vmem:[%s6760_s12 + $0x3ed0] sm:$0xff]  ;;  %v2186_v53 = vld [vmem:[%s6760_s12 + $0x3ed8] sm:$0xff] }
 0x433   : > { %v2187_v54 = vld [vmem:[%s6760_s12 + $0x3ee0] sm:$0xff]  ;;  %6275 = vst [vmem:[%s6775_s17 + $0x3ea0] sm:$0xff] %v4227_v43  ;;  %6276 = vst [vmem:[%s6775_s17 + $0x3ea8] sm:$0xff] %v4228_v44  ;;  %v4233_v55 = vadd.f32 1.0, %v2185_v52  ;;  %v4234_v56 = vadd.f32 1.0, %v2186_v53  ;;  %v2188_v58 = vld [vmem:[%s6760_s12 + $0x3ee8] sm:$0xff] }
 0x434   : > { %6277 = vst [vmem:[%s6775_s17 + $0x3eb0] sm:$0xff] %v4229_v45  ;;  %v4235_v57 = vadd.f32 1.0, %v2187_v54  ;;  %v2189_v59 = vld [vmem:[%s6760_s12 + $0x3ef0] sm:$0xff]  ;;  %v2190_v60 = vld [vmem:[%s6760_s12 + $0x3ef8] sm:$0xff]  ;;  %6278 = vst [vmem:[%s6775_s17 + $0x3eb8] sm:$0xff] %v4230_v49  ;;  %v4236_v61 = vadd.f32 1.0, %v2188_v58 }
 0x435   : > { %6279 = vst [vmem:[%s6775_s17 + $0x3ec0] sm:$0xff] %v4231_v50  ;;  %6280 = vst [vmem:[%s6775_s17 + $0x3ec8] sm:$0xff] %v4232_v51  ;;  %v4237_v62 = vadd.f32 1.0, %v2189_v59  ;;  %v4238_v63 = vadd.f32 1.0, %v2190_v60  ;;  %v2191_v0 = vld [vmem:[%s6760_s12 + $0x3f00] sm:$0xff]  ;;  %v2192_v1 = vld [vmem:[%s6760_s12 + $0x3f08] sm:$0xff] }
 0x436   : > { %v2193_v2 = vld [vmem:[%s6760_s12 + $0x3f10] sm:$0xff]  ;;  %6281 = vst [vmem:[%s6775_s17 + $0x3ed0] sm:$0xff] %v4233_v55  ;;  %6282 = vst [vmem:[%s6775_s17 + $0x3ed8] sm:$0xff] %v4234_v56  ;;  %v4239_v3 = vadd.f32 1.0, %v2191_v0  ;;  %v4240_v4 = vadd.f32 1.0, %v2192_v1  ;;  %v2194_v6 = vld [vmem:[%s6760_s12 + $0x3f18] sm:$0xff] }
 0x437   : > { %6283 = vst [vmem:[%s6775_s17 + $0x3ee0] sm:$0xff] %v4235_v57  ;;  %v4241_v5 = vadd.f32 1.0, %v2193_v2  ;;  %v2195_v7 = vld [vmem:[%s6760_s12 + $0x3f20] sm:$0xff]  ;;  %v2196_v8 = vld [vmem:[%s6760_s12 + $0x3f28] sm:$0xff]  ;;  %6284 = vst [vmem:[%s6775_s17 + $0x3ee8] sm:$0xff] %v4236_v61  ;;  %v4242_v9 = vadd.f32 1.0, %v2194_v6 }
 0x438   : > { %6285 = vst [vmem:[%s6775_s17 + $0x3ef0] sm:$0xff] %v4237_v62  ;;  %6286 = vst [vmem:[%s6775_s17 + $0x3ef8] sm:$0xff] %v4238_v63  ;;  %v4243_v10 = vadd.f32 1.0, %v2195_v7  ;;  %v4244_v11 = vadd.f32 1.0, %v2196_v8  ;;  %v2197_v12 = vld [vmem:[%s6760_s12 + $0x3f30] sm:$0xff]  ;;  %v2198_v13 = vld [vmem:[%s6760_s12 + $0x3f38] sm:$0xff] }
 0x439   : > { %v2199_v14 = vld [vmem:[%s6760_s12 + $0x3f40] sm:$0xff]  ;;  %6287 = vst [vmem:[%s6775_s17 + $0x3f00] sm:$0xff] %v4239_v3  ;;  %6288 = vst [vmem:[%s6775_s17 + $0x3f08] sm:$0xff] %v4240_v4  ;;  %v4245_v15 = vadd.f32 1.0, %v2197_v12  ;;  %v4246_v16 = vadd.f32 1.0, %v2198_v13  ;;  %v2200_v18 = vld [vmem:[%s6760_s12 + $0x3f48] sm:$0xff] }
 0x43a   : > { %6289 = vst [vmem:[%s6775_s17 + $0x3f10] sm:$0xff] %v4241_v5  ;;  %v4247_v17 = vadd.f32 1.0, %v2199_v14  ;;  %v2201_v19 = vld [vmem:[%s6760_s12 + $0x3f50] sm:$0xff]  ;;  %v2202_v20 = vld [vmem:[%s6760_s12 + $0x3f58] sm:$0xff]  ;;  %6290 = vst [vmem:[%s6775_s17 + $0x3f18] sm:$0xff] %v4242_v9  ;;  %v4248_v21 = vadd.f32 1.0, %v2200_v18 }
 0x43b   : > { %6291 = vst [vmem:[%s6775_s17 + $0x3f20] sm:$0xff] %v4243_v10  ;;  %6292 = vst [vmem:[%s6775_s17 + $0x3f28] sm:$0xff] %v4244_v11  ;;  %v4249_v22 = vadd.f32 1.0, %v2201_v19  ;;  %v4250_v23 = vadd.f32 1.0, %v2202_v20  ;;  %v2203_v24 = vld [vmem:[%s6760_s12 + $0x3f60] sm:$0xff]  ;;  %v2204_v25 = vld [vmem:[%s6760_s12 + $0x3f68] sm:$0xff] }
 0x43c   : > { %v2205_v26 = vld [vmem:[%s6760_s12 + $0x3f70] sm:$0xff]  ;;  %6293 = vst [vmem:[%s6775_s17 + $0x3f30] sm:$0xff] %v4245_v15  ;;  %6294 = vst [vmem:[%s6775_s17 + $0x3f38] sm:$0xff] %v4246_v16  ;;  %v4251_v27 = vadd.f32 1.0, %v2203_v24  ;;  %v4252_v28 = vadd.f32 1.0, %v2204_v25  ;;  %v2206_v30 = vld [vmem:[%s6760_s12 + $0x3f78] sm:$0xff] }
 0x43d   : > { %6295 = vst [vmem:[%s6775_s17 + $0x3f40] sm:$0xff] %v4247_v17  ;;  %v4253_v29 = vadd.f32 1.0, %v2205_v26  ;;  %v2207_v31 = vld [vmem:[%s6760_s12 + $0x3f80] sm:$0xff]  ;;  %v2208_v32 = vld [vmem:[%s6760_s12 + $0x3f88] sm:$0xff]  ;;  %6296 = vst [vmem:[%s6775_s17 + $0x3f48] sm:$0xff] %v4248_v21  ;;  %v4254_v33 = vadd.f32 1.0, %v2206_v30 }
 0x43e   : > { %6297 = vst [vmem:[%s6775_s17 + $0x3f50] sm:$0xff] %v4249_v22  ;;  %6298 = vst [vmem:[%s6775_s17 + $0x3f58] sm:$0xff] %v4250_v23  ;;  %v4255_v34 = vadd.f32 1.0, %v2207_v31  ;;  %v4256_v35 = vadd.f32 1.0, %v2208_v32  ;;  %v2209_v36 = vld [vmem:[%s6760_s12 + $0x3f90] sm:$0xff]  ;;  %v2210_v37 = vld [vmem:[%s6760_s12 + $0x3f98] sm:$0xff] }
 0x43f   : > { %v2211_v38 = vld [vmem:[%s6760_s12 + $0x3fa0] sm:$0xff]  ;;  %6299 = vst [vmem:[%s6775_s17 + $0x3f60] sm:$0xff] %v4251_v27  ;;  %6300 = vst [vmem:[%s6775_s17 + $0x3f68] sm:$0xff] %v4252_v28  ;;  %v4257_v39 = vadd.f32 1.0, %v2209_v36  ;;  %v4258_v40 = vadd.f32 1.0, %v2210_v37  ;;  %v2212_v42 = vld [vmem:[%s6760_s12 + $0x3fa8] sm:$0xff] }
 0x440   : > { %6301 = vst [vmem:[%s6775_s17 + $0x3f70] sm:$0xff] %v4253_v29  ;;  %v4259_v41 = vadd.f32 1.0, %v2211_v38  ;;  %v2213_v43 = vld [vmem:[%s6760_s12 + $0x3fb0] sm:$0xff]  ;;  %v2214_v44 = vld [vmem:[%s6760_s12 + $0x3fb8] sm:$0xff]  ;;  %6302 = vst [vmem:[%s6775_s17 + $0x3f78] sm:$0xff] %v4254_v33  ;;  %v4260_v45 = vadd.f32 1.0, %v2212_v42 }
 0x441   : > { %6303 = vst [vmem:[%s6775_s17 + $0x3f80] sm:$0xff] %v4255_v34  ;;  %6304 = vst [vmem:[%s6775_s17 + $0x3f88] sm:$0xff] %v4256_v35  ;;  %v4261_v46 = vadd.f32 1.0, %v2213_v43  ;;  %v4262_v47 = vadd.f32 1.0, %v2214_v44  ;;  %v2215_v48 = vld [vmem:[%s6760_s12 + $0x3fc0] sm:$0xff]  ;;  %v2216_v49 = vld [vmem:[%s6760_s12 + $0x3fc8] sm:$0xff] }
 0x442   : > { %v2217_v50 = vld [vmem:[%s6760_s12 + $0x3fd0] sm:$0xff]  ;;  %6305 = vst [vmem:[%s6775_s17 + $0x3f90] sm:$0xff] %v4257_v39  ;;  %6306 = vst [vmem:[%s6775_s17 + $0x3f98] sm:$0xff] %v4258_v40  ;;  %v4263_v51 = vadd.f32 1.0, %v2215_v48  ;;  %v4264_v52 = vadd.f32 1.0, %v2216_v49  ;;  %v2218_v54 = vld [vmem:[%s6760_s12 + $0x3fd8] sm:$0xff] }
 0x443   : > { %6307 = vst [vmem:[%s6775_s17 + $0x3fa0] sm:$0xff] %v4259_v41  ;;  %v4265_v53 = vadd.f32 1.0, %v2217_v50  ;;  %v2219_v55 = vld [vmem:[%s6760_s12 + $0x3fe0] sm:$0xff]  ;;  %v2220_v56 = vld [vmem:[%s6760_s12 + $0x3fe8] sm:$0xff]  ;;  %6308 = vst [vmem:[%s6775_s17 + $0x3fa8] sm:$0xff] %v4260_v45  ;;  %v4266_v57 = vadd.f32 1.0, %v2218_v54 }
 0x444   : > { %6309 = vst [vmem:[%s6775_s17 + $0x3fb0] sm:$0xff] %v4261_v46  ;;  %6310 = vst [vmem:[%s6775_s17 + $0x3fb8] sm:$0xff] %v4262_v47  ;;  %v4267_v58 = vadd.f32 1.0, %v2219_v55  ;;  %v4268_v59 = vadd.f32 1.0, %v2220_v56  ;;  %v2221_v60 = vld [vmem:[%s6760_s12 + $0x3ff0] sm:$0xff]  ;;  %v2222_v61 = vld [vmem:[%s6760_s12 + $0x3ff8] sm:$0xff] }
 0x445   : > { %6311 = vst [vmem:[%s6775_s17 + $0x3fc0] sm:$0xff] %v4263_v51  ;;  %6312 = vst [vmem:[%s6775_s17 + $0x3fc8] sm:$0xff] %v4264_v52  ;;  %v4269_v62 = vadd.f32 1.0, %v2221_v60  ;;  %v4270_v63 = vadd.f32 1.0, %v2222_v61  ;;  %6326 = sbr.rel (!%p6697_p9) target bundleno = 1128 (0x468), region = 32  ;;  %s6329_s3 = ssub.s32 (%p6697_p9), 375, %s6447_s27 }
 0x446   : > { %6313 = vst [vmem:[%s6775_s17 + $0x3fd0] sm:$0xff] %v4265_v53  ;;  %6314 = vst [vmem:[%s6775_s17 + $0x3fd8] sm:$0xff] %v4266_v57  ;;  %p6330_p8 = scmp.lt.s32.totalorder (%p6697_p9), %s6329_s3, 256 }
 0x447   : > { %6315 = vst [vmem:[%s6775_s17 + $0x3fe0] sm:$0xff] %v4267_v58  ;;  %6316 = vst [vmem:[%s6775_s17 + $0x3fe8] sm:$0xff] %v4268_v59 }
 0x448   : > { %6317 = vst [vmem:[%s6775_s17 + $0x3ff0] sm:$0xff] %v4269_v62  ;;  %6318 = vst [vmem:[%s6775_s17 + $0x3ff8] sm:$0xff] %v4270_v63 }
 0x44c   : > { %s10950_s3 = smov (!%p6330_p8, %s6329_s3), 256 }
 0x44d   : > { %s10868_s4 = sshll.u32 %s10950_s3, 10 }
 0x44e   : > { %s6335_s13 = ssub.s32 262144, %s10868_s4 }
 0x44f   : > { %6336 = vsyncadd %s6320_s25, %s6335_s13  ;;  %p6450_p11 = scmp.ne.s32.totalorder %s10868_s4, 0  ;;  %s6462_s18 = sshll.u32 %s6624_s9, 18 }
 0x450   : > { %s10878_s21 = scalar_lea.hbm %s10933_s1, %s6462_s18  ;;  %s6343_s22 = sshll.u32 %s6775_s17, 4  ;;  %s10881_s22 = int_to_ptr.vmem [resolvable:$true] %s6343_s22 }
 0x451   : > { %s6550_s23 = scalar_lea.vmem %s10881_s22, %s10868_s4  ;;  %s6637_s24 = smov [#allocation5]  }
 0x452   : > { %p6551_p9 = scmp.ne.s32.totalorder %s10881_s22, %s6550_s23  ;;  %s6554_s26 = sshll.u32 %s6637_s24, 4  ;;  %s6555_s26 = int_to_ptr.vmem [resolvable:$false] %s6554_s26 }
 0x453   : > { %s6556_s9 = scalar_lea.vmem %s6555_s26, 524288  ;;  %p6557_p13 = scmp.lt.s32.totalorder %s10881_s22, %s6555_s26 }
 0x454   : > { %p6552_p12 = pnand %p6551_p9, %p6450_p11  ;;  %p6558_p1 = scmp.lt.s32.totalorder %s6556_s9, %s6550_s23 }
 0x456   : > { %p6553_p0 = pneg %p6552_p12  ;;  %p6559_p2 = por %p6558_p1, %p6557_p13 }
 0x458   : > { %p6560_p4 = pnand %p6559_p2, %p6553_p0 }
 0x45a   : > { %6563 = shalt.err (!%p6560_p4)
}
 0x45b   : > { %s6564_s28 = scalar_lea.hbm %s10878_s21, %s10868_s4  ;;  %s6568_s5 = scalar_lea.hbm %s10933_s1, 384000 }
 0x45c   : > { %p6565_p5 = scmp.ne.s32.totalorder %s10878_s21, %s6564_s28  ;;  %p6569_p7 = scmp.lt.u32.totalorder %s10878_s21, %s10933_s1 }
 0x45d   : > { %p6570_p10 = scmp.lt.u32.totalorder %s6568_s5, %s6564_s28  ;;  %p6572_p9 = scmp.lt.u32.totalorder %s6564_s28, %s10878_s21 }
 0x45e   : > { %p6566_p6 = pnand %p6565_p5, %p6450_p11 }
 0x45f   : > { %p6571_p8 = por %p6570_p10, %p6569_p7 }
 0x460   : > { %p6567_p3 = pneg %p6566_p6 }
 0x461   : > { %p6573_p12 = por %p6572_p9, %p6571_p8 }
 0x463   : > { %p6574_p0 = pnand %p6573_p12, %p6567_p3 }
 0x465   : > { %6577 = shalt.err (!%p6574_p0)
}
 0x466   : > { %s6638_s27 = smov 1024   ;;  %s6639_s3 = smov 64  }
 0x467   : > { %6349 = dma.vmem_to_hbm [thread:$0]  (%p6450_p11), %s10881_s22, %s10868_s4, %s10878_s21, %s6320_s25, %s6638_s27, %s6638_s27, %s6639_s3  }
 0x468 PF: > { %s6358_s13 = sand.u32 1, %s6612_s6   ;;  %p10938_p13 = scmp.ne.s32.totalorder %s10937_s20, 0 }
 0x469   : > { %p10939_p1 = scmp.ge.s32.totalorder %s6632_s11, 2  ;;  %s6359_s18 = scalar_lea.sflag [#allocation4], %s6358_s13 }
 0x46b   : > { %p6466_p2 = pnand %p10939_p1, %p10938_p13 }
 0x46d   : > { %6607 = dma.done.wait (!%p6466_p2), %s6359_s18, 262144  }
 0x46e   : > { %6609 = vsyncadd (!%p6466_p2), %s6359_s18, 4294705152  ;;  %s17_s11 = sadd.s32 1, %s6632_s11   ;;  %s10940_s6 = smov %s6616_s7 }
 0x46f   : > { %p14_p4 = scmp.ge.s32.totalorder %s17_s11, 4   ;;  %s10941_s7 = smov %s6620_s8 }
 0x470   : > { %s10942_s8 = smov %s6702_s19  ;;  %s10943_s9 = smov %s6628_s10 }
 0x471   : > { %s10944_s10 = smov %s10946_s14  ;;  %16 = sbr.rel (!%p14_p4) target bundleno = 6 (0x6), region = 69 }
 0x478   :  { %6364 = vsyncpa [#allocation3], 1 }
 0x479   :  { %6366 = vsyncpa [#allocation3 + $0x1], 1 }
 0x47a   :  { %6367 = vsyncpa [#allocation4], 1 }
 0x47b   :  { %6369 = vsyncpa [#allocation4 + $0x1], 1 }

</bundles_post_ra>
